<compile_context>
chip_gen: v6e
topology: v6e:2x2x1
jax: 0.10.0
libtpu: 0.0.40
codegen_flags: <defaults>
</compile_context>

<pallas_src>
import functools
import math

import jax
import jax.numpy as jnp
from jax.experimental import pallas as pl
from jax.experimental.pallas import tpu as pltpu

NEG_INF = -1e9


def _layer_norm(y, gamma, beta, eps=1e-5):
    mu = jnp.mean(y, axis=-1, keepdims=True)
    var = jnp.mean((y - mu) * (y - mu), axis=-1, keepdims=True)
    return (y - mu) * jax.lax.rsqrt(var + eps) * gamma + beta


def _make_fused_kernel(W, T, V, D, H, F, num_layers):
    dh = D // H
    scale = 1.0 / math.sqrt(dh)

    # --- one post-LN transformer encoder layer on a batch of sequences -------
    #     x: (N, S, D) f32, bias: (N, 1, S) f32 additive key mask.
    #     wqkv (D,3D), wo (D,D), w1 (D,F), w2 (F,D): bf16.
    #     pv (8, PW) f32 packed rows: [bqkv(3D), bo(D), b1(F), b2(D),
    #                                  g1(D), be1(D), g2(D), be2(D)]
    def enc_layer(x, bias, wqkv, wo, w1, w2, pv):
        N, S, _ = x.shape
        bqkv = pv[0:1, 0:3 * D]
        bo = pv[1:2, 0:D]
        b1 = pv[2:3, 0:F]
        b2 = pv[3:4, 0:D]
        g1 = pv[4:5, 0:D]
        be1 = pv[5:6, 0:D]
        g2 = pv[6:7, 0:D]
        be2 = pv[7:8, 0:D]

        xf = x.reshape(N * S, D)
        # fused QKV projection: single MXU matmul (bf16 in, f32 accumulate)
        qkv = jnp.dot(xf.astype(jnp.bfloat16), wqkv,
                      preferred_element_type=jnp.float32) + bqkv        # (N*S, 3D)

        ctx_heads = []
        for hd in range(H):  # static unroll; per-head lane slices only
            q = (qkv[:, hd * dh:(hd + 1) * dh] * scale).reshape(N, S, dh)
            k = qkv[:, D + hd * dh:D + (hd + 1) * dh].reshape(N, S, dh)
            v = qkv[:, 2 * D + hd * dh:2 * D + (hd + 1) * dh].reshape(N, S, dh)
            s = jnp.einsum('nqd,nkd->nqk', q.astype(jnp.bfloat16),
                           k.astype(jnp.bfloat16),
                           preferred_element_type=jnp.float32)          # (N,S,S)
            s = s + bias
            s = s - jnp.max(s, axis=-1, keepdims=True)
            p = jnp.exp(s)
            p = p * pl.reciprocal(jnp.sum(p, axis=-1, keepdims=True), approx=True)
            ctx = jnp.einsum('nqk,nkd->nqd', p.astype(jnp.bfloat16),
                             v.astype(jnp.bfloat16),
                             preferred_element_type=jnp.float32)        # (N,S,dh)
            ctx_heads.append(ctx.reshape(N * S, dh))
        ctx_all = jnp.concatenate(ctx_heads, axis=-1)                   # (N*S, D)

        # single fused output projection for all heads
        attn = jnp.dot(ctx_all.astype(jnp.bfloat16), wo,
                       preferred_element_type=jnp.float32) + bo
        x1 = _layer_norm(xf + attn, g1, be1)
        hdn = jnp.maximum(
            jnp.dot(x1.astype(jnp.bfloat16), w1,
                    preferred_element_type=jnp.float32) + b1, 0.0)
        ffn = jnp.dot(hdn.astype(jnp.bfloat16), w2,
                      preferred_element_type=jnp.float32) + b2
        return _layer_norm(x1 + ffn, g2, be2).reshape(N, S, D)

    def kernel(idx_ref, table_ref, mtraj_ref, mday_ref,
               wqkv_d_ref, wo_d_ref, w1_d_ref, w2_d_ref, pv_d_ref,
               wqkv_w_ref, wo_w_ref, w1_w_ref, w2_w_ref, pv_w_ref,
               o_ref):
        idx = idx_ref[0]                                    # (W, T) int32
        m_traj = mtraj_ref[0]                               # (W, T) f32
        m_day = mday_ref[0]                                 # (1, W) f32

        # ---- embedding lookup inside the kernel (one-hot matmul; no HBM
        #      (B,W,T,D) intermediate)
        iota = jax.lax.broadcasted_iota(jnp.int32, (W, T, V), 2)
        onehot = (iota == idx[:, :, None]).astype(jnp.float32)          # (W,T,V)
        x = jnp.dot(onehot.reshape(W * T, V), table_ref[...],
                    preferred_element_type=jnp.float32).reshape(W, T, D)

        # ---- day encoder: all W windows of this batch element in one block
        bias_traj = ((1.0 - m_traj) * NEG_INF)[:, None, :]              # (W,1,T)
        h = x
        for l in range(num_layers):
            h = enc_layer(h, bias_traj, wqkv_d_ref[l], wo_d_ref[l],
                          w1_d_ref[l], w2_d_ref[l], pv_d_ref[l])
        denom = jnp.maximum(jnp.sum(m_traj, axis=-1, keepdims=True), 1.0)   # (W,1)
        day_vec = jnp.sum(h * m_traj[:, :, None], axis=1) / denom          # (W,D)

        # ---- week encoder over the window axis (torch.cat equivalent is the
        #      batched day_vec above)
        bias_day = ((1.0 - m_day) * NEG_INF)[:, None, :]                # (1,1,W)
        h2 = day_vec[None]                                              # (1,W,D)
        for l in range(num_layers):
            h2 = enc_layer(h2, bias_day, wqkv_w_ref[l], wo_w_ref[l],
                           w1_w_ref[l], w2_w_ref[l], pv_w_ref[l])
        denom_w = jnp.maximum(jnp.sum(m_day, axis=-1, keepdims=True), 1.0)  # (1,1)
        week = jnp.dot(m_day, h2[0],
                       preferred_element_type=jnp.float32) / denom_w       # (1,D)
        o_ref[0] = week

    return kernel


# ---------------------------------------------------------------------------
# Parameter initialization (deterministic, synthetic) — packed / stacked layout
# ---------------------------------------------------------------------------
def init_layer(key, D, H, F):
    PW = max(3 * D, F, D)
    ks = jax.random.split(key, 6)
    s = 0.05
    wq = s * jax.random.normal(ks[0], (D, D), jnp.float32)
    wk = s * jax.random.normal(ks[1], (D, D), jnp.float32)
    wv = s * jax.random.normal(ks[2], (D, D), jnp.float32)
    wqkv = jnp.concatenate([wq, wk, wv], axis=1)                 # (D, 3D)
    wo = s * jax.random.normal(ks[3], (D, D), jnp.float32)
    w1 = s * jax.random.normal(ks[4], (D, F), jnp.float32)
    w2 = s * jax.random.normal(ks[5], (F, D), jnp.float32)
    # packed vectors: rows [bqkv, bo, b1, b2, g1, be1, g2, be2]
    pv = jnp.zeros((8, PW), jnp.float32)
    pv = pv.at[4, 0:D].set(1.0)   # g1 = 1
    pv = pv.at[6, 0:D].set(1.0)   # g2 = 1
    return {"wqkv": wqkv, "wo": wo, "w1": w1, "w2": w2, "pv": pv}


def _stack_layers(layers):
    out = {k: jnp.stack([l[k] for l in layers], axis=0) for k in layers[0]}
    for k in ("wqkv", "wo", "w1", "w2"):          # bf16 MXU inputs, f32 accumulate
        out[k] = out[k].astype(jnp.bfloat16)
    return out


def init_temporal_encoder(key, traj_len, D, H, F, num_layers):
    k_emb, k_day, k_week = jax.random.split(key, 3)
    day = _stack_layers([init_layer(k, D, H, F)
                         for k in jax.random.split(k_day, num_layers)])
    week = _stack_layers([init_layer(k, D, H, F)
                          for k in jax.random.split(k_week, num_layers)])
    return {
        "tim_embed_table": 0.05 * jax.random.normal(
            k_emb, (traj_len + 1, D), jnp.float32),
        "day": day,
        "week": week,
    }


# ---------------------------------------------------------------------------
# Forward pass (mirrors TemporalEncoder.forward) — one fused pallas_call
# ---------------------------------------------------------------------------
def temporal_encoder_forward(params, tim_batch, mask_day, mask_traj, *, H):
    B, W, T = tim_batch.shape
    table = params["tim_embed_table"]
    V, D = table.shape
    day, week = params["day"], params["week"]
    num_layers = day["wqkv"].shape[0]
    F = day["w1"].shape[2]

    idx = tim_batch.astype(jnp.int32)                               # (B, W, T)
    m_traj = mask_traj[:, :, 1:-1].astype(jnp.float32)              # (B, W, T)
    m_day = mask_day.astype(jnp.float32).reshape(B, 1, W)           # (B, 1, W)

    kernel = _make_fused_kernel(W, T, V, D, H, F, num_layers)

    def rep_spec(arr):  # full-array, grid-invariant (weight) spec
        n = arr.ndim
        return pl.BlockSpec(arr.shape, lambda b, n=n: (0,) * n)

    in_specs = [
        pl.BlockSpec((1, W, T), lambda b: (b, 0, 0)),   # idx
        rep_spec(table),                                # embedding table
        pl.BlockSpec((1, W, T), lambda b: (b, 0, 0)),   # m_traj
        pl.BlockSpec((1, 1, W), lambda b: (b, 0, 0)),   # m_day
        rep_spec(day["wqkv"]), rep_spec(day["wo"]),
        rep_spec(day["w1"]), rep_spec(day["w2"]), rep_spec(day["pv"]),
        rep_spec(week["wqkv"]), rep_spec(week["wo"]),
        rep_spec(week["w1"]), rep_spec(week["w2"]), rep_spec(week["pv"]),
    ]
    out_specs = pl.BlockSpec((1, 1, D), lambda b: (b, 0, 0))

    out = pl.pallas_call(
        kernel,
        out_shape=jax.ShapeDtypeStruct((B, 1, D), jnp.float32),
        grid=(B,),
        in_specs=in_specs,
        out_specs=out_specs,
        compiler_params=pltpu.CompilerParams(
            dimension_semantics=("parallel",)),          # 2 TCs on v7x
    )(idx, table, m_traj, m_day,
      day["wqkv"], day["wo"], day["w1"], day["w2"], day["pv"],
      week["wqkv"], week["wo"], week["w1"], week["w2"], week["pv"])
    return out.reshape(B, D)


# ---------------------------------------------------------------------------
if __name__ == "__main__":
    # small, forward-consistent hyperparameters
    B = 2            # batch
    win_len = 4      # windows ("days") per sample
    traj_len = 8     # points per trajectory
    D = 32           # dim_embed_tim
    H = 4            # head_num_tim
    F = 64           # dim_enc_tim (FFN hidden)
    num_enc = 2      # num_enc_tim

    key = jax.random.PRNGKey(0)
    k_par, k_tim = jax.random.split(key)

    params = init_temporal_encoder(k_par, traj_len, D, H, F, num_enc)

    # inputs
    tim_batch = jax.random.randint(k_tim, (B, win_len, traj_len), 0, traj_len + 1)
    # deterministic masks (1 = valid, 0 = pad); mask_traj includes begin/end tokens
    lens = 6 + (jnp.arange(B)[:, None] + jnp.arange(win_len)[None, :]) % 3   # (B, W)
    mask_traj = (jnp.arange(traj_len + 2)[None, None, :] <
                 (lens + 2)[:, :, None]).astype(jnp.float32)   # (B, W, traj_len+2)
    mask_day = jnp.ones((B, win_len), jnp.float32).at[:, -1].set(
        jnp.array([1.0, 0.0]))                                  # (B, W)

    fwd = jax.jit(functools.partial(temporal_encoder_forward, H=H))
    out = fwd(params, tim_batch, mask_day, mask_traj)
    out = jax.block_until_ready(out)
    assert out.shape == (B, D) and bool(jnp.all(jnp.isfinite(out)))
    print("KERNEL_OK")
</pallas_src>

<mosaic_0001>
module attributes {stable_mosaic.version = 11 : i64} {
  func.func @kernel(%arg0: i32, %arg1: memref<1x4x8xi32, #tpu.memory_space<vmem>>, %arg2: memref<9x32xf32, #tpu.memory_space<vmem>>, %arg3: memref<1x4x8xf32, #tpu.memory_space<vmem>>, %arg4: memref<1x1x4xf32, #tpu.memory_space<vmem>>, %arg5: memref<2x32x96xbf16, #tpu.memory_space<vmem>>, %arg6: memref<2x32x32xbf16, #tpu.memory_space<vmem>>, %arg7: memref<2x32x64xbf16, #tpu.memory_space<vmem>>, %arg8: memref<2x64x32xbf16, #tpu.memory_space<vmem>>, %arg9: memref<2x8x96xf32, #tpu.memory_space<vmem>>, %arg10: memref<2x32x96xbf16, #tpu.memory_space<vmem>>, %arg11: memref<2x32x32xbf16, #tpu.memory_space<vmem>>, %arg12: memref<2x32x64xbf16, #tpu.memory_space<vmem>>, %arg13: memref<2x64x32xbf16, #tpu.memory_space<vmem>>, %arg14: memref<2x8x96xf32, #tpu.memory_space<vmem>>, %arg15: memref<1x1x32xf32, #tpu.memory_space<vmem>>) attributes {dimension_semantics = [#tpu.dimension_semantics<parallel>], iteration_bounds = array<i64: 2>, scalar_prefetch = 0 : i64, scratch_operands = 0 : i64, tpu.core_type = #tpu.core_type<tc>, window_params = [{transform_indices = @transform_0, window_bounds = array<i64: 1, 4, 8>}, {pipeline_mode = #tpu.pipeline_mode<synchronous>, transform_indices = @transform_1, window_bounds = array<i64: 9, 32>}, {transform_indices = @transform_2, window_bounds = array<i64: 1, 4, 8>}, {transform_indices = @transform_3, window_bounds = array<i64: 1, 1, 4>}, {pipeline_mode = #tpu.pipeline_mode<synchronous>, transform_indices = @transform_4, window_bounds = array<i64: 2, 32, 96>}, {pipeline_mode = #tpu.pipeline_mode<synchronous>, transform_indices = @transform_5, window_bounds = array<i64: 2, 32, 32>}, {pipeline_mode = #tpu.pipeline_mode<synchronous>, transform_indices = @transform_6, window_bounds = array<i64: 2, 32, 64>}, {pipeline_mode = #tpu.pipeline_mode<synchronous>, transform_indices = @transform_7, window_bounds = array<i64: 2, 64, 32>}, {pipeline_mode = #tpu.pipeline_mode<synchronous>, transform_indices = @transform_8, window_bounds = array<i64: 2, 8, 96>}, {pipeline_mode = #tpu.pipeline_mode<synchronous>, transform_indices = @transform_9, window_bounds = array<i64: 2, 32, 96>}, {pipeline_mode = #tpu.pipeline_mode<synchronous>, transform_indices = @transform_10, window_bounds = array<i64: 2, 32, 32>}, {pipeline_mode = #tpu.pipeline_mode<synchronous>, transform_indices = @transform_11, window_bounds = array<i64: 2, 32, 64>}, {pipeline_mode = #tpu.pipeline_mode<synchronous>, transform_indices = @transform_12, window_bounds = array<i64: 2, 64, 32>}, {pipeline_mode = #tpu.pipeline_mode<synchronous>, transform_indices = @transform_13, window_bounds = array<i64: 2, 8, 96>}, {transform_indices = @transform_14, window_bounds = array<i64: 1, 1, 32>}]} {
    %c0 = arith.constant 0 : index
    %c0_0 = arith.constant 0 : index
    %c0_1 = arith.constant 0 : index
    %0 = vector.load %arg1[%c0, %c0_0, %c0_1] : memref<1x4x8xi32, #tpu.memory_space<vmem>>, vector<1x4x8xi32>
    %1 = vector.shape_cast %0 : vector<1x4x8xi32> to vector<4x8xi32>
    %c0_2 = arith.constant 0 : index
    %c0_3 = arith.constant 0 : index
    %c0_4 = arith.constant 0 : index
    %2 = vector.load %arg3[%c0_2, %c0_3, %c0_4] : memref<1x4x8xf32, #tpu.memory_space<vmem>>, vector<1x4x8xf32>
    %3 = vector.shape_cast %2 : vector<1x4x8xf32> to vector<4x8xf32>
    %c0_5 = arith.constant 0 : index
    %c0_6 = arith.constant 0 : index
    %c0_7 = arith.constant 0 : index
    %4 = vector.load %arg4[%c0_5, %c0_6, %c0_7] : memref<1x1x4xf32, #tpu.memory_space<vmem>>, vector<1x1x4xf32>
    %5 = vector.shape_cast %4 : vector<1x1x4xf32> to vector<1x4xf32>
    %6 = tpu.iota {dimensions = array<i32: 2>} : vector<4x8x9xi32>
    %7 = vector.shape_cast %1 : vector<4x8xi32> to vector<4x8x1xi32>
    %8 = vector.broadcast %7 : vector<4x8x1xi32> to vector<4x8x9xi32>
    %9 = arith.cmpi eq, %6, %8 : vector<4x8x9xi32>
    %10 = arith.extui %9 : vector<4x8x9xi1> to vector<4x8x9xi32>
    %11 = arith.sitofp %10 : vector<4x8x9xi32> to vector<4x8x9xf32>
    %12 = vector.shape_cast %11 : vector<4x8x9xf32> to vector<32x9xf32>
    %c0_8 = arith.constant 0 : index
    %c0_9 = arith.constant 0 : index
    %13 = vector.load %arg2[%c0_8, %c0_9] : memref<9x32xf32, #tpu.memory_space<vmem>>, vector<9x32xf32>
    %cst = arith.constant dense<0.000000e+00> : vector<32x32xf32>
    %14 = tpu.matmul %12, %13, %cst {dimension_numbers = #tpu.dot_dimension_numbers<[1], [0], [0], [1], [0, 0, 1, 1], [], []>} : vector<32x9xf32>, vector<9x32xf32>, vector<32x32xf32> -> vector<32x32xf32>
    %15 = vector.shape_cast %14 : vector<32x32xf32> to vector<4x8x32xf32>
    %cst_10 = arith.constant 1.000000e+00 : f32
    %16 = vector.broadcast %cst_10 : f32 to vector<4x8xf32>
    %17 = arith.subf %16, %3 : vector<4x8xf32>
    %cst_11 = arith.constant -1.000000e+09 : f32
    %18 = vector.broadcast %cst_11 : f32 to vector<4x8xf32>
    %19 = arith.mulf %17, %18 : vector<4x8xf32>
    %20 = vector.shape_cast %19 : vector<4x8xf32> to vector<4x1x8xf32>
    %c0_12 = arith.constant 0 : index
    %c0_13 = arith.constant 0 : index
    %c0_14 = arith.constant 0 : index
    %21 = vector.load %arg5[%c0_12, %c0_13, %c0_14] : memref<2x32x96xbf16, #tpu.memory_space<vmem>>, vector<1x32x96xbf16>
    %22 = vector.shape_cast %21 : vector<1x32x96xbf16> to vector<32x96xbf16>
    %c0_15 = arith.constant 0 : index
    %c0_16 = arith.constant 0 : index
    %c0_17 = arith.constant 0 : index
    %23 = vector.load %arg6[%c0_15, %c0_16, %c0_17] : memref<2x32x32xbf16, #tpu.memory_space<vmem>>, vector<1x32x32xbf16>
    %24 = vector.shape_cast %23 : vector<1x32x32xbf16> to vector<32x32xbf16>
    %c0_18 = arith.constant 0 : index
    %c0_19 = arith.constant 0 : index
    %c0_20 = arith.constant 0 : index
    %25 = vector.load %arg7[%c0_18, %c0_19, %c0_20] : memref<2x32x64xbf16, #tpu.memory_space<vmem>>, vector<1x32x64xbf16>
    %26 = vector.shape_cast %25 : vector<1x32x64xbf16> to vector<32x64xbf16>
    %c0_21 = arith.constant 0 : index
    %c0_22 = arith.constant 0 : index
    %c0_23 = arith.constant 0 : index
    %27 = vector.load %arg8[%c0_21, %c0_22, %c0_23] : memref<2x64x32xbf16, #tpu.memory_space<vmem>>, vector<1x64x32xbf16>
    %28 = vector.shape_cast %27 : vector<1x64x32xbf16> to vector<64x32xbf16>
    %c0_24 = arith.constant 0 : index
    %c0_25 = arith.constant 0 : index
    %c0_26 = arith.constant 0 : index
    %29 = vector.load %arg9[%c0_24, %c0_25, %c0_26] : memref<2x8x96xf32, #tpu.memory_space<vmem>>, vector<1x8x96xf32>
    %30 = vector.shape_cast %29 : vector<1x8x96xf32> to vector<8x96xf32>
    %31 = vector.extract_strided_slice %30 {offsets = [0, 0], sizes = [1, 96], strides = [1, 1]} : vector<8x96xf32> to vector<1x96xf32>
    %32 = vector.extract_strided_slice %30 {offsets = [1, 0], sizes = [1, 32], strides = [1, 1]} : vector<8x96xf32> to vector<1x32xf32>
    %33 = vector.extract_strided_slice %30 {offsets = [2, 0], sizes = [1, 64], strides = [1, 1]} : vector<8x96xf32> to vector<1x64xf32>
    %34 = vector.extract_strided_slice %30 {offsets = [3, 0], sizes = [1, 32], strides = [1, 1]} : vector<8x96xf32> to vector<1x32xf32>
    %35 = vector.extract_strided_slice %30 {offsets = [4, 0], sizes = [1, 32], strides = [1, 1]} : vector<8x96xf32> to vector<1x32xf32>
    %36 = vector.extract_strided_slice %30 {offsets = [5, 0], sizes = [1, 32], strides = [1, 1]} : vector<8x96xf32> to vector<1x32xf32>
    %37 = vector.extract_strided_slice %30 {offsets = [6, 0], sizes = [1, 32], strides = [1, 1]} : vector<8x96xf32> to vector<1x32xf32>
    %38 = vector.extract_strided_slice %30 {offsets = [7, 0], sizes = [1, 32], strides = [1, 1]} : vector<8x96xf32> to vector<1x32xf32>
    %39 = vector.shape_cast %15 : vector<4x8x32xf32> to vector<32x32xf32>
    %40 = arith.truncf %39 : vector<32x32xf32> to vector<32x32xbf16>
    %cst_27 = arith.constant dense<0.000000e+00> : vector<32x96xf32>
    %41 = tpu.matmul %40, %22, %cst_27 {dimension_numbers = #tpu.dot_dimension_numbers<[1], [0], [0], [1], [0, 0, 1, 1], [], []>} : vector<32x32xbf16>, vector<32x96xbf16>, vector<32x96xf32> -> vector<32x96xf32>
    %42 = vector.broadcast %31 : vector<1x96xf32> to vector<32x96xf32>
    %43 = arith.addf %41, %42 : vector<32x96xf32>
    %44 = vector.extract_strided_slice %43 {offsets = [0, 0], sizes = [32, 8], strides = [1, 1]} : vector<32x96xf32> to vector<32x8xf32>
    %cst_28 = arith.constant 0.353553385 : f32
    %45 = vector.broadcast %cst_28 : f32 to vector<32x8xf32>
    %46 = arith.mulf %44, %45 : vector<32x8xf32>
    %47 = vector.shape_cast %46 : vector<32x8xf32> to vector<4x8x8xf32>
    %48 = vector.extract_strided_slice %43 {offsets = [0, 32], sizes = [32, 8], strides = [1, 1]} : vector<32x96xf32> to vector<32x8xf32>
    %49 = vector.shape_cast %48 : vector<32x8xf32> to vector<4x8x8xf32>
    %50 = vector.extract_strided_slice %43 {offsets = [0, 64], sizes = [32, 8], strides = [1, 1]} : vector<32x96xf32> to vector<32x8xf32>
    %51 = vector.shape_cast %50 : vector<32x8xf32> to vector<4x8x8xf32>
    %52 = arith.truncf %47 : vector<4x8x8xf32> to vector<4x8x8xbf16>
    %53 = arith.truncf %49 : vector<4x8x8xf32> to vector<4x8x8xbf16>
    "tpu.trace_start"() <{level = 10 : i32, message = "nqd,nkd->nqk"}> : () -> ()
    %cst_29 = arith.constant dense<0.000000e+00> : vector<4x8x8xf32>
    %54 = tpu.matmul %52, %53, %cst_29 {dimension_numbers = #tpu.dot_dimension_numbers<[2], [2], [1], [1], [0, 0, 0, 1, 1, 1], [0], [0]>} : vector<4x8x8xbf16>, vector<4x8x8xbf16>, vector<4x8x8xf32> -> vector<4x8x8xf32>
    "tpu.trace_stop"() : () -> ()
    %55 = vector.broadcast %20 : vector<4x1x8xf32> to vector<4x8x8xf32>
    %56 = arith.addf %54, %55 : vector<4x8x8xf32>
    %cst_30 = arith.constant dense<0xFF800000> : vector<4x8xf32>
    %57 = vector.multi_reduction <maximumf>, %56, %cst_30 [2] : vector<4x8x8xf32> to vector<4x8xf32>
    %58 = vector.shape_cast %57 : vector<4x8xf32> to vector<4x8x1xf32>
    %59 = vector.broadcast %58 : vector<4x8x1xf32> to vector<4x8x8xf32>
    %60 = arith.subf %56, %59 : vector<4x8x8xf32>
    %61 = math.exp %60 : vector<4x8x8xf32>
    %cst_31 = arith.constant dense<0.000000e+00> : vector<4x8xf32>
    %62 = vector.multi_reduction <add>, %61, %cst_31 [2] : vector<4x8x8xf32> to vector<4x8xf32>
    %63 = vector.shape_cast %62 : vector<4x8xf32> to vector<4x8x1xf32>
    %64 = tpu.reciprocal %63 {approx = true} : vector<4x8x1xf32> -> vector<4x8x1xf32>
    %65 = vector.broadcast %64 : vector<4x8x1xf32> to vector<4x8x8xf32>
    %66 = arith.mulf %61, %65 : vector<4x8x8xf32>
    %67 = arith.truncf %66 : vector<4x8x8xf32> to vector<4x8x8xbf16>
    %68 = arith.truncf %51 : vector<4x8x8xf32> to vector<4x8x8xbf16>
    "tpu.trace_start"() <{level = 10 : i32, message = "nqk,nkd->nqd"}> : () -> ()
    %cst_32 = arith.constant dense<0.000000e+00> : vector<4x8x8xf32>
    %69 = tpu.matmul %67, %68, %cst_32 {dimension_numbers = #tpu.dot_dimension_numbers<[2], [1], [1], [2], [0, 0, 0, 1, 1, 2], [0], [0]>} : vector<4x8x8xbf16>, vector<4x8x8xbf16>, vector<4x8x8xf32> -> vector<4x8x8xf32>
    "tpu.trace_stop"() : () -> ()
    %70 = vector.shape_cast %69 : vector<4x8x8xf32> to vector<32x8xf32>
    %71 = vector.extract_strided_slice %43 {offsets = [0, 8], sizes = [32, 8], strides = [1, 1]} : vector<32x96xf32> to vector<32x8xf32>
    %cst_33 = arith.constant 0.353553385 : f32
    %72 = vector.broadcast %cst_33 : f32 to vector<32x8xf32>
    %73 = arith.mulf %71, %72 : vector<32x8xf32>
    %74 = vector.shape_cast %73 : vector<32x8xf32> to vector<4x8x8xf32>
    %75 = vector.extract_strided_slice %43 {offsets = [0, 40], sizes = [32, 8], strides = [1, 1]} : vector<32x96xf32> to vector<32x8xf32>
    %76 = vector.shape_cast %75 : vector<32x8xf32> to vector<4x8x8xf32>
    %77 = vector.extract_strided_slice %43 {offsets = [0, 72], sizes = [32, 8], strides = [1, 1]} : vector<32x96xf32> to vector<32x8xf32>
    %78 = vector.shape_cast %77 : vector<32x8xf32> to vector<4x8x8xf32>
    %79 = arith.truncf %74 : vector<4x8x8xf32> to vector<4x8x8xbf16>
    %80 = arith.truncf %76 : vector<4x8x8xf32> to vector<4x8x8xbf16>
    "tpu.trace_start"() <{level = 10 : i32, message = "nqd,nkd->nqk"}> : () -> ()
    %cst_34 = arith.constant dense<0.000000e+00> : vector<4x8x8xf32>
    %81 = tpu.matmul %79, %80, %cst_34 {dimension_numbers = #tpu.dot_dimension_numbers<[2], [2], [1], [1], [0, 0, 0, 1, 1, 1], [0], [0]>} : vector<4x8x8xbf16>, vector<4x8x8xbf16>, vector<4x8x8xf32> -> vector<4x8x8xf32>
    "tpu.trace_stop"() : () -> ()
    %82 = vector.broadcast %20 : vector<4x1x8xf32> to vector<4x8x8xf32>
    %83 = arith.addf %81, %82 : vector<4x8x8xf32>
    %cst_35 = arith.constant dense<0xFF800000> : vector<4x8xf32>
    %84 = vector.multi_reduction <maximumf>, %83, %cst_35 [2] : vector<4x8x8xf32> to vector<4x8xf32>
    %85 = vector.shape_cast %84 : vector<4x8xf32> to vector<4x8x1xf32>
    %86 = vector.broadcast %85 : vector<4x8x1xf32> to vector<4x8x8xf32>
    %87 = arith.subf %83, %86 : vector<4x8x8xf32>
    %88 = math.exp %87 : vector<4x8x8xf32>
    %cst_36 = arith.constant dense<0.000000e+00> : vector<4x8xf32>
    %89 = vector.multi_reduction <add>, %88, %cst_36 [2] : vector<4x8x8xf32> to vector<4x8xf32>
    %90 = vector.shape_cast %89 : vector<4x8xf32> to vector<4x8x1xf32>
    %91 = tpu.reciprocal %90 {approx = true} : vector<4x8x1xf32> -> vector<4x8x1xf32>
    %92 = vector.broadcast %91 : vector<4x8x1xf32> to vector<4x8x8xf32>
    %93 = arith.mulf %88, %92 : vector<4x8x8xf32>
    %94 = arith.truncf %93 : vector<4x8x8xf32> to vector<4x8x8xbf16>
    %95 = arith.truncf %78 : vector<4x8x8xf32> to vector<4x8x8xbf16>
    "tpu.trace_start"() <{level = 10 : i32, message = "nqk,nkd->nqd"}> : () -> ()
    %cst_37 = arith.constant dense<0.000000e+00> : vector<4x8x8xf32>
    %96 = tpu.matmul %94, %95, %cst_37 {dimension_numbers = #tpu.dot_dimension_numbers<[2], [1], [1], [2], [0, 0, 0, 1, 1, 2], [0], [0]>} : vector<4x8x8xbf16>, vector<4x8x8xbf16>, vector<4x8x8xf32> -> vector<4x8x8xf32>
    "tpu.trace_stop"() : () -> ()
    %97 = vector.shape_cast %96 : vector<4x8x8xf32> to vector<32x8xf32>
    %98 = vector.extract_strided_slice %43 {offsets = [0, 16], sizes = [32, 8], strides = [1, 1]} : vector<32x96xf32> to vector<32x8xf32>
    %cst_38 = arith.constant 0.353553385 : f32
    %99 = vector.broadcast %cst_38 : f32 to vector<32x8xf32>
    %100 = arith.mulf %98, %99 : vector<32x8xf32>
    %101 = vector.shape_cast %100 : vector<32x8xf32> to vector<4x8x8xf32>
    %102 = vector.extract_strided_slice %43 {offsets = [0, 48], sizes = [32, 8], strides = [1, 1]} : vector<32x96xf32> to vector<32x8xf32>
    %103 = vector.shape_cast %102 : vector<32x8xf32> to vector<4x8x8xf32>
    %104 = vector.extract_strided_slice %43 {offsets = [0, 80], sizes = [32, 8], strides = [1, 1]} : vector<32x96xf32> to vector<32x8xf32>
    %105 = vector.shape_cast %104 : vector<32x8xf32> to vector<4x8x8xf32>
    %106 = arith.truncf %101 : vector<4x8x8xf32> to vector<4x8x8xbf16>
    %107 = arith.truncf %103 : vector<4x8x8xf32> to vector<4x8x8xbf16>
    "tpu.trace_start"() <{level = 10 : i32, message = "nqd,nkd->nqk"}> : () -> ()
    %cst_39 = arith.constant dense<0.000000e+00> : vector<4x8x8xf32>
    %108 = tpu.matmul %106, %107, %cst_39 {dimension_numbers = #tpu.dot_dimension_numbers<[2], [2], [1], [1], [0, 0, 0, 1, 1, 1], [0], [0]>} : vector<4x8x8xbf16>, vector<4x8x8xbf16>, vector<4x8x8xf32> -> vector<4x8x8xf32>
    "tpu.trace_stop"() : () -> ()
    %109 = vector.broadcast %20 : vector<4x1x8xf32> to vector<4x8x8xf32>
    %110 = arith.addf %108, %109 : vector<4x8x8xf32>
    %cst_40 = arith.constant dense<0xFF800000> : vector<4x8xf32>
    %111 = vector.multi_reduction <maximumf>, %110, %cst_40 [2] : vector<4x8x8xf32> to vector<4x8xf32>
    %112 = vector.shape_cast %111 : vector<4x8xf32> to vector<4x8x1xf32>
    %113 = vector.broadcast %112 : vector<4x8x1xf32> to vector<4x8x8xf32>
    %114 = arith.subf %110, %113 : vector<4x8x8xf32>
    %115 = math.exp %114 : vector<4x8x8xf32>
    %cst_41 = arith.constant dense<0.000000e+00> : vector<4x8xf32>
    %116 = vector.multi_reduction <add>, %115, %cst_41 [2] : vector<4x8x8xf32> to vector<4x8xf32>
    %117 = vector.shape_cast %116 : vector<4x8xf32> to vector<4x8x1xf32>
    %118 = tpu.reciprocal %117 {approx = true} : vector<4x8x1xf32> -> vector<4x8x1xf32>
    %119 = vector.broadcast %118 : vector<4x8x1xf32> to vector<4x8x8xf32>
    %120 = arith.mulf %115, %119 : vector<4x8x8xf32>
    %121 = arith.truncf %120 : vector<4x8x8xf32> to vector<4x8x8xbf16>
    %122 = arith.truncf %105 : vector<4x8x8xf32> to vector<4x8x8xbf16>
    "tpu.trace_start"() <{level = 10 : i32, message = "nqk,nkd->nqd"}> : () -> ()
    %cst_42 = arith.constant dense<0.000000e+00> : vector<4x8x8xf32>
    %123 = tpu.matmul %121, %122, %cst_42 {dimension_numbers = #tpu.dot_dimension_numbers<[2], [1], [1], [2], [0, 0, 0, 1, 1, 2], [0], [0]>} : vector<4x8x8xbf16>, vector<4x8x8xbf16>, vector<4x8x8xf32> -> vector<4x8x8xf32>
    "tpu.trace_stop"() : () -> ()
    %124 = vector.shape_cast %123 : vector<4x8x8xf32> to vector<32x8xf32>
    %125 = vector.extract_strided_slice %43 {offsets = [0, 24], sizes = [32, 8], strides = [1, 1]} : vector<32x96xf32> to vector<32x8xf32>
    %cst_43 = arith.constant 0.353553385 : f32
    %126 = vector.broadcast %cst_43 : f32 to vector<32x8xf32>
    %127 = arith.mulf %125, %126 : vector<32x8xf32>
    %128 = vector.shape_cast %127 : vector<32x8xf32> to vector<4x8x8xf32>
    %129 = vector.extract_strided_slice %43 {offsets = [0, 56], sizes = [32, 8], strides = [1, 1]} : vector<32x96xf32> to vector<32x8xf32>
    %130 = vector.shape_cast %129 : vector<32x8xf32> to vector<4x8x8xf32>
    %131 = vector.extract_strided_slice %43 {offsets = [0, 88], sizes = [32, 8], strides = [1, 1]} : vector<32x96xf32> to vector<32x8xf32>
    %132 = vector.shape_cast %131 : vector<32x8xf32> to vector<4x8x8xf32>
    %133 = arith.truncf %128 : vector<4x8x8xf32> to vector<4x8x8xbf16>
    %134 = arith.truncf %130 : vector<4x8x8xf32> to vector<4x8x8xbf16>
    "tpu.trace_start"() <{level = 10 : i32, message = "nqd,nkd->nqk"}> : () -> ()
    %cst_44 = arith.constant dense<0.000000e+00> : vector<4x8x8xf32>
    %135 = tpu.matmul %133, %134, %cst_44 {dimension_numbers = #tpu.dot_dimension_numbers<[2], [2], [1], [1], [0, 0, 0, 1, 1, 1], [0], [0]>} : vector<4x8x8xbf16>, vector<4x8x8xbf16>, vector<4x8x8xf32> -> vector<4x8x8xf32>
    "tpu.trace_stop"() : () -> ()
    %136 = vector.broadcast %20 : vector<4x1x8xf32> to vector<4x8x8xf32>
    %137 = arith.addf %135, %136 : vector<4x8x8xf32>
    %cst_45 = arith.constant dense<0xFF800000> : vector<4x8xf32>
    %138 = vector.multi_reduction <maximumf>, %137, %cst_45 [2] : vector<4x8x8xf32> to vector<4x8xf32>
    %139 = vector.shape_cast %138 : vector<4x8xf32> to vector<4x8x1xf32>
    %140 = vector.broadcast %139 : vector<4x8x1xf32> to vector<4x8x8xf32>
    %141 = arith.subf %137, %140 : vector<4x8x8xf32>
    %142 = math.exp %141 : vector<4x8x8xf32>
    %cst_46 = arith.constant dense<0.000000e+00> : vector<4x8xf32>
    %143 = vector.multi_reduction <add>, %142, %cst_46 [2] : vector<4x8x8xf32> to vector<4x8xf32>
    %144 = vector.shape_cast %143 : vector<4x8xf32> to vector<4x8x1xf32>
    %145 = tpu.reciprocal %144 {approx = true} : vector<4x8x1xf32> -> vector<4x8x1xf32>
    %146 = vector.broadcast %145 : vector<4x8x1xf32> to vector<4x8x8xf32>
    %147 = arith.mulf %142, %146 : vector<4x8x8xf32>
    %148 = arith.truncf %147 : vector<4x8x8xf32> to vector<4x8x8xbf16>
    %149 = arith.truncf %132 : vector<4x8x8xf32> to vector<4x8x8xbf16>
    "tpu.trace_start"() <{level = 10 : i32, message = "nqk,nkd->nqd"}> : () -> ()
    %cst_47 = arith.constant dense<0.000000e+00> : vector<4x8x8xf32>
    %150 = tpu.matmul %148, %149, %cst_47 {dimension_numbers = #tpu.dot_dimension_numbers<[2], [1], [1], [2], [0, 0, 0, 1, 1, 2], [0], [0]>} : vector<4x8x8xbf16>, vector<4x8x8xbf16>, vector<4x8x8xf32> -> vector<4x8x8xf32>
    "tpu.trace_stop"() : () -> ()
    %151 = vector.shape_cast %150 : vector<4x8x8xf32> to vector<32x8xf32>
    %152 = tpu.concatenate %70, %97, %124, %151 in 1 : vector<32x8xf32>, vector<32x8xf32>, vector<32x8xf32>, vector<32x8xf32> -> vector<32x32xf32>
    %153 = arith.truncf %152 : vector<32x32xf32> to vector<32x32xbf16>
    %cst_48 = arith.constant dense<0.000000e+00> : vector<32x32xf32>
    %154 = tpu.matmul %153, %24, %cst_48 {dimension_numbers = #tpu.dot_dimension_numbers<[1], [0], [0], [1], [0, 0, 1, 1], [], []>} : vector<32x32xbf16>, vector<32x32xbf16>, vector<32x32xf32> -> vector<32x32xf32>
    %155 = vector.broadcast %32 : vector<1x32xf32> to vector<32x32xf32>
    %156 = arith.addf %154, %155 : vector<32x32xf32>
    %157 = arith.addf %39, %156 : vector<32x32xf32>
    %cst_49 = arith.constant dense<0.000000e+00> : vector<32xf32>
    %158 = vector.multi_reduction <add>, %157, %cst_49 [1] : vector<32x32xf32> to vector<32xf32>
    %159 = vector.shape_cast %158 : vector<32xf32> to vector<32x1xf32>
    %cst_50 = arith.constant 3.200000e+01 : f32
    %160 = vector.broadcast %cst_50 : f32 to vector<32x1xf32>
    %161 = arith.divf %159, %160 : vector<32x1xf32>
    %162 = vector.broadcast %161 : vector<32x1xf32> to vector<32x32xf32>
    %163 = arith.subf %157, %162 : vector<32x32xf32>
    %164 = vector.broadcast %161 : vector<32x1xf32> to vector<32x32xf32>
    %165 = arith.subf %157, %164 : vector<32x32xf32>
    %166 = arith.mulf %163, %165 : vector<32x32xf32>
    %cst_51 = arith.constant dense<0.000000e+00> : vector<32xf32>
    %167 = vector.multi_reduction <add>, %166, %cst_51 [1] : vector<32x32xf32> to vector<32xf32>
    %168 = vector.shape_cast %167 : vector<32xf32> to vector<32x1xf32>
    %cst_52 = arith.constant 3.200000e+01 : f32
    %169 = vector.broadcast %cst_52 : f32 to vector<32x1xf32>
    %170 = arith.divf %168, %169 : vector<32x1xf32>
    %171 = vector.broadcast %161 : vector<32x1xf32> to vector<32x32xf32>
    %172 = arith.subf %157, %171 : vector<32x32xf32>
    %cst_53 = arith.constant 9.99999974E-6 : f32
    %173 = vector.broadcast %cst_53 : f32 to vector<32x1xf32>
    %174 = arith.addf %170, %173 : vector<32x1xf32>
    %175 = math.rsqrt %174 : vector<32x1xf32>
    %176 = vector.broadcast %175 : vector<32x1xf32> to vector<32x32xf32>
    %177 = arith.mulf %172, %176 : vector<32x32xf32>
    %178 = vector.broadcast %35 : vector<1x32xf32> to vector<32x32xf32>
    %179 = arith.mulf %177, %178 : vector<32x32xf32>
    %180 = vector.broadcast %36 : vector<1x32xf32> to vector<32x32xf32>
    %181 = arith.addf %179, %180 : vector<32x32xf32>
    %182 = arith.truncf %181 : vector<32x32xf32> to vector<32x32xbf16>
    %cst_54 = arith.constant dense<0.000000e+00> : vector<32x64xf32>
    %183 = tpu.matmul %182, %26, %cst_54 {dimension_numbers = #tpu.dot_dimension_numbers<[1], [0], [0], [1], [0, 0, 1, 1], [], []>} : vector<32x32xbf16>, vector<32x64xbf16>, vector<32x64xf32> -> vector<32x64xf32>
    %184 = vector.broadcast %33 : vector<1x64xf32> to vector<32x64xf32>
    %185 = arith.addf %183, %184 : vector<32x64xf32>
    %cst_55 = arith.constant 0.000000e+00 : f32
    %186 = vector.broadcast %cst_55 : f32 to vector<32x64xf32>
    %187 = arith.maximumf %185, %186 : vector<32x64xf32>
    %188 = arith.truncf %187 : vector<32x64xf32> to vector<32x64xbf16>
    %cst_56 = arith.constant dense<0.000000e+00> : vector<32x32xf32>
    %189 = tpu.matmul %188, %28, %cst_56 {dimension_numbers = #tpu.dot_dimension_numbers<[1], [0], [0], [1], [0, 0, 1, 1], [], []>} : vector<32x64xbf16>, vector<64x32xbf16>, vector<32x32xf32> -> vector<32x32xf32>
    %190 = vector.broadcast %34 : vector<1x32xf32> to vector<32x32xf32>
    %191 = arith.addf %189, %190 : vector<32x32xf32>
    %192 = arith.addf %181, %191 : vector<32x32xf32>
    %cst_57 = arith.constant dense<0.000000e+00> : vector<32xf32>
    %193 = vector.multi_reduction <add>, %192, %cst_57 [1] : vector<32x32xf32> to vector<32xf32>
    %194 = vector.shape_cast %193 : vector<32xf32> to vector<32x1xf32>
    %cst_58 = arith.constant 3.200000e+01 : f32
    %195 = vector.broadcast %cst_58 : f32 to vector<32x1xf32>
    %196 = arith.divf %194, %195 : vector<32x1xf32>
    %197 = vector.broadcast %196 : vector<32x1xf32> to vector<32x32xf32>
    %198 = arith.subf %192, %197 : vector<32x32xf32>
    %199 = vector.broadcast %196 : vector<32x1xf32> to vector<32x32xf32>
    %200 = arith.subf %192, %199 : vector<32x32xf32>
    %201 = arith.mulf %198, %200 : vector<32x32xf32>
    %cst_59 = arith.constant dense<0.000000e+00> : vector<32xf32>
    %202 = vector.multi_reduction <add>, %201, %cst_59 [1] : vector<32x32xf32> to vector<32xf32>
    %203 = vector.shape_cast %202 : vector<32xf32> to vector<32x1xf32>
    %cst_60 = arith.constant 3.200000e+01 : f32
    %204 = vector.broadcast %cst_60 : f32 to vector<32x1xf32>
    %205 = arith.divf %203, %204 : vector<32x1xf32>
    %206 = vector.broadcast %196 : vector<32x1xf32> to vector<32x32xf32>
    %207 = arith.subf %192, %206 : vector<32x32xf32>
    %cst_61 = arith.constant 9.99999974E-6 : f32
    %208 = vector.broadcast %cst_61 : f32 to vector<32x1xf32>
    %209 = arith.addf %205, %208 : vector<32x1xf32>
    %210 = math.rsqrt %209 : vector<32x1xf32>
    %211 = vector.broadcast %210 : vector<32x1xf32> to vector<32x32xf32>
    %212 = arith.mulf %207, %211 : vector<32x32xf32>
    %213 = vector.broadcast %37 : vector<1x32xf32> to vector<32x32xf32>
    %214 = arith.mulf %212, %213 : vector<32x32xf32>
    %215 = vector.broadcast %38 : vector<1x32xf32> to vector<32x32xf32>
    %216 = arith.addf %214, %215 : vector<32x32xf32>
    %217 = vector.shape_cast %216 : vector<32x32xf32> to vector<4x8x32xf32>
    %c1 = arith.constant 1 : index
    %c0_62 = arith.constant 0 : index
    %c0_63 = arith.constant 0 : index
    %218 = vector.load %arg5[%c1, %c0_62, %c0_63] : memref<2x32x96xbf16, #tpu.memory_space<vmem>>, vector<1x32x96xbf16>
    %219 = vector.shape_cast %218 : vector<1x32x96xbf16> to vector<32x96xbf16>
    %c1_64 = arith.constant 1 : index
    %c0_65 = arith.constant 0 : index
    %c0_66 = arith.constant 0 : index
    %220 = vector.load %arg6[%c1_64, %c0_65, %c0_66] : memref<2x32x32xbf16, #tpu.memory_space<vmem>>, vector<1x32x32xbf16>
    %221 = vector.shape_cast %220 : vector<1x32x32xbf16> to vector<32x32xbf16>
    %c1_67 = arith.constant 1 : index
    %c0_68 = arith.constant 0 : index
    %c0_69 = arith.constant 0 : index
    %222 = vector.load %arg7[%c1_67, %c0_68, %c0_69] : memref<2x32x64xbf16, #tpu.memory_space<vmem>>, vector<1x32x64xbf16>
    %223 = vector.shape_cast %222 : vector<1x32x64xbf16> to vector<32x64xbf16>
    %c1_70 = arith.constant 1 : index
    %c0_71 = arith.constant 0 : index
    %c0_72 = arith.constant 0 : index
    %224 = vector.load %arg8[%c1_70, %c0_71, %c0_72] : memref<2x64x32xbf16, #tpu.memory_space<vmem>>, vector<1x64x32xbf16>
    %225 = vector.shape_cast %224 : vector<1x64x32xbf16> to vector<64x32xbf16>
    %c1_73 = arith.constant 1 : index
    %c0_74 = arith.constant 0 : index
    %c0_75 = arith.constant 0 : index
    %226 = vector.load %arg9[%c1_73, %c0_74, %c0_75] : memref<2x8x96xf32, #tpu.memory_space<vmem>>, vector<1x8x96xf32>
    %227 = vector.shape_cast %226 : vector<1x8x96xf32> to vector<8x96xf32>
    %228 = vector.extract_strided_slice %227 {offsets = [0, 0], sizes = [1, 96], strides = [1, 1]} : vector<8x96xf32> to vector<1x96xf32>
    %229 = vector.extract_strided_slice %227 {offsets = [1, 0], sizes = [1, 32], strides = [1, 1]} : vector<8x96xf32> to vector<1x32xf32>
    %230 = vector.extract_strided_slice %227 {offsets = [2, 0], sizes = [1, 64], strides = [1, 1]} : vector<8x96xf32> to vector<1x64xf32>
    %231 = vector.extract_strided_slice %227 {offsets = [3, 0], sizes = [1, 32], strides = [1, 1]} : vector<8x96xf32> to vector<1x32xf32>
    %232 = vector.extract_strided_slice %227 {offsets = [4, 0], sizes = [1, 32], strides = [1, 1]} : vector<8x96xf32> to vector<1x32xf32>
    %233 = vector.extract_strided_slice %227 {offsets = [5, 0], sizes = [1, 32], strides = [1, 1]} : vector<8x96xf32> to vector<1x32xf32>
    %234 = vector.extract_strided_slice %227 {offsets = [6, 0], sizes = [1, 32], strides = [1, 1]} : vector<8x96xf32> to vector<1x32xf32>
    %235 = vector.extract_strided_slice %227 {offsets = [7, 0], sizes = [1, 32], strides = [1, 1]} : vector<8x96xf32> to vector<1x32xf32>
    %236 = vector.shape_cast %217 : vector<4x8x32xf32> to vector<32x32xf32>
    %237 = arith.truncf %236 : vector<32x32xf32> to vector<32x32xbf16>
    %cst_76 = arith.constant dense<0.000000e+00> : vector<32x96xf32>
    %238 = tpu.matmul %237, %219, %cst_76 {dimension_numbers = #tpu.dot_dimension_numbers<[1], [0], [0], [1], [0, 0, 1, 1], [], []>} : vector<32x32xbf16>, vector<32x96xbf16>, vector<32x96xf32> -> vector<32x96xf32>
    %239 = vector.broadcast %228 : vector<1x96xf32> to vector<32x96xf32>
    %240 = arith.addf %238, %239 : vector<32x96xf32>
    %241 = vector.extract_strided_slice %240 {offsets = [0, 0], sizes = [32, 8], strides = [1, 1]} : vector<32x96xf32> to vector<32x8xf32>
    %cst_77 = arith.constant 0.353553385 : f32
    %242 = vector.broadcast %cst_77 : f32 to vector<32x8xf32>
    %243 = arith.mulf %241, %242 : vector<32x8xf32>
    %244 = vector.shape_cast %243 : vector<32x8xf32> to vector<4x8x8xf32>
    %245 = vector.extract_strided_slice %240 {offsets = [0, 32], sizes = [32, 8], strides = [1, 1]} : vector<32x96xf32> to vector<32x8xf32>
    %246 = vector.shape_cast %245 : vector<32x8xf32> to vector<4x8x8xf32>
    %247 = vector.extract_strided_slice %240 {offsets = [0, 64], sizes = [32, 8], strides = [1, 1]} : vector<32x96xf32> to vector<32x8xf32>
    %248 = vector.shape_cast %247 : vector<32x8xf32> to vector<4x8x8xf32>
    %249 = arith.truncf %244 : vector<4x8x8xf32> to vector<4x8x8xbf16>
    %250 = arith.truncf %246 : vector<4x8x8xf32> to vector<4x8x8xbf16>
    "tpu.trace_start"() <{level = 10 : i32, message = "nqd,nkd->nqk"}> : () -> ()
    %cst_78 = arith.constant dense<0.000000e+00> : vector<4x8x8xf32>
    %251 = tpu.matmul %249, %250, %cst_78 {dimension_numbers = #tpu.dot_dimension_numbers<[2], [2], [1], [1], [0, 0, 0, 1, 1, 1], [0], [0]>} : vector<4x8x8xbf16>, vector<4x8x8xbf16>, vector<4x8x8xf32> -> vector<4x8x8xf32>
    "tpu.trace_stop"() : () -> ()
    %252 = vector.broadcast %20 : vector<4x1x8xf32> to vector<4x8x8xf32>
    %253 = arith.addf %251, %252 : vector<4x8x8xf32>
    %cst_79 = arith.constant dense<0xFF800000> : vector<4x8xf32>
    %254 = vector.multi_reduction <maximumf>, %253, %cst_79 [2] : vector<4x8x8xf32> to vector<4x8xf32>
    %255 = vector.shape_cast %254 : vector<4x8xf32> to vector<4x8x1xf32>
    %256 = vector.broadcast %255 : vector<4x8x1xf32> to vector<4x8x8xf32>
    %257 = arith.subf %253, %256 : vector<4x8x8xf32>
    %258 = math.exp %257 : vector<4x8x8xf32>
    %cst_80 = arith.constant dense<0.000000e+00> : vector<4x8xf32>
    %259 = vector.multi_reduction <add>, %258, %cst_80 [2] : vector<4x8x8xf32> to vector<4x8xf32>
    %260 = vector.shape_cast %259 : vector<4x8xf32> to vector<4x8x1xf32>
    %261 = tpu.reciprocal %260 {approx = true} : vector<4x8x1xf32> -> vector<4x8x1xf32>
    %262 = vector.broadcast %261 : vector<4x8x1xf32> to vector<4x8x8xf32>
    %263 = arith.mulf %258, %262 : vector<4x8x8xf32>
    %264 = arith.truncf %263 : vector<4x8x8xf32> to vector<4x8x8xbf16>
    %265 = arith.truncf %248 : vector<4x8x8xf32> to vector<4x8x8xbf16>
    "tpu.trace_start"() <{level = 10 : i32, message = "nqk,nkd->nqd"}> : () -> ()
    %cst_81 = arith.constant dense<0.000000e+00> : vector<4x8x8xf32>
    %266 = tpu.matmul %264, %265, %cst_81 {dimension_numbers = #tpu.dot_dimension_numbers<[2], [1], [1], [2], [0, 0, 0, 1, 1, 2], [0], [0]>} : vector<4x8x8xbf16>, vector<4x8x8xbf16>, vector<4x8x8xf32> -> vector<4x8x8xf32>
    "tpu.trace_stop"() : () -> ()
    %267 = vector.shape_cast %266 : vector<4x8x8xf32> to vector<32x8xf32>
    %268 = vector.extract_strided_slice %240 {offsets = [0, 8], sizes = [32, 8], strides = [1, 1]} : vector<32x96xf32> to vector<32x8xf32>
    %cst_82 = arith.constant 0.353553385 : f32
    %269 = vector.broadcast %cst_82 : f32 to vector<32x8xf32>
    %270 = arith.mulf %268, %269 : vector<32x8xf32>
    %271 = vector.shape_cast %270 : vector<32x8xf32> to vector<4x8x8xf32>
    %272 = vector.extract_strided_slice %240 {offsets = [0, 40], sizes = [32, 8], strides = [1, 1]} : vector<32x96xf32> to vector<32x8xf32>
    %273 = vector.shape_cast %272 : vector<32x8xf32> to vector<4x8x8xf32>
    %274 = vector.extract_strided_slice %240 {offsets = [0, 72], sizes = [32, 8], strides = [1, 1]} : vector<32x96xf32> to vector<32x8xf32>
    %275 = vector.shape_cast %274 : vector<32x8xf32> to vector<4x8x8xf32>
    %276 = arith.truncf %271 : vector<4x8x8xf32> to vector<4x8x8xbf16>
    %277 = arith.truncf %273 : vector<4x8x8xf32> to vector<4x8x8xbf16>
    "tpu.trace_start"() <{level = 10 : i32, message = "nqd,nkd->nqk"}> : () -> ()
    %cst_83 = arith.constant dense<0.000000e+00> : vector<4x8x8xf32>
    %278 = tpu.matmul %276, %277, %cst_83 {dimension_numbers = #tpu.dot_dimension_numbers<[2], [2], [1], [1], [0, 0, 0, 1, 1, 1], [0], [0]>} : vector<4x8x8xbf16>, vector<4x8x8xbf16>, vector<4x8x8xf32> -> vector<4x8x8xf32>
    "tpu.trace_stop"() : () -> ()
    %279 = vector.broadcast %20 : vector<4x1x8xf32> to vector<4x8x8xf32>
    %280 = arith.addf %278, %279 : vector<4x8x8xf32>
    %cst_84 = arith.constant dense<0xFF800000> : vector<4x8xf32>
    %281 = vector.multi_reduction <maximumf>, %280, %cst_84 [2] : vector<4x8x8xf32> to vector<4x8xf32>
    %282 = vector.shape_cast %281 : vector<4x8xf32> to vector<4x8x1xf32>
    %283 = vector.broadcast %282 : vector<4x8x1xf32> to vector<4x8x8xf32>
    %284 = arith.subf %280, %283 : vector<4x8x8xf32>
    %285 = math.exp %284 : vector<4x8x8xf32>
    %cst_85 = arith.constant dense<0.000000e+00> : vector<4x8xf32>
    %286 = vector.multi_reduction <add>, %285, %cst_85 [2] : vector<4x8x8xf32> to vector<4x8xf32>
    %287 = vector.shape_cast %286 : vector<4x8xf32> to vector<4x8x1xf32>
    %288 = tpu.reciprocal %287 {approx = true} : vector<4x8x1xf32> -> vector<4x8x1xf32>
    %289 = vector.broadcast %288 : vector<4x8x1xf32> to vector<4x8x8xf32>
    %290 = arith.mulf %285, %289 : vector<4x8x8xf32>
    %291 = arith.truncf %290 : vector<4x8x8xf32> to vector<4x8x8xbf16>
    %292 = arith.truncf %275 : vector<4x8x8xf32> to vector<4x8x8xbf16>
    "tpu.trace_start"() <{level = 10 : i32, message = "nqk,nkd->nqd"}> : () -> ()
    %cst_86 = arith.constant dense<0.000000e+00> : vector<4x8x8xf32>
    %293 = tpu.matmul %291, %292, %cst_86 {dimension_numbers = #tpu.dot_dimension_numbers<[2], [1], [1], [2], [0, 0, 0, 1, 1, 2], [0], [0]>} : vector<4x8x8xbf16>, vector<4x8x8xbf16>, vector<4x8x8xf32> -> vector<4x8x8xf32>
    "tpu.trace_stop"() : () -> ()
    %294 = vector.shape_cast %293 : vector<4x8x8xf32> to vector<32x8xf32>
    %295 = vector.extract_strided_slice %240 {offsets = [0, 16], sizes = [32, 8], strides = [1, 1]} : vector<32x96xf32> to vector<32x8xf32>
    %cst_87 = arith.constant 0.353553385 : f32
    %296 = vector.broadcast %cst_87 : f32 to vector<32x8xf32>
    %297 = arith.mulf %295, %296 : vector<32x8xf32>
    %298 = vector.shape_cast %297 : vector<32x8xf32> to vector<4x8x8xf32>
    %299 = vector.extract_strided_slice %240 {offsets = [0, 48], sizes = [32, 8], strides = [1, 1]} : vector<32x96xf32> to vector<32x8xf32>
    %300 = vector.shape_cast %299 : vector<32x8xf32> to vector<4x8x8xf32>
    %301 = vector.extract_strided_slice %240 {offsets = [0, 80], sizes = [32, 8], strides = [1, 1]} : vector<32x96xf32> to vector<32x8xf32>
    %302 = vector.shape_cast %301 : vector<32x8xf32> to vector<4x8x8xf32>
    %303 = arith.truncf %298 : vector<4x8x8xf32> to vector<4x8x8xbf16>
    %304 = arith.truncf %300 : vector<4x8x8xf32> to vector<4x8x8xbf16>
    "tpu.trace_start"() <{level = 10 : i32, message = "nqd,nkd->nqk"}> : () -> ()
    %cst_88 = arith.constant dense<0.000000e+00> : vector<4x8x8xf32>
    %305 = tpu.matmul %303, %304, %cst_88 {dimension_numbers = #tpu.dot_dimension_numbers<[2], [2], [1], [1], [0, 0, 0, 1, 1, 1], [0], [0]>} : vector<4x8x8xbf16>, vector<4x8x8xbf16>, vector<4x8x8xf32> -> vector<4x8x8xf32>
    "tpu.trace_stop"() : () -> ()
    %306 = vector.broadcast %20 : vector<4x1x8xf32> to vector<4x8x8xf32>
    %307 = arith.addf %305, %306 : vector<4x8x8xf32>
    %cst_89 = arith.constant dense<0xFF800000> : vector<4x8xf32>
    %308 = vector.multi_reduction <maximumf>, %307, %cst_89 [2] : vector<4x8x8xf32> to vector<4x8xf32>
    %309 = vector.shape_cast %308 : vector<4x8xf32> to vector<4x8x1xf32>
    %310 = vector.broadcast %309 : vector<4x8x1xf32> to vector<4x8x8xf32>
    %311 = arith.subf %307, %310 : vector<4x8x8xf32>
    %312 = math.exp %311 : vector<4x8x8xf32>
    %cst_90 = arith.constant dense<0.000000e+00> : vector<4x8xf32>
    %313 = vector.multi_reduction <add>, %312, %cst_90 [2] : vector<4x8x8xf32> to vector<4x8xf32>
    %314 = vector.shape_cast %313 : vector<4x8xf32> to vector<4x8x1xf32>
    %315 = tpu.reciprocal %314 {approx = true} : vector<4x8x1xf32> -> vector<4x8x1xf32>
    %316 = vector.broadcast %315 : vector<4x8x1xf32> to vector<4x8x8xf32>
    %317 = arith.mulf %312, %316 : vector<4x8x8xf32>
    %318 = arith.truncf %317 : vector<4x8x8xf32> to vector<4x8x8xbf16>
    %319 = arith.truncf %302 : vector<4x8x8xf32> to vector<4x8x8xbf16>
    "tpu.trace_start"() <{level = 10 : i32, message = "nqk,nkd->nqd"}> : () -> ()
    %cst_91 = arith.constant dense<0.000000e+00> : vector<4x8x8xf32>
    %320 = tpu.matmul %318, %319, %cst_91 {dimension_numbers = #tpu.dot_dimension_numbers<[2], [1], [1], [2], [0, 0, 0, 1, 1, 2], [0], [0]>} : vector<4x8x8xbf16>, vector<4x8x8xbf16>, vector<4x8x8xf32> -> vector<4x8x8xf32>
    "tpu.trace_stop"() : () -> ()
    %321 = vector.shape_cast %320 : vector<4x8x8xf32> to vector<32x8xf32>
    %322 = vector.extract_strided_slice %240 {offsets = [0, 24], sizes = [32, 8], strides = [1, 1]} : vector<32x96xf32> to vector<32x8xf32>
    %cst_92 = arith.constant 0.353553385 : f32
    %323 = vector.broadcast %cst_92 : f32 to vector<32x8xf32>
    %324 = arith.mulf %322, %323 : vector<32x8xf32>
    %325 = vector.shape_cast %324 : vector<32x8xf32> to vector<4x8x8xf32>
    %326 = vector.extract_strided_slice %240 {offsets = [0, 56], sizes = [32, 8], strides = [1, 1]} : vector<32x96xf32> to vector<32x8xf32>
    %327 = vector.shape_cast %326 : vector<32x8xf32> to vector<4x8x8xf32>
    %328 = vector.extract_strided_slice %240 {offsets = [0, 88], sizes = [32, 8], strides = [1, 1]} : vector<32x96xf32> to vector<32x8xf32>
    %329 = vector.shape_cast %328 : vector<32x8xf32> to vector<4x8x8xf32>
    %330 = arith.truncf %325 : vector<4x8x8xf32> to vector<4x8x8xbf16>
    %331 = arith.truncf %327 : vector<4x8x8xf32> to vector<4x8x8xbf16>
    "tpu.trace_start"() <{level = 10 : i32, message = "nqd,nkd->nqk"}> : () -> ()
    %cst_93 = arith.constant dense<0.000000e+00> : vector<4x8x8xf32>
    %332 = tpu.matmul %330, %331, %cst_93 {dimension_numbers = #tpu.dot_dimension_numbers<[2], [2], [1], [1], [0, 0, 0, 1, 1, 1], [0], [0]>} : vector<4x8x8xbf16>, vector<4x8x8xbf16>, vector<4x8x8xf32> -> vector<4x8x8xf32>
    "tpu.trace_stop"() : () -> ()
    %333 = vector.broadcast %20 : vector<4x1x8xf32> to vector<4x8x8xf32>
    %334 = arith.addf %332, %333 : vector<4x8x8xf32>
    %cst_94 = arith.constant dense<0xFF800000> : vector<4x8xf32>
    %335 = vector.multi_reduction <maximumf>, %334, %cst_94 [2] : vector<4x8x8xf32> to vector<4x8xf32>
    %336 = vector.shape_cast %335 : vector<4x8xf32> to vector<4x8x1xf32>
    %337 = vector.broadcast %336 : vector<4x8x1xf32> to vector<4x8x8xf32>
    %338 = arith.subf %334, %337 : vector<4x8x8xf32>
    %339 = math.exp %338 : vector<4x8x8xf32>
    %cst_95 = arith.constant dense<0.000000e+00> : vector<4x8xf32>
    %340 = vector.multi_reduction <add>, %339, %cst_95 [2] : vector<4x8x8xf32> to vector<4x8xf32>
    %341 = vector.shape_cast %340 : vector<4x8xf32> to vector<4x8x1xf32>
    %342 = tpu.reciprocal %341 {approx = true} : vector<4x8x1xf32> -> vector<4x8x1xf32>
    %343 = vector.broadcast %342 : vector<4x8x1xf32> to vector<4x8x8xf32>
    %344 = arith.mulf %339, %343 : vector<4x8x8xf32>
    %345 = arith.truncf %344 : vector<4x8x8xf32> to vector<4x8x8xbf16>
    %346 = arith.truncf %329 : vector<4x8x8xf32> to vector<4x8x8xbf16>
    "tpu.trace_start"() <{level = 10 : i32, message = "nqk,nkd->nqd"}> : () -> ()
    %cst_96 = arith.constant dense<0.000000e+00> : vector<4x8x8xf32>
    %347 = tpu.matmul %345, %346, %cst_96 {dimension_numbers = #tpu.dot_dimension_numbers<[2], [1], [1], [2], [0, 0, 0, 1, 1, 2], [0], [0]>} : vector<4x8x8xbf16>, vector<4x8x8xbf16>, vector<4x8x8xf32> -> vector<4x8x8xf32>
    "tpu.trace_stop"() : () -> ()
    %348 = vector.shape_cast %347 : vector<4x8x8xf32> to vector<32x8xf32>
    %349 = tpu.concatenate %267, %294, %321, %348 in 1 : vector<32x8xf32>, vector<32x8xf32>, vector<32x8xf32>, vector<32x8xf32> -> vector<32x32xf32>
    %350 = arith.truncf %349 : vector<32x32xf32> to vector<32x32xbf16>
    %cst_97 = arith.constant dense<0.000000e+00> : vector<32x32xf32>
    %351 = tpu.matmul %350, %221, %cst_97 {dimension_numbers = #tpu.dot_dimension_numbers<[1], [0], [0], [1], [0, 0, 1, 1], [], []>} : vector<32x32xbf16>, vector<32x32xbf16>, vector<32x32xf32> -> vector<32x32xf32>
    %352 = vector.broadcast %229 : vector<1x32xf32> to vector<32x32xf32>
    %353 = arith.addf %351, %352 : vector<32x32xf32>
    %354 = arith.addf %236, %353 : vector<32x32xf32>
    %cst_98 = arith.constant dense<0.000000e+00> : vector<32xf32>
    %355 = vector.multi_reduction <add>, %354, %cst_98 [1] : vector<32x32xf32> to vector<32xf32>
    %356 = vector.shape_cast %355 : vector<32xf32> to vector<32x1xf32>
    %cst_99 = arith.constant 3.200000e+01 : f32
    %357 = vector.broadcast %cst_99 : f32 to vector<32x1xf32>
    %358 = arith.divf %356, %357 : vector<32x1xf32>
    %359 = vector.broadcast %358 : vector<32x1xf32> to vector<32x32xf32>
    %360 = arith.subf %354, %359 : vector<32x32xf32>
    %361 = vector.broadcast %358 : vector<32x1xf32> to vector<32x32xf32>
    %362 = arith.subf %354, %361 : vector<32x32xf32>
    %363 = arith.mulf %360, %362 : vector<32x32xf32>
    %cst_100 = arith.constant dense<0.000000e+00> : vector<32xf32>
    %364 = vector.multi_reduction <add>, %363, %cst_100 [1] : vector<32x32xf32> to vector<32xf32>
    %365 = vector.shape_cast %364 : vector<32xf32> to vector<32x1xf32>
    %cst_101 = arith.constant 3.200000e+01 : f32
    %366 = vector.broadcast %cst_101 : f32 to vector<32x1xf32>
    %367 = arith.divf %365, %366 : vector<32x1xf32>
    %368 = vector.broadcast %358 : vector<32x1xf32> to vector<32x32xf32>
    %369 = arith.subf %354, %368 : vector<32x32xf32>
    %cst_102 = arith.constant 9.99999974E-6 : f32
    %370 = vector.broadcast %cst_102 : f32 to vector<32x1xf32>
    %371 = arith.addf %367, %370 : vector<32x1xf32>
    %372 = math.rsqrt %371 : vector<32x1xf32>
    %373 = vector.broadcast %372 : vector<32x1xf32> to vector<32x32xf32>
    %374 = arith.mulf %369, %373 : vector<32x32xf32>
    %375 = vector.broadcast %232 : vector<1x32xf32> to vector<32x32xf32>
    %376 = arith.mulf %374, %375 : vector<32x32xf32>
    %377 = vector.broadcast %233 : vector<1x32xf32> to vector<32x32xf32>
    %378 = arith.addf %376, %377 : vector<32x32xf32>
    %379 = arith.truncf %378 : vector<32x32xf32> to vector<32x32xbf16>
    %cst_103 = arith.constant dense<0.000000e+00> : vector<32x64xf32>
    %380 = tpu.matmul %379, %223, %cst_103 {dimension_numbers = #tpu.dot_dimension_numbers<[1], [0], [0], [1], [0, 0, 1, 1], [], []>} : vector<32x32xbf16>, vector<32x64xbf16>, vector<32x64xf32> -> vector<32x64xf32>
    %381 = vector.broadcast %230 : vector<1x64xf32> to vector<32x64xf32>
    %382 = arith.addf %380, %381 : vector<32x64xf32>
    %cst_104 = arith.constant 0.000000e+00 : f32
    %383 = vector.broadcast %cst_104 : f32 to vector<32x64xf32>
    %384 = arith.maximumf %382, %383 : vector<32x64xf32>
    %385 = arith.truncf %384 : vector<32x64xf32> to vector<32x64xbf16>
    %cst_105 = arith.constant dense<0.000000e+00> : vector<32x32xf32>
    %386 = tpu.matmul %385, %225, %cst_105 {dimension_numbers = #tpu.dot_dimension_numbers<[1], [0], [0], [1], [0, 0, 1, 1], [], []>} : vector<32x64xbf16>, vector<64x32xbf16>, vector<32x32xf32> -> vector<32x32xf32>
    %387 = vector.broadcast %231 : vector<1x32xf32> to vector<32x32xf32>
    %388 = arith.addf %386, %387 : vector<32x32xf32>
    %389 = arith.addf %378, %388 : vector<32x32xf32>
    %cst_106 = arith.constant dense<0.000000e+00> : vector<32xf32>
    %390 = vector.multi_reduction <add>, %389, %cst_106 [1] : vector<32x32xf32> to vector<32xf32>
    %391 = vector.shape_cast %390 : vector<32xf32> to vector<32x1xf32>
    %cst_107 = arith.constant 3.200000e+01 : f32
    %392 = vector.broadcast %cst_107 : f32 to vector<32x1xf32>
    %393 = arith.divf %391, %392 : vector<32x1xf32>
    %394 = vector.broadcast %393 : vector<32x1xf32> to vector<32x32xf32>
    %395 = arith.subf %389, %394 : vector<32x32xf32>
    %396 = vector.broadcast %393 : vector<32x1xf32> to vector<32x32xf32>
    %397 = arith.subf %389, %396 : vector<32x32xf32>
    %398 = arith.mulf %395, %397 : vector<32x32xf32>
    %cst_108 = arith.constant dense<0.000000e+00> : vector<32xf32>
    %399 = vector.multi_reduction <add>, %398, %cst_108 [1] : vector<32x32xf32> to vector<32xf32>
    %400 = vector.shape_cast %399 : vector<32xf32> to vector<32x1xf32>
    %cst_109 = arith.constant 3.200000e+01 : f32
    %401 = vector.broadcast %cst_109 : f32 to vector<32x1xf32>
    %402 = arith.divf %400, %401 : vector<32x1xf32>
    %403 = vector.broadcast %393 : vector<32x1xf32> to vector<32x32xf32>
    %404 = arith.subf %389, %403 : vector<32x32xf32>
    %cst_110 = arith.constant 9.99999974E-6 : f32
    %405 = vector.broadcast %cst_110 : f32 to vector<32x1xf32>
    %406 = arith.addf %402, %405 : vector<32x1xf32>
    %407 = math.rsqrt %406 : vector<32x1xf32>
    %408 = vector.broadcast %407 : vector<32x1xf32> to vector<32x32xf32>
    %409 = arith.mulf %404, %408 : vector<32x32xf32>
    %410 = vector.broadcast %234 : vector<1x32xf32> to vector<32x32xf32>
    %411 = arith.mulf %409, %410 : vector<32x32xf32>
    %412 = vector.broadcast %235 : vector<1x32xf32> to vector<32x32xf32>
    %413 = arith.addf %411, %412 : vector<32x32xf32>
    %414 = vector.shape_cast %413 : vector<32x32xf32> to vector<4x8x32xf32>
    %cst_111 = arith.constant dense<0.000000e+00> : vector<4xf32>
    %415 = vector.multi_reduction <add>, %3, %cst_111 [1] : vector<4x8xf32> to vector<4xf32>
    %416 = vector.shape_cast %415 : vector<4xf32> to vector<4x1xf32>
    %cst_112 = arith.constant 1.000000e+00 : f32
    %417 = vector.broadcast %cst_112 : f32 to vector<4x1xf32>
    %418 = arith.maximumf %416, %417 : vector<4x1xf32>
    %419 = vector.shape_cast %3 : vector<4x8xf32> to vector<4x8x1xf32>
    %420 = vector.broadcast %419 : vector<4x8x1xf32> to vector<4x8x32xf32>
    %421 = arith.mulf %414, %420 : vector<4x8x32xf32>
    %cst_113 = arith.constant dense<0.000000e+00> : vector<4x32xf32>
    %422 = vector.multi_reduction <add>, %421, %cst_113 [1] : vector<4x8x32xf32> to vector<4x32xf32>
    %423 = vector.broadcast %418 : vector<4x1xf32> to vector<4x32xf32>
    %424 = arith.divf %422, %423 : vector<4x32xf32>
    %cst_114 = arith.constant 1.000000e+00 : f32
    %425 = vector.broadcast %cst_114 : f32 to vector<1x4xf32>
    %426 = arith.subf %425, %5 : vector<1x4xf32>
    %cst_115 = arith.constant -1.000000e+09 : f32
    %427 = vector.broadcast %cst_115 : f32 to vector<1x4xf32>
    %428 = arith.mulf %426, %427 : vector<1x4xf32>
    %429 = vector.shape_cast %428 : vector<1x4xf32> to vector<1x1x4xf32>
    %430 = vector.shape_cast %424 : vector<4x32xf32> to vector<1x4x32xf32>
    %c0_116 = arith.constant 0 : index
    %c0_117 = arith.constant 0 : index
    %c0_118 = arith.constant 0 : index
    %431 = vector.load %arg10[%c0_116, %c0_117, %c0_118] : memref<2x32x96xbf16, #tpu.memory_space<vmem>>, vector<1x32x96xbf16>
    %432 = vector.shape_cast %431 : vector<1x32x96xbf16> to vector<32x96xbf16>
    %c0_119 = arith.constant 0 : index
    %c0_120 = arith.constant 0 : index
    %c0_121 = arith.constant 0 : index
    %433 = vector.load %arg11[%c0_119, %c0_120, %c0_121] : memref<2x32x32xbf16, #tpu.memory_space<vmem>>, vector<1x32x32xbf16>
    %434 = vector.shape_cast %433 : vector<1x32x32xbf16> to vector<32x32xbf16>
    %c0_122 = arith.constant 0 : index
    %c0_123 = arith.constant 0 : index
    %c0_124 = arith.constant 0 : index
    %435 = vector.load %arg12[%c0_122, %c0_123, %c0_124] : memref<2x32x64xbf16, #tpu.memory_space<vmem>>, vector<1x32x64xbf16>
    %436 = vector.shape_cast %435 : vector<1x32x64xbf16> to vector<32x64xbf16>
    %c0_125 = arith.constant 0 : index
    %c0_126 = arith.constant 0 : index
    %c0_127 = arith.constant 0 : index
    %437 = vector.load %arg13[%c0_125, %c0_126, %c0_127] : memref<2x64x32xbf16, #tpu.memory_space<vmem>>, vector<1x64x32xbf16>
    %438 = vector.shape_cast %437 : vector<1x64x32xbf16> to vector<64x32xbf16>
    %c0_128 = arith.constant 0 : index
    %c0_129 = arith.constant 0 : index
    %c0_130 = arith.constant 0 : index
    %439 = vector.load %arg14[%c0_128, %c0_129, %c0_130] : memref<2x8x96xf32, #tpu.memory_space<vmem>>, vector<1x8x96xf32>
    %440 = vector.shape_cast %439 : vector<1x8x96xf32> to vector<8x96xf32>
    %441 = vector.extract_strided_slice %440 {offsets = [0, 0], sizes = [1, 96], strides = [1, 1]} : vector<8x96xf32> to vector<1x96xf32>
    %442 = vector.extract_strided_slice %440 {offsets = [1, 0], sizes = [1, 32], strides = [1, 1]} : vector<8x96xf32> to vector<1x32xf32>
    %443 = vector.extract_strided_slice %440 {offsets = [2, 0], sizes = [1, 64], strides = [1, 1]} : vector<8x96xf32> to vector<1x64xf32>
    %444 = vector.extract_strided_slice %440 {offsets = [3, 0], sizes = [1, 32], strides = [1, 1]} : vector<8x96xf32> to vector<1x32xf32>
    %445 = vector.extract_strided_slice %440 {offsets = [4, 0], sizes = [1, 32], strides = [1, 1]} : vector<8x96xf32> to vector<1x32xf32>
    %446 = vector.extract_strided_slice %440 {offsets = [5, 0], sizes = [1, 32], strides = [1, 1]} : vector<8x96xf32> to vector<1x32xf32>
    %447 = vector.extract_strided_slice %440 {offsets = [6, 0], sizes = [1, 32], strides = [1, 1]} : vector<8x96xf32> to vector<1x32xf32>
    %448 = vector.extract_strided_slice %440 {offsets = [7, 0], sizes = [1, 32], strides = [1, 1]} : vector<8x96xf32> to vector<1x32xf32>
    %449 = vector.shape_cast %430 : vector<1x4x32xf32> to vector<4x32xf32>
    %450 = arith.truncf %449 : vector<4x32xf32> to vector<4x32xbf16>
    %cst_131 = arith.constant dense<0.000000e+00> : vector<4x96xf32>
    %451 = tpu.matmul %450, %432, %cst_131 {dimension_numbers = #tpu.dot_dimension_numbers<[1], [0], [0], [1], [0, 0, 1, 1], [], []>} : vector<4x32xbf16>, vector<32x96xbf16>, vector<4x96xf32> -> vector<4x96xf32>
    %452 = vector.broadcast %441 : vector<1x96xf32> to vector<4x96xf32>
    %453 = arith.addf %451, %452 : vector<4x96xf32>
    %454 = vector.extract_strided_slice %453 {offsets = [0, 0], sizes = [4, 8], strides = [1, 1]} : vector<4x96xf32> to vector<4x8xf32>
    %cst_132 = arith.constant 0.353553385 : f32
    %455 = vector.broadcast %cst_132 : f32 to vector<4x8xf32>
    %456 = arith.mulf %454, %455 : vector<4x8xf32>
    %457 = vector.shape_cast %456 : vector<4x8xf32> to vector<1x4x8xf32>
    %458 = vector.extract_strided_slice %453 {offsets = [0, 32], sizes = [4, 8], strides = [1, 1]} : vector<4x96xf32> to vector<4x8xf32>
    %459 = vector.shape_cast %458 : vector<4x8xf32> to vector<1x4x8xf32>
    %460 = vector.extract_strided_slice %453 {offsets = [0, 64], sizes = [4, 8], strides = [1, 1]} : vector<4x96xf32> to vector<4x8xf32>
    %461 = vector.shape_cast %460 : vector<4x8xf32> to vector<1x4x8xf32>
    %462 = arith.truncf %457 : vector<1x4x8xf32> to vector<1x4x8xbf16>
    %463 = arith.truncf %459 : vector<1x4x8xf32> to vector<1x4x8xbf16>
    "tpu.trace_start"() <{level = 10 : i32, message = "nqd,nkd->nqk"}> : () -> ()
    %cst_133 = arith.constant dense<0.000000e+00> : vector<1x4x4xf32>
    %464 = tpu.matmul %462, %463, %cst_133 {dimension_numbers = #tpu.dot_dimension_numbers<[2], [2], [1], [1], [0, 0, 0, 1, 1, 1], [0], [0]>} : vector<1x4x8xbf16>, vector<1x4x8xbf16>, vector<1x4x4xf32> -> vector<1x4x4xf32>
    "tpu.trace_stop"() : () -> ()
    %465 = vector.broadcast %429 : vector<1x1x4xf32> to vector<1x4x4xf32>
    %466 = arith.addf %464, %465 : vector<1x4x4xf32>
    %cst_134 = arith.constant dense<0xFF800000> : vector<1x4xf32>
    %467 = vector.multi_reduction <maximumf>, %466, %cst_134 [2] : vector<1x4x4xf32> to vector<1x4xf32>
    %468 = vector.shape_cast %467 : vector<1x4xf32> to vector<1x4x1xf32>
    %469 = vector.broadcast %468 : vector<1x4x1xf32> to vector<1x4x4xf32>
    %470 = arith.subf %466, %469 : vector<1x4x4xf32>
    %471 = math.exp %470 : vector<1x4x4xf32>
    %cst_135 = arith.constant dense<0.000000e+00> : vector<1x4xf32>
    %472 = vector.multi_reduction <add>, %471, %cst_135 [2] : vector<1x4x4xf32> to vector<1x4xf32>
    %473 = vector.shape_cast %472 : vector<1x4xf32> to vector<1x4x1xf32>
    %474 = tpu.reciprocal %473 {approx = true} : vector<1x4x1xf32> -> vector<1x4x1xf32>
    %475 = vector.broadcast %474 : vector<1x4x1xf32> to vector<1x4x4xf32>
    %476 = arith.mulf %471, %475 : vector<1x4x4xf32>
    %477 = arith.truncf %476 : vector<1x4x4xf32> to vector<1x4x4xbf16>
    %478 = arith.truncf %461 : vector<1x4x8xf32> to vector<1x4x8xbf16>
    "tpu.trace_start"() <{level = 10 : i32, message = "nqk,nkd->nqd"}> : () -> ()
    %cst_136 = arith.constant dense<0.000000e+00> : vector<1x4x8xf32>
    %479 = tpu.matmul %477, %478, %cst_136 {dimension_numbers = #tpu.dot_dimension_numbers<[2], [1], [1], [2], [0, 0, 0, 1, 1, 2], [0], [0]>} : vector<1x4x4xbf16>, vector<1x4x8xbf16>, vector<1x4x8xf32> -> vector<1x4x8xf32>
    "tpu.trace_stop"() : () -> ()
    %480 = vector.shape_cast %479 : vector<1x4x8xf32> to vector<4x8xf32>
    %481 = vector.extract_strided_slice %453 {offsets = [0, 8], sizes = [4, 8], strides = [1, 1]} : vector<4x96xf32> to vector<4x8xf32>
    %cst_137 = arith.constant 0.353553385 : f32
    %482 = vector.broadcast %cst_137 : f32 to vector<4x8xf32>
    %483 = arith.mulf %481, %482 : vector<4x8xf32>
    %484 = vector.shape_cast %483 : vector<4x8xf32> to vector<1x4x8xf32>
    %485 = vector.extract_strided_slice %453 {offsets = [0, 40], sizes = [4, 8], strides = [1, 1]} : vector<4x96xf32> to vector<4x8xf32>
    %486 = vector.shape_cast %485 : vector<4x8xf32> to vector<1x4x8xf32>
    %487 = vector.extract_strided_slice %453 {offsets = [0, 72], sizes = [4, 8], strides = [1, 1]} : vector<4x96xf32> to vector<4x8xf32>
    %488 = vector.shape_cast %487 : vector<4x8xf32> to vector<1x4x8xf32>
    %489 = arith.truncf %484 : vector<1x4x8xf32> to vector<1x4x8xbf16>
    %490 = arith.truncf %486 : vector<1x4x8xf32> to vector<1x4x8xbf16>
    "tpu.trace_start"() <{level = 10 : i32, message = "nqd,nkd->nqk"}> : () -> ()
    %cst_138 = arith.constant dense<0.000000e+00> : vector<1x4x4xf32>
    %491 = tpu.matmul %489, %490, %cst_138 {dimension_numbers = #tpu.dot_dimension_numbers<[2], [2], [1], [1], [0, 0, 0, 1, 1, 1], [0], [0]>} : vector<1x4x8xbf16>, vector<1x4x8xbf16>, vector<1x4x4xf32> -> vector<1x4x4xf32>
    "tpu.trace_stop"() : () -> ()
    %492 = vector.broadcast %429 : vector<1x1x4xf32> to vector<1x4x4xf32>
    %493 = arith.addf %491, %492 : vector<1x4x4xf32>
    %cst_139 = arith.constant dense<0xFF800000> : vector<1x4xf32>
    %494 = vector.multi_reduction <maximumf>, %493, %cst_139 [2] : vector<1x4x4xf32> to vector<1x4xf32>
    %495 = vector.shape_cast %494 : vector<1x4xf32> to vector<1x4x1xf32>
    %496 = vector.broadcast %495 : vector<1x4x1xf32> to vector<1x4x4xf32>
    %497 = arith.subf %493, %496 : vector<1x4x4xf32>
    %498 = math.exp %497 : vector<1x4x4xf32>
    %cst_140 = arith.constant dense<0.000000e+00> : vector<1x4xf32>
    %499 = vector.multi_reduction <add>, %498, %cst_140 [2] : vector<1x4x4xf32> to vector<1x4xf32>
    %500 = vector.shape_cast %499 : vector<1x4xf32> to vector<1x4x1xf32>
    %501 = tpu.reciprocal %500 {approx = true} : vector<1x4x1xf32> -> vector<1x4x1xf32>
    %502 = vector.broadcast %501 : vector<1x4x1xf32> to vector<1x4x4xf32>
    %503 = arith.mulf %498, %502 : vector<1x4x4xf32>
    %504 = arith.truncf %503 : vector<1x4x4xf32> to vector<1x4x4xbf16>
    %505 = arith.truncf %488 : vector<1x4x8xf32> to vector<1x4x8xbf16>
    "tpu.trace_start"() <{level = 10 : i32, message = "nqk,nkd->nqd"}> : () -> ()
    %cst_141 = arith.constant dense<0.000000e+00> : vector<1x4x8xf32>
    %506 = tpu.matmul %504, %505, %cst_141 {dimension_numbers = #tpu.dot_dimension_numbers<[2], [1], [1], [2], [0, 0, 0, 1, 1, 2], [0], [0]>} : vector<1x4x4xbf16>, vector<1x4x8xbf16>, vector<1x4x8xf32> -> vector<1x4x8xf32>
    "tpu.trace_stop"() : () -> ()
    %507 = vector.shape_cast %506 : vector<1x4x8xf32> to vector<4x8xf32>
    %508 = vector.extract_strided_slice %453 {offsets = [0, 16], sizes = [4, 8], strides = [1, 1]} : vector<4x96xf32> to vector<4x8xf32>
    %cst_142 = arith.constant 0.353553385 : f32
    %509 = vector.broadcast %cst_142 : f32 to vector<4x8xf32>
    %510 = arith.mulf %508, %509 : vector<4x8xf32>
    %511 = vector.shape_cast %510 : vector<4x8xf32> to vector<1x4x8xf32>
    %512 = vector.extract_strided_slice %453 {offsets = [0, 48], sizes = [4, 8], strides = [1, 1]} : vector<4x96xf32> to vector<4x8xf32>
    %513 = vector.shape_cast %512 : vector<4x8xf32> to vector<1x4x8xf32>
    %514 = vector.extract_strided_slice %453 {offsets = [0, 80], sizes = [4, 8], strides = [1, 1]} : vector<4x96xf32> to vector<4x8xf32>
    %515 = vector.shape_cast %514 : vector<4x8xf32> to vector<1x4x8xf32>
    %516 = arith.truncf %511 : vector<1x4x8xf32> to vector<1x4x8xbf16>
    %517 = arith.truncf %513 : vector<1x4x8xf32> to vector<1x4x8xbf16>
    "tpu.trace_start"() <{level = 10 : i32, message = "nqd,nkd->nqk"}> : () -> ()
    %cst_143 = arith.constant dense<0.000000e+00> : vector<1x4x4xf32>
    %518 = tpu.matmul %516, %517, %cst_143 {dimension_numbers = #tpu.dot_dimension_numbers<[2], [2], [1], [1], [0, 0, 0, 1, 1, 1], [0], [0]>} : vector<1x4x8xbf16>, vector<1x4x8xbf16>, vector<1x4x4xf32> -> vector<1x4x4xf32>
    "tpu.trace_stop"() : () -> ()
    %519 = vector.broadcast %429 : vector<1x1x4xf32> to vector<1x4x4xf32>
    %520 = arith.addf %518, %519 : vector<1x4x4xf32>
    %cst_144 = arith.constant dense<0xFF800000> : vector<1x4xf32>
    %521 = vector.multi_reduction <maximumf>, %520, %cst_144 [2] : vector<1x4x4xf32> to vector<1x4xf32>
    %522 = vector.shape_cast %521 : vector<1x4xf32> to vector<1x4x1xf32>
    %523 = vector.broadcast %522 : vector<1x4x1xf32> to vector<1x4x4xf32>
    %524 = arith.subf %520, %523 : vector<1x4x4xf32>
    %525 = math.exp %524 : vector<1x4x4xf32>
    %cst_145 = arith.constant dense<0.000000e+00> : vector<1x4xf32>
    %526 = vector.multi_reduction <add>, %525, %cst_145 [2] : vector<1x4x4xf32> to vector<1x4xf32>
    %527 = vector.shape_cast %526 : vector<1x4xf32> to vector<1x4x1xf32>
    %528 = tpu.reciprocal %527 {approx = true} : vector<1x4x1xf32> -> vector<1x4x1xf32>
    %529 = vector.broadcast %528 : vector<1x4x1xf32> to vector<1x4x4xf32>
    %530 = arith.mulf %525, %529 : vector<1x4x4xf32>
    %531 = arith.truncf %530 : vector<1x4x4xf32> to vector<1x4x4xbf16>
    %532 = arith.truncf %515 : vector<1x4x8xf32> to vector<1x4x8xbf16>
    "tpu.trace_start"() <{level = 10 : i32, message = "nqk,nkd->nqd"}> : () -> ()
    %cst_146 = arith.constant dense<0.000000e+00> : vector<1x4x8xf32>
    %533 = tpu.matmul %531, %532, %cst_146 {dimension_numbers = #tpu.dot_dimension_numbers<[2], [1], [1], [2], [0, 0, 0, 1, 1, 2], [0], [0]>} : vector<1x4x4xbf16>, vector<1x4x8xbf16>, vector<1x4x8xf32> -> vector<1x4x8xf32>
    "tpu.trace_stop"() : () -> ()
    %534 = vector.shape_cast %533 : vector<1x4x8xf32> to vector<4x8xf32>
    %535 = vector.extract_strided_slice %453 {offsets = [0, 24], sizes = [4, 8], strides = [1, 1]} : vector<4x96xf32> to vector<4x8xf32>
    %cst_147 = arith.constant 0.353553385 : f32
    %536 = vector.broadcast %cst_147 : f32 to vector<4x8xf32>
    %537 = arith.mulf %535, %536 : vector<4x8xf32>
    %538 = vector.shape_cast %537 : vector<4x8xf32> to vector<1x4x8xf32>
    %539 = vector.extract_strided_slice %453 {offsets = [0, 56], sizes = [4, 8], strides = [1, 1]} : vector<4x96xf32> to vector<4x8xf32>
    %540 = vector.shape_cast %539 : vector<4x8xf32> to vector<1x4x8xf32>
    %541 = vector.extract_strided_slice %453 {offsets = [0, 88], sizes = [4, 8], strides = [1, 1]} : vector<4x96xf32> to vector<4x8xf32>
    %542 = vector.shape_cast %541 : vector<4x8xf32> to vector<1x4x8xf32>
    %543 = arith.truncf %538 : vector<1x4x8xf32> to vector<1x4x8xbf16>
    %544 = arith.truncf %540 : vector<1x4x8xf32> to vector<1x4x8xbf16>
    "tpu.trace_start"() <{level = 10 : i32, message = "nqd,nkd->nqk"}> : () -> ()
    %cst_148 = arith.constant dense<0.000000e+00> : vector<1x4x4xf32>
    %545 = tpu.matmul %543, %544, %cst_148 {dimension_numbers = #tpu.dot_dimension_numbers<[2], [2], [1], [1], [0, 0, 0, 1, 1, 1], [0], [0]>} : vector<1x4x8xbf16>, vector<1x4x8xbf16>, vector<1x4x4xf32> -> vector<1x4x4xf32>
    "tpu.trace_stop"() : () -> ()
    %546 = vector.broadcast %429 : vector<1x1x4xf32> to vector<1x4x4xf32>
    %547 = arith.addf %545, %546 : vector<1x4x4xf32>
    %cst_149 = arith.constant dense<0xFF800000> : vector<1x4xf32>
    %548 = vector.multi_reduction <maximumf>, %547, %cst_149 [2] : vector<1x4x4xf32> to vector<1x4xf32>
    %549 = vector.shape_cast %548 : vector<1x4xf32> to vector<1x4x1xf32>
    %550 = vector.broadcast %549 : vector<1x4x1xf32> to vector<1x4x4xf32>
    %551 = arith.subf %547, %550 : vector<1x4x4xf32>
    %552 = math.exp %551 : vector<1x4x4xf32>
    %cst_150 = arith.constant dense<0.000000e+00> : vector<1x4xf32>
    %553 = vector.multi_reduction <add>, %552, %cst_150 [2] : vector<1x4x4xf32> to vector<1x4xf32>
    %554 = vector.shape_cast %553 : vector<1x4xf32> to vector<1x4x1xf32>
    %555 = tpu.reciprocal %554 {approx = true} : vector<1x4x1xf32> -> vector<1x4x1xf32>
    %556 = vector.broadcast %555 : vector<1x4x1xf32> to vector<1x4x4xf32>
    %557 = arith.mulf %552, %556 : vector<1x4x4xf32>
    %558 = arith.truncf %557 : vector<1x4x4xf32> to vector<1x4x4xbf16>
    %559 = arith.truncf %542 : vector<1x4x8xf32> to vector<1x4x8xbf16>
    "tpu.trace_start"() <{level = 10 : i32, message = "nqk,nkd->nqd"}> : () -> ()
    %cst_151 = arith.constant dense<0.000000e+00> : vector<1x4x8xf32>
    %560 = tpu.matmul %558, %559, %cst_151 {dimension_numbers = #tpu.dot_dimension_numbers<[2], [1], [1], [2], [0, 0, 0, 1, 1, 2], [0], [0]>} : vector<1x4x4xbf16>, vector<1x4x8xbf16>, vector<1x4x8xf32> -> vector<1x4x8xf32>
    "tpu.trace_stop"() : () -> ()
    %561 = vector.shape_cast %560 : vector<1x4x8xf32> to vector<4x8xf32>
    %562 = tpu.concatenate %480, %507, %534, %561 in 1 : vector<4x8xf32>, vector<4x8xf32>, vector<4x8xf32>, vector<4x8xf32> -> vector<4x32xf32>
    %563 = arith.truncf %562 : vector<4x32xf32> to vector<4x32xbf16>
    %cst_152 = arith.constant dense<0.000000e+00> : vector<4x32xf32>
    %564 = tpu.matmul %563, %434, %cst_152 {dimension_numbers = #tpu.dot_dimension_numbers<[1], [0], [0], [1], [0, 0, 1, 1], [], []>} : vector<4x32xbf16>, vector<32x32xbf16>, vector<4x32xf32> -> vector<4x32xf32>
    %565 = vector.broadcast %442 : vector<1x32xf32> to vector<4x32xf32>
    %566 = arith.addf %564, %565 : vector<4x32xf32>
    %567 = arith.addf %449, %566 : vector<4x32xf32>
    %cst_153 = arith.constant dense<0.000000e+00> : vector<4xf32>
    %568 = vector.multi_reduction <add>, %567, %cst_153 [1] : vector<4x32xf32> to vector<4xf32>
    %569 = vector.shape_cast %568 : vector<4xf32> to vector<4x1xf32>
    %cst_154 = arith.constant 3.200000e+01 : f32
    %570 = vector.broadcast %cst_154 : f32 to vector<4x1xf32>
    %571 = arith.divf %569, %570 : vector<4x1xf32>
    %572 = vector.broadcast %571 : vector<4x1xf32> to vector<4x32xf32>
    %573 = arith.subf %567, %572 : vector<4x32xf32>
    %574 = vector.broadcast %571 : vector<4x1xf32> to vector<4x32xf32>
    %575 = arith.subf %567, %574 : vector<4x32xf32>
    %576 = arith.mulf %573, %575 : vector<4x32xf32>
    %cst_155 = arith.constant dense<0.000000e+00> : vector<4xf32>
    %577 = vector.multi_reduction <add>, %576, %cst_155 [1] : vector<4x32xf32> to vector<4xf32>
    %578 = vector.shape_cast %577 : vector<4xf32> to vector<4x1xf32>
    %cst_156 = arith.constant 3.200000e+01 : f32
    %579 = vector.broadcast %cst_156 : f32 to vector<4x1xf32>
    %580 = arith.divf %578, %579 : vector<4x1xf32>
    %581 = vector.broadcast %571 : vector<4x1xf32> to vector<4x32xf32>
    %582 = arith.subf %567, %581 : vector<4x32xf32>
    %cst_157 = arith.constant 9.99999974E-6 : f32
    %583 = vector.broadcast %cst_157 : f32 to vector<4x1xf32>
    %584 = arith.addf %580, %583 : vector<4x1xf32>
    %585 = math.rsqrt %584 : vector<4x1xf32>
    %586 = vector.broadcast %585 : vector<4x1xf32> to vector<4x32xf32>
    %587 = arith.mulf %582, %586 : vector<4x32xf32>
    %588 = vector.broadcast %445 : vector<1x32xf32> to vector<4x32xf32>
    %589 = arith.mulf %587, %588 : vector<4x32xf32>
    %590 = vector.broadcast %446 : vector<1x32xf32> to vector<4x32xf32>
    %591 = arith.addf %589, %590 : vector<4x32xf32>
    %592 = arith.truncf %591 : vector<4x32xf32> to vector<4x32xbf16>
    %cst_158 = arith.constant dense<0.000000e+00> : vector<4x64xf32>
    %593 = tpu.matmul %592, %436, %cst_158 {dimension_numbers = #tpu.dot_dimension_numbers<[1], [0], [0], [1], [0, 0, 1, 1], [], []>} : vector<4x32xbf16>, vector<32x64xbf16>, vector<4x64xf32> -> vector<4x64xf32>
    %594 = vector.broadcast %443 : vector<1x64xf32> to vector<4x64xf32>
    %595 = arith.addf %593, %594 : vector<4x64xf32>
    %cst_159 = arith.constant 0.000000e+00 : f32
    %596 = vector.broadcast %cst_159 : f32 to vector<4x64xf32>
    %597 = arith.maximumf %595, %596 : vector<4x64xf32>
    %598 = arith.truncf %597 : vector<4x64xf32> to vector<4x64xbf16>
    %cst_160 = arith.constant dense<0.000000e+00> : vector<4x32xf32>
    %599 = tpu.matmul %598, %438, %cst_160 {dimension_numbers = #tpu.dot_dimension_numbers<[1], [0], [0], [1], [0, 0, 1, 1], [], []>} : vector<4x64xbf16>, vector<64x32xbf16>, vector<4x32xf32> -> vector<4x32xf32>
    %600 = vector.broadcast %444 : vector<1x32xf32> to vector<4x32xf32>
    %601 = arith.addf %599, %600 : vector<4x32xf32>
    %602 = arith.addf %591, %601 : vector<4x32xf32>
    %cst_161 = arith.constant dense<0.000000e+00> : vector<4xf32>
    %603 = vector.multi_reduction <add>, %602, %cst_161 [1] : vector<4x32xf32> to vector<4xf32>
    %604 = vector.shape_cast %603 : vector<4xf32> to vector<4x1xf32>
    %cst_162 = arith.constant 3.200000e+01 : f32
    %605 = vector.broadcast %cst_162 : f32 to vector<4x1xf32>
    %606 = arith.divf %604, %605 : vector<4x1xf32>
    %607 = vector.broadcast %606 : vector<4x1xf32> to vector<4x32xf32>
    %608 = arith.subf %602, %607 : vector<4x32xf32>
    %609 = vector.broadcast %606 : vector<4x1xf32> to vector<4x32xf32>
    %610 = arith.subf %602, %609 : vector<4x32xf32>
    %611 = arith.mulf %608, %610 : vector<4x32xf32>
    %cst_163 = arith.constant dense<0.000000e+00> : vector<4xf32>
    %612 = vector.multi_reduction <add>, %611, %cst_163 [1] : vector<4x32xf32> to vector<4xf32>
    %613 = vector.shape_cast %612 : vector<4xf32> to vector<4x1xf32>
    %cst_164 = arith.constant 3.200000e+01 : f32
    %614 = vector.broadcast %cst_164 : f32 to vector<4x1xf32>
    %615 = arith.divf %613, %614 : vector<4x1xf32>
    %616 = vector.broadcast %606 : vector<4x1xf32> to vector<4x32xf32>
    %617 = arith.subf %602, %616 : vector<4x32xf32>
    %cst_165 = arith.constant 9.99999974E-6 : f32
    %618 = vector.broadcast %cst_165 : f32 to vector<4x1xf32>
    %619 = arith.addf %615, %618 : vector<4x1xf32>
    %620 = math.rsqrt %619 : vector<4x1xf32>
    %621 = vector.broadcast %620 : vector<4x1xf32> to vector<4x32xf32>
    %622 = arith.mulf %617, %621 : vector<4x32xf32>
    %623 = vector.broadcast %447 : vector<1x32xf32> to vector<4x32xf32>
    %624 = arith.mulf %622, %623 : vector<4x32xf32>
    %625 = vector.broadcast %448 : vector<1x32xf32> to vector<4x32xf32>
    %626 = arith.addf %624, %625 : vector<4x32xf32>
    %627 = vector.shape_cast %626 : vector<4x32xf32> to vector<1x4x32xf32>
    %c1_166 = arith.constant 1 : index
    %c0_167 = arith.constant 0 : index
    %c0_168 = arith.constant 0 : index
    %628 = vector.load %arg10[%c1_166, %c0_167, %c0_168] : memref<2x32x96xbf16, #tpu.memory_space<vmem>>, vector<1x32x96xbf16>
    %629 = vector.shape_cast %628 : vector<1x32x96xbf16> to vector<32x96xbf16>
    %c1_169 = arith.constant 1 : index
    %c0_170 = arith.constant 0 : index
    %c0_171 = arith.constant 0 : index
    %630 = vector.load %arg11[%c1_169, %c0_170, %c0_171] : memref<2x32x32xbf16, #tpu.memory_space<vmem>>, vector<1x32x32xbf16>
    %631 = vector.shape_cast %630 : vector<1x32x32xbf16> to vector<32x32xbf16>
    %c1_172 = arith.constant 1 : index
    %c0_173 = arith.constant 0 : index
    %c0_174 = arith.constant 0 : index
    %632 = vector.load %arg12[%c1_172, %c0_173, %c0_174] : memref<2x32x64xbf16, #tpu.memory_space<vmem>>, vector<1x32x64xbf16>
    %633 = vector.shape_cast %632 : vector<1x32x64xbf16> to vector<32x64xbf16>
    %c1_175 = arith.constant 1 : index
    %c0_176 = arith.constant 0 : index
    %c0_177 = arith.constant 0 : index
    %634 = vector.load %arg13[%c1_175, %c0_176, %c0_177] : memref<2x64x32xbf16, #tpu.memory_space<vmem>>, vector<1x64x32xbf16>
    %635 = vector.shape_cast %634 : vector<1x64x32xbf16> to vector<64x32xbf16>
    %c1_178 = arith.constant 1 : index
    %c0_179 = arith.constant 0 : index
    %c0_180 = arith.constant 0 : index
    %636 = vector.load %arg14[%c1_178, %c0_179, %c0_180] : memref<2x8x96xf32, #tpu.memory_space<vmem>>, vector<1x8x96xf32>
    %637 = vector.shape_cast %636 : vector<1x8x96xf32> to vector<8x96xf32>
    %638 = vector.extract_strided_slice %637 {offsets = [0, 0], sizes = [1, 96], strides = [1, 1]} : vector<8x96xf32> to vector<1x96xf32>
    %639 = vector.extract_strided_slice %637 {offsets = [1, 0], sizes = [1, 32], strides = [1, 1]} : vector<8x96xf32> to vector<1x32xf32>
    %640 = vector.extract_strided_slice %637 {offsets = [2, 0], sizes = [1, 64], strides = [1, 1]} : vector<8x96xf32> to vector<1x64xf32>
    %641 = vector.extract_strided_slice %637 {offsets = [3, 0], sizes = [1, 32], strides = [1, 1]} : vector<8x96xf32> to vector<1x32xf32>
    %642 = vector.extract_strided_slice %637 {offsets = [4, 0], sizes = [1, 32], strides = [1, 1]} : vector<8x96xf32> to vector<1x32xf32>
    %643 = vector.extract_strided_slice %637 {offsets = [5, 0], sizes = [1, 32], strides = [1, 1]} : vector<8x96xf32> to vector<1x32xf32>
    %644 = vector.extract_strided_slice %637 {offsets = [6, 0], sizes = [1, 32], strides = [1, 1]} : vector<8x96xf32> to vector<1x32xf32>
    %645 = vector.extract_strided_slice %637 {offsets = [7, 0], sizes = [1, 32], strides = [1, 1]} : vector<8x96xf32> to vector<1x32xf32>
    %646 = vector.shape_cast %627 : vector<1x4x32xf32> to vector<4x32xf32>
    %647 = arith.truncf %646 : vector<4x32xf32> to vector<4x32xbf16>
    %cst_181 = arith.constant dense<0.000000e+00> : vector<4x96xf32>
    %648 = tpu.matmul %647, %629, %cst_181 {dimension_numbers = #tpu.dot_dimension_numbers<[1], [0], [0], [1], [0, 0, 1, 1], [], []>} : vector<4x32xbf16>, vector<32x96xbf16>, vector<4x96xf32> -> vector<4x96xf32>
    %649 = vector.broadcast %638 : vector<1x96xf32> to vector<4x96xf32>
    %650 = arith.addf %648, %649 : vector<4x96xf32>
    %651 = vector.extract_strided_slice %650 {offsets = [0, 0], sizes = [4, 8], strides = [1, 1]} : vector<4x96xf32> to vector<4x8xf32>
    %cst_182 = arith.constant 0.353553385 : f32
    %652 = vector.broadcast %cst_182 : f32 to vector<4x8xf32>
    %653 = arith.mulf %651, %652 : vector<4x8xf32>
    %654 = vector.shape_cast %653 : vector<4x8xf32> to vector<1x4x8xf32>
    %655 = vector.extract_strided_slice %650 {offsets = [0, 32], sizes = [4, 8], strides = [1, 1]} : vector<4x96xf32> to vector<4x8xf32>
    %656 = vector.shape_cast %655 : vector<4x8xf32> to vector<1x4x8xf32>
    %657 = vector.extract_strided_slice %650 {offsets = [0, 64], sizes = [4, 8], strides = [1, 1]} : vector<4x96xf32> to vector<4x8xf32>
    %658 = vector.shape_cast %657 : vector<4x8xf32> to vector<1x4x8xf32>
    %659 = arith.truncf %654 : vector<1x4x8xf32> to vector<1x4x8xbf16>
    %660 = arith.truncf %656 : vector<1x4x8xf32> to vector<1x4x8xbf16>
    "tpu.trace_start"() <{level = 10 : i32, message = "nqd,nkd->nqk"}> : () -> ()
    %cst_183 = arith.constant dense<0.000000e+00> : vector<1x4x4xf32>
    %661 = tpu.matmul %659, %660, %cst_183 {dimension_numbers = #tpu.dot_dimension_numbers<[2], [2], [1], [1], [0, 0, 0, 1, 1, 1], [0], [0]>} : vector<1x4x8xbf16>, vector<1x4x8xbf16>, vector<1x4x4xf32> -> vector<1x4x4xf32>
    "tpu.trace_stop"() : () -> ()
    %662 = vector.broadcast %429 : vector<1x1x4xf32> to vector<1x4x4xf32>
    %663 = arith.addf %661, %662 : vector<1x4x4xf32>
    %cst_184 = arith.constant dense<0xFF800000> : vector<1x4xf32>
    %664 = vector.multi_reduction <maximumf>, %663, %cst_184 [2] : vector<1x4x4xf32> to vector<1x4xf32>
    %665 = vector.shape_cast %664 : vector<1x4xf32> to vector<1x4x1xf32>
    %666 = vector.broadcast %665 : vector<1x4x1xf32> to vector<1x4x4xf32>
    %667 = arith.subf %663, %666 : vector<1x4x4xf32>
    %668 = math.exp %667 : vector<1x4x4xf32>
    %cst_185 = arith.constant dense<0.000000e+00> : vector<1x4xf32>
    %669 = vector.multi_reduction <add>, %668, %cst_185 [2] : vector<1x4x4xf32> to vector<1x4xf32>
    %670 = vector.shape_cast %669 : vector<1x4xf32> to vector<1x4x1xf32>
    %671 = tpu.reciprocal %670 {approx = true} : vector<1x4x1xf32> -> vector<1x4x1xf32>
    %672 = vector.broadcast %671 : vector<1x4x1xf32> to vector<1x4x4xf32>
    %673 = arith.mulf %668, %672 : vector<1x4x4xf32>
    %674 = arith.truncf %673 : vector<1x4x4xf32> to vector<1x4x4xbf16>
    %675 = arith.truncf %658 : vector<1x4x8xf32> to vector<1x4x8xbf16>
    "tpu.trace_start"() <{level = 10 : i32, message = "nqk,nkd->nqd"}> : () -> ()
    %cst_186 = arith.constant dense<0.000000e+00> : vector<1x4x8xf32>
    %676 = tpu.matmul %674, %675, %cst_186 {dimension_numbers = #tpu.dot_dimension_numbers<[2], [1], [1], [2], [0, 0, 0, 1, 1, 2], [0], [0]>} : vector<1x4x4xbf16>, vector<1x4x8xbf16>, vector<1x4x8xf32> -> vector<1x4x8xf32>
    "tpu.trace_stop"() : () -> ()
    %677 = vector.shape_cast %676 : vector<1x4x8xf32> to vector<4x8xf32>
    %678 = vector.extract_strided_slice %650 {offsets = [0, 8], sizes = [4, 8], strides = [1, 1]} : vector<4x96xf32> to vector<4x8xf32>
    %cst_187 = arith.constant 0.353553385 : f32
    %679 = vector.broadcast %cst_187 : f32 to vector<4x8xf32>
    %680 = arith.mulf %678, %679 : vector<4x8xf32>
    %681 = vector.shape_cast %680 : vector<4x8xf32> to vector<1x4x8xf32>
    %682 = vector.extract_strided_slice %650 {offsets = [0, 40], sizes = [4, 8], strides = [1, 1]} : vector<4x96xf32> to vector<4x8xf32>
    %683 = vector.shape_cast %682 : vector<4x8xf32> to vector<1x4x8xf32>
    %684 = vector.extract_strided_slice %650 {offsets = [0, 72], sizes = [4, 8], strides = [1, 1]} : vector<4x96xf32> to vector<4x8xf32>
    %685 = vector.shape_cast %684 : vector<4x8xf32> to vector<1x4x8xf32>
    %686 = arith.truncf %681 : vector<1x4x8xf32> to vector<1x4x8xbf16>
    %687 = arith.truncf %683 : vector<1x4x8xf32> to vector<1x4x8xbf16>
    "tpu.trace_start"() <{level = 10 : i32, message = "nqd,nkd->nqk"}> : () -> ()
    %cst_188 = arith.constant dense<0.000000e+00> : vector<1x4x4xf32>
    %688 = tpu.matmul %686, %687, %cst_188 {dimension_numbers = #tpu.dot_dimension_numbers<[2], [2], [1], [1], [0, 0, 0, 1, 1, 1], [0], [0]>} : vector<1x4x8xbf16>, vector<1x4x8xbf16>, vector<1x4x4xf32> -> vector<1x4x4xf32>
    "tpu.trace_stop"() : () -> ()
    %689 = vector.broadcast %429 : vector<1x1x4xf32> to vector<1x4x4xf32>
    %690 = arith.addf %688, %689 : vector<1x4x4xf32>
    %cst_189 = arith.constant dense<0xFF800000> : vector<1x4xf32>
    %691 = vector.multi_reduction <maximumf>, %690, %cst_189 [2] : vector<1x4x4xf32> to vector<1x4xf32>
    %692 = vector.shape_cast %691 : vector<1x4xf32> to vector<1x4x1xf32>
    %693 = vector.broadcast %692 : vector<1x4x1xf32> to vector<1x4x4xf32>
    %694 = arith.subf %690, %693 : vector<1x4x4xf32>
    %695 = math.exp %694 : vector<1x4x4xf32>
    %cst_190 = arith.constant dense<0.000000e+00> : vector<1x4xf32>
    %696 = vector.multi_reduction <add>, %695, %cst_190 [2] : vector<1x4x4xf32> to vector<1x4xf32>
    %697 = vector.shape_cast %696 : vector<1x4xf32> to vector<1x4x1xf32>
    %698 = tpu.reciprocal %697 {approx = true} : vector<1x4x1xf32> -> vector<1x4x1xf32>
    %699 = vector.broadcast %698 : vector<1x4x1xf32> to vector<1x4x4xf32>
    %700 = arith.mulf %695, %699 : vector<1x4x4xf32>
    %701 = arith.truncf %700 : vector<1x4x4xf32> to vector<1x4x4xbf16>
    %702 = arith.truncf %685 : vector<1x4x8xf32> to vector<1x4x8xbf16>
    "tpu.trace_start"() <{level = 10 : i32, message = "nqk,nkd->nqd"}> : () -> ()
    %cst_191 = arith.constant dense<0.000000e+00> : vector<1x4x8xf32>
    %703 = tpu.matmul %701, %702, %cst_191 {dimension_numbers = #tpu.dot_dimension_numbers<[2], [1], [1], [2], [0, 0, 0, 1, 1, 2], [0], [0]>} : vector<1x4x4xbf16>, vector<1x4x8xbf16>, vector<1x4x8xf32> -> vector<1x4x8xf32>
    "tpu.trace_stop"() : () -> ()
    %704 = vector.shape_cast %703 : vector<1x4x8xf32> to vector<4x8xf32>
    %705 = vector.extract_strided_slice %650 {offsets = [0, 16], sizes = [4, 8], strides = [1, 1]} : vector<4x96xf32> to vector<4x8xf32>
    %cst_192 = arith.constant 0.353553385 : f32
    %706 = vector.broadcast %cst_192 : f32 to vector<4x8xf32>
    %707 = arith.mulf %705, %706 : vector<4x8xf32>
    %708 = vector.shape_cast %707 : vector<4x8xf32> to vector<1x4x8xf32>
    %709 = vector.extract_strided_slice %650 {offsets = [0, 48], sizes = [4, 8], strides = [1, 1]} : vector<4x96xf32> to vector<4x8xf32>
    %710 = vector.shape_cast %709 : vector<4x8xf32> to vector<1x4x8xf32>
    %711 = vector.extract_strided_slice %650 {offsets = [0, 80], sizes = [4, 8], strides = [1, 1]} : vector<4x96xf32> to vector<4x8xf32>
    %712 = vector.shape_cast %711 : vector<4x8xf32> to vector<1x4x8xf32>
    %713 = arith.truncf %708 : vector<1x4x8xf32> to vector<1x4x8xbf16>
    %714 = arith.truncf %710 : vector<1x4x8xf32> to vector<1x4x8xbf16>
    "tpu.trace_start"() <{level = 10 : i32, message = "nqd,nkd->nqk"}> : () -> ()
    %cst_193 = arith.constant dense<0.000000e+00> : vector<1x4x4xf32>
    %715 = tpu.matmul %713, %714, %cst_193 {dimension_numbers = #tpu.dot_dimension_numbers<[2], [2], [1], [1], [0, 0, 0, 1, 1, 1], [0], [0]>} : vector<1x4x8xbf16>, vector<1x4x8xbf16>, vector<1x4x4xf32> -> vector<1x4x4xf32>
    "tpu.trace_stop"() : () -> ()
    %716 = vector.broadcast %429 : vector<1x1x4xf32> to vector<1x4x4xf32>
    %717 = arith.addf %715, %716 : vector<1x4x4xf32>
    %cst_194 = arith.constant dense<0xFF800000> : vector<1x4xf32>
    %718 = vector.multi_reduction <maximumf>, %717, %cst_194 [2] : vector<1x4x4xf32> to vector<1x4xf32>
    %719 = vector.shape_cast %718 : vector<1x4xf32> to vector<1x4x1xf32>
    %720 = vector.broadcast %719 : vector<1x4x1xf32> to vector<1x4x4xf32>
    %721 = arith.subf %717, %720 : vector<1x4x4xf32>
    %722 = math.exp %721 : vector<1x4x4xf32>
    %cst_195 = arith.constant dense<0.000000e+00> : vector<1x4xf32>
    %723 = vector.multi_reduction <add>, %722, %cst_195 [2] : vector<1x4x4xf32> to vector<1x4xf32>
    %724 = vector.shape_cast %723 : vector<1x4xf32> to vector<1x4x1xf32>
    %725 = tpu.reciprocal %724 {approx = true} : vector<1x4x1xf32> -> vector<1x4x1xf32>
    %726 = vector.broadcast %725 : vector<1x4x1xf32> to vector<1x4x4xf32>
    %727 = arith.mulf %722, %726 : vector<1x4x4xf32>
    %728 = arith.truncf %727 : vector<1x4x4xf32> to vector<1x4x4xbf16>
    %729 = arith.truncf %712 : vector<1x4x8xf32> to vector<1x4x8xbf16>
    "tpu.trace_start"() <{level = 10 : i32, message = "nqk,nkd->nqd"}> : () -> ()
    %cst_196 = arith.constant dense<0.000000e+00> : vector<1x4x8xf32>
    %730 = tpu.matmul %728, %729, %cst_196 {dimension_numbers = #tpu.dot_dimension_numbers<[2], [1], [1], [2], [0, 0, 0, 1, 1, 2], [0], [0]>} : vector<1x4x4xbf16>, vector<1x4x8xbf16>, vector<1x4x8xf32> -> vector<1x4x8xf32>
    "tpu.trace_stop"() : () -> ()
    %731 = vector.shape_cast %730 : vector<1x4x8xf32> to vector<4x8xf32>
    %732 = vector.extract_strided_slice %650 {offsets = [0, 24], sizes = [4, 8], strides = [1, 1]} : vector<4x96xf32> to vector<4x8xf32>
    %cst_197 = arith.constant 0.353553385 : f32
    %733 = vector.broadcast %cst_197 : f32 to vector<4x8xf32>
    %734 = arith.mulf %732, %733 : vector<4x8xf32>
    %735 = vector.shape_cast %734 : vector<4x8xf32> to vector<1x4x8xf32>
    %736 = vector.extract_strided_slice %650 {offsets = [0, 56], sizes = [4, 8], strides = [1, 1]} : vector<4x96xf32> to vector<4x8xf32>
    %737 = vector.shape_cast %736 : vector<4x8xf32> to vector<1x4x8xf32>
    %738 = vector.extract_strided_slice %650 {offsets = [0, 88], sizes = [4, 8], strides = [1, 1]} : vector<4x96xf32> to vector<4x8xf32>
    %739 = vector.shape_cast %738 : vector<4x8xf32> to vector<1x4x8xf32>
    %740 = arith.truncf %735 : vector<1x4x8xf32> to vector<1x4x8xbf16>
    %741 = arith.truncf %737 : vector<1x4x8xf32> to vector<1x4x8xbf16>
    "tpu.trace_start"() <{level = 10 : i32, message = "nqd,nkd->nqk"}> : () -> ()
    %cst_198 = arith.constant dense<0.000000e+00> : vector<1x4x4xf32>
    %742 = tpu.matmul %740, %741, %cst_198 {dimension_numbers = #tpu.dot_dimension_numbers<[2], [2], [1], [1], [0, 0, 0, 1, 1, 1], [0], [0]>} : vector<1x4x8xbf16>, vector<1x4x8xbf16>, vector<1x4x4xf32> -> vector<1x4x4xf32>
    "tpu.trace_stop"() : () -> ()
    %743 = vector.broadcast %429 : vector<1x1x4xf32> to vector<1x4x4xf32>
    %744 = arith.addf %742, %743 : vector<1x4x4xf32>
    %cst_199 = arith.constant dense<0xFF800000> : vector<1x4xf32>
    %745 = vector.multi_reduction <maximumf>, %744, %cst_199 [2] : vector<1x4x4xf32> to vector<1x4xf32>
    %746 = vector.shape_cast %745 : vector<1x4xf32> to vector<1x4x1xf32>
    %747 = vector.broadcast %746 : vector<1x4x1xf32> to vector<1x4x4xf32>
    %748 = arith.subf %744, %747 : vector<1x4x4xf32>
    %749 = math.exp %748 : vector<1x4x4xf32>
    %cst_200 = arith.constant dense<0.000000e+00> : vector<1x4xf32>
    %750 = vector.multi_reduction <add>, %749, %cst_200 [2] : vector<1x4x4xf32> to vector<1x4xf32>
    %751 = vector.shape_cast %750 : vector<1x4xf32> to vector<1x4x1xf32>
    %752 = tpu.reciprocal %751 {approx = true} : vector<1x4x1xf32> -> vector<1x4x1xf32>
    %753 = vector.broadcast %752 : vector<1x4x1xf32> to vector<1x4x4xf32>
    %754 = arith.mulf %749, %753 : vector<1x4x4xf32>
    %755 = arith.truncf %754 : vector<1x4x4xf32> to vector<1x4x4xbf16>
    %756 = arith.truncf %739 : vector<1x4x8xf32> to vector<1x4x8xbf16>
    "tpu.trace_start"() <{level = 10 : i32, message = "nqk,nkd->nqd"}> : () -> ()
    %cst_201 = arith.constant dense<0.000000e+00> : vector<1x4x8xf32>
    %757 = tpu.matmul %755, %756, %cst_201 {dimension_numbers = #tpu.dot_dimension_numbers<[2], [1], [1], [2], [0, 0, 0, 1, 1, 2], [0], [0]>} : vector<1x4x4xbf16>, vector<1x4x8xbf16>, vector<1x4x8xf32> -> vector<1x4x8xf32>
    "tpu.trace_stop"() : () -> ()
    %758 = vector.shape_cast %757 : vector<1x4x8xf32> to vector<4x8xf32>
    %759 = tpu.concatenate %677, %704, %731, %758 in 1 : vector<4x8xf32>, vector<4x8xf32>, vector<4x8xf32>, vector<4x8xf32> -> vector<4x32xf32>
    %760 = arith.truncf %759 : vector<4x32xf32> to vector<4x32xbf16>
    %cst_202 = arith.constant dense<0.000000e+00> : vector<4x32xf32>
    %761 = tpu.matmul %760, %631, %cst_202 {dimension_numbers = #tpu.dot_dimension_numbers<[1], [0], [0], [1], [0, 0, 1, 1], [], []>} : vector<4x32xbf16>, vector<32x32xbf16>, vector<4x32xf32> -> vector<4x32xf32>
    %762 = vector.broadcast %639 : vector<1x32xf32> to vector<4x32xf32>
    %763 = arith.addf %761, %762 : vector<4x32xf32>
    %764 = arith.addf %646, %763 : vector<4x32xf32>
    %cst_203 = arith.constant dense<0.000000e+00> : vector<4xf32>
    %765 = vector.multi_reduction <add>, %764, %cst_203 [1] : vector<4x32xf32> to vector<4xf32>
    %766 = vector.shape_cast %765 : vector<4xf32> to vector<4x1xf32>
    %cst_204 = arith.constant 3.200000e+01 : f32
    %767 = vector.broadcast %cst_204 : f32 to vector<4x1xf32>
    %768 = arith.divf %766, %767 : vector<4x1xf32>
    %769 = vector.broadcast %768 : vector<4x1xf32> to vector<4x32xf32>
    %770 = arith.subf %764, %769 : vector<4x32xf32>
    %771 = vector.broadcast %768 : vector<4x1xf32> to vector<4x32xf32>
    %772 = arith.subf %764, %771 : vector<4x32xf32>
    %773 = arith.mulf %770, %772 : vector<4x32xf32>
    %cst_205 = arith.constant dense<0.000000e+00> : vector<4xf32>
    %774 = vector.multi_reduction <add>, %773, %cst_205 [1] : vector<4x32xf32> to vector<4xf32>
    %775 = vector.shape_cast %774 : vector<4xf32> to vector<4x1xf32>
    %cst_206 = arith.constant 3.200000e+01 : f32
    %776 = vector.broadcast %cst_206 : f32 to vector<4x1xf32>
    %777 = arith.divf %775, %776 : vector<4x1xf32>
    %778 = vector.broadcast %768 : vector<4x1xf32> to vector<4x32xf32>
    %779 = arith.subf %764, %778 : vector<4x32xf32>
    %cst_207 = arith.constant 9.99999974E-6 : f32
    %780 = vector.broadcast %cst_207 : f32 to vector<4x1xf32>
    %781 = arith.addf %777, %780 : vector<4x1xf32>
    %782 = math.rsqrt %781 : vector<4x1xf32>
    %783 = vector.broadcast %782 : vector<4x1xf32> to vector<4x32xf32>
    %784 = arith.mulf %779, %783 : vector<4x32xf32>
    %785 = vector.broadcast %642 : vector<1x32xf32> to vector<4x32xf32>
    %786 = arith.mulf %784, %785 : vector<4x32xf32>
    %787 = vector.broadcast %643 : vector<1x32xf32> to vector<4x32xf32>
    %788 = arith.addf %786, %787 : vector<4x32xf32>
    %789 = arith.truncf %788 : vector<4x32xf32> to vector<4x32xbf16>
    %cst_208 = arith.constant dense<0.000000e+00> : vector<4x64xf32>
    %790 = tpu.matmul %789, %633, %cst_208 {dimension_numbers = #tpu.dot_dimension_numbers<[1], [0], [0], [1], [0, 0, 1, 1], [], []>} : vector<4x32xbf16>, vector<32x64xbf16>, vector<4x64xf32> -> vector<4x64xf32>
    %791 = vector.broadcast %640 : vector<1x64xf32> to vector<4x64xf32>
    %792 = arith.addf %790, %791 : vector<4x64xf32>
    %cst_209 = arith.constant 0.000000e+00 : f32
    %793 = vector.broadcast %cst_209 : f32 to vector<4x64xf32>
    %794 = arith.maximumf %792, %793 : vector<4x64xf32>
    %795 = arith.truncf %794 : vector<4x64xf32> to vector<4x64xbf16>
    %cst_210 = arith.constant dense<0.000000e+00> : vector<4x32xf32>
    %796 = tpu.matmul %795, %635, %cst_210 {dimension_numbers = #tpu.dot_dimension_numbers<[1], [0], [0], [1], [0, 0, 1, 1], [], []>} : vector<4x64xbf16>, vector<64x32xbf16>, vector<4x32xf32> -> vector<4x32xf32>
    %797 = vector.broadcast %641 : vector<1x32xf32> to vector<4x32xf32>
    %798 = arith.addf %796, %797 : vector<4x32xf32>
    %799 = arith.addf %788, %798 : vector<4x32xf32>
    %cst_211 = arith.constant dense<0.000000e+00> : vector<4xf32>
    %800 = vector.multi_reduction <add>, %799, %cst_211 [1] : vector<4x32xf32> to vector<4xf32>
    %801 = vector.shape_cast %800 : vector<4xf32> to vector<4x1xf32>
    %cst_212 = arith.constant 3.200000e+01 : f32
    %802 = vector.broadcast %cst_212 : f32 to vector<4x1xf32>
    %803 = arith.divf %801, %802 : vector<4x1xf32>
    %804 = vector.broadcast %803 : vector<4x1xf32> to vector<4x32xf32>
    %805 = arith.subf %799, %804 : vector<4x32xf32>
    %806 = vector.broadcast %803 : vector<4x1xf32> to vector<4x32xf32>
    %807 = arith.subf %799, %806 : vector<4x32xf32>
    %808 = arith.mulf %805, %807 : vector<4x32xf32>
    %cst_213 = arith.constant dense<0.000000e+00> : vector<4xf32>
    %809 = vector.multi_reduction <add>, %808, %cst_213 [1] : vector<4x32xf32> to vector<4xf32>
    %810 = vector.shape_cast %809 : vector<4xf32> to vector<4x1xf32>
    %cst_214 = arith.constant 3.200000e+01 : f32
    %811 = vector.broadcast %cst_214 : f32 to vector<4x1xf32>
    %812 = arith.divf %810, %811 : vector<4x1xf32>
    %813 = vector.broadcast %803 : vector<4x1xf32> to vector<4x32xf32>
    %814 = arith.subf %799, %813 : vector<4x32xf32>
    %cst_215 = arith.constant 9.99999974E-6 : f32
    %815 = vector.broadcast %cst_215 : f32 to vector<4x1xf32>
    %816 = arith.addf %812, %815 : vector<4x1xf32>
    %817 = math.rsqrt %816 : vector<4x1xf32>
    %818 = vector.broadcast %817 : vector<4x1xf32> to vector<4x32xf32>
    %819 = arith.mulf %814, %818 : vector<4x32xf32>
    %820 = vector.broadcast %644 : vector<1x32xf32> to vector<4x32xf32>
    %821 = arith.mulf %819, %820 : vector<4x32xf32>
    %822 = vector.broadcast %645 : vector<1x32xf32> to vector<4x32xf32>
    %823 = arith.addf %821, %822 : vector<4x32xf32>
    %824 = vector.shape_cast %823 : vector<4x32xf32> to vector<1x4x32xf32>
    %cst_216 = arith.constant dense<0.000000e+00> : vector<1xf32>
    %825 = vector.multi_reduction <add>, %5, %cst_216 [1] : vector<1x4xf32> to vector<1xf32>
    %826 = vector.shape_cast %825 : vector<1xf32> to vector<1x1xf32>
    %cst_217 = arith.constant 1.000000e+00 : f32
    %827 = vector.broadcast %cst_217 : f32 to vector<1x1xf32>
    %828 = arith.maximumf %826, %827 : vector<1x1xf32>
    %829 = vector.shape_cast %824 : vector<1x4x32xf32> to vector<4x32xf32>
    %cst_218 = arith.constant dense<0.000000e+00> : vector<1x32xf32>
    %830 = tpu.matmul %5, %829, %cst_218 {dimension_numbers = #tpu.dot_dimension_numbers<[1], [0], [0], [1], [0, 0, 1, 1], [], []>} : vector<1x4xf32>, vector<4x32xf32>, vector<1x32xf32> -> vector<1x32xf32>
    %831 = vector.broadcast %828 : vector<1x1xf32> to vector<1x32xf32>
    %832 = arith.divf %830, %831 : vector<1x32xf32>
    %c0_219 = arith.constant 0 : index
    %c0_220 = arith.constant 0 : index
    %c0_221 = arith.constant 0 : index
    %833 = vector.load %arg15[%c0_219, %c0_220, %c0_221] : memref<1x1x32xf32, #tpu.memory_space<vmem>>, vector<1x1x32xf32>
    %834 = vector.shape_cast %833 : vector<1x1x32xf32> to vector<1x32xf32>
    %835 = vector.shape_cast %832 : vector<1x32xf32> to vector<1x1x32xf32>
    tpu.vector_store %arg15[%c0_219, %c0_220, %c0_221], %835 {strides = array<i32>} : memref<1x1x32xf32, #tpu.memory_space<vmem>>, vector<1x1x32xf32>,
    return
  }
  func.func @transform_0(%arg0: i32) -> (i32, i32, i32) {
    %c0_i32 = arith.constant 0 : i32
    %c0_i32_0 = arith.constant 0 : i32
    %c0_i32_1 = arith.constant 0 : i32
    return %arg0, %c0_i32, %c0_i32_0 : i32, i32, i32
  }
  func.func @transform_1(%arg0: i32) -> (i32, i32) {
    %c0_i32 = arith.constant 0 : i32
    %c0_i32_0 = arith.constant 0 : i32
    %c0_i32_1 = arith.constant 0 : i32
    return %c0_i32, %c0_i32_0 : i32, i32
  }
  func.func @transform_2(%arg0: i32) -> (i32, i32, i32) {
    %c0_i32 = arith.constant 0 : i32
    %c0_i32_0 = arith.constant 0 : i32
    %c0_i32_1 = arith.constant 0 : i32
    return %arg0, %c0_i32, %c0_i32_0 : i32, i32, i32
  }
  func.func @transform_3(%arg0: i32) -> (i32, i32, i32) {
    %c0_i32 = arith.constant 0 : i32
    %c0_i32_0 = arith.constant 0 : i32
    %c0_i32_1 = arith.constant 0 : i32
    return %arg0, %c0_i32, %c0_i32_0 : i32, i32, i32
  }
  func.func @transform_4(%arg0: i32) -> (i32, i32, i32) {
    %c0_i32 = arith.constant 0 : i32
    %c0_i32_0 = arith.constant 0 : i32
    %c0_i32_1 = arith.constant 0 : i32
    %c0_i32_2 = arith.constant 0 : i32
    return %c0_i32, %c0_i32_0, %c0_i32_1 : i32, i32, i32
  }
  func.func @transform_5(%arg0: i32) -> (i32, i32, i32) {
    %c0_i32 = arith.constant 0 : i32
    %c0_i32_0 = arith.constant 0 : i32
    %c0_i32_1 = arith.constant 0 : i32
    %c0_i32_2 = arith.constant 0 : i32
    return %c0_i32, %c0_i32_0, %c0_i32_1 : i32, i32, i32
  }
  func.func @transform_6(%arg0: i32) -> (i32, i32, i32) {
    %c0_i32 = arith.constant 0 : i32
    %c0_i32_0 = arith.constant 0 : i32
    %c0_i32_1 = arith.constant 0 : i32
    %c0_i32_2 = arith.constant 0 : i32
    return %c0_i32, %c0_i32_0, %c0_i32_1 : i32, i32, i32
  }
  func.func @transform_7(%arg0: i32) -> (i32, i32, i32) {
    %c0_i32 = arith.constant 0 : i32
    %c0_i32_0 = arith.constant 0 : i32
    %c0_i32_1 = arith.constant 0 : i32
    %c0_i32_2 = arith.constant 0 : i32
    return %c0_i32, %c0_i32_0, %c0_i32_1 : i32, i32, i32
  }
  func.func @transform_8(%arg0: i32) -> (i32, i32, i32) {
    %c0_i32 = arith.constant 0 : i32
    %c0_i32_0 = arith.constant 0 : i32
    %c0_i32_1 = arith.constant 0 : i32
    %c0_i32_2 = arith.constant 0 : i32
    return %c0_i32, %c0_i32_0, %c0_i32_1 : i32, i32, i32
  }
  func.func @transform_9(%arg0: i32) -> (i32, i32, i32) {
    %c0_i32 = arith.constant 0 : i32
    %c0_i32_0 = arith.constant 0 : i32
    %c0_i32_1 = arith.constant 0 : i32
    %c0_i32_2 = arith.constant 0 : i32
    return %c0_i32, %c0_i32_0, %c0_i32_1 : i32, i32, i32
  }
  func.func @transform_10(%arg0: i32) -> (i32, i32, i32) {
    %c0_i32 = arith.constant 0 : i32
    %c0_i32_0 = arith.constant 0 : i32
    %c0_i32_1 = arith.constant 0 : i32
    %c0_i32_2 = arith.constant 0 : i32
    return %c0_i32, %c0_i32_0, %c0_i32_1 : i32, i32, i32
  }
  func.func @transform_11(%arg0: i32) -> (i32, i32, i32) {
    %c0_i32 = arith.constant 0 : i32
    %c0_i32_0 = arith.constant 0 : i32
    %c0_i32_1 = arith.constant 0 : i32
    %c0_i32_2 = arith.constant 0 : i32
    return %c0_i32, %c0_i32_0, %c0_i32_1 : i32, i32, i32
  }
  func.func @transform_12(%arg0: i32) -> (i32, i32, i32) {
    %c0_i32 = arith.constant 0 : i32
    %c0_i32_0 = arith.constant 0 : i32
    %c0_i32_1 = arith.constant 0 : i32
    %c0_i32_2 = arith.constant 0 : i32
    return %c0_i32, %c0_i32_0, %c0_i32_1 : i32, i32, i32
  }
  func.func @transform_13(%arg0: i32) -> (i32, i32, i32) {
    %c0_i32 = arith.constant 0 : i32
    %c0_i32_0 = arith.constant 0 : i32
    %c0_i32_1 = arith.constant 0 : i32
    %c0_i32_2 = arith.constant 0 : i32
    return %c0_i32, %c0_i32_0, %c0_i32_1 : i32, i32, i32
  }
  func.func @transform_14(%arg0: i32) -> (i32, i32, i32) {
    %c0_i32 = arith.constant 0 : i32
    %c0_i32_0 = arith.constant 0 : i32
    %c0_i32_1 = arith.constant 0 : i32
    return %arg0, %c0_i32, %c0_i32_0 : i32, i32, i32
  }
}

</mosaic_0001>

<bundles_post_ra>
// kernel: temporal_encoder_forward.1
= control target key start
LH: loop header
LB: loop body
LE: loop exit
PB: predicated region body
PF: predicated region fallthrough
CT: control target
= control target key end

     0   :  { %s11073_s0 = inlined_call_operand.hbm [shape: s32[2,4,8], index: 0, kind: input, shape index: {}]   ;;  %s11074_s1 = inlined_call_operand.hbm [shape: f32[9,32], index: 1, kind: input, shape index: {}]   ;;  %s11075_s2 = inlined_call_operand.vmem [shape: f32[2,4,8], index: 2, kind: input, shape index: {}]   ;;  %s11076_s3 = inlined_call_operand.hbm [shape: f32[2,1,4], index: 3, kind: input, shape index: {}]   ;;  %s11077_s4 = inlined_call_operand.vmem [shape: bf16[2,32,96], index: 4, kind: input, shape index: {}]   ;;  %s11078_s5 = inlined_call_operand.vmem [shape: bf16[2,32,32], index: 5, kind: input, shape index: {}]   ;;  %s11079_s6 = inlined_call_operand.vmem [shape: bf16[2,32,64], index: 6, kind: input, shape index: {}]   ;;  %s11080_s7 = inlined_call_operand.vmem [shape: bf16[2,64,32], index: 7, kind: input, shape index: {}]   ;;  %s11081_s8 = inlined_call_operand.hbm [shape: f32[2,8,96], index: 8, kind: input, shape index: {}]   ;;  %s11082_s9 = inlined_call_operand.vmem [shape: bf16[2,32,96], index: 9, kind: input, shape index: {}]   ;;  %s11083_s10 = inlined_call_operand.vmem [shape: bf16[2,32,32], index: 10, kind: input, shape index: {}]   ;;  %s11084_s11 = inlined_call_operand.vmem [shape: bf16[2,32,64], index: 11, kind: input, shape index: {}]   ;;  %s11085_s12 = inlined_call_operand.vmem [shape: bf16[2,64,32], index: 12, kind: input, shape index: {}]   ;;  %s11086_s13 = inlined_call_operand.hbm [shape: f32[2,8,96], index: 13, kind: input, shape index: {}]   ;;  %s11087_s14 = inlined_call_operand.hbm [shape: f32[2,1,32], index: 14, kind: output, shape index: {}]  }
   0x1   :  { %11129 = sst [smem:[#allocation21_spill]] %s11073_s0 }
   0x2   :  { %11130 = sst [smem:[#allocation22_spill]] %s11074_s1 }
   0x3   :  { %11131 = sst [smem:[#allocation23_spill]] %s11075_s2 }
   0x4   :  { %11132 = sst [smem:[#allocation24_spill]] %s11076_s3 }
   0x5   :  { %11133 = sst [smem:[#allocation25_spill]] %s11077_s4 }
   0x6   :  { %11134 = sst [smem:[#allocation26_spill]] %s11081_s8 }
   0x7   :  { %11135 = sst [smem:[#allocation27_spill]] %s11082_s9 }
   0x8   :  { %11136 = sst [smem:[#allocation28_spill]] %s11083_s10 }
   0x9   :  { %11137 = sst [smem:[#allocation29_spill]] %s11084_s11 }
   0xa   :  { %11138 = sst [smem:[#allocation30_spill]] %s11085_s12 }
   0xb   :  { %11139 = sst [smem:[#allocation31_spill]] %s11087_s14 }
   0xc   :  { %19 = vsyncpa [#allocation3], 0 }
   0xd   :  { %21 = vsyncpa [#allocation3 + $0x1], 0 }
   0xe   :  { %22 = vsyncpa [#allocation6], 0 }
   0xf   :  { %23 = vsyncpa [#allocation10], 0 }
  0x10   :  { %24 = vsyncpa [#allocation4], 0 }
  0x11   :  { %26 = vsyncpa [#allocation4 + $0x1], 0  ;;  %s9428_s29 = smov 0   ;;  %s9430_s30 = smov 0  }
  0x12   :  { %s9432_s15 = smov 0   ;;  %s9434_s16 = smov 0  }
  0x13 LB: > { %11140 = sst [smem:[#allocation18_spill]] %s9314_s29  ;;  %s9449_s17 = sadd.s32 4294967295, %s9326_s16   ;;  %s9326_s16 = sphi %s9434_s16, %s11194_s16   ;;  %s9322_s15 = sphi %s9432_s15, %s11197_s15   ;;  %s9318_s30 = sphi %s9430_s30, %s11196_s30   ;;  %s9314_s29 = sphi %s9428_s29, %s11195_s29  }
  0x14   : > { %s7613_s18 = sadd.s32 4294967294, %s9326_s16   ;;  %p52_p0 = scmp.ne.s32.totalorder %s9318_s30, %s9314_s29 }
  0x15   : > { %p11102_p1 = scmp.eq.s32.totalorder %s9449_s17, 0  ;;  %p359_p2 = scmp.eq.s32.totalorder %s9449_s17, 1 }
  0x16   : > { %p365_p3 = scmp.eq.s32.totalorder %s7613_s18, 1  ;;  %p7614_p5 = scmp.ge.s32.totalorder %s9326_s16, 1 }
  0x17   : > { %p9458_p4 = por %p11102_p1, %p52_p0  ;;  %p372_p7 = scmp.lt.s32.totalorder %s9326_s16, 3 }
  0x18   : > { %p9463_p6 = por %p365_p3, %p52_p0  ;;  %s9328_s22 = smov [#allocation5]  }
  0x19   : > { %s11141_s19 = scalar_select %p9458_p4, 1, 0 }
  0x1a   : > { %s11142_s20 = scalar_select %p9463_p6, 1, 0 }
  0x1b   : > { %p9468_p8 = pnand %p7614_p5, %p372_p7  ;;  %s384_s23 = sshll.u32 %s9328_s22, 4  ;;  %s385_s23 = int_to_ptr.vmem [resolvable:$true] %s384_s23 }
  0x1c   : > { %11143 = sst [smem:[#allocation19_spill]] %s11142_s20  ;;  %s9482_s25 = sadd.s32 1, %s9326_s16  }
  0x1d   : > { %s11144_s21 = scalar_select %p9468_p8, 1, 0 }
  0x1e   : > { %p8715_p9 = pneg %p9468_p8  ;;  %11146 = sst [smem:[#allocation20_spill]] %s9482_s25 }
  0x1f   : > { %s39_s26 = sadd.s32 1, %s9322_s15  ;;  %s36_s27 = ssub.s32 %s9326_s16, %s9482_s25 }
  0x20   : > { %p9477_p11 = pnand %p8715_p9, %p11102_p1  ;;  %s9123_s28 = scalar_lea.vmem %s385_s23, 256 }
  0x21   : > { %p9124_p13 = scmp.ne.s32.totalorder %s385_s23, %s9123_s28  ;;  %p9131_p5 = scmp.lt.s32.totalorder %s385_s23, %s385_s23 }
  0x22   : > { %p11103_p12 = pneg %p9477_p11  ;;  %p9132_p7 = scmp.lt.s32.totalorder %s9123_s28, %s9123_s28 }
  0x24   : > { %p9126_p0 = pnand %p9124_p13, %p11103_p12  ;;  %p9133_p9 = por %p9132_p7, %p9131_p5 }
  0x26   : > { %p9127_p3 = pneg %p9126_p0 }
  0x28   : > { %p9134_p10 = pnand %p9133_p9, %p9127_p3 }
  0x2a   : > { %9137 = shalt.err (!%p9134_p10)
}
  0x2b   : > { %s11098_s18 = smov 128   ;;  %s11100_s22 = smov 8  }
  0x2c   : > { %s11147_s1 = sld [smem:[#allocation22_spill]]  ;;  %p37_p10 = scmp.eq.s32.totalorder %s36_s27, 0 }
  0x2d   : > { %p46_p13 = scmp.ne.s32.totalorder %s9322_s15, %s9318_s30  ;;  %p47_p0 = scmp.eq.s32.totalorder %s9326_s16, 0 }
  0x2e   : > { %p8739_p3 = scmp.lt.s32.totalorder %s9326_s16, 2  ;;  %s448_s14 = sand.u32 1, %s9326_s16  }
  0x2f   : > { %s9505_s20 = scalar_select %p37_p10, %s9322_s15, %s39_s26  }
  0x30   : > { %p48_p5 = por %p47_p0, %p46_p13  ;;  %p9509_p7 = por %p359_p2, %p46_p13 }
  0x31   : > { %s11097_s12 = sand.u32 1, %s9322_s15   ;;  %s7620_s10 = sshll.u32 %s9326_s16, 6 }
  0x32   : > { %8718 = dma.hbm_to_vmem [thread:$0]  (!%p9477_p11), %s11147_s1, 256, %s385_s23, [#allocation6], %s11098_s18, %s11098_s18, %s11100_s22  }
  0x33   : > { %s11148_s29 = scalar_select %p9509_p7, 1, 0 }
  0x34   : > { %s7619_s11 = sshll.u32 %s11097_s12, 2  ;;  %s11149_s0 = sld [smem:[#allocation21_spill]] }
  0x35   : > { %s452_s26 = scalar_lea.vmem [#allocation2], %s7619_s11  ;;  %p9525_p2 = pnand %p8739_p3, %p48_p5 }
  0x36   : > { %s459_s27 = sshll.u32 %s452_s26, 4  ;;  %s9331_s12 = smov [#allocation8]   ;;  %s9523_s27 = int_to_ptr.vmem [resolvable:$true] %s459_s27 }
  0x37   : > { %s409_s18 = sshll.u32 %s9331_s12, 4  ;;  %s9529_s22 = scalar_lea.sflag [#allocation3], %s448_s14  ;;  %s410_s18 = int_to_ptr.vmem [resolvable:$true] %s409_s18 }
  0x38   : > { %p9140_p10 = pneg %p9525_p2 }
  0x3a   : > { %s9521_s23 = scalar_lea.hbm %s11149_s0, %s7620_s10  ;;  %s9143_s25 = scalar_lea.hbm %s11149_s0, 128 }
  0x3b   : > { %s9138_s9 = scalar_lea.hbm %s9521_s23, 64  ;;  %p9144_p3 = scmp.lt.s32.totalorder %s9521_s23, %s11149_s0 }
  0x3c   : > { %p9139_p9 = scmp.ne.s32.totalorder %s9521_s23, %s9138_s9  ;;  %p9145_p5 = scmp.lt.s32.totalorder %s9143_s25, %s9138_s9 }
  0x3e   : > { %p9141_p13 = pnand %p9140_p10, %p9139_p9  ;;  %p9146_p1 = por %p9145_p5, %p9144_p3 }
  0x40   : > { %p9142_p0 = pneg %p9141_p13 }
  0x42   : > { %p9147_p12 = pnand %p9146_p1, %p9142_p0 }
  0x44   : > { %9150 = shalt.err (!%p9147_p12)
}
  0x45   : > { %s9151_s12 = scalar_lea.vmem %s9523_s27, 64  ;;  %s9332_s14 = smov [#allocation2]  }
  0x46   : > { %p9152_p6 = scmp.ne.s32.totalorder %s9523_s27, %s9151_s12  ;;  %s9156_s10 = sshll.u32 %s9332_s14, 4  ;;  %s9157_s10 = int_to_ptr.vmem [resolvable:$false] %s9156_s10 }
  0x47   : > { %s9158_s11 = scalar_lea.vmem %s9157_s10, 128  ;;  %p9159_p7 = scmp.lt.s32.totalorder %s9523_s27, %s9157_s10 }
  0x48   : > { %p9154_p9 = pnand %p9152_p6, %p9140_p10  ;;  %p9160_p4 = scmp.lt.s32.totalorder %s9158_s11, %s9151_s12 }
  0x4a   : > { %p9155_p13 = pneg %p9154_p9  ;;  %p9161_p8 = por %p9160_p4, %p9159_p7 }
  0x4c   : > { %p9162_p3 = pnand %p9161_p8, %p9155_p13 }
  0x4e   : > { %9165 = shalt.err (!%p9162_p3)
}
  0x4f   : > { %8728 = dma.hbm_to_vmem [thread:$0]  (!%p9525_p2), %s9521_s23, 64, %s9523_s27, %s9529_s22  }
  0x50   : > { %s9333_s1 = smov [#allocation9]   ;;  %s9177_s25 = scalar_lea.vmem %s410_s18, 256 }
  0x51   : > { %s434_s9 = sshll.u32 %s9333_s1, 4  ;;  %p9178_p1 = scmp.ne.s32.totalorder %s410_s18, %s9177_s25  ;;  %s435_s9 = int_to_ptr.vmem [resolvable:$true] %s434_s9 }
  0x52   : > { %p11151_p6 = pneg %p9477_p11  ;;  %p9185_p5 = scmp.lt.s32.totalorder %s410_s18, %s410_s18 }
  0x53   : > { %p9186_p4 = scmp.lt.s32.totalorder %s9177_s25, %s9177_s25 }
  0x54   : > { %p9180_p12 = pnand %p9178_p1, %p11151_p6 }
  0x55   : > { %p9187_p8 = por %p9186_p4, %p9185_p5 }
  0x56   : > { %p9181_p0 = pneg %p9180_p12 }
  0x58   : > { %p9188_p7 = pnand %p9187_p8, %p9181_p0 }
  0x5a   : > { %9191 = shalt.err (!%p9188_p7)
}
  0x5b   : > { %s11152_s26 = smov 8   ;;  %s11153_s12 = smov 128  }
  0x5c   : > { %s11154_s8 = sld [smem:[#allocation26_spill]]  ;;  %s9203_s14 = scalar_lea.vmem %s435_s9, 256 }
  0x5d   : > { %p9204_p9 = scmp.ne.s32.totalorder %s435_s9, %s9203_s14  ;;  %p11155_p13 = pmov %p11151_p6 }
  0x5e   : > { %p9211_p6 = scmp.lt.s32.totalorder %s435_s9, %s435_s9  ;;  %p9212_p12 = scmp.lt.s32.totalorder %s9203_s14, %s9203_s14 }
  0x5f   : > { %p9206_p3 = pnand %p9204_p9, %p11155_p13 }
  0x60   : > { %p9213_p0 = por %p9212_p12, %p9211_p6 }
  0x61   : > { %p9207_p1 = pneg %p9206_p3 }
  0x62   : > { %8721 = dma.hbm_to_vmem [thread:$0]  (!%p9477_p11), %s11154_s8, 256, %s410_s18, [#allocation6], %s11153_s12, %s11153_s12, %s11152_s26  }
  0x63   : > { %p9214_p5 = pnand %p9213_p0, %p9207_p1 }
  0x65   : > { %9217 = shalt.err (!%p9214_p5)
}
  0x66   : > { %8724 = dma.hbm_to_vmem [thread:$0]  (!%p9477_p11), %s11086_s13, 256, %s435_s9, [#allocation10], %s11153_s12, %s11153_s12, %s11152_s26  }
  0x67   : > { %s7621_s18 = sshll.u32 %s9326_s16, 4  ;;  %s11156_s1 = sand.u32 1, %s9322_s15  }
  0x68   : > { %s476_s25 = scalar_lea.vmem [#allocation7], %s11156_s1  ;;  %s11157_s3 = sld [smem:[#allocation24_spill]] }
  0x69   : > { %s483_s23 = sshll.u32 %s476_s25, 4  ;;  %s484_s23 = int_to_ptr.vmem [resolvable:$true] %s483_s23 }
  0x6e   : > { %s481_s0 = scalar_lea.hbm %s11157_s3, %s7621_s18  ;;  %s9223_s8 = scalar_lea.hbm %s11157_s3, 32 }
  0x6f   : > { %s9218_s24 = scalar_lea.hbm %s481_s0, 16  ;;  %p9224_p11 = scmp.lt.s32.totalorder %s481_s0, %s11157_s3 }
  0x70   : > { %p9219_p4 = scmp.ne.s32.totalorder %s481_s0, %s9218_s24  ;;  %p9225_p9 = scmp.lt.s32.totalorder %s9223_s8, %s9218_s24 }
  0x72   : > { %p9221_p8 = pnand %p9219_p4, %p9140_p10  ;;  %p9226_p13 = por %p9225_p9, %p9224_p11 }
  0x74   : > { %p9222_p7 = pneg %p9221_p8 }
  0x76   : > { %p9227_p3 = pnand %p9226_p13, %p9222_p7 }
  0x78   : > { %9230 = shalt.err (!%p9227_p3)
}
  0x79   : > { %s9231_s12 = scalar_lea.vmem %s484_s23, 16  ;;  %s9334_s18 = smov [#allocation7]  }
  0x7a   : > { %p9232_p1 = scmp.ne.s32.totalorder %s484_s23, %s9231_s12  ;;  %s9236_s1 = sshll.u32 %s9334_s18, 4  ;;  %s9237_s1 = int_to_ptr.vmem [resolvable:$false] %s9236_s1 }
  0x7b   : > { %s9238_s25 = scalar_lea.vmem %s9237_s1, 32  ;;  %p9239_p0 = scmp.lt.s32.totalorder %s484_s23, %s9237_s1 }
  0x7c   : > { %p9234_p6 = pnand %p9232_p1, %p9140_p10  ;;  %p9240_p5 = scmp.lt.s32.totalorder %s9238_s25, %s9231_s12 }
  0x7e   : > { %p9235_p12 = pneg %p9234_p6  ;;  %p9241_p4 = por %p9240_p5, %p9239_p0 }
  0x80   : > { %p9242_p8 = pnand %p9241_p4, %p9235_p12 }
  0x82   : > { %9245 = shalt.err (!%p9242_p8)
}
  0x83   : > { %8731 = dma.hbm_to_vmem [thread:$0]  (!%p9525_p2), %s481_s0, 16, %s484_s23, %s9529_s22  }
  0x84   : > { %p11158_p7 = scmp.ne.s32.totalorder %s11144_s21, 0 }
  0x85   : > { %s494_s8 = sand.u32 (!%p11158_p7), 1, %s9449_s17   ;;  %s9603_s27 = sand.u32 (!%p11158_p7), 1, %s9318_s30  }
  0x86   : > { %492 = sbr.rel (%p11158_p7) target bundleno = 13887 (0x363f), region = 76  ;;  %s7623_s14 = sshll.u32 (!%p11158_p7), %s9603_s27, 2 }
  0x87   : > { %s495_s24 = scalar_lea.sflag (!%p11158_p7), [#allocation3], %s494_s8  ;;  %s498_s10 = scalar_lea.vmem (!%p11158_p7), [#allocation2], %s7623_s14 }
  0x88   : > { %p11159_p10 = scmp.ne.s32.totalorder (!%p11158_p7), %s11141_s19, 0 }
  0x8b   : > { %9289 = dma.done.wait (%p11159_p10), %s495_s24, 64  }
  0x8c   : > { %9291 = vsyncadd (%p11159_p10), %s495_s24, 4294967232  ;;  %p11160_p2 = scmp.eq.s32.totalorder %s9449_s17, 0 }
  0x8e   : > { %9293 = dma.done.wait (%p11160_p2), [#allocation6], 256   ;;  %p11161_p11 = pmov %p11160_p2 }
  0x90   : > { %9295 = vsyncadd (%p11161_p11), [#allocation6], 4294967040 }
  0x91   : > { %9297 = dma.done.wait (%p11159_p10), %s495_s24, 16  }
  0x92   : > { %9299 = vsyncadd (%p11159_p10), %s495_s24, 4294967280  ;;  %p11162_p9 = pmov %p11160_p2 }
  0x93   : > { %p11163_p13 = pmov %p11160_p2 }
  0x94   : > { %9301 = dma.done.wait (%p11162_p9), [#allocation6], 256  }
  0x95   : > { %9303 = vsyncadd (%p11163_p13), [#allocation6], 4294967040  ;;  %p11164_p3 = pmov %p11160_p2 }
  0x96   : > { %p11165_p1 = pmov %p11160_p2 }
  0x97   : > { %9305 = dma.done.wait (%p11164_p3), [#allocation10], 256  }
  0x98   : > { %9307 = vsyncadd (%p11165_p1), [#allocation10], 4294967040  ;;  %v578_v0 = vlaneseq  ;;  %vm635_vm0 = vcmask 1040384   ;;  %v575_v6 = vld [vmem:[%s498_s10] sm:$0xf]  ;;  %v620_v8 = vld [vmem:[#allocation5] sm:$0xff] }
  0x99   : > { %v621_v7 = vld [vmem:[#allocation5 + $0x8] sm:$0x1]  ;;  %v9335_v13 = vmov 0.0   ;;  %vm622_vm1 = vcmask 72704   ;;  %s11166_s4 = sld [smem:[#allocation25_spill]]  ;;  %vm790_vm6 = vcmask 261120  }
  0x9a   : > { %v9627_v1 = vshrl.u32 %v578_v0, 7  ;;  %8058 = vmatprep.subr.msk.mxu0 %vm635_vm0, %v621_v7  ;;  %v579_v14 = vand.u32 127, %v578_v0  ;;  %v771_v31 = vld [vmem:[#allocation8] sm:$0xff]  ;;  %vm9336_vm7 = vmmov 0   ;;  %s11127_s23 = smov 96   ;;  %vm881_vm8 = vcmask 64512  }
  0x9b   : > { %8059 = vmatpush3.msk.msra.mxu0 %vm635_vm0, %v621_v7  ;;  %p570_p6 = scmp.lt.s32.totalorder %s9449_s17, 1  ;;  %s11167_s2 = sld [smem:[#allocation23_spill]]  ;;  %v9338_v61 = vmov 1966171168   ;;  %vm1128_vm9 = vcmask 1043456   ;;  %vm2692_vm10 = vcmask 130048  }
  0x9c   : > { %v9630_v2 = vsub.s32 0, %v9627_v1  ;;  %v9633_v3 = vsub.s32 2, %v9627_v1  ;;  %v9636_v4 = vsub.s32 1, %v9627_v1  ;;  %v9639_v5 = vsub.s32 3, %v9627_v1  ;;  %8060 = vmatprep.subr.mxu0 %v620_v8  ;;  %s11119_s1 = smov 64   ;;  %s11128_s25 = smov 88  }
  0x9d   : > { %8061 = vmatpush3.msra.mxu0 %v620_v8  ;;  %s571_s11 = scalar_select %p570_p6, %s9449_s17, 1  ;;  %v728_v62 = vunpack.c.l.s4 %v9338_v61  ;;  %vm2697_vm11 = vcmask 195584   ;;  %vm2955_vm12 = vcmask 523264   ;;  %vm5393_vm13 = vcmask 60416  }
  0x9e   : > { %v583_v9 = vrot.slane %v575_v6, %v9630_v2  ;;  %v597_v10 = vrot.slane %v575_v6, %v9633_v3  ;;  %v590_v11 = vrot.slane %v575_v6, %v9636_v4  ;;  %v604_v12 = vrot.slane %v575_v6, %v9639_v5  ;;  %8076 = vmatprep.subr.bf16.mxu0 %v9335_v13  ;;  %s11125_s8 = smov 120   ;;  %s11117_s14 = smov 56  }
  0x9f   : > { %v8858_v23 = vld [vmem:[%s11166_s4 + $0x8] sm:$0xff]   ;;  %v8859_v24 = vld [vmem:[%s11166_s4] sm:$0xff]   ;;  %v777_v33 = vrot.slane %v771_v31, %v9630_v2  ;;  %s7627_s9 = sshll.u32 %s571_s11, 2  ;;  %v729_v6 = vunpack.c.0.s8 %v728_v62  ;;  %s11126_s24 = smov 80   ;;  %vm5514_vm14 = vcmask 1041409   ;;  %vm5517_vm15 = vcmask 1042434  }
  0xa0   : > { %585 = vbcast.lane.b32.xlu0 %v583_v9, 256  ;;  %599 = vbcast.lane.b32.xlu1 %v597_v10, 256  ;;  %s11123_s10 = smov 112   ;;  %s11115_s19 = smov 48   ;;  %vm5520_vm0 = vcmask 1043459  }
  0xa1   : > { %8068 = vmatprep.subr.bf16.mxu1 %v8858_v23  ;;  %s9729_s18 = scalar_lea.vmem %s11167_s2, %s7627_s9  ;;  %v732_v8 = vsub.s32 %v729_v6, %v9627_v1  ;;  %s11124_s21 = smov 72  }
  0xa2   : > { %8069 = vmatpush3.bf16.msra.mxu1 %v8858_v23  ;;  %v576_v63 = vld [vmem:[%s9729_s18] sm:$0xf]  ;;  %s11121_s22 = smov 104   ;;  %s11113_s28 = smov 40  }
  0xa3   : > { %8070 = vmatprep.subr.bf16.mxu1 %v8859_v24  ;;  %v724_v0 = vsub.f32 1.0, %v576_v63  ;;  %s11109_s11 = smov 8   ;;  %s11107_s9 = smov 16  }
  0xa4   : > { %592 = vbcast.lane.b32.xlu0 %v590_v11, 256  ;;  %606 = vbcast.lane.b32.xlu1 %v604_v12, 256  ;;  %s11168_s26 = smov 40   ;;  %s11169_s12 = smov 8  }
  0xa5   : > { %v725_v7 = vmul.f32 -1e+09, %v724_v0  ;;  %s11173_s0 = smov 104   ;;  %s11180_s2 = sld [smem:[#allocation30_spill]] }
  0xa6   : > { %8071 = vmatpush3.bf16.msra.mxu1 %v8859_v24  ;;  %s11181_s3 = smov 88   ;;  %p11189_p0 = scmp.ne.s32.totalorder %s11148_s29, 0 }
  0xa7   : > { %8082 = vmatprep.subr.bf16.mxu1 %v9335_v13  ;;  %v733_v9 = vrot.slane %v725_v7, %v732_v8 }
  0xa9   : > { %v741_v10 = vrot.slane %v733_v9, %v732_v8  ;;  %v734_v11 = vcombine.high %v733_v9, %v733_v9 }
  0xab   : > { %v9734_v12 = vrot.slane %v741_v10, %v9630_v2 }
 0x112   : > { %v586_v15 = vpop.permute.xlu0 %585  ;;  %v600_v16 = vpop.permute.xlu1 %599 }
 0x113   : > { %vm608_vm2 = vcmp.eq.s32.totalorder %v579_v14, %v586_v15  ;;  %vm610_vm3 = vcmp.eq.s32.totalorder %v579_v14, %v600_v16 }
 0x114   : > { %v7628_v17 = vsel %vm608_vm2, 1.0, %v9335_v13  ;;  %v7630_v20 = vsel %vm610_vm3, 1.0, %v9335_v13  ;;  %vm5655_vm2 = vcmask 1041408   ;;  %vm5651_vm3 = vcmask 31744  }
 0x115   : > { %8062 = vmatprep.mubr.msk.f32.mxu0 %vm622_vm1, %v7628_v17 }
 0x116   : > { %v593_v18 = vpop.permute.xlu0 %592  ;;  %v607_v19 = vpop.permute.xlu1 %606 }
 0x117   : > { %vm609_vm4 = vcmp.eq.s32.totalorder %v579_v14, %v593_v18  ;;  %vm611_vm5 = vcmp.eq.s32.totalorder %v579_v14, %v607_v19  ;;  %v748_v14 = vrot.slane %v734_v11, %v732_v8  ;;  %v749_v18 = vcombine.high %v741_v10, %v741_v10 }
 0x118   : > { %v7629_v21 = vsel %vm609_vm4, 1.0, %v9335_v13  ;;  %v7631_v22 = vsel %vm611_vm5, 1.0, %v9335_v13  ;;  %vm6128_vm4 = vcmask 257024   ;;  %vm7382_vm5 = vcmask 24576  }
 0x119   : > { %8063 = vmatmul.mubr.msk.f32.vlgmr.msra.gmra.mxu0 %vm622_vm1, %v7629_v21  ;;  %v9738_v17 = vrot.slane %v748_v14, %v9630_v2  ;;  %v9743_v24 = vrot.slane %v749_v18, %v9630_v2 }
 0x11a   : > { %8065 = vmatprep.mubr.msk.f32.mxu0 %vm622_vm1, %v7630_v20 }
 0x11d   : > { %8066 = vmatmul.mubr.msk.f32.gmra.mxu0 %vm622_vm1, %v7631_v22  ;;  %vm5636_vm1 = vcmask 27648  }
 0x11e   : > { %8078 = vmatprep.mubr.msk.bf16.mxu0 %vm9336_vm7, %v9335_v13 }
 0x1d9   : > { %v9657_v25 = vpop.f32.mrf.mxu0 }
 0x1db   : > { %v9659_v26 = vpop.f32.mrf.mxu0 }
 0x1dc   : > { %v772_v27 = vpack.c.bf16 %v9657_v25, %v9659_v26 }
 0x1dd   : > { %v9663_v28 = vpop.f32.mrf.mxu0 }
 0x1de   : > { %8072 = vmatprep.mubr.msk.bf16.mxu1 %vm790_vm6, %v772_v27  ;;  %v750_v27 = vcombine.high %v748_v14, %v748_v14 }
 0x1df   : > { %v9666_v29 = vpop.f32.mrf.mxu0 }
 0x1e0   : > { %v773_v30 = vpack.c.bf16 %v9663_v28, %v9666_v29 }
 0x1e2   : > { %8073 = vmatmul.mubr.msk.bf16.vlgmr.msra.gmra.mxu1 %vm790_vm6, %v773_v30 }
 0x1e3   : > { %8084 = vmatprep.mubr.msk.bf16.mxu1 %vm9336_vm7, %v9335_v13 }
 0x2a2   : > { %v8074_v32 = vpop.f32.mrf.mxu1 }
 0x2a3   : > { %v840_v37 = vadd.f32 %v8074_v32, %v777_v33 }
 0x2a4   : > { %v831_v34 = vpop.f32.mrf.mxu1 }
 0x2a5   : > { %v832_v35 = vadd.f32 %v831_v34, %v777_v33  ;;  %v9680_v41 = vpack.c.bf16 %v840_v37, %v840_v37  ;;  %v848_v55 = vmul.f32 0.35355338, %v840_v37 }
 0x2a6   : > { %v8075_v36 = vpop.f32.mrf.mxu1 }
 0x2a7   : > { %v9676_v38 = vpack.c.bf16 %v832_v35, %v832_v35  ;;  %v843_v42 = vadd.f32 %v8075_v36, %v777_v33  ;;  %v846_v47 = vmul.f32 0.35355338, %v832_v35  ;;  %v9711_v58 = vpack.c.bf16 %v848_v55, %v848_v55 }
 0x2a8   : > { %v834_v39 = vpop.f32.mrf.mxu1  ;;  %v9748_v36 = vrot.slane %v750_v27, %v9630_v2 }
 0x2a9   : > { %v835_v40 = vadd.f32 %v834_v39, %v777_v33  ;;  %879 = vrot.lane.b32.xlu0 %v9676_v38, %s11127_s23  ;;  %v9688_v44 = vpack.c.bf16 %v843_v42, %v843_v42  ;;  %v9695_v51 = vpack.c.bf16 %v846_v47, %v846_v47  ;;  %v849_v59 = vmul.f32 0.35355338, %v843_v42 }
 0x2ab   : > { %v9682_v43 = vpack.c.bf16 %v835_v40, %v835_v40  ;;  %v847_v52 = vmul.f32 0.35355338, %v835_v40  ;;  %v9718_v60 = vpack.c.bf16 %v849_v59, %v849_v59 }
 0x2ad   : > { %929 = vrot.lane.b32.xlu1 %v9682_v43, %s11127_s23  ;;  %978 = vrot.lane.b32.xlu0 %v9680_v41, %s11127_s23  ;;  %v9703_v56 = vpack.c.bf16 %v847_v52, %v847_v52 }
 0x2b1   : > { %1027 = vrot.lane.b32.xlu1 %v9688_v44, %s11127_s23 }
 0x31b   : > { %v880_v45 = vpop.permute.xlu0 %879 }
 0x31c   : > { %v886_v46 = vsel %vm881_vm8, %v880_v45, 0 }
 0x31d   : > { %8077 = vmatpush3.bf16.xpose.msra.mxu0 %v886_v46 }
 0x31e   : > { %8088 = vmatprep.subr.bf16.mxu0 %v9335_v13 }
 0x31f   : > { %v930_v48 = vpop.permute.xlu1 %929  ;;  %v979_v50 = vpop.permute.xlu0 %978 }
 0x320   : > { %v935_v49 = vsel %vm881_vm8, %v930_v48, 0  ;;  %v984_v53 = vsel %vm881_vm8, %v979_v50, 0 }
 0x321   : > { %8083 = vmatpush3.bf16.xpose.msra.mxu1 %v935_v49 }
 0x322   : > { %8094 = vmatprep.subr.bf16.mxu1 %v9335_v13 }
 0x323   : > { %v1028_v54 = vpop.permute.xlu1 %1027 }
 0x324   : > { %8079 = vmatmul.mubr.msk.bf16.vlgmr.msra.gmra.mxu0 %vm881_vm8, %v9695_v51  ;;  %v1033_v57 = vsel %vm881_vm8, %v1028_v54, 0 }
 0x325   : > { %8089 = vmatpush3.bf16.xpose.msra.mxu0 %v984_v53  ;;  %8090 = vmatprep.mubr.msk.bf16.mxu0 %vm9336_vm7, %v9335_v13 }
 0x326   : > { %8100 = vmatprep.subr.bf16.mxu0 %v9335_v13 }
 0x328   : > { %8085 = vmatmul.mubr.msk.bf16.vlgmr.msra.gmra.mxu1 %vm881_vm8, %v9703_v56 }
 0x329   : > { %8095 = vmatpush3.bf16.xpose.msra.mxu1 %v1033_v57  ;;  %8096 = vmatprep.mubr.msk.bf16.mxu1 %vm9336_vm7, %v9335_v13 }
 0x32a   : > { %8106 = vmatprep.subr.bf16.mxu1 %v9335_v13 }
 0x32c   : > { %8091 = vmatmul.mubr.msk.bf16.vlgmr.msra.gmra.mxu0 %vm881_vm8, %v9711_v58 }
 0x32d   : > { %8102 = vmatprep.mubr.msk.bf16.mxu0 %vm9336_vm7, %v9335_v13 }
 0x330   : > { %8097 = vmatmul.mubr.msk.bf16.vlgmr.msra.gmra.mxu1 %vm881_vm8, %v9718_v60 }
 0x331   : > { %8108 = vmatprep.mubr.msk.bf16.mxu1 %vm9336_vm7, %v9335_v13 }
 0x3e4   : > { %v922_v15 = vpop.f32.mrf.mxu0 }
 0x3e5   : > { %v923_v16 = vadd.f32 %v922_v15, %v9734_v12 }
 0x3e6   : > { %v8080_v19 = vpop.f32.mrf.mxu0 }
 0x3e7   : > { %v1075_v20 = vsel %vm881_vm8, %v923_v16, -inf }
 0x3e8   : > { %v971_v21 = vpop.f32.mrf.mxu1  ;;  %1076 = vmax.xlane.f32.xlu0 %v1075_v20  ;;  %v925_v22 = vpop.f32.mrf.mxu0 }
 0x3e9   : > { %v972_v23 = vadd.f32 %v971_v21, %v9738_v17 }
 0x3ea   : > { %v8081_v30 = vpop.f32.mrf.mxu0  ;;  %v8086_v31 = vpop.f32.mrf.mxu1 }
 0x3eb   : > { %v1078_v32 = vsel %vm881_vm8, %v972_v23, -inf }
 0x3ec   : > { %1079 = vmax.xlane.f32.xlu1 %v1078_v32  ;;  %v974_v33 = vpop.f32.mrf.mxu1  ;;  %v1020_v34 = vpop.f32.mrf.mxu0 }
 0x3ed   : > { %v1021_v35 = vadd.f32 %v1020_v34, %v9743_v24 }
 0x3ee   : > { %v8087_v37 = vpop.f32.mrf.mxu1  ;;  %v8092_v39 = vpop.f32.mrf.mxu0 }
 0x3ef   : > { %v1081_v40 = vsel %vm881_vm8, %v1021_v35, -inf }
 0x3f0   : > { %v1069_v42 = vpop.f32.mrf.mxu1  ;;  %1082 = vmax.xlane.f32.xlu0 %v1081_v40  ;;  %v1023_v45 = vpop.f32.mrf.mxu0 }
 0x3f1   : > { %v1070_v46 = vadd.f32 %v1069_v42, %v9748_v36 }
 0x3f2   : > { %v8093_v47 = vpop.f32.mrf.mxu0  ;;  %v8098_v48 = vpop.f32.mrf.mxu1 }
 0x3f3   : > { %v1084_v49 = vsel %vm881_vm8, %v1070_v46, -inf }
 0x3f4   : > { %v1072_v50 = vpop.f32.mrf.mxu1  ;;  %1085 = vmax.xlane.f32.xlu0 %v1084_v49 }
 0x3f6   : > { %v8099_v52 = vpop.f32.mrf.mxu1 }
 0x3fd   : > { %1123 = vrot.lane.b32.xlu1 %v9676_v38, %s11119_s1 }
 0x471   : > { %v1077_v53 = vpop.xlane.xlu0 %1076 }
 0x472   : > { %v1087_v54 = vsub.f32 %v923_v16, %v1077_v53 }
 0x474   : > { %v1091_v55 = vmul.f32 1.442695, %v1087_v54 }
 0x475   : > { %v1080_v57 = vpop.xlane.xlu1 %1079 }
 0x476   : > { %8898 = vpow2.f32 %v1091_v55  ;;  %v1088_v59 = vsub.f32 %v972_v23, %v1080_v57 }
 0x478   : > { %v1093_v61 = vmul.f32 1.442695, %v1088_v59 }
 0x479   : > { %v1124_v62 = vpop.permute.xlu1 %1123  ;;  %v1083_v9 = vpop.xlane.xlu0 %1082 }
 0x47a   : > { %8900 = vpow2.f32 %v1093_v61  ;;  %v1130_v63 = vsel %vm1128_vm9, %v1124_v62, 0  ;;  %v1089_v11 = vsub.f32 %v1021_v35, %v1083_v9 }
 0x47b   : > { %8101 = vmatpush3.bf16.msra.mxu0 %v1130_v63 }
 0x47c   : > { %8112 = vmatprep.subr.bf16.mxu0 %v9335_v13  ;;  %v1095_v15 = vmul.f32 1.442695, %v1089_v11 }
 0x47d   : > { %v1086_v10 = vpop.xlane.xlu0 %1085 }
 0x47e   : > { %v1090_v14 = vsub.f32 %v1070_v46, %v1086_v10  ;;  %8902 = vpow2.f32 %v1095_v15 }
 0x480   : > { %v1097_v16 = vmul.f32 1.442695, %v1090_v14 }
 0x482   : > { %8904 = vpow2.f32 %v1097_v16 }
 0x483   : > { %v8899_v0 = vpop.eup %8898 }
 0x484   : > { %v1099_v6 = vsel %vm881_vm8, %v8899_v0, 0.0 }
 0x485   : > { %1100 = vadd.xlane.f32.xlu1 %v1099_v6 }
 0x487   : > { %v8901_v7 = vpop.eup %8900 }
 0x488   : > { %v1102_v8 = vsel %vm881_vm8, %v8901_v7, 0.0 }
 0x489   : > { %1103 = vadd.xlane.f32.xlu0 %v1102_v8 }
 0x48b   : > { %v8903_v18 = vpop.eup %8902 }
 0x48c   : > { %v1105_v20 = vsel %vm881_vm8, %v8903_v18, 0.0 }
 0x48f   : > { %v8905_v19 = vpop.eup %8904 }
 0x490   : > { %v1108_v21 = vsel %vm881_vm8, %v8905_v19, 0.0 }
 0x496   : > { %1220 = vrot.lane.b32.xlu1 %v9680_v41, %s11119_s1 }
 0x49a   : > { %1268 = vrot.lane.b32.xlu1 %v9688_v44, %s11119_s1 }
 0x49f   : > { %1172 = vrot.lane.b32.xlu0 %v9682_v43, %s11119_s1 }
 0x4be   : > { %1106 = vadd.xlane.f32.xlu1 %v1105_v20  ;;  %1109 = vadd.xlane.f32.xlu0 %v1108_v21 }
 0x4cf   : > { %1370 = vrot.lane.b32.xlu1 %v9682_v43, %s11128_s25 }
 0x4d3   : > { %1368 = vrot.lane.b32.xlu1 %v9703_v56, %s11125_s8 }
 0x4d4   : > { %1319 = vrot.lane.b32.xlu0 %v9676_v38, %s11128_s25 }
 0x4d7   : > { %1472 = vrot.lane.b32.xlu1 %v9688_v44, %s11128_s25 }
 0x4d8   : > { %1317 = vrot.lane.b32.xlu0 %v9695_v51, %s11125_s8 }
 0x4db   : > { %1470 = vrot.lane.b32.xlu1 %v9718_v60, %s11125_s8 }
 0x4dc   : > { %1421 = vrot.lane.b32.xlu0 %v9680_v41, %s11128_s25 }
 0x4e0   : > { %1419 = vrot.lane.b32.xlu0 %v9711_v58, %s11125_s8 }
 0x50e   : > { %v1101_v22 = vpop.xlane.xlu1 %1100 }
 0x50f   : > { %8906 = vrcp.f32 %v1101_v22 }
 0x512   : > { %v1104_v23 = vpop.xlane.xlu0 %1103  ;;  %v1221_v32 = vpop.permute.xlu1 %1220 }
 0x513   : > { %8908 = vrcp.f32 %v1104_v23  ;;  %v1226_v37 = vsel %vm1128_vm9, %v1221_v32, 0 }
 0x516   : > { %v1173_v27 = vpop.permute.xlu0 %1172  ;;  %v1269_v40 = vpop.permute.xlu1 %1268 }
 0x517   : > { %v1178_v30 = vsel %vm1128_vm9, %v1173_v27, 0  ;;  %v1274_v45 = vsel %vm1128_vm9, %v1269_v40, 0 }
 0x518   : > { %8107 = vmatpush3.bf16.msra.mxu1 %v1178_v30 }
 0x519   : > { %8118 = vmatprep.subr.bf16.mxu1 %v9335_v13 }
 0x51c   : > { %v8907_v31 = vpop.eup %8906 }
 0x51d   : > { %v1115_v33 = vmul.f32 %v8907_v31, %v8899_v0 }
 0x51f   : > { %v1119_v34 = vpack.c.bf16 %v1115_v33, %v1115_v33 }
 0x520   : > { %v8909_v35 = vpop.eup %8908 }
 0x521   : > { %8103 = vmatmul.mubr.msk.bf16.vlgmr.msra.gmra.mxu0 %vm881_vm8, %v1119_v34  ;;  %v1116_v39 = vmul.f32 %v8909_v35, %v8901_v7 }
 0x522   : > { %8113 = vmatpush3.bf16.msra.mxu0 %v1226_v37  ;;  %8114 = vmatprep.mubr.msk.bf16.mxu0 %vm9336_vm7, %v9335_v13 }
 0x523   : > { %v1120_v42 = vpack.c.bf16 %v1116_v39, %v1116_v39  ;;  %8124 = vmatprep.subr.bf16.mxu0 %v9335_v13 }
 0x525   : > { %8109 = vmatmul.mubr.msk.bf16.vlgmr.msra.gmra.mxu1 %vm881_vm8, %v1120_v42 }
 0x526   : > { %8119 = vmatpush3.bf16.msra.mxu1 %v1274_v45  ;;  %8120 = vmatprep.mubr.msk.bf16.mxu1 %vm9336_vm7, %v9335_v13 }
 0x527   : > { %8130 = vmatprep.subr.bf16.mxu1 %v9335_v13 }
 0x547   : > { %v1107_v46 = vpop.xlane.xlu1 %1106  ;;  %v1110_v47 = vpop.xlane.xlu0 %1109 }
 0x548   : > { %8910 = vrcp.f32 %v1107_v46 }
 0x549   : > { %8912 = vrcp.f32 %v1110_v47 }
 0x54b   : > { %v1320_v48 = vpop.permute.xlu0 %1319  ;;  %v1371_v49 = vpop.permute.xlu1 %1370 }
 0x54c   : > { %v1325_v61 = vsel %vm881_vm8, %v1320_v48, 0  ;;  %v1376_v63 = vsel %vm881_vm8, %v1371_v49, 0 }
 0x54f   : > { %v1318_v57 = vpop.permute.xlu0 %1317  ;;  %v1369_v62 = vpop.permute.xlu1 %1368 }
 0x553   : > { %v1422_v0 = vpop.permute.xlu0 %1421  ;;  %v1473_v6 = vpop.permute.xlu1 %1472 }
 0x554   : > { %v1427_v7 = vsel %vm881_vm8, %v1422_v0, 0  ;;  %v1478_v8 = vsel %vm881_vm8, %v1473_v6, 0 }
 0x555   : > { %v8911_v50 = vpop.eup %8910 }
 0x556   : > { %v8913_v52 = vpop.eup %8912  ;;  %v1117_v53 = vmul.f32 %v8911_v50, %v8903_v18 }
 0x557   : > { %v1118_v54 = vmul.f32 %v8913_v52, %v8905_v19  ;;  %v1420_v9 = vpop.permute.xlu0 %1419  ;;  %v1471_v10 = vpop.permute.xlu1 %1470 }
 0x558   : > { %v1121_v55 = vpack.c.bf16 %v1117_v53, %v1117_v53 }
 0x559   : > { %v1122_v59 = vpack.c.bf16 %v1118_v54, %v1118_v54 }
 0x55a   : > { %8115 = vmatmul.mubr.msk.bf16.vlgmr.msra.gmra.mxu0 %vm881_vm8, %v1121_v55 }
 0x55b   : > { %8121 = vmatmul.mubr.msk.bf16.vlgmr.msra.gmra.mxu1 %vm881_vm8, %v1122_v59  ;;  %8125 = vmatpush3.bf16.xpose.msra.mxu0 %v1325_v61 }
 0x55c   : > { %8131 = vmatpush3.bf16.xpose.msra.mxu1 %v1376_v63  ;;  %8126 = vmatprep.mubr.msk.bf16.mxu0 %vm9336_vm7, %v9335_v13 }
 0x55d   : > { %8132 = vmatprep.mubr.msk.bf16.mxu1 %vm9336_vm7, %v9335_v13  ;;  %8136 = vmatprep.subr.bf16.mxu0 %v9335_v13 }
 0x55e   : > { %8142 = vmatprep.subr.bf16.mxu1 %v9335_v13 }
 0x562   : > { %8127 = vmatmul.mubr.msk.bf16.vlgmr.msra.gmra.mxu0 %vm881_vm8, %v1318_v57 }
 0x563   : > { %8133 = vmatmul.mubr.msk.bf16.vlgmr.msra.gmra.mxu1 %vm881_vm8, %v1369_v62  ;;  %8137 = vmatpush3.bf16.xpose.msra.mxu0 %v1427_v7 }
 0x564   : > { %8143 = vmatpush3.bf16.xpose.msra.mxu1 %v1478_v8  ;;  %8138 = vmatprep.mubr.msk.bf16.mxu0 %vm9336_vm7, %v9335_v13 }
 0x565   : > { %8144 = vmatprep.mubr.msk.bf16.mxu1 %vm9336_vm7, %v9335_v13  ;;  %8148 = vmatprep.subr.bf16.mxu0 %v9335_v13 }
 0x566   : > { %8154 = vmatprep.subr.bf16.mxu1 %v9335_v13 }
 0x56a   : > { %8139 = vmatmul.mubr.msk.bf16.vlgmr.msra.gmra.mxu0 %vm881_vm8, %v1420_v9 }
 0x56b   : > { %8145 = vmatmul.mubr.msk.bf16.vlgmr.msra.gmra.mxu1 %vm881_vm8, %v1471_v10  ;;  %8150 = vmatprep.mubr.msk.bf16.mxu0 %vm9336_vm7, %v9335_v13 }
 0x56c   : > { %8156 = vmatprep.mubr.msk.bf16.mxu1 %vm9336_vm7, %v9335_v13 }
 0x5e1   : > { %v9821_v11 = vpop.f32.mrf.mxu0 }
 0x5e3   : > { %v8104_v14 = vpop.f32.mrf.mxu0 }
 0x5e5   : > { %v1169_v15 = vpop.f32.mrf.mxu0  ;;  %v9823_v16 = vpop.f32.mrf.mxu1 }
 0x5e7   : > { %v8105_v18 = vpop.f32.mrf.mxu0  ;;  %v8110_v19 = vpop.f32.mrf.mxu1 }
 0x5e9   : > { %v1217_v20 = vpop.f32.mrf.mxu1 }
 0x5eb   : > { %v8111_v21 = vpop.f32.mrf.mxu1 }
 0x61a   : > { %v9825_v22 = vpop.f32.mrf.mxu0 }
 0x61b   : > { %v9827_v23 = vpop.f32.mrf.mxu1 }
 0x61c   : > { %v8116_v27 = vpop.f32.mrf.mxu0 }
 0x61d   : > { %v8122_v30 = vpop.f32.mrf.mxu1 }
 0x61e   : > { %v1265_v31 = vpop.f32.mrf.mxu0 }
 0x61f   : > { %v1313_v32 = vpop.f32.mrf.mxu1 }
 0x620   : > { %v8117_v33 = vpop.f32.mrf.mxu0 }
 0x621   : > { %v8123_v34 = vpop.f32.mrf.mxu1 }
 0x622   : > { %v1361_v35 = vpop.f32.mrf.mxu0 }
 0x623   : > { %v1362_v37 = vadd.f32 %v1361_v35, %v9734_v12  ;;  %v1412_v39 = vpop.f32.mrf.mxu1 }
 0x624   : > { %v1413_v40 = vadd.f32 %v1412_v39, %v9738_v17  ;;  %v8128_v42 = vpop.f32.mrf.mxu0 }
 0x625   : > { %v8134_v45 = vpop.f32.mrf.mxu1  ;;  %v1520_v46 = vsel %vm881_vm8, %v1362_v37, -inf }
 0x626   : > { %v1523_v47 = vsel %vm881_vm8, %v1413_v40, -inf  ;;  %1521 = vmax.xlane.f32.xlu0 %v1520_v46  ;;  %v1364_v48 = vpop.f32.mrf.mxu0 }
 0x627   : > { %1524 = vmax.xlane.f32.xlu1 %v1523_v47  ;;  %v1415_v49 = vpop.f32.mrf.mxu1 }
 0x628   : > { %v8129_v50 = vpop.f32.mrf.mxu0 }
 0x629   : > { %v8135_v52 = vpop.f32.mrf.mxu1 }
 0x62a   : > { %v1463_v53 = vpop.f32.mrf.mxu0 }
 0x62b   : > { %v1464_v54 = vadd.f32 %v1463_v53, %v9743_v24  ;;  %v1514_v55 = vpop.f32.mrf.mxu1 }
 0x62c   : > { %v8140_v57 = vpop.f32.mrf.mxu0  ;;  %v1515_v59 = vadd.f32 %v1514_v55, %v9748_v36 }
 0x62d   : > { %v8146_v61 = vpop.f32.mrf.mxu1  ;;  %v1526_v62 = vsel %vm881_vm8, %v1464_v54, -inf }
 0x62e   : > { %1527 = vmax.xlane.f32.xlu0 %v1526_v62  ;;  %v1466_v63 = vpop.f32.mrf.mxu0  ;;  %v1529_v8 = vsel %vm881_vm8, %v1515_v59, -inf }
 0x62f   : > { %v1517_v0 = vpop.f32.mrf.mxu1 }
 0x630   : > { %v8141_v6 = vpop.f32.mrf.mxu0 }
 0x631   : > { %v8147_v7 = vpop.f32.mrf.mxu1 }
 0x632   : > { %1530 = vmax.xlane.f32.xlu0 %v1529_v8 }
 0x638   : > { %1568 = vrot.lane.b32.xlu1 %v9676_v38, %s11117_s14 }
 0x6af   : > { %v1522_v9 = vpop.xlane.xlu0 %1521 }
 0x6b0   : > { %v1525_v10 = vpop.xlane.xlu1 %1524  ;;  %v1532_v14 = vsub.f32 %v1362_v37, %v1522_v9 }
 0x6b1   : > { %v1533_v15 = vsub.f32 %v1413_v40, %v1525_v10 }
 0x6b2   : > { %v1536_v18 = vmul.f32 1.442695, %v1532_v14 }
 0x6b3   : > { %v1538_v19 = vmul.f32 1.442695, %v1533_v15 }
 0x6b4   : > { %8914 = vpow2.f32 %v1536_v18  ;;  %v1569_v20 = vpop.permute.xlu1 %1568 }
 0x6b5   : > { %8916 = vpow2.f32 %v1538_v19  ;;  %v1574_v21 = vsel %vm1128_vm9, %v1569_v20, 0 }
 0x6b6   : > { %8149 = vmatpush3.bf16.msra.mxu0 %v1574_v21 }
 0x6b7   : > { %8160 = vmatprep.subr.bf16.mxu0 %v9335_v13  ;;  %v1528_v33 = vpop.xlane.xlu0 %1527 }
 0x6b8   : > { %v1534_v37 = vsub.f32 %v1464_v54, %v1528_v33 }
 0x6ba   : > { %v1540_v40 = vmul.f32 1.442695, %v1534_v37 }
 0x6bb   : > { %v1531_v34 = vpop.xlane.xlu0 %1530 }
 0x6bc   : > { %v1535_v35 = vsub.f32 %v1515_v59, %v1531_v34 }
 0x6be   : > { %v1542_v39 = vmul.f32 1.442695, %v1535_v35 }
 0x6c0   : > { %8918 = vpow2.f32 %v1542_v39 }
 0x6c1   : > { %v8915_v27 = vpop.eup %8914  ;;  %8920 = vpow2.f32 %v1540_v40 }
 0x6c2   : > { %v8917_v30 = vpop.eup %8916  ;;  %v1544_v31 = vsel %vm881_vm8, %v8915_v27, 0.0 }
 0x6c3   : > { %1545 = vadd.xlane.f32.xlu1 %v1544_v31  ;;  %v1547_v32 = vsel %vm881_vm8, %v8917_v30, 0.0 }
 0x6c4   : > { %1548 = vadd.xlane.f32.xlu0 %v1547_v32 }
 0x6cd   : > { %v8919_v42 = vpop.eup %8918 }
 0x6ce   : > { %v8921_v45 = vpop.eup %8920  ;;  %v1553_v46 = vsel %vm881_vm8, %v8919_v42, 0.0 }
 0x6cf   : > { %v1550_v47 = vsel %vm881_vm8, %v8921_v45, 0.0 }
 0x6d4   : > { %1664 = vrot.lane.b32.xlu1 %v9680_v41, %s11117_s14 }
 0x6d8   : > { %1712 = vrot.lane.b32.xlu1 %v9688_v44, %s11117_s14 }
 0x6da   : > { %1616 = vrot.lane.b32.xlu0 %v9682_v43, %s11117_s14 }
 0x6f9   : > { %1554 = vadd.xlane.f32.xlu0 %v1553_v46 }
 0x6fc   : > { %1551 = vadd.xlane.f32.xlu1 %v1550_v47 }
 0x70d   : > { %1812 = vrot.lane.b32.xlu1 %v9682_v43, %s11126_s24 }
 0x70f   : > { %1762 = vrot.lane.b32.xlu0 %v9676_v38, %s11126_s24 }
 0x711   : > { %1810 = vrot.lane.b32.xlu1 %v9703_v56, %s11123_s10 }
 0x713   : > { %1760 = vrot.lane.b32.xlu0 %v9695_v51, %s11123_s10 }
 0x715   : > { %1912 = vrot.lane.b32.xlu1 %v9688_v44, %s11126_s24 }
 0x717   : > { %1862 = vrot.lane.b32.xlu0 %v9680_v41, %s11126_s24 }
 0x719   : > { %1910 = vrot.lane.b32.xlu1 %v9718_v60, %s11123_s10 }
 0x71b   : > { %1860 = vrot.lane.b32.xlu0 %v9711_v58, %s11123_s10 }
 0x74c   : > { %v1546_v48 = vpop.xlane.xlu1 %1545 }
 0x74d   : > { %8922 = vrcp.f32 %v1546_v48  ;;  %v1549_v49 = vpop.xlane.xlu0 %1548 }
 0x74e   : > { %8924 = vrcp.f32 %v1549_v49 }
 0x750   : > { %v1665_v53 = vpop.permute.xlu1 %1664 }
 0x751   : > { %v1617_v50 = vpop.permute.xlu0 %1616  ;;  %v1670_v0 = vsel %vm1128_vm9, %v1665_v53, 0 }
 0x752   : > { %v1622_v52 = vsel %vm1128_vm9, %v1617_v50, 0 }
 0x753   : > { %8155 = vmatpush3.bf16.msra.mxu1 %v1622_v52 }
 0x754   : > { %8166 = vmatprep.subr.bf16.mxu1 %v9335_v13  ;;  %v1713_v61 = vpop.permute.xlu1 %1712 }
 0x755   : > { %v1718_v6 = vsel %vm1128_vm9, %v1713_v61, 0 }
 0x75a   : > { %v8923_v54 = vpop.eup %8922 }
 0x75b   : > { %v8925_v55 = vpop.eup %8924  ;;  %v1560_v57 = vmul.f32 %v8923_v54, %v8915_v27 }
 0x75c   : > { %v1561_v59 = vmul.f32 %v8925_v55, %v8917_v30 }
 0x75d   : > { %v1564_v62 = vpack.c.bf16 %v1560_v57, %v1560_v57 }
 0x75e   : > { %v1565_v63 = vpack.c.bf16 %v1561_v59, %v1561_v59 }
 0x75f   : > { %8151 = vmatmul.mubr.msk.bf16.vlgmr.msra.gmra.mxu0 %vm881_vm8, %v1564_v62 }
 0x760   : > { %8157 = vmatmul.mubr.msk.bf16.vlgmr.msra.gmra.mxu1 %vm881_vm8, %v1565_v63  ;;  %8161 = vmatpush3.bf16.msra.mxu0 %v1670_v0 }
 0x761   : > { %8167 = vmatpush3.bf16.msra.mxu1 %v1718_v6  ;;  %8168 = vmatprep.mubr.msk.bf16.mxu1 %vm9336_vm7, %v9335_v13 }
 0x762   : > { %8178 = vmatprep.subr.bf16.mxu1 %v9335_v13  ;;  %8162 = vmatprep.mubr.msk.bf16.mxu0 %vm9336_vm7, %v9335_v13 }
 0x763   : > { %8172 = vmatprep.subr.bf16.mxu0 %v9335_v13 }
 0x782   : > { %v1555_v7 = vpop.xlane.xlu0 %1554 }
 0x783   : > { %8926 = vrcp.f32 %v1555_v7 }
 0x785   : > { %v1552_v8 = vpop.xlane.xlu1 %1551 }
 0x786   : > { %8928 = vrcp.f32 %v1552_v8  ;;  %v1763_v14 = vpop.permute.xlu0 %1762 }
 0x787   : > { %v1768_v32 = vsel %vm881_vm8, %v1763_v14, 0 }
 0x789   : > { %v1813_v9 = vpop.permute.xlu1 %1812 }
 0x78a   : > { %v1818_v27 = vsel %vm881_vm8, %v1813_v9, 0  ;;  %v1761_v31 = vpop.permute.xlu0 %1760 }
 0x78d   : > { %v1811_v20 = vpop.permute.xlu1 %1810 }
 0x78e   : > { %v1863_v34 = vpop.permute.xlu0 %1862 }
 0x78f   : > { %v1868_v37 = vsel %vm881_vm8, %v1863_v34, 0 }
 0x790   : > { %v8927_v10 = vpop.eup %8926 }
 0x791   : > { %v1563_v15 = vmul.f32 %v8927_v10, %v8919_v42  ;;  %v1913_v33 = vpop.permute.xlu1 %1912 }
 0x792   : > { %v1918_v35 = vsel %vm881_vm8, %v1913_v33, 0  ;;  %v1861_v40 = vpop.permute.xlu0 %1860 }
 0x793   : > { %v8929_v18 = vpop.eup %8928  ;;  %v1567_v19 = vpack.c.bf16 %v1563_v15, %v1563_v15 }
 0x794   : > { %v1562_v21 = vmul.f32 %v8929_v18, %v8921_v45 }
 0x795   : > { %8169 = vmatmul.mubr.msk.bf16.vlgmr.msra.gmra.mxu1 %vm881_vm8, %v1567_v19  ;;  %v1911_v39 = vpop.permute.xlu1 %1910 }
 0x796   : > { %8179 = vmatpush3.bf16.xpose.msra.mxu1 %v1818_v27  ;;  %v1566_v30 = vpack.c.bf16 %v1562_v21, %v1562_v21  ;;  %8180 = vmatprep.mubr.msk.bf16.mxu1 %vm9336_vm7, %v9335_v13 }
 0x797   : > { %8190 = vmatprep.subr.bf16.mxu1 %v9335_v13 }
 0x798   : > { %8163 = vmatmul.mubr.msk.bf16.vlgmr.msra.gmra.mxu0 %vm881_vm8, %v1566_v30 }
 0x799   : > { %8173 = vmatpush3.bf16.xpose.msra.mxu0 %v1768_v32  ;;  %8174 = vmatprep.mubr.msk.bf16.mxu0 %vm9336_vm7, %v9335_v13 }
 0x79a   : > { %8184 = vmatprep.subr.bf16.mxu0 %v9335_v13 }
 0x79d   : > { %8181 = vmatmul.mubr.msk.bf16.vlgmr.msra.gmra.mxu1 %vm881_vm8, %v1811_v20 }
 0x79e   : > { %8191 = vmatpush3.bf16.xpose.msra.mxu1 %v1918_v35  ;;  %8192 = vmatprep.mubr.msk.bf16.mxu1 %vm9336_vm7, %v9335_v13 }
 0x79f   : > { %8202 = vmatprep.subr.bf16.mxu1 %v9335_v13 }
 0x7a0   : > { %8175 = vmatmul.mubr.msk.bf16.vlgmr.msra.gmra.mxu0 %vm881_vm8, %v1761_v31 }
 0x7a1   : > { %8185 = vmatpush3.bf16.xpose.msra.mxu0 %v1868_v37  ;;  %8186 = vmatprep.mubr.msk.bf16.mxu0 %vm9336_vm7, %v9335_v13 }
 0x7a2   : > { %8196 = vmatprep.subr.bf16.mxu0 %v9335_v13 }
 0x7a5   : > { %8193 = vmatmul.mubr.msk.bf16.vlgmr.msra.gmra.mxu1 %vm881_vm8, %v1911_v39 }
 0x7a6   : > { %8204 = vmatprep.mubr.msk.bf16.mxu1 %vm9336_vm7, %v9335_v13 }
 0x7a8   : > { %8187 = vmatmul.mubr.msk.bf16.vlgmr.msra.gmra.mxu0 %vm881_vm8, %v1861_v40 }
 0x7a9   : > { %8198 = vmatprep.mubr.msk.bf16.mxu0 %vm9336_vm7, %v9335_v13 }
 0x81f   : > { %v9905_v42 = vpop.f32.mrf.mxu0 }
 0x820   : > { %v9907_v45 = vpop.f32.mrf.mxu1 }
 0x821   : > { %v8798_v46 = vpack.i.bf16 %v9907_v45, %v9905_v42  ;;  %v8152_v47 = vpop.f32.mrf.mxu0 }
 0x822   : > { %v8158_v48 = vpop.f32.mrf.mxu1 }
 0x823   : > { %v1613_v49 = vpop.f32.mrf.mxu0 }
 0x824   : > { %v1661_v50 = vpop.f32.mrf.mxu1 }
 0x825   : > { %v8153_v52 = vpop.f32.mrf.mxu0 }
 0x826   : > { %v8159_v53 = vpop.f32.mrf.mxu1 }
 0x855   : > { %v9911_v54 = vpop.f32.mrf.mxu1 }
 0x857   : > { %v8170_v55 = vpop.f32.mrf.mxu1 }
 0x858   : > { %v9913_v57 = vpop.f32.mrf.mxu0 }
 0x859   : > { %v8803_v59 = vpack.i.bf16 %v9911_v54, %v9913_v57  ;;  %v1757_v61 = vpop.f32.mrf.mxu1 }
 0x85a   : > { %v8164_v62 = vpop.f32.mrf.mxu0 }
 0x85b   : > { %v8171_v63 = vpop.f32.mrf.mxu1 }
 0x85c   : > { %v1709_v0 = vpop.f32.mrf.mxu0 }
 0x85d   : > { %v1854_v6 = vpop.f32.mrf.mxu1 }
 0x85e   : > { %v1855_v7 = vadd.f32 %v1854_v6, %v9738_v17  ;;  %v8165_v8 = vpop.f32.mrf.mxu0 }
 0x85f   : > { %v8182_v9 = vpop.f32.mrf.mxu1 }
 0x860   : > { %v1963_v10 = vsel %vm881_vm8, %v1855_v7, -inf  ;;  %v1804_v14 = vpop.f32.mrf.mxu0 }
 0x861   : > { %1964 = vmax.xlane.f32.xlu1 %v1963_v10  ;;  %v1805_v15 = vadd.f32 %v1804_v14, %v9734_v12  ;;  %v1857_v18 = vpop.f32.mrf.mxu1 }
 0x862   : > { %v8176_v19 = vpop.f32.mrf.mxu0 }
 0x863   : > { %v8183_v20 = vpop.f32.mrf.mxu1  ;;  %v1960_v21 = vsel %vm881_vm8, %v1805_v15, -inf }
 0x864   : > { %1961 = vmax.xlane.f32.xlu0 %v1960_v21  ;;  %v1807_v27 = vpop.f32.mrf.mxu0 }
 0x865   : > { %v1954_v30 = vpop.f32.mrf.mxu1 }
 0x866   : > { %v8177_v31 = vpop.f32.mrf.mxu0  ;;  %v1955_v39 = vadd.f32 %v1954_v30, %v9748_v36 }
 0x867   : > { %v8194_v32 = vpop.f32.mrf.mxu1 }
 0x868   : > { %v1904_v33 = vpop.f32.mrf.mxu0  ;;  %v1969_v50 = vsel %vm881_vm8, %v1955_v39, -inf }
 0x869   : > { %v1905_v34 = vadd.f32 %v1904_v33, %v9743_v24  ;;  %v1957_v35 = vpop.f32.mrf.mxu1 }
 0x86a   : > { %v8188_v37 = vpop.f32.mrf.mxu0 }
 0x86b   : > { %v8195_v40 = vpop.f32.mrf.mxu1  ;;  %v1966_v47 = vsel %vm881_vm8, %v1905_v34, -inf }
 0x86c   : > { %1967 = vmax.xlane.f32.xlu0 %v1966_v47  ;;  %v1907_v48 = vpop.f32.mrf.mxu0 }
 0x86e   : > { %v8189_v49 = vpop.f32.mrf.mxu0 }
 0x870   : > { %1970 = vmax.xlane.f32.xlu0 %v1969_v50 }
 0x872   : > { %2008 = vrot.lane.b32.xlu1 %v9676_v38, %s11115_s19 }
 0x8ea   : > { %v1965_v52 = vpop.xlane.xlu1 %1964 }
 0x8eb   : > { %v1973_v53 = vsub.f32 %v1855_v7, %v1965_v52 }
 0x8ed   : > { %v1978_v55 = vmul.f32 1.442695, %v1973_v53  ;;  %v1962_v61 = vpop.xlane.xlu0 %1961 }
 0x8ee   : > { %v2009_v62 = vpop.permute.xlu1 %2008  ;;  %v1972_v63 = vsub.f32 %v1805_v15, %v1962_v61 }
 0x8ef   : > { %8930 = vpow2.f32 %v1978_v55  ;;  %v2014_v0 = vsel %vm1128_vm9, %v2009_v62, 0 }
 0x8f0   : > { %v1976_v6 = vmul.f32 1.442695, %v1972_v63  ;;  %8197 = vmatpush3.bf16.msra.mxu0 %v2014_v0 }
 0x8f1   : > { %8208 = vmatprep.subr.bf16.mxu0 %v9335_v13 }
 0x8f2   : > { %8932 = vpow2.f32 %v1976_v6 }
 0x8f5   : > { %v1968_v7 = vpop.xlane.xlu0 %1967 }
 0x8f6   : > { %v1974_v20 = vsub.f32 %v1905_v34, %v1968_v7 }
 0x8f8   : > { %v1980_v21 = vmul.f32 1.442695, %v1974_v20 }
 0x8f9   : > { %v1971_v15 = vpop.xlane.xlu0 %1970 }
 0x8fa   : > { %v1975_v18 = vsub.f32 %v1955_v39, %v1971_v15 }
 0x8fc   : > { %v8931_v8 = vpop.eup %8930  ;;  %v1982_v19 = vmul.f32 1.442695, %v1975_v18 }
 0x8fd   : > { %v1987_v9 = vsel %vm881_vm8, %v8931_v8, 0.0 }
 0x8fe   : > { %1988 = vadd.xlane.f32.xlu0 %v1987_v9  ;;  %8934 = vpow2.f32 %v1982_v19 }
 0x8ff   : > { %v8933_v10 = vpop.eup %8932  ;;  %8936 = vpow2.f32 %v1980_v21 }
 0x900   : > { %v1984_v14 = vsel %vm881_vm8, %v8933_v10, 0.0 }
 0x901   : > { %1985 = vadd.xlane.f32.xlu1 %v1984_v14 }
 0x90b   : > { %v8935_v27 = vpop.eup %8934 }
 0x90c   : > { %v1993_v30 = vsel %vm881_vm8, %v8935_v27, 0.0  ;;  %v8937_v31 = vpop.eup %8936 }
 0x90d   : > { %v1990_v32 = vsel %vm881_vm8, %v8937_v31, 0.0 }
 0x912   : > { %2104 = vrot.lane.b32.xlu1 %v9680_v41, %s11115_s19 }
 0x914   : > { %2056 = vrot.lane.b32.xlu0 %v9682_v43, %s11115_s19 }
 0x916   : > { %2152 = vrot.lane.b32.xlu1 %v9688_v44, %s11115_s19 }
 0x933   : > { %1994 = vadd.xlane.f32.xlu0 %v1993_v30 }
 0x93a   : > { %1991 = vadd.xlane.f32.xlu1 %v1990_v32 }
 0x949   : > { %2202 = vrot.lane.b32.xlu0 %v9676_v38, %s11124_s21 }
 0x94b   : > { %2252 = vrot.lane.b32.xlu1 %v9682_v43, %s11124_s21 }
 0x94d   : > { %2200 = vrot.lane.b32.xlu0 %v9695_v51, %s11121_s22 }
 0x94f   : > { %2250 = vrot.lane.b32.xlu1 %v9703_v56, %s11121_s22 }
 0x951   : > { %2302 = vrot.lane.b32.xlu0 %v9680_v41, %s11124_s21 }
 0x953   : > { %2352 = vrot.lane.b32.xlu1 %v9688_v44, %s11124_s21 }
 0x955   : > { %2300 = vrot.lane.b32.xlu0 %v9711_v58, %s11121_s22 }
 0x957   : > { %2350 = vrot.lane.b32.xlu1 %v9718_v60, %s11121_s22 }
 0x987   : > { %v1989_v33 = vpop.xlane.xlu0 %1988 }
 0x988   : > { %8938 = vrcp.f32 %v1989_v33 }
 0x98a   : > { %v1986_v34 = vpop.xlane.xlu1 %1985 }
 0x98b   : > { %8940 = vrcp.f32 %v1986_v34  ;;  %v2057_v51 = vpop.permute.xlu0 %2056 }
 0x98c   : > { %v2062_v35 = vsel %vm1128_vm9, %v2057_v51, 0 }
 0x98d   : > { %8203 = vmatpush3.bf16.msra.mxu1 %v2062_v35 }
 0x98e   : > { %8214 = vmatprep.subr.bf16.mxu1 %v9335_v13  ;;  %v2105_v56 = vpop.permute.xlu1 %2104 }
 0x98f   : > { %v2110_v50 = vsel %vm1128_vm9, %v2105_v56, 0 }
 0x992   : > { %v2153_v40 = vpop.permute.xlu1 %2152 }
 0x993   : > { %v2158_v49 = vsel %vm1128_vm9, %v2153_v40, 0 }
 0x995   : > { %v8939_v37 = vpop.eup %8938 }
 0x996   : > { %v2001_v39 = vmul.f32 %v8939_v37, %v8931_v8 }
 0x998   : > { %v8941_v47 = vpop.eup %8940  ;;  %v2005_v48 = vpack.c.bf16 %v2001_v39, %v2001_v39 }
 0x999   : > { %v2000_v58 = vmul.f32 %v8941_v47, %v8933_v10 }
 0x99a   : > { %8205 = vmatmul.mubr.msk.bf16.vlgmr.msra.gmra.mxu1 %vm881_vm8, %v2005_v48 }
 0x99b   : > { %8215 = vmatpush3.bf16.msra.mxu1 %v2158_v49  ;;  %v2004_v60 = vpack.c.bf16 %v2000_v58, %v2000_v58  ;;  %8216 = vmatprep.mubr.msk.bf16.mxu1 %vm9336_vm7, %v9335_v13 }
 0x99c   : > { %8226 = vmatprep.subr.bf16.mxu1 %v9335_v13 }
 0x99d   : > { %8199 = vmatmul.mubr.msk.bf16.vlgmr.msra.gmra.mxu0 %vm881_vm8, %v2004_v60 }
 0x99e   : > { %8209 = vmatpush3.bf16.msra.mxu0 %v2110_v50  ;;  %8210 = vmatprep.mubr.msk.bf16.mxu0 %vm9336_vm7, %v9335_v13 }
 0x99f   : > { %8220 = vmatprep.subr.bf16.mxu0 %v9335_v13 }
 0x9bc   : > { %v1995_v52 = vpop.xlane.xlu0 %1994 }
 0x9bd   : > { %8942 = vrcp.f32 %v1995_v52 }
 0x9c0   : > { %v2203_v6 = vpop.permute.xlu0 %2202 }
 0x9c1   : > { %v2208_v18 = vsel %vm881_vm8, %v2203_v6, 0 }
 0x9c3   : > { %v1992_v53 = vpop.xlane.xlu1 %1991 }
 0x9c4   : > { %8944 = vrcp.f32 %v1992_v53  ;;  %v2201_v15 = vpop.permute.xlu0 %2200 }
 0x9c7   : > { %v2253_v55 = vpop.permute.xlu1 %2252 }
 0x9c8   : > { %v2258_v8 = vsel %vm881_vm8, %v2253_v55, 0  ;;  %v2303_v20 = vpop.permute.xlu0 %2302 }
 0x9c9   : > { %v2308_v21 = vsel %vm881_vm8, %v2303_v20, 0 }
 0x9ca   : > { %v8943_v61 = vpop.eup %8942 }
 0x9cb   : > { %v2003_v62 = vmul.f32 %v8943_v61, %v8935_v27  ;;  %v2251_v0 = vpop.permute.xlu1 %2250 }
 0x9cc   : > { %v2301_v30 = vpop.permute.xlu0 %2300 }
 0x9cd   : > { %v2007_v63 = vpack.c.bf16 %v2003_v62, %v2003_v62 }
 0x9cf   : > { %8217 = vmatmul.mubr.msk.bf16.vlgmr.msra.gmra.mxu1 %vm881_vm8, %v2007_v63  ;;  %v2353_v14 = vpop.permute.xlu1 %2352 }
 0x9d0   : > { %8227 = vmatpush3.bf16.xpose.msra.mxu1 %v2258_v8  ;;  %8228 = vmatprep.mubr.msk.bf16.mxu1 %vm9336_vm7, %v9335_v13  ;;  %v2358_v19 = vsel %vm881_vm8, %v2353_v14, 0 }
 0x9d1   : > { %v8945_v9 = vpop.eup %8944  ;;  %8238 = vmatprep.subr.bf16.mxu1 %v9335_v13 }
 0x9d2   : > { %v2002_v10 = vmul.f32 %v8945_v9, %v8937_v31 }
 0x9d3   : > { %v2351_v27 = vpop.permute.xlu1 %2350 }
 0x9d4   : > { %v2006_v7 = vpack.c.bf16 %v2002_v10, %v2002_v10 }
 0x9d6   : > { %8211 = vmatmul.mubr.msk.bf16.vlgmr.msra.gmra.mxu0 %vm881_vm8, %v2006_v7 }
 0x9d7   : > { %8221 = vmatpush3.bf16.xpose.msra.mxu0 %v2208_v18  ;;  %8229 = vmatmul.mubr.msk.bf16.vlgmr.msra.gmra.mxu1 %vm881_vm8, %v2251_v0 }
 0x9d8   : > { %8239 = vmatpush3.bf16.xpose.msra.mxu1 %v2358_v19  ;;  %8222 = vmatprep.mubr.msk.bf16.mxu0 %vm9336_vm7, %v9335_v13 }
 0x9d9   : > { %8232 = vmatprep.subr.bf16.mxu0 %v9335_v13  ;;  %8240 = vmatprep.mubr.msk.bf16.mxu1 %vm9336_vm7, %v9335_v13 }
 0x9da   : > { %8250 = vmatprep.subr.bf16.mxu1 %v9335_v13 }
 0x9de   : > { %8223 = vmatmul.mubr.msk.bf16.vlgmr.msra.gmra.mxu0 %vm881_vm8, %v2201_v15 }
 0x9df   : > { %8233 = vmatpush3.bf16.xpose.msra.mxu0 %v2308_v21  ;;  %8241 = vmatmul.mubr.msk.bf16.vlgmr.msra.gmra.mxu1 %vm881_vm8, %v2351_v27 }
 0x9e0   : > { %8234 = vmatprep.mubr.msk.bf16.mxu0 %vm9336_vm7, %v9335_v13  ;;  %8244 = vmatprep.subr.bf16.mxu0 %v9335_v13 }
 0x9e1   : > { %8252 = vmatprep.mubr.msk.bf16.mxu1 %vm9336_vm7, %v9335_v13 }
 0x9e6   : > { %8235 = vmatmul.mubr.msk.bf16.vlgmr.msra.gmra.mxu0 %vm881_vm8, %v2301_v30 }
 0x9e7   : > { %8246 = vmatprep.mubr.msk.bf16.mxu0 %vm9336_vm7, %v9335_v13 }
 0xa5a   : > { %v9993_v31 = vpop.f32.mrf.mxu1 }
 0xa5c   : > { %v8206_v32 = vpop.f32.mrf.mxu1 }
 0xa5d   : > { %v9995_v33 = vpop.f32.mrf.mxu0 }
 0xa5e   : > { %v8808_v34 = vpack.i.bf16 %v9993_v31, %v9995_v33  ;;  %v2101_v51 = vpop.f32.mrf.mxu1 }
 0xa5f   : > { %v8200_v35 = vpop.f32.mrf.mxu0 }
 0xa60   : > { %v8207_v56 = vpop.f32.mrf.mxu1 }
 0xa61   : > { %v2053_v37 = vpop.f32.mrf.mxu0 }
 0xa63   : > { %v8201_v39 = vpop.f32.mrf.mxu0 }
 0xa8f   : > { %v9999_v40 = vpop.f32.mrf.mxu1 }
 0xa91   : > { %v8218_v47 = vpop.f32.mrf.mxu1 }
 0xa93   : > { %v2197_v48 = vpop.f32.mrf.mxu1 }
 0xa95   : > { %v8219_v58 = vpop.f32.mrf.mxu1 }
 0xa96   : > { %v10001_v49 = vpop.f32.mrf.mxu0 }
 0xa97   : > { %v8813_v60 = vpack.i.bf16 %v9999_v40, %v10001_v49  ;;  %v2294_v50 = vpop.f32.mrf.mxu1 }
 0xa98   : > { %v2295_v52 = vadd.f32 %v2294_v50, %v9738_v17  ;;  %v8212_v53 = vpop.f32.mrf.mxu0 }
 0xa99   : > { %v8230_v55 = vpop.f32.mrf.mxu1 }
 0xa9a   : > { %v2403_v61 = vsel %vm881_vm8, %v2295_v52, -inf  ;;  %v2149_v62 = vpop.f32.mrf.mxu0 }
 0xa9b   : > { %2404 = vmax.xlane.f32.xlu1 %v2403_v61  ;;  %v2297_v63 = vpop.f32.mrf.mxu1 }
 0xa9c   : > { %v8213_v0 = vpop.f32.mrf.mxu0 }
 0xa9d   : > { %v8231_v6 = vpop.f32.mrf.mxu1 }
 0xa9e   : > { %v2244_v8 = vpop.f32.mrf.mxu0 }
 0xa9f   : > { %v2245_v9 = vadd.f32 %v2244_v8, %v9734_v12  ;;  %v2394_v10 = vpop.f32.mrf.mxu1 }
 0xaa0   : > { %v8224_v14 = vpop.f32.mrf.mxu0  ;;  %v2395_v51 = vadd.f32 %v2394_v10, %v9748_v36 }
 0xaa1   : > { %v8242_v7 = vpop.f32.mrf.mxu1  ;;  %v2400_v15 = vsel %vm881_vm8, %v2245_v9, -inf }
 0xaa2   : > { %2401 = vmax.xlane.f32.xlu0 %v2400_v15  ;;  %v2247_v18 = vpop.f32.mrf.mxu0  ;;  %v2409_v39 = vsel %vm881_vm8, %v2395_v51, -inf }
 0xaa3   : > { %v2397_v19 = vpop.f32.mrf.mxu1 }
 0xaa4   : > { %v8225_v20 = vpop.f32.mrf.mxu0 }
 0xaa5   : > { %v8243_v21 = vpop.f32.mrf.mxu1 }
 0xaa6   : > { %v2344_v27 = vpop.f32.mrf.mxu0 }
 0xaa7   : > { %v2345_v30 = vadd.f32 %v2344_v27, %v9743_v24 }
 0xaa8   : > { %v8236_v32 = vpop.f32.mrf.mxu0 }
 0xaa9   : > { %v2406_v35 = vsel %vm881_vm8, %v2345_v30, -inf }
 0xaaa   : > { %2407 = vmax.xlane.f32.xlu0 %v2406_v35  ;;  %v2347_v56 = vpop.f32.mrf.mxu0 }
 0xaac   : > { %2448 = vrot.lane.b32.xlu1 %v9676_v38, %s11113_s28  ;;  %v8237_v37 = vpop.f32.mrf.mxu0 }
 0xaad   : > { %v8860_v37 = vld [vmem:[%s11078_s5 + $0x8] sm:$0xff]  }
 0xaae   : > { %2410 = vmax.xlane.f32.xlu0 %v2409_v39 }
 0xb24   : > { %v2405_v47 = vpop.xlane.xlu1 %2404 }
 0xb25   : > { %v2413_v48 = vsub.f32 %v2295_v52, %v2405_v47 }
 0xb27   : > { %v2418_v58 = vmul.f32 1.442695, %v2413_v48 }
 0xb28   : > { %v2449_v50 = vpop.permute.xlu1 %2448 }
 0xb29   : > { %8946 = vpow2.f32 %v2418_v58  ;;  %v2454_v53 = vsel %vm1128_vm9, %v2449_v50, 0  ;;  %v8861_v50 = vld [vmem:[%s11078_s5] sm:$0xff]  }
 0xb2a   : > { %8245 = vmatpush3.bf16.msra.mxu0 %v2454_v53 }
 0xb2b   : > { %v2402_v55 = vpop.xlane.xlu0 %2401  ;;  %8256 = vmatprep.subr.bf16.mxu0 %v9335_v13 }
 0xb2c   : > { %v2412_v61 = vsub.f32 %v2245_v9, %v2402_v55 }
 0xb2e   : > { %v2416_v62 = vmul.f32 1.442695, %v2412_v61 }
 0xb30   : > { %8948 = vpow2.f32 %v2416_v62 }
 0xb33   : > { %v2408_v63 = vpop.xlane.xlu0 %2407 }
 0xb34   : > { %v2414_v38 = vsub.f32 %v2345_v30, %v2408_v63 }
 0xb36   : > { %v8947_v0 = vpop.eup %8946  ;;  %v2420_v6 = vmul.f32 1.442695, %v2414_v38 }
 0xb37   : > { %v2427_v8 = vsel %vm881_vm8, %v8947_v0, 0.0  ;;  %v2411_v10 = vpop.xlane.xlu0 %2410 }
 0xb38   : > { %8950 = vpow2.f32 %v2420_v6  ;;  %2428 = vadd.xlane.f32.xlu0 %v2427_v8  ;;  %v2415_v52 = vsub.f32 %v2395_v51, %v2411_v10 }
 0xb3a   : > { %v2422_v14 = vmul.f32 1.442695, %v2415_v52 }
 0xb3c   : > { %8952 = vpow2.f32 %v2422_v14 }
 0xb3d   : > { %v8949_v7 = vpop.eup %8948 }
 0xb3e   : > { %v2424_v15 = vsel %vm881_vm8, %v8949_v7, 0.0 }
 0xb3f   : > { %2425 = vadd.xlane.f32.xlu1 %v2424_v15 }
 0xb45   : > { %v8951_v18 = vpop.eup %8950 }
 0xb46   : > { %v2430_v9 = vsel %vm881_vm8, %v8951_v18, 0.0 }
 0xb47   : > { %2431 = vadd.xlane.f32.xlu1 %v2430_v9 }
 0xb49   : > { %v8953_v19 = vpop.eup %8952 }
 0xb4a   : > { %v2433_v20 = vsel %vm881_vm8, %v8953_v19, 0.0 }
 0xb4b   : > { %2434 = vadd.xlane.f32.xlu0 %v2433_v20 }
 0xb58   : > { %2544 = vrot.lane.b32.xlu1 %v9680_v41, %s11113_s28 }
 0xb5c   : > { %2592 = vrot.lane.b32.xlu1 %v9688_v44, %s11113_s28 }
 0xb60   : > { %8804 = vrot.lane.b32.xlu1 %v8803_v59, %s11109_s11 }
 0xb61   : > { %2496 = vrot.lane.b32.xlu0 %v9682_v43, %s11113_s28  ;;  %s11170_s28 = smov 16  }
 0xb64   : > { %8814 = vrot.lane.b32.xlu1 %v8813_v60, %s11107_s9 }
 0xb65   : > { %8799 = vrot.lane.b32.xlu0 %v8798_v46, %s11109_s11  ;;  %s11111_s11 = smov 24  }
 0xb69   : > { %8809 = vrot.lane.b32.xlu0 %v8808_v34, %s11107_s9  ;;  %s11174_s9 = scalar_lea.vmem [#allocation7], %s9603_s27 }
 0xbc1   : > { %v2429_v41 = vpop.xlane.xlu0 %2428 }
 0xbc2   : > { %8954 = vrcp.f32 %v2429_v41 }
 0xbc8   : > { %v2426_v44 = vpop.xlane.xlu1 %2425 }
 0xbc9   : > { %8956 = vrcp.f32 %v2426_v44 }
 0xbcf   : > { %v8955_v54 = vpop.eup %8954 }
 0xbd0   : > { %v2432_v43 = vpop.xlane.xlu1 %2431  ;;  %v2441_v60 = vmul.f32 %v8955_v54, %v8947_v0 }
 0xbd1   : > { %8958 = vrcp.f32 %v2432_v43 }
 0xbd2   : > { %v2445_v33 = vpack.c.bf16 %v2441_v60, %v2441_v60 }
 0xbd4   : > { %v2545_v57 = vpop.permute.xlu1 %2544  ;;  %v2435_v59 = vpop.xlane.xlu0 %2434 }
 0xbd5   : > { %8960 = vrcp.f32 %v2435_v59  ;;  %v2550_v31 = vsel %vm1128_vm9, %v2545_v57, 0 }
 0xbd6   : > { %v8957_v40 = vpop.eup %8956 }
 0xbd7   : > { %v2440_v49 = vmul.f32 %v8957_v40, %v8949_v7 }
 0xbd8   : > { %v2497_v42 = vpop.permute.xlu0 %2496  ;;  %v2593_v21 = vpop.permute.xlu1 %2592 }
 0xbd9   : > { %v2502_v45 = vsel %vm1128_vm9, %v2497_v42, 0  ;;  %v2444_v46 = vpack.c.bf16 %v2440_v49, %v2440_v49  ;;  %v2598_v34 = vsel %vm1128_vm9, %v2593_v21, 0 }
 0xbda   : > { %8251 = vmatpush3.bf16.msra.mxu1 %v2502_v45 }
 0xbdb   : > { %8247 = vmatmul.mubr.msk.bf16.vlgmr.msra.gmra.mxu0 %vm881_vm8, %v2444_v46  ;;  %8262 = vmatprep.subr.bf16.mxu1 %v9335_v13 }
 0xbdc   : > { %8257 = vmatpush3.bf16.msra.mxu0 %v2550_v31  ;;  %8258 = vmatprep.mubr.msk.bf16.mxu0 %vm9336_vm7, %v9335_v13  ;;  %v8805_v43 = vpop.permute.xlu1 %8804 }
 0xbdd   : > { %8253 = vmatmul.mubr.msk.bf16.vlgmr.msra.gmra.mxu1 %vm881_vm8, %v2445_v33  ;;  %8268 = vmatprep.subr.bf16.mxu0 %v8860_v37  ;;  %v8807_v33 = vunpack.i.h.bf16 %v8805_v43 }
 0xbde   : > { %v8959_v27 = vpop.eup %8958  ;;  %8263 = vmatpush3.bf16.msra.mxu1 %v2598_v34  ;;  %8264 = vmatprep.mubr.msk.bf16.mxu1 %vm9336_vm7, %v9335_v13  ;;  %v8806_v34 = vunpack.i.l.bf16 %v8805_v43 }
 0xbdf   : > { %v2442_v30 = vmul.f32 %v8959_v27, %v8951_v18  ;;  %v8800_v18 = vpop.permute.xlu0 %8799 }
 0xbe0   : > { %v8801_v20 = vunpack.i.l.bf16 %v8800_v18  ;;  %v8815_v31 = vpop.permute.xlu1 %8814 }
 0xbe1   : > { %v2446_v51 = vpack.c.bf16 %v2442_v30, %v2442_v30  ;;  %v8816_v27 = vunpack.i.l.bf16 %v8815_v31 }
 0xbe2   : > { %v8961_v32 = vpop.eup %8960  ;;  %v2688_v59 = vsel %vm881_vm8, %v9821_v11, %v8801_v20  ;;  %v2691_v11 = vsel %vm881_vm8, %v9827_v23, %v8807_v33  ;;  %v8864_v33 = vld [vmem:[%s11080_s7 + $0x18] sm:$0xff]  }
 0xbe3   : > { %8259 = vmatmul.mubr.msk.bf16.vlgmr.msra.gmra.mxu0 %vm881_vm8, %v2446_v51  ;;  %v2443_v35 = vmul.f32 %v8961_v32, %v8953_v19  ;;  %v8810_v9 = vpop.permute.xlu0 %8809  ;;  %v8802_v19 = vunpack.i.h.bf16 %v8800_v18  ;;  %v2690_v32 = vsel %vm881_vm8, %v9825_v22, %v8806_v34 }
 0xbe4   : > { %8269 = vmatpush3.bf16.msra.mxu0 %v8860_v37  ;;  %v8812_v41 = vunpack.i.h.bf16 %v8810_v9  ;;  %v8811_v44 = vunpack.i.l.bf16 %v8810_v9 }
 0xbe5   : > { %v2447_v56 = vpack.c.bf16 %v2443_v35, %v2443_v35  ;;  %8270 = vmatprep.subr.bf16.mxu0 %v8861_v50  ;;  %v2689_v57 = vsel %vm881_vm8, %v9823_v16, %v8802_v19  ;;  %v8817_v16 = vunpack.i.h.bf16 %v8815_v31  ;;  %v8863_v31 = vld [vmem:[%s11079_s6] sm:$0xff]  }
 0xbe6   : > { %v2693_v60 = vsel %vm2692_vm10, %v2688_v59, %v8811_v44  ;;  %v2694_v42 = vsel %vm2692_vm10, %v2689_v57, %v8812_v41 }
 0xbe7   : > { %8265 = vmatmul.mubr.msk.bf16.vlgmr.msra.gmra.mxu1 %vm881_vm8, %v2447_v56  ;;  %v2695_v56 = vsel %vm2692_vm10, %v2690_v32, %v8816_v27  ;;  %v2696_v37 = vsel %vm2692_vm10, %v2691_v11, %v8817_v16 }
 0xbe8   : > { %8271 = vmatpush3.bf16.msra.mxu0 %v8861_v50 }
 0xbe9   : > { %8284 = vmatprep.subr.bf16.mxu0 %v8864_v33 }
 0xc9b   : > { %v2490_v39 = vpop.f32.mrf.mxu0 }
 0xc9d   : > { %v8248_v47 = vpop.f32.mrf.mxu0  ;;  %v2538_v48 = vpop.f32.mrf.mxu1 }
 0xc9e   : > { %v8818_v58 = vpack.i.bf16 %v2538_v48, %v2490_v39 }
 0xc9f   : > { %v2493_v53 = vpop.f32.mrf.mxu0  ;;  %v8254_v55 = vpop.f32.mrf.mxu1 }
 0xca0   : > { %8819 = vrot.lane.b32.xlu0 %v8818_v58, %s11111_s11  ;;  %v10081_v58 = vld [vmem:[#allocation8] sm:$0xff] }
 0xca1   : > { %v8249_v61 = vpop.f32.mrf.mxu0  ;;  %v2541_v62 = vpop.f32.mrf.mxu1  ;;  %v2707_v23 = vrot.slane %v10081_v58, %v9636_v4 }
 0xca3   : > { %v8255_v63 = vpop.f32.mrf.mxu1  ;;  %v2586_v38 = vpop.f32.mrf.mxu0 }
 0xca5   : > { %v8260_v0 = vpop.f32.mrf.mxu0 }
 0xca7   : > { %v2589_v6 = vpop.f32.mrf.mxu0  ;;  %v2634_v8 = vpop.f32.mrf.mxu1 }
 0xca8   : > { %v8823_v10 = vpack.i.bf16 %v2634_v8, %v2586_v38 }
 0xca9   : > { %v8261_v52 = vpop.f32.mrf.mxu0  ;;  %v8266_v14 = vpop.f32.mrf.mxu1 }
 0xcaa   : > { %8824 = vrot.lane.b32.xlu1 %v8823_v10, %s11111_s11  ;;  %s11179_s11 = sld [smem:[#allocation29_spill]] }
 0xcab   : > { %v2637_v7 = vpop.f32.mrf.mxu1 }
 0xcad   : > { %v8267_v15 = vpop.f32.mrf.mxu1 }
 0xd12   : > { %v8820_v54 = vpop.permute.xlu0 %8819 }
 0xd13   : > { %v8822_v40 = vunpack.i.h.bf16 %v8820_v54  ;;  %v8821_v49 = vunpack.i.l.bf16 %v8820_v54 }
 0xd15   : > { %v2699_v45 = vsel %vm2697_vm11, %v2694_v42, %v8822_v40  ;;  %v2698_v46 = vsel %vm2697_vm11, %v2693_v60, %v8821_v49 }
 0xd16   : > { %v2702_v21 = vpack.c.bf16 %v2699_v45, %v2698_v46 }
 0xd18   : > { %8272 = vmatprep.mubr.msk.bf16.mxu0 %vm790_vm6, %v2702_v21  ;;  %v8862_v21 = vld [vmem:[%s11079_s6 + $0x8] sm:$0xff]  }
 0xd19   : > { %8276 = vmatprep.subr.bf16.mxu1 %v8862_v21 }
 0xd1a   : > { %8277 = vmatpush3.bf16.msra.mxu1 %v8862_v21 }
 0xd1b   : > { %8278 = vmatprep.subr.bf16.mxu1 %v8863_v31 }
 0xd1c   : > { %v8825_v30 = vpop.permute.xlu1 %8824 }
 0xd1d   : > { %v8827_v51 = vunpack.i.h.bf16 %v8825_v30  ;;  %v8826_v35 = vunpack.i.l.bf16 %v8825_v30 }
 0xd1e   : > { %8279 = vmatpush3.bf16.msra.mxu1 %v8863_v31 }
 0xd1f   : > { %v2701_v39 = vsel %vm2697_vm11, %v2696_v37, %v8827_v51  ;;  %v2700_v47 = vsel %vm2697_vm11, %v2695_v56, %v8826_v35 }
 0xd20   : > { %v2703_v48 = vpack.c.bf16 %v2701_v39, %v2700_v47 }
 0xd22   : > { %8273 = vmatmul.mubr.msk.bf16.vlgmr.msra.gmra.mxu0 %vm790_vm6, %v2703_v48  ;;  %v10107_v48 = vsub.s32 4, %v9627_v1 }
 0xd23   : > { %8285 = vmatpush3.bf16.msra.mxu0 %v8864_v33  ;;  %v2930_v33 = vrot.slane %v10081_v58, %v9639_v5 }
 0xde2   : > { %v8274_v50 = vpop.f32.mrf.mxu0 }
 0xde3   : > { %v2769_v53 = vadd.f32 %v8274_v50, %v2707_v23 }
 0xde4   : > { %v2760_v22 = vpop.f32.mrf.mxu0 }
 0xde5   : > { %v2761_v55 = vadd.f32 %v2760_v22, %v2707_v23  ;;  %v2777_v8 = vadd.f32 %v2769_v53, %v9666_v29  ;;  %v2835_v22 = vrot.slane %v10081_v58, %v10107_v48  ;;  %v10112_v53 = vsub.s32 5, %v9627_v1 }
 0xde6   : > { %v8275_v61 = vpop.f32.mrf.mxu0 }
 0xde7   : > { %v2775_v62 = vadd.f32 %v2761_v55, %v9659_v26  ;;  %v2772_v38 = vadd.f32 %v8275_v61, %v2707_v23  ;;  %v2785_v14 = vsel %vm790_vm6, %v2777_v8, 0.0 }
 0xde8   : > { %v2763_v63 = vpop.f32.mrf.mxu0 }
 0xde9   : > { %v2764_v0 = vadd.f32 %v2763_v63, %v2707_v23  ;;  %v2779_v6 = vsel %vm790_vm6, %v2775_v62, 0.0  ;;  %v2778_v7 = vadd.f32 %v9663_v28, %v2772_v38 }
 0xdea   : > { %2780 = vadd.xlane.f32.xlu0 %v2779_v6 }
 0xdeb   : > { %v2776_v10 = vadd.f32 %v9657_v25, %v2764_v0  ;;  %v2788_v26 = vsel %vm790_vm6, %v2778_v7, 0.0  ;;  %v2843_v0 = vrot.slane %v10081_v58, %v10112_v53 }
 0xded   : > { %v2782_v52 = vsel %vm790_vm6, %v2776_v10, 0.0 }
 0xdee   : > { %2783 = vadd.xlane.f32.xlu1 %v2782_v52  ;;  %2786 = vadd.xlane.f32.xlu0 %v2785_v14 }
 0xdf2   : > { %2789 = vadd.xlane.f32.xlu0 %v2788_v26 }
 0xe73   : > { %v2781_v15 = vpop.xlane.xlu0 %2780 }
 0xe74   : > { %v2792_v18 = vmul.f32 0.03125, %v2781_v15 }
 0xe76   : > { %v2796_v9 = vsub.f32 %v2775_v62, %v2792_v18 }
 0xe77   : > { %v2784_v19 = vpop.xlane.xlu1 %2783  ;;  %v2787_v20 = vpop.xlane.xlu0 %2786 }
 0xe78   : > { %v2793_v29 = vmul.f32 0.03125, %v2784_v19  ;;  %v2794_v41 = vmul.f32 0.03125, %v2787_v20  ;;  %v2800_v44 = vmul.f32 %v2796_v9, %v2796_v9  ;;  %v8865_v20 = vld [vmem:[%s11080_s7 + $0x10] sm:$0xff]  }
 0xe79   : > { %8286 = vmatprep.subr.bf16.mxu0 %v8865_v20 }
 0xe7a   : > { %v2797_v25 = vsub.f32 %v2776_v10, %v2793_v29  ;;  %v2798_v43 = vsub.f32 %v2777_v8, %v2794_v41  ;;  %v2804_v54 = vsel %vm790_vm6, %v2800_v44, 0.0  ;;  %8287 = vmatpush3.bf16.msra.mxu0 %v8865_v20  ;;  %v8866_v29 = vld [vmem:[%s11080_s7 + $0x8] sm:$0xff]   ;;  %v8867_v41 = vld [vmem:[%s11080_s7] sm:$0xff]  }
 0xe7b   : > { %2805 = vadd.xlane.f32.xlu1 %v2804_v54  ;;  %v2790_v57 = vpop.xlane.xlu0 %2789  ;;  %8288 = vmatprep.subr.bf16.mxu0 %v8866_v29 }
 0xe7c   : > { %v2795_v28 = vmul.f32 0.03125, %v2790_v57  ;;  %v2801_v59 = vmul.f32 %v2797_v25, %v2797_v25  ;;  %v2802_v40 = vmul.f32 %v2798_v43, %v2798_v43 }
 0xe7e   : > { %v2799_v49 = vsub.f32 %v2778_v7, %v2795_v28  ;;  %v2807_v60 = vsel %vm790_vm6, %v2801_v59, 0.0  ;;  %v2810_v42 = vsel %vm790_vm6, %v2802_v40, 0.0  ;;  %8289 = vmatpush3.bf16.msra.mxu0 %v8866_v29 }
 0xe7f   : > { %2808 = vadd.xlane.f32.xlu0 %v2807_v60  ;;  %2811 = vadd.xlane.f32.xlu1 %v2810_v42 }
 0xe80   : > { %v2803_v45 = vmul.f32 %v2799_v49, %v2799_v49  ;;  %8290 = vmatprep.subr.bf16.mxu0 %v8867_v41 }
 0xe82   : > { %v2813_v46 = vsel %vm790_vm6, %v2803_v45, 0.0  ;;  %8291 = vmatpush3.bf16.msra.mxu0 %v8867_v41 }
 0xe83   : > { %2814 = vadd.xlane.f32.xlu0 %v2813_v46  ;;  %8310 = vmatprep.subr.bf16.mxu0 %v9335_v13 }
 0xf04   : > { %v2806_v34 = vpop.xlane.xlu1 %2805 }
 0xf05   : > { %v2816_v16 = vmul.f32 0.03125, %v2806_v34 }
 0xf07   : > { %v2820_v27 = vadd.f32 1e-05, %v2816_v16 }
 0xf08   : > { %v2812_v30 = vpop.xlane.xlu1 %2811  ;;  %v2809_v11 = vpop.xlane.xlu0 %2808 }
 0xf09   : > { %8962 = vrsqrt.f32 %v2820_v27  ;;  %v2818_v32 = vmul.f32 0.03125, %v2812_v30  ;;  %v2817_v51 = vmul.f32 0.03125, %v2809_v11 }
 0xf0b   : > { %v2822_v35 = vadd.f32 1e-05, %v2818_v32  ;;  %v2821_v56 = vadd.f32 1e-05, %v2817_v51 }
 0xf0c   : > { %v2815_v37 = vpop.xlane.xlu0 %2814 }
 0xf0d   : > { %8964 = vrsqrt.f32 %v2822_v35  ;;  %v2819_v39 = vmul.f32 0.03125, %v2815_v37 }
 0xf0e   : > { %8966 = vrsqrt.f32 %v2821_v56 }
 0xf0f   : > { %v2823_v47 = vadd.f32 1e-05, %v2819_v39 }
 0xf11   : > { %8968 = vrsqrt.f32 %v2823_v47 }
 0xf16   : > { %v8963_v23 = vpop.eup %8962 }
 0xf17   : > { %v2828_v50 = vmul.f32 %v8963_v23, %v2796_v9 }
 0xf19   : > { %v2836_v38 = vmul.f32 %v2835_v22, %v2828_v50 }
 0xf1a   : > { %v8965_v55 = vpop.eup %8964 }
 0xf1b   : > { %v8967_v61 = vpop.eup %8966  ;;  %v2830_v62 = vmul.f32 %v8965_v55, %v2798_v43  ;;  %v2844_v14 = vadd.f32 %v2843_v0, %v2836_v38 }
 0xf1c   : > { %v2829_v63 = vmul.f32 %v8967_v61, %v2797_v25  ;;  %v2853_v25 = vrot.slane %v10081_v58, %v9633_v3 }
 0xf1d   : > { %v2838_v52 = vmul.f32 %v2835_v22, %v2830_v62 }
 0xf1e   : > { %v8969_v6 = vpop.eup %8968  ;;  %v2837_v8 = vmul.f32 %v2835_v22, %v2829_v63 }
 0xf1f   : > { %v2831_v10 = vmul.f32 %v8969_v6, %v2799_v49  ;;  %v2846_v18 = vadd.f32 %v2843_v0, %v2838_v52 }
 0xf20   : > { %v2845_v7 = vadd.f32 %v2843_v0, %v2837_v8 }
 0xf21   : > { %v2839_v26 = vmul.f32 %v2835_v22, %v2831_v10 }
 0xf22   : > { %v2848_v15 = vpack.c.bf16 %v2845_v7, %v2844_v14 }
 0xf23   : > { %v2847_v9 = vadd.f32 %v2843_v0, %v2839_v26 }
 0xf24   : > { %8280 = vmatprep.mubr.msk.bf16.mxu1 %vm790_vm6, %v2848_v15 }
 0xf25   : > { %v2849_v19 = vpack.c.bf16 %v2847_v9, %v2846_v18 }
 0xf27   : > { %8281 = vmatmul.mubr.msk.bf16.vlgmr.msra.gmra.mxu1 %vm790_vm6, %v2849_v19 }
 0xfe7   : > { %v8282_v44 = vpop.f32.mrf.mxu1 }
 0xfe8   : > { %v2915_v59 = vadd.f32 %v8282_v44, %v2853_v25 }
 0xfe9   : > { %v2906_v43 = vpop.f32.mrf.mxu1 }
 0xfea   : > { %v2907_v57 = vadd.f32 %v2906_v43, %v2853_v25  ;;  %v2923_v46 = vmax.f32 %v2915_v59, 0.0  ;;  %v8869_v43 = vld [vmem:[%s11166_s4 + $0x10] sm:$0xff]  }
 0xfeb   : > { %v8283_v54 = vpop.f32.mrf.mxu1 }
 0xfec   : > { %v2918_v28 = vadd.f32 %v8283_v54, %v2853_v25  ;;  %v2921_v42 = vmax.f32 %v2907_v57, 0.0 }
 0xfed   : > { %v2909_v40 = vpop.f32.mrf.mxu1 }
 0xfee   : > { %v2910_v49 = vadd.f32 %v2909_v40, %v2853_v25  ;;  %v2924_v60 = vmax.f32 %v2918_v28, 0.0  ;;  %v8868_v25 = vld [vmem:[%s11166_s4 + $0x18] sm:$0xff]   ;;  %s11182_s4 = smov 96  }
 0xfef   : > { %8296 = vmatprep.subr.bf16.mxu1 %v8868_v25 }
 0xff0   : > { %v2922_v45 = vmax.f32 %v2910_v49, 0.0  ;;  %v2926_v31 = vpack.c.bf16 %v2924_v60, %v2923_v46  ;;  %8297 = vmatpush3.bf16.msra.mxu1 %v8868_v25 }
 0xff1   : > { %8298 = vmatprep.subr.bf16.mxu1 %v8869_v43 }
 0xff2   : > { %v2925_v21 = vpack.c.bf16 %v2922_v45, %v2921_v42 }
 0xff4   : > { %8292 = vmatprep.mubr.msk.bf16.mxu0 %vm2955_vm12, %v2925_v21  ;;  %8299 = vmatpush3.bf16.msra.mxu1 %v8869_v43 }
 0xff5   : > { %8293 = vmatmul.mubr.msk.bf16.vlgmr.msra.gmra.mxu0 %vm2955_vm12, %v2926_v31  ;;  %8304 = vmatprep.subr.bf16.mxu1 %v9335_v13 }
 0xff6   : > { %8312 = vmatprep.mubr.msk.bf16.mxu0 %vm9336_vm7, %v9335_v13 }
0x10b5   : > { %v8294_v34 = vpop.f32.mrf.mxu0 }
0x10b6   : > { %v3005_v27 = vadd.f32 %v8294_v34, %v2930_v33 }
0x10b7   : > { %v2996_v16 = vpop.f32.mrf.mxu0 }
0x10b8   : > { %v2997_v30 = vadd.f32 %v2996_v16, %v2930_v33  ;;  %v3013_v39 = vadd.f32 %v3005_v27, %v2846_v18 }
0x10b9   : > { %v8295_v11 = vpop.f32.mrf.mxu0 }
0x10ba   : > { %v3011_v32 = vadd.f32 %v2997_v30, %v2844_v14  ;;  %v3008_v35 = vadd.f32 %v8295_v11, %v2930_v33  ;;  %v3021_v22 = vsel %vm790_vm6, %v3013_v39, 0.0  ;;  %v10157_v30 = vsub.s32 7, %v9627_v1 }
0x10bb   : > { %v2999_v51 = vpop.f32.mrf.mxu0 }
0x10bc   : > { %v3000_v56 = vadd.f32 %v2999_v51, %v2930_v33  ;;  %v3015_v37 = vsel %vm790_vm6, %v3011_v32, 0.0  ;;  %v3014_v23 = vadd.f32 %v3008_v35, %v2847_v9  ;;  %v10152_v33 = vsub.s32 6, %v9627_v1 }
0x10bd   : > { %3016 = vadd.xlane.f32.xlu1 %v3015_v37 }
0x10be   : > { %v3012_v47 = vadd.f32 %v3000_v56, %v2845_v7  ;;  %v3024_v55 = vsel %vm790_vm6, %v3014_v23, 0.0  ;;  %v3070_v27 = vrot.slane %v10081_v58, %v10152_v33  ;;  %v3078_v56 = vrot.slane %v10081_v58, %v10157_v30 }
0x10c0   : > { %v3018_v50 = vsel %vm790_vm6, %v3012_v47, 0.0 }
0x10c1   : > { %3019 = vadd.xlane.f32.xlu0 %v3018_v50  ;;  %3022 = vadd.xlane.f32.xlu1 %v3021_v22 }
0x10c5   : > { %3025 = vadd.xlane.f32.xlu0 %v3024_v55 }
0x1146   : > { %v3017_v61 = vpop.xlane.xlu1 %3016 }
0x1147   : > { %v3027_v62 = vmul.f32 0.03125, %v3017_v61 }
0x1149   : > { %v3031_v63 = vsub.f32 %v3011_v32, %v3027_v62 }
0x114a   : > { %v3020_v38 = vpop.xlane.xlu0 %3019  ;;  %v3023_v0 = vpop.xlane.xlu1 %3022 }
0x114b   : > { %v3028_v6 = vmul.f32 0.03125, %v3020_v38  ;;  %v3029_v8 = vmul.f32 0.03125, %v3023_v0  ;;  %v3035_v10 = vmul.f32 %v3031_v63, %v3031_v63  ;;  %v3108_v38 = vld [vmem:[#allocation8 + $0x8] sm:$0xff] }
0x114d   : > { %v3032_v52 = vsub.f32 %v3012_v47, %v3028_v6  ;;  %v3033_v14 = vsub.f32 %v3013_v39, %v3029_v8  ;;  %v3039_v7 = vsel %vm790_vm6, %v3035_v10, 0.0  ;;  %v3114_v6 = vrot.slane %v3108_v38, %v9630_v2 }
0x114e   : > { %v3026_v26 = vpop.xlane.xlu0 %3025  ;;  %3040 = vadd.xlane.f32.xlu1 %v3039_v7 }
0x114f   : > { %v3030_v15 = vmul.f32 0.03125, %v3026_v26  ;;  %v3036_v18 = vmul.f32 %v3032_v52, %v3032_v52  ;;  %v3037_v9 = vmul.f32 %v3033_v14, %v3033_v14 }
0x1151   : > { %v3034_v19 = vsub.f32 %v3014_v23, %v3030_v15  ;;  %v3042_v20 = vsel %vm790_vm6, %v3036_v18, 0.0  ;;  %v3045_v29 = vsel %vm790_vm6, %v3037_v9, 0.0 }
0x1152   : > { %3043 = vadd.xlane.f32.xlu0 %v3042_v20  ;;  %3046 = vadd.xlane.f32.xlu1 %v3045_v29 }
0x1153   : > { %v3038_v41 = vmul.f32 %v3034_v19, %v3034_v19 }
0x1155   : > { %v3048_v44 = vsel %vm790_vm6, %v3038_v41, 0.0 }
0x1156   : > { %3049 = vadd.xlane.f32.xlu0 %v3048_v44 }
0x11d7   : > { %v3041_v54 = vpop.xlane.xlu1 %3040 }
0x11d8   : > { %v3051_v57 = vmul.f32 0.03125, %v3041_v54 }
0x11da   : > { %v3055_v28 = vadd.f32 1e-05, %v3051_v57 }
0x11db   : > { %v3044_v59 = vpop.xlane.xlu0 %3043  ;;  %v3047_v40 = vpop.xlane.xlu1 %3046 }
0x11dc   : > { %8970 = vrsqrt.f32 %v3055_v28  ;;  %v3052_v49 = vmul.f32 0.03125, %v3044_v59  ;;  %v3053_v60 = vmul.f32 0.03125, %v3047_v40 }
0x11de   : > { %v3056_v42 = vadd.f32 1e-05, %v3052_v49  ;;  %v3057_v45 = vadd.f32 1e-05, %v3053_v60 }
0x11df   : > { %v3050_v46 = vpop.xlane.xlu0 %3049 }
0x11e0   : > { %8972 = vrsqrt.f32 %v3056_v42  ;;  %v3054_v21 = vmul.f32 0.03125, %v3050_v46 }
0x11e1   : > { %8974 = vrsqrt.f32 %v3057_v45 }
0x11e2   : > { %v3058_v31 = vadd.f32 1e-05, %v3054_v21 }
0x11e4   : > { %8976 = vrsqrt.f32 %v3058_v31 }
0x11e9   : > { %v8971_v34 = vpop.eup %8970 }
0x11ea   : > { %v3063_v16 = vmul.f32 %v8971_v34, %v3031_v63 }
0x11ec   : > { %v3071_v35 = vmul.f32 %v3070_v27, %v3063_v16 }
0x11ed   : > { %v8973_v11 = vpop.eup %8972 }
0x11ee   : > { %v8975_v32 = vpop.eup %8974  ;;  %v3064_v51 = vmul.f32 %v8973_v11, %v3032_v52  ;;  %v10161_v50 = vadd.f32 %v3078_v56, %v3071_v35 }
0x11ef   : > { %v3065_v37 = vmul.f32 %v8975_v32, %v3033_v14 }
0x11f0   : > { %v3072_v39 = vmul.f32 %v3070_v27, %v3064_v51 }
0x11f1   : > { %v8977_v47 = vpop.eup %8976  ;;  %v3073_v55 = vmul.f32 %v3070_v27, %v3065_v37 }
0x11f2   : > { %v3066_v23 = vmul.f32 %v8977_v47, %v3034_v19  ;;  %v10163_v22 = vadd.f32 %v3078_v56, %v3072_v39 }
0x11f3   : > { %v10168_v62 = vadd.f32 %v3078_v56, %v3073_v55 }
0x11f4   : > { %v3109_v1 = vpack.c.bf16 %v10163_v22, %v10161_v50  ;;  %v3074_v61 = vmul.f32 %v3070_v27, %v3066_v23 }
0x11f6   : > { %8300 = vmatprep.mubr.msk.bf16.mxu1 %vm790_vm6, %v3109_v1  ;;  %v10170_v63 = vadd.f32 %v3078_v56, %v3074_v61 }
0x11f8   : > { %v3110_v58 = vpack.c.bf16 %v10170_v63, %v10168_v62 }
0x11fa   : > { %8301 = vmatmul.mubr.msk.bf16.vlgmr.msra.gmra.mxu1 %vm790_vm6, %v3110_v58 }
0x11fb   : > { %8306 = vmatprep.mubr.msk.bf16.mxu1 %vm9336_vm7, %v9335_v13 }
0x12ba   : > { %v8302_v0 = vpop.f32.mrf.mxu1 }
0x12bb   : > { %v3176_v14 = vadd.f32 %v8302_v0, %v3114_v6 }
0x12bc   : > { %v3167_v8 = vpop.f32.mrf.mxu1 }
0x12bd   : > { %v3168_v10 = vadd.f32 %v3167_v8, %v3114_v6  ;;  %v10182_v18 = vpack.c.bf16 %v3176_v14, %v3176_v14  ;;  %v3184_v49 = vmul.f32 0.35355338, %v3176_v14 }
0x12be   : > { %v8303_v52 = vpop.f32.mrf.mxu1 }
0x12bf   : > { %v10178_v7 = vpack.c.bf16 %v3168_v10, %v3168_v10  ;;  %v3179_v9 = vadd.f32 %v8303_v52, %v3114_v6  ;;  %v3182_v44 = vmul.f32 0.35355338, %v3168_v10  ;;  %v10213_v45 = vpack.c.bf16 %v3184_v49, %v3184_v49 }
0x12c0   : > { %v3170_v26 = vpop.f32.mrf.mxu1 }
0x12c1   : > { %v3171_v15 = vadd.f32 %v3170_v26, %v3114_v6  ;;  %3195 = vrot.lane.b32.xlu1 %v10178_v7, %s11127_s23  ;;  %v10190_v20 = vpack.c.bf16 %v3179_v9, %v3179_v9  ;;  %v10197_v57 = vpack.c.bf16 %v3182_v44, %v3182_v44  ;;  %v3185_v46 = vmul.f32 0.35355338, %v3179_v9 }
0x12c3   : > { %v10184_v19 = vpack.c.bf16 %v3171_v15, %v3171_v15  ;;  %v3183_v28 = vmul.f32 0.35355338, %v3171_v15  ;;  %v10220_v21 = vpack.c.bf16 %v3185_v46, %v3185_v46 }
0x12c5   : > { %3244 = vrot.lane.b32.xlu0 %v10184_v19, %s11127_s23  ;;  %3293 = vrot.lane.b32.xlu1 %v10182_v18, %s11127_s23  ;;  %v10205_v60 = vpack.c.bf16 %v3183_v28, %v3183_v28 }
0x12c9   : > { %3342 = vrot.lane.b32.xlu1 %v10190_v20, %s11127_s23 }
0x1333   : > { %v3196_v29 = vpop.permute.xlu1 %3195 }
0x1334   : > { %v3201_v41 = vsel %vm881_vm8, %v3196_v29, 0 }
0x1335   : > { %8305 = vmatpush3.bf16.xpose.msra.mxu1 %v3201_v41 }
0x1336   : > { %8316 = vmatprep.subr.bf16.mxu1 %v9335_v13 }
0x1337   : > { %v3245_v25 = vpop.permute.xlu0 %3244  ;;  %v3294_v43 = vpop.permute.xlu1 %3293 }
0x1338   : > { %v3250_v54 = vsel %vm881_vm8, %v3245_v25, 0  ;;  %v3299_v59 = vsel %vm881_vm8, %v3294_v43, 0 }
0x1339   : > { %8311 = vmatpush3.bf16.xpose.msra.mxu0 %v3250_v54 }
0x133a   : > { %8322 = vmatprep.subr.bf16.mxu0 %v9335_v13 }
0x133b   : > { %v3343_v40 = vpop.permute.xlu1 %3342 }
0x133c   : > { %8307 = vmatmul.mubr.msk.bf16.vlgmr.msra.gmra.mxu1 %vm881_vm8, %v10197_v57  ;;  %v3348_v42 = vsel %vm881_vm8, %v3343_v40, 0 }
0x133d   : > { %8317 = vmatpush3.bf16.xpose.msra.mxu1 %v3299_v59  ;;  %8318 = vmatprep.mubr.msk.bf16.mxu1 %vm9336_vm7, %v9335_v13 }
0x133e   : > { %8328 = vmatprep.subr.bf16.mxu1 %v9335_v13 }
0x1340   : > { %8313 = vmatmul.mubr.msk.bf16.vlgmr.msra.gmra.mxu0 %vm881_vm8, %v10205_v60 }
0x1341   : > { %8323 = vmatpush3.bf16.xpose.msra.mxu0 %v3348_v42  ;;  %8324 = vmatprep.mubr.msk.bf16.mxu0 %vm9336_vm7, %v9335_v13 }
0x1342   : > { %8334 = vmatprep.subr.bf16.mxu0 %v9335_v13 }
0x1344   : > { %8319 = vmatmul.mubr.msk.bf16.vlgmr.msra.gmra.mxu1 %vm881_vm8, %v10213_v45 }
0x1345   : > { %8330 = vmatprep.mubr.msk.bf16.mxu1 %vm9336_vm7, %v9335_v13 }
0x1348   : > { %8325 = vmatmul.mubr.msk.bf16.vlgmr.msra.gmra.mxu0 %vm881_vm8, %v10220_v21 }
0x1349   : > { %8336 = vmatprep.mubr.msk.bf16.mxu0 %vm9336_vm7, %v9335_v13 }
0x13fc   : > { %v3237_v31 = vpop.f32.mrf.mxu1 }
0x13fd   : > { %v3238_v34 = vadd.f32 %v3237_v31, %v9734_v12 }
0x13fe   : > { %v8308_v16 = vpop.f32.mrf.mxu1 }
0x13ff   : > { %v3390_v27 = vsel %vm881_vm8, %v3238_v34, -inf }
0x1400   : > { %v3286_v11 = vpop.f32.mrf.mxu0  ;;  %3391 = vmax.xlane.f32.xlu0 %v3390_v27  ;;  %v3240_v32 = vpop.f32.mrf.mxu1 }
0x1401   : > { %v3287_v51 = vadd.f32 %v3286_v11, %v9738_v17 }
0x1402   : > { %v8309_v35 = vpop.f32.mrf.mxu1  ;;  %v8314_v56 = vpop.f32.mrf.mxu0 }
0x1403   : > { %v3393_v37 = vsel %vm881_vm8, %v3287_v51, -inf }
0x1404   : > { %v3289_v39 = vpop.f32.mrf.mxu0  ;;  %3394 = vmax.xlane.f32.xlu1 %v3393_v37  ;;  %v3335_v47 = vpop.f32.mrf.mxu1 }
0x1405   : > { %v3336_v23 = vadd.f32 %v3335_v47, %v9743_v24 }
0x1406   : > { %v8315_v55 = vpop.f32.mrf.mxu0  ;;  %v8320_v1 = vpop.f32.mrf.mxu1 }
0x1407   : > { %v3396_v61 = vsel %vm881_vm8, %v3336_v23, -inf }
0x1408   : > { %v3384_v58 = vpop.f32.mrf.mxu0  ;;  %3397 = vmax.xlane.f32.xlu0 %v3396_v61  ;;  %v3338_v38 = vpop.f32.mrf.mxu1 }
0x1409   : > { %v3385_v0 = vadd.f32 %v3384_v58, %v9748_v36 }
0x140a   : > { %v8321_v6 = vpop.f32.mrf.mxu1  ;;  %v8326_v8 = vpop.f32.mrf.mxu0 }
0x140b   : > { %v3399_v10 = vsel %vm881_vm8, %v3385_v0, -inf }
0x140c   : > { %v3387_v52 = vpop.f32.mrf.mxu0  ;;  %3400 = vmax.xlane.f32.xlu0 %v3399_v10 }
0x140e   : > { %v8327_v14 = vpop.f32.mrf.mxu0 }
0x1415   : > { %3438 = vrot.lane.b32.xlu1 %v10178_v7, %s11119_s1 }
0x1489   : > { %v3392_v26 = vpop.xlane.xlu0 %3391 }
0x148a   : > { %v3402_v15 = vsub.f32 %v3238_v34, %v3392_v26 }
0x148c   : > { %v3406_v9 = vmul.f32 1.442695, %v3402_v15 }
0x148d   : > { %v3395_v29 = vpop.xlane.xlu1 %3394 }
0x148e   : > { %8978 = vpow2.f32 %v3406_v9  ;;  %v3403_v41 = vsub.f32 %v3287_v51, %v3395_v29 }
0x1490   : > { %v3408_v44 = vmul.f32 1.442695, %v3403_v41 }
0x1491   : > { %v3439_v25 = vpop.permute.xlu1 %3438  ;;  %v3398_v49 = vpop.xlane.xlu0 %3397 }
0x1492   : > { %8980 = vpow2.f32 %v3408_v44  ;;  %v3444_v43 = vsel %vm1128_vm9, %v3439_v25, 0  ;;  %v3404_v46 = vsub.f32 %v3336_v23, %v3398_v49 }
0x1493   : > { %8329 = vmatpush3.bf16.msra.mxu1 %v3444_v43 }
0x1494   : > { %8340 = vmatprep.subr.bf16.mxu1 %v9335_v13  ;;  %v3410_v34 = vmul.f32 1.442695, %v3404_v46 }
0x1495   : > { %v3401_v42 = vpop.xlane.xlu0 %3400 }
0x1496   : > { %v3405_v31 = vsub.f32 %v3385_v0, %v3401_v42  ;;  %8982 = vpow2.f32 %v3410_v34 }
0x1498   : > { %v3412_v16 = vmul.f32 1.442695, %v3405_v31 }
0x149a   : > { %8984 = vpow2.f32 %v3412_v16 }
0x149b   : > { %v8979_v54 = vpop.eup %8978 }
0x149c   : > { %v3414_v28 = vsel %vm881_vm8, %v8979_v54, 0.0 }
0x149d   : > { %3415 = vadd.xlane.f32.xlu1 %v3414_v28 }
0x149f   : > { %v8981_v59 = vpop.eup %8980 }
0x14a0   : > { %v3417_v40 = vsel %vm881_vm8, %v8981_v59, 0.0 }
0x14a1   : > { %3418 = vadd.xlane.f32.xlu0 %v3417_v40 }
0x14a3   : > { %v8983_v27 = vpop.eup %8982 }
0x14a4   : > { %v3420_v32 = vsel %vm881_vm8, %v8983_v27, 0.0 }
0x14a7   : > { %v8985_v11 = vpop.eup %8984 }
0x14a8   : > { %v3423_v51 = vsel %vm881_vm8, %v8985_v11, 0.0 }
0x14ae   : > { %3534 = vrot.lane.b32.xlu1 %v10182_v18, %s11119_s1 }
0x14b2   : > { %3582 = vrot.lane.b32.xlu1 %v10190_v20, %s11119_s1 }
0x14b7   : > { %3486 = vrot.lane.b32.xlu0 %v10184_v19, %s11119_s1  ;;  %s11176_s1 = smov 56  }
0x14d6   : > { %3421 = vadd.xlane.f32.xlu1 %v3420_v32  ;;  %3424 = vadd.xlane.f32.xlu0 %v3423_v51 }
0x14e7   : > { %3684 = vrot.lane.b32.xlu1 %v10184_v19, %s11128_s25 }
0x14eb   : > { %3682 = vrot.lane.b32.xlu1 %v10205_v60, %s11125_s8 }
0x14ec   : > { %3633 = vrot.lane.b32.xlu0 %v10178_v7, %s11128_s25 }
0x14ef   : > { %3786 = vrot.lane.b32.xlu1 %v10190_v20, %s11128_s25 }
0x14f0   : > { %3631 = vrot.lane.b32.xlu0 %v10197_v57, %s11125_s8 }
0x14f3   : > { %3784 = vrot.lane.b32.xlu1 %v10220_v21, %s11125_s8 }
0x14f4   : > { %3735 = vrot.lane.b32.xlu0 %v10182_v18, %s11128_s25 }
0x14f8   : > { %3733 = vrot.lane.b32.xlu0 %v10213_v45, %s11125_s8 }
0x1526   : > { %v3416_v35 = vpop.xlane.xlu1 %3415 }
0x1527   : > { %8986 = vrcp.f32 %v3416_v35 }
0x152a   : > { %v3419_v56 = vpop.xlane.xlu0 %3418  ;;  %v3535_v23 = vpop.permute.xlu1 %3534 }
0x152b   : > { %8988 = vrcp.f32 %v3419_v56  ;;  %v3540_v58 = vsel %vm1128_vm9, %v3535_v23, 0 }
0x152e   : > { %v3487_v37 = vpop.permute.xlu0 %3486  ;;  %v3583_v0 = vpop.permute.xlu1 %3582 }
0x152f   : > { %v3492_v39 = vsel %vm1128_vm9, %v3487_v37, 0  ;;  %v3588_v8 = vsel %vm1128_vm9, %v3583_v0, 0 }
0x1530   : > { %8335 = vmatpush3.bf16.msra.mxu0 %v3492_v39 }
0x1531   : > { %8346 = vmatprep.subr.bf16.mxu0 %v9335_v13 }
0x1534   : > { %v8987_v47 = vpop.eup %8986 }
0x1535   : > { %v3430_v55 = vmul.f32 %v8987_v47, %v8979_v54 }
0x1537   : > { %v3434_v1 = vpack.c.bf16 %v3430_v55, %v3430_v55 }
0x1538   : > { %v8989_v61 = vpop.eup %8988 }
0x1539   : > { %8331 = vmatmul.mubr.msk.bf16.vlgmr.msra.gmra.mxu1 %vm881_vm8, %v3434_v1  ;;  %v3431_v38 = vmul.f32 %v8989_v61, %v8981_v59 }
0x153a   : > { %8341 = vmatpush3.bf16.msra.mxu1 %v3540_v58  ;;  %8342 = vmatprep.mubr.msk.bf16.mxu1 %vm9336_vm7, %v9335_v13 }
0x153b   : > { %v3435_v6 = vpack.c.bf16 %v3431_v38, %v3431_v38  ;;  %8352 = vmatprep.subr.bf16.mxu1 %v9335_v13 }
0x153d   : > { %8337 = vmatmul.mubr.msk.bf16.vlgmr.msra.gmra.mxu0 %vm881_vm8, %v3435_v6 }
0x153e   : > { %8347 = vmatpush3.bf16.msra.mxu0 %v3588_v8  ;;  %8348 = vmatprep.mubr.msk.bf16.mxu0 %vm9336_vm7, %v9335_v13 }
0x153f   : > { %8358 = vmatprep.subr.bf16.mxu0 %v9335_v13 }
0x155f   : > { %v3422_v10 = vpop.xlane.xlu1 %3421  ;;  %v3425_v52 = vpop.xlane.xlu0 %3424 }
0x1560   : > { %8990 = vrcp.f32 %v3422_v10 }
0x1561   : > { %8992 = vrcp.f32 %v3425_v52 }
0x1563   : > { %v3634_v14 = vpop.permute.xlu0 %3633  ;;  %v3685_v26 = vpop.permute.xlu1 %3684 }
0x1564   : > { %v3639_v54 = vsel %vm881_vm8, %v3634_v14, 0  ;;  %v3690_v59 = vsel %vm881_vm8, %v3685_v26, 0 }
0x1567   : > { %v3632_v25 = vpop.permute.xlu0 %3631  ;;  %v3683_v28 = vpop.permute.xlu1 %3682 }
0x156b   : > { %v3736_v40 = vpop.permute.xlu0 %3735  ;;  %v3787_v49 = vpop.permute.xlu1 %3786 }
0x156c   : > { %v3741_v42 = vsel %vm881_vm8, %v3736_v40, 0  ;;  %v3792_v46 = vsel %vm881_vm8, %v3787_v49, 0 }
0x156d   : > { %v8991_v15 = vpop.eup %8990 }
0x156e   : > { %v8993_v9 = vpop.eup %8992  ;;  %v3432_v29 = vmul.f32 %v8991_v15, %v8983_v27 }
0x156f   : > { %v3433_v41 = vmul.f32 %v8993_v9, %v8985_v11  ;;  %v3734_v31 = vpop.permute.xlu0 %3733  ;;  %v3785_v34 = vpop.permute.xlu1 %3784 }
0x1570   : > { %v3436_v44 = vpack.c.bf16 %v3432_v29, %v3432_v29 }
0x1571   : > { %v3437_v43 = vpack.c.bf16 %v3433_v41, %v3433_v41 }
0x1572   : > { %8343 = vmatmul.mubr.msk.bf16.vlgmr.msra.gmra.mxu1 %vm881_vm8, %v3436_v44 }
0x1573   : > { %8349 = vmatmul.mubr.msk.bf16.vlgmr.msra.gmra.mxu0 %vm881_vm8, %v3437_v43  ;;  %8353 = vmatpush3.bf16.xpose.msra.mxu1 %v3639_v54 }
0x1574   : > { %8359 = vmatpush3.bf16.xpose.msra.mxu0 %v3690_v59  ;;  %8354 = vmatprep.mubr.msk.bf16.mxu1 %vm9336_vm7, %v9335_v13 }
0x1575   : > { %8360 = vmatprep.mubr.msk.bf16.mxu0 %vm9336_vm7, %v9335_v13  ;;  %8364 = vmatprep.subr.bf16.mxu1 %v9335_v13 }
0x1576   : > { %8370 = vmatprep.subr.bf16.mxu0 %v9335_v13 }
0x157a   : > { %8355 = vmatmul.mubr.msk.bf16.vlgmr.msra.gmra.mxu1 %vm881_vm8, %v3632_v25 }
0x157b   : > { %8361 = vmatmul.mubr.msk.bf16.vlgmr.msra.gmra.mxu0 %vm881_vm8, %v3683_v28  ;;  %8365 = vmatpush3.bf16.xpose.msra.mxu1 %v3741_v42 }
0x157c   : > { %8371 = vmatpush3.bf16.xpose.msra.mxu0 %v3792_v46  ;;  %8366 = vmatprep.mubr.msk.bf16.mxu1 %vm9336_vm7, %v9335_v13 }
0x157d   : > { %8372 = vmatprep.mubr.msk.bf16.mxu0 %vm9336_vm7, %v9335_v13  ;;  %8376 = vmatprep.subr.bf16.mxu1 %v9335_v13 }
0x157e   : > { %8382 = vmatprep.subr.bf16.mxu0 %v9335_v13 }
0x1582   : > { %8367 = vmatmul.mubr.msk.bf16.vlgmr.msra.gmra.mxu1 %vm881_vm8, %v3734_v31 }
0x1583   : > { %8373 = vmatmul.mubr.msk.bf16.vlgmr.msra.gmra.mxu0 %vm881_vm8, %v3785_v34  ;;  %8378 = vmatprep.mubr.msk.bf16.mxu1 %vm9336_vm7, %v9335_v13 }
0x1584   : > { %8384 = vmatprep.mubr.msk.bf16.mxu0 %vm9336_vm7, %v9335_v13 }
0x15f9   : > { %v10302_v16 = vpop.f32.mrf.mxu1 }
0x15fb   : > { %v8332_v27 = vpop.f32.mrf.mxu1 }
0x15fd   : > { %v3483_v11 = vpop.f32.mrf.mxu1  ;;  %v10304_v32 = vpop.f32.mrf.mxu0 }
0x15ff   : > { %v8333_v51 = vpop.f32.mrf.mxu1  ;;  %v8338_v35 = vpop.f32.mrf.mxu0 }
0x1601   : > { %v3531_v56 = vpop.f32.mrf.mxu0 }
0x1603   : > { %v8339_v37 = vpop.f32.mrf.mxu0 }
0x1632   : > { %v10306_v39 = vpop.f32.mrf.mxu1 }
0x1633   : > { %v10308_v47 = vpop.f32.mrf.mxu0 }
0x1634   : > { %v8344_v23 = vpop.f32.mrf.mxu1 }
0x1635   : > { %v8350_v55 = vpop.f32.mrf.mxu0 }
0x1636   : > { %v3579_v1 = vpop.f32.mrf.mxu1 }
0x1637   : > { %v3627_v61 = vpop.f32.mrf.mxu0 }
0x1638   : > { %v8345_v58 = vpop.f32.mrf.mxu1 }
0x1639   : > { %v8351_v38 = vpop.f32.mrf.mxu0 }
0x163a   : > { %v3675_v0 = vpop.f32.mrf.mxu1 }
0x163b   : > { %v3676_v6 = vadd.f32 %v3675_v0, %v9734_v12  ;;  %v3726_v8 = vpop.f32.mrf.mxu0 }
0x163c   : > { %v3727_v10 = vadd.f32 %v3726_v8, %v9738_v17  ;;  %v8356_v52 = vpop.f32.mrf.mxu1 }
0x163d   : > { %v8362_v14 = vpop.f32.mrf.mxu0  ;;  %v3834_v26 = vsel %vm881_vm8, %v3676_v6, -inf }
0x163e   : > { %v3837_v15 = vsel %vm881_vm8, %v3727_v10, -inf  ;;  %3835 = vmax.xlane.f32.xlu0 %v3834_v26  ;;  %v3678_v9 = vpop.f32.mrf.mxu1 }
0x163f   : > { %3838 = vmax.xlane.f32.xlu1 %v3837_v15  ;;  %v3729_v29 = vpop.f32.mrf.mxu0 }
0x1640   : > { %v8357_v41 = vpop.f32.mrf.mxu1 }
0x1641   : > { %v8363_v44 = vpop.f32.mrf.mxu0 }
0x1642   : > { %v3777_v25 = vpop.f32.mrf.mxu1 }
0x1643   : > { %v3778_v43 = vadd.f32 %v3777_v25, %v9743_v24  ;;  %v3828_v54 = vpop.f32.mrf.mxu0 }
0x1644   : > { %v8368_v28 = vpop.f32.mrf.mxu1  ;;  %v3829_v59 = vadd.f32 %v3828_v54, %v9748_v36 }
0x1645   : > { %v8374_v40 = vpop.f32.mrf.mxu0  ;;  %v3840_v49 = vsel %vm881_vm8, %v3778_v43, -inf }
0x1646   : > { %3841 = vmax.xlane.f32.xlu0 %v3840_v49  ;;  %v3780_v42 = vpop.f32.mrf.mxu1  ;;  %v3843_v27 = vsel %vm881_vm8, %v3829_v59, -inf }
0x1647   : > { %v3831_v46 = vpop.f32.mrf.mxu0 }
0x1648   : > { %v8369_v31 = vpop.f32.mrf.mxu1 }
0x1649   : > { %v8375_v34 = vpop.f32.mrf.mxu0 }
0x164a   : > { %3844 = vmax.xlane.f32.xlu0 %v3843_v27 }
0x1650   : > { %3882 = vrot.lane.b32.xlu1 %v10178_v7, %s11117_s14 }
0x16c7   : > { %v3836_v11 = vpop.xlane.xlu0 %3835 }
0x16c8   : > { %v3839_v51 = vpop.xlane.xlu1 %3838  ;;  %v3846_v35 = vsub.f32 %v3676_v6, %v3836_v11 }
0x16c9   : > { %v3847_v56 = vsub.f32 %v3727_v10, %v3839_v51 }
0x16ca   : > { %v3850_v37 = vmul.f32 1.442695, %v3846_v35 }
0x16cb   : > { %v3852_v23 = vmul.f32 1.442695, %v3847_v56 }
0x16cc   : > { %8994 = vpow2.f32 %v3850_v37  ;;  %v3883_v55 = vpop.permute.xlu1 %3882 }
0x16cd   : > { %8996 = vpow2.f32 %v3852_v23  ;;  %v3888_v1 = vsel %vm1128_vm9, %v3883_v55, 0 }
0x16ce   : > { %8377 = vmatpush3.bf16.msra.mxu1 %v3888_v1 }
0x16cf   : > { %8388 = vmatprep.subr.bf16.mxu1 %v9335_v13  ;;  %v3842_v6 = vpop.xlane.xlu0 %3841 }
0x16d0   : > { %v3848_v52 = vsub.f32 %v3778_v43, %v3842_v6 }
0x16d2   : > { %v3854_v26 = vmul.f32 1.442695, %v3848_v52 }
0x16d3   : > { %v3845_v8 = vpop.xlane.xlu0 %3844 }
0x16d4   : > { %v3849_v10 = vsub.f32 %v3829_v59, %v3845_v8 }
0x16d6   : > { %v3856_v14 = vmul.f32 1.442695, %v3849_v10 }
0x16d8   : > { %8998 = vpow2.f32 %v3856_v14 }
0x16d9   : > { %v8995_v61 = vpop.eup %8994  ;;  %9000 = vpow2.f32 %v3854_v26 }
0x16da   : > { %v8997_v58 = vpop.eup %8996  ;;  %v3858_v38 = vsel %vm881_vm8, %v8995_v61, 0.0 }
0x16db   : > { %3859 = vadd.xlane.f32.xlu1 %v3858_v38  ;;  %v3861_v0 = vsel %vm881_vm8, %v8997_v58, 0.0 }
0x16dc   : > { %3862 = vadd.xlane.f32.xlu0 %v3861_v0 }
0x16e5   : > { %v8999_v15 = vpop.eup %8998 }
0x16e6   : > { %v9001_v9 = vpop.eup %9000  ;;  %v3867_v29 = vsel %vm881_vm8, %v8999_v15, 0.0 }
0x16e7   : > { %v3864_v41 = vsel %vm881_vm8, %v9001_v9, 0.0 }
0x16ec   : > { %3978 = vrot.lane.b32.xlu1 %v10182_v18, %s11117_s14 }
0x16f0   : > { %4026 = vrot.lane.b32.xlu1 %v10190_v20, %s11117_s14 }
0x16f2   : > { %3930 = vrot.lane.b32.xlu0 %v10184_v19, %s11117_s14  ;;  %s11171_s14 = smov 24  }
0x1711   : > { %3868 = vadd.xlane.f32.xlu0 %v3867_v29 }
0x1714   : > { %3865 = vadd.xlane.f32.xlu1 %v3864_v41 }
0x1725   : > { %4126 = vrot.lane.b32.xlu1 %v10184_v19, %s11126_s24 }
0x1727   : > { %4076 = vrot.lane.b32.xlu0 %v10178_v7, %s11126_s24 }
0x1729   : > { %4124 = vrot.lane.b32.xlu1 %v10205_v60, %s11123_s10 }
0x172b   : > { %4074 = vrot.lane.b32.xlu0 %v10197_v57, %s11123_s10 }
0x172d   : > { %4226 = vrot.lane.b32.xlu1 %v10190_v20, %s11126_s24 }
0x172f   : > { %4176 = vrot.lane.b32.xlu0 %v10182_v18, %s11126_s24 }
0x1731   : > { %4224 = vrot.lane.b32.xlu1 %v10220_v21, %s11123_s10 }
0x1733   : > { %4174 = vrot.lane.b32.xlu0 %v10213_v45, %s11123_s10 }
0x1764   : > { %v3860_v44 = vpop.xlane.xlu1 %3859 }
0x1765   : > { %9002 = vrcp.f32 %v3860_v44  ;;  %v3863_v25 = vpop.xlane.xlu0 %3862 }
0x1766   : > { %9004 = vrcp.f32 %v3863_v25 }
0x1768   : > { %v3979_v28 = vpop.permute.xlu1 %3978 }
0x1769   : > { %v3931_v43 = vpop.permute.xlu0 %3930  ;;  %v3984_v27 = vsel %vm1128_vm9, %v3979_v28, 0 }
0x176a   : > { %v3936_v54 = vsel %vm1128_vm9, %v3931_v43, 0 }
0x176b   : > { %8383 = vmatpush3.bf16.msra.mxu0 %v3936_v54 }
0x176c   : > { %8394 = vmatprep.subr.bf16.mxu0 %v9335_v13  ;;  %v4027_v46 = vpop.permute.xlu1 %4026 }
0x176d   : > { %v4032_v11 = vsel %vm1128_vm9, %v4027_v46, 0 }
0x1772   : > { %v9003_v59 = vpop.eup %9002 }
0x1773   : > { %v9005_v40 = vpop.eup %9004  ;;  %v3874_v49 = vmul.f32 %v9003_v59, %v8995_v61 }
0x1774   : > { %v3875_v42 = vmul.f32 %v9005_v40, %v8997_v58 }
0x1775   : > { %v3878_v31 = vpack.c.bf16 %v3874_v49, %v3874_v49 }
0x1776   : > { %v3879_v34 = vpack.c.bf16 %v3875_v42, %v3875_v42 }
0x1777   : > { %8379 = vmatmul.mubr.msk.bf16.vlgmr.msra.gmra.mxu1 %vm881_vm8, %v3878_v31 }
0x1778   : > { %8385 = vmatmul.mubr.msk.bf16.vlgmr.msra.gmra.mxu0 %vm881_vm8, %v3879_v34  ;;  %8389 = vmatpush3.bf16.msra.mxu1 %v3984_v27 }
0x1779   : > { %8395 = vmatpush3.bf16.msra.mxu0 %v4032_v11  ;;  %8396 = vmatprep.mubr.msk.bf16.mxu0 %vm9336_vm7, %v9335_v13 }
0x177a   : > { %8406 = vmatprep.subr.bf16.mxu0 %v9335_v13  ;;  %8390 = vmatprep.mubr.msk.bf16.mxu1 %vm9336_vm7, %v9335_v13 }
0x177b   : > { %8400 = vmatprep.subr.bf16.mxu1 %v9335_v13 }
0x179a   : > { %v3869_v51 = vpop.xlane.xlu0 %3868 }
0x179b   : > { %9006 = vrcp.f32 %v3869_v51 }
0x179d   : > { %v3866_v35 = vpop.xlane.xlu1 %3865 }
0x179e   : > { %9008 = vrcp.f32 %v3866_v35  ;;  %v4077_v23 = vpop.permute.xlu0 %4076 }
0x179f   : > { %v4082_v10 = vsel %vm881_vm8, %v4077_v23, 0 }
0x17a1   : > { %v4127_v56 = vpop.permute.xlu1 %4126 }
0x17a2   : > { %v4132_v0 = vsel %vm881_vm8, %v4127_v56, 0  ;;  %v4075_v8 = vpop.permute.xlu0 %4074 }
0x17a5   : > { %v4125_v58 = vpop.permute.xlu1 %4124 }
0x17a6   : > { %v4177_v14 = vpop.permute.xlu0 %4176 }
0x17a8   : > { %v9007_v37 = vpop.eup %9006 }
0x17a9   : > { %v3877_v55 = vmul.f32 %v9007_v37, %v8999_v15  ;;  %v4227_v52 = vpop.permute.xlu1 %4226  ;;  %v4182_v15 = vsel %vm881_vm8, %v4177_v14, 0 }
0x17aa   : > { %v4232_v26 = vsel %vm881_vm8, %v4227_v52, 0  ;;  %v4175_v29 = vpop.permute.xlu0 %4174 }
0x17ab   : > { %v9009_v1 = vpop.eup %9008  ;;  %v3881_v61 = vpack.c.bf16 %v3877_v55, %v3877_v55 }
0x17ac   : > { %v3876_v38 = vmul.f32 %v9009_v1, %v9001_v9 }
0x17ad   : > { %8397 = vmatmul.mubr.msk.bf16.vlgmr.msra.gmra.mxu0 %vm881_vm8, %v3881_v61  ;;  %v4225_v9 = vpop.permute.xlu1 %4224 }
0x17ae   : > { %8407 = vmatpush3.bf16.xpose.msra.mxu0 %v4132_v0  ;;  %v3880_v6 = vpack.c.bf16 %v3876_v38, %v3876_v38  ;;  %8408 = vmatprep.mubr.msk.bf16.mxu0 %vm9336_vm7, %v9335_v13 }
0x17af   : > { %8418 = vmatprep.subr.bf16.mxu0 %v9335_v13 }
0x17b0   : > { %8391 = vmatmul.mubr.msk.bf16.vlgmr.msra.gmra.mxu1 %vm881_vm8, %v3880_v6 }
0x17b1   : > { %8401 = vmatpush3.bf16.xpose.msra.mxu1 %v4082_v10  ;;  %8402 = vmatprep.mubr.msk.bf16.mxu1 %vm9336_vm7, %v9335_v13 }
0x17b2   : > { %8412 = vmatprep.subr.bf16.mxu1 %v9335_v13 }
0x17b5   : > { %8409 = vmatmul.mubr.msk.bf16.vlgmr.msra.gmra.mxu0 %vm881_vm8, %v4125_v58 }
0x17b6   : > { %8419 = vmatpush3.bf16.xpose.msra.mxu0 %v4232_v26  ;;  %8420 = vmatprep.mubr.msk.bf16.mxu0 %vm9336_vm7, %v9335_v13 }
0x17b7   : > { %8430 = vmatprep.subr.bf16.mxu0 %v9335_v13 }
0x17b8   : > { %8403 = vmatmul.mubr.msk.bf16.vlgmr.msra.gmra.mxu1 %vm881_vm8, %v4075_v8 }
0x17b9   : > { %8413 = vmatpush3.bf16.xpose.msra.mxu1 %v4182_v15  ;;  %8414 = vmatprep.mubr.msk.bf16.mxu1 %vm9336_vm7, %v9335_v13 }
0x17ba   : > { %8424 = vmatprep.subr.bf16.mxu1 %v9335_v13 }
0x17bd   : > { %8421 = vmatmul.mubr.msk.bf16.vlgmr.msra.gmra.mxu0 %vm881_vm8, %v4225_v9 }
0x17be   : > { %8432 = vmatprep.mubr.msk.bf16.mxu0 %vm9336_vm7, %v9335_v13 }
0x17c0   : > { %8415 = vmatmul.mubr.msk.bf16.vlgmr.msra.gmra.mxu1 %vm881_vm8, %v4175_v29 }
0x17c1   : > { %8426 = vmatprep.mubr.msk.bf16.mxu1 %vm9336_vm7, %v9335_v13 }
0x1837   : > { %v10386_v41 = vpop.f32.mrf.mxu1 }
0x1838   : > { %v10388_v44 = vpop.f32.mrf.mxu0 }
0x1839   : > { %v8828_v25 = vpack.i.bf16 %v10388_v44, %v10386_v41  ;;  %v8380_v43 = vpop.f32.mrf.mxu1 }
0x183a   : > { %v8386_v54 = vpop.f32.mrf.mxu0 }
0x183b   : > { %v3927_v28 = vpop.f32.mrf.mxu1 }
0x183c   : > { %v3975_v59 = vpop.f32.mrf.mxu0 }
0x183d   : > { %v8381_v40 = vpop.f32.mrf.mxu1 }
0x183e   : > { %v8387_v49 = vpop.f32.mrf.mxu0 }
0x186d   : > { %v10392_v42 = vpop.f32.mrf.mxu0 }
0x186f   : > { %v8398_v46 = vpop.f32.mrf.mxu0 }
0x1870   : > { %v10394_v31 = vpop.f32.mrf.mxu1 }
0x1871   : > { %v8833_v34 = vpack.i.bf16 %v10392_v42, %v10394_v31  ;;  %v4071_v27 = vpop.f32.mrf.mxu0 }
0x1872   : > { %v8392_v11 = vpop.f32.mrf.mxu1 }
0x1873   : > { %v8399_v51 = vpop.f32.mrf.mxu0 }
0x1874   : > { %v4023_v35 = vpop.f32.mrf.mxu1 }
0x1875   : > { %v4168_v56 = vpop.f32.mrf.mxu0 }
0x1876   : > { %v4169_v37 = vadd.f32 %v4168_v56, %v9738_v17  ;;  %v8393_v23 = vpop.f32.mrf.mxu1 }
0x1877   : > { %v8410_v55 = vpop.f32.mrf.mxu0 }
0x1878   : > { %v4277_v1 = vsel %vm881_vm8, %v4169_v37, -inf  ;;  %v4118_v61 = vpop.f32.mrf.mxu1 }
0x1879   : > { %4278 = vmax.xlane.f32.xlu1 %v4277_v1  ;;  %v4119_v58 = vadd.f32 %v4118_v61, %v9734_v12  ;;  %v4171_v38 = vpop.f32.mrf.mxu0 }
0x187a   : > { %v8404_v0 = vpop.f32.mrf.mxu1 }
0x187b   : > { %v8411_v6 = vpop.f32.mrf.mxu0  ;;  %v4274_v8 = vsel %vm881_vm8, %v4119_v58, -inf }
0x187c   : > { %4275 = vmax.xlane.f32.xlu0 %v4274_v8  ;;  %v4121_v10 = vpop.f32.mrf.mxu1 }
0x187d   : > { %v4268_v52 = vpop.f32.mrf.mxu0 }
0x187e   : > { %v8405_v14 = vpop.f32.mrf.mxu1  ;;  %v4269_v54 = vadd.f32 %v4268_v52, %v9748_v36 }
0x187f   : > { %v8422_v26 = vpop.f32.mrf.mxu0 }
0x1880   : > { %v4218_v15 = vpop.f32.mrf.mxu1  ;;  %v4283_v46 = vsel %vm881_vm8, %v4269_v54, -inf }
0x1881   : > { %v4219_v9 = vadd.f32 %v4218_v15, %v9743_v24  ;;  %v4271_v29 = vpop.f32.mrf.mxu0 }
0x1882   : > { %v8416_v43 = vpop.f32.mrf.mxu1 }
0x1883   : > { %v8423_v28 = vpop.f32.mrf.mxu0  ;;  %v4280_v59 = vsel %vm881_vm8, %v4219_v9, -inf }
0x1884   : > { %4281 = vmax.xlane.f32.xlu0 %v4280_v59  ;;  %v4221_v40 = vpop.f32.mrf.mxu1 }
0x1886   : > { %v8417_v49 = vpop.f32.mrf.mxu1 }
0x1888   : > { %4284 = vmax.xlane.f32.xlu0 %v4283_v46 }
0x188a   : > { %4322 = vrot.lane.b32.xlu1 %v10178_v7, %s11115_s19 }
0x1902   : > { %v4279_v27 = vpop.xlane.xlu1 %4278 }
0x1903   : > { %v4287_v11 = vsub.f32 %v4169_v37, %v4279_v27 }
0x1905   : > { %v4292_v51 = vmul.f32 1.442695, %v4287_v11  ;;  %v4276_v35 = vpop.xlane.xlu0 %4275 }
0x1906   : > { %v4323_v56 = vpop.permute.xlu1 %4322  ;;  %v4286_v23 = vsub.f32 %v4119_v58, %v4276_v35 }
0x1907   : > { %9010 = vpow2.f32 %v4292_v51  ;;  %v4328_v55 = vsel %vm1128_vm9, %v4323_v56, 0 }
0x1908   : > { %v4290_v1 = vmul.f32 1.442695, %v4286_v23  ;;  %8425 = vmatpush3.bf16.msra.mxu1 %v4328_v55 }
0x1909   : > { %8436 = vmatprep.subr.bf16.mxu1 %v9335_v13 }
0x190a   : > { %9012 = vpow2.f32 %v4290_v1 }
0x190d   : > { %v4282_v37 = vpop.xlane.xlu0 %4281 }
0x190e   : > { %v4288_v52 = vsub.f32 %v4219_v9, %v4282_v37 }
0x1910   : > { %v4294_v14 = vmul.f32 1.442695, %v4288_v52 }
0x1911   : > { %v4285_v58 = vpop.xlane.xlu0 %4284 }
0x1912   : > { %v4289_v8 = vsub.f32 %v4269_v54, %v4285_v58 }
0x1914   : > { %v9011_v61 = vpop.eup %9010  ;;  %v4296_v10 = vmul.f32 1.442695, %v4289_v8 }
0x1915   : > { %v4301_v38 = vsel %vm881_vm8, %v9011_v61, 0.0 }
0x1916   : > { %4302 = vadd.xlane.f32.xlu0 %v4301_v38  ;;  %9014 = vpow2.f32 %v4296_v10 }
0x1917   : > { %v9013_v0 = vpop.eup %9012  ;;  %9016 = vpow2.f32 %v4294_v14 }
0x1918   : > { %v4298_v6 = vsel %vm881_vm8, %v9013_v0, 0.0 }
0x1919   : > { %4299 = vadd.xlane.f32.xlu1 %v4298_v6 }
0x1923   : > { %v9015_v26 = vpop.eup %9014 }
0x1924   : > { %v4307_v15 = vsel %vm881_vm8, %v9015_v26, 0.0  ;;  %v9017_v29 = vpop.eup %9016 }
0x1925   : > { %v4304_v43 = vsel %vm881_vm8, %v9017_v29, 0.0 }
0x192a   : > { %4418 = vrot.lane.b32.xlu1 %v10182_v18, %s11115_s19 }
0x192c   : > { %4370 = vrot.lane.b32.xlu0 %v10184_v19, %s11115_s19 }
0x192e   : > { %4466 = vrot.lane.b32.xlu1 %v10190_v20, %s11115_s19  ;;  %s11177_s19 = smov 48  }
0x194b   : > { %4308 = vadd.xlane.f32.xlu0 %v4307_v15 }
0x1952   : > { %4305 = vadd.xlane.f32.xlu1 %v4304_v43 }
0x1961   : > { %4516 = vrot.lane.b32.xlu0 %v10178_v7, %s11124_s21 }
0x1963   : > { %4566 = vrot.lane.b32.xlu1 %v10184_v19, %s11124_s21 }
0x1965   : > { %4514 = vrot.lane.b32.xlu0 %v10197_v57, %s11121_s22 }
0x1967   : > { %4564 = vrot.lane.b32.xlu1 %v10205_v60, %s11121_s22 }
0x1969   : > { %4616 = vrot.lane.b32.xlu0 %v10182_v18, %s11124_s21 }
0x196b   : > { %4666 = vrot.lane.b32.xlu1 %v10190_v20, %s11124_s21 }
0x196d   : > { %4614 = vrot.lane.b32.xlu0 %v10213_v45, %s11121_s22 }
0x196f   : > { %4664 = vrot.lane.b32.xlu1 %v10220_v21, %s11121_s22  ;;  %s11172_s22 = sld [smem:[#allocation27_spill]] }
0x199f   : > { %v4303_v9 = vpop.xlane.xlu0 %4302 }
0x19a0   : > { %9018 = vrcp.f32 %v4303_v9 }
0x19a2   : > { %v4300_v54 = vpop.xlane.xlu1 %4299 }
0x19a3   : > { %9020 = vrcp.f32 %v4300_v54  ;;  %v4371_v57 = vpop.permute.xlu0 %4370 }
0x19a4   : > { %v4376_v28 = vsel %vm1128_vm9, %v4371_v57, 0 }
0x19a5   : > { %8431 = vmatpush3.bf16.msra.mxu0 %v4376_v28 }
0x19a6   : > { %8442 = vmatprep.subr.bf16.mxu0 %v9335_v13  ;;  %v4419_v60 = vpop.permute.xlu1 %4418 }
0x19a7   : > { %v4424_v51 = vsel %vm1128_vm9, %v4419_v60, 0 }
0x19aa   : > { %v4467_v49 = vpop.permute.xlu1 %4466 }
0x19ab   : > { %v4472_v11 = vsel %vm1128_vm9, %v4467_v49, 0 }
0x19ad   : > { %v9019_v59 = vpop.eup %9018 }
0x19ae   : > { %v4315_v40 = vmul.f32 %v9019_v59, %v9011_v61 }
0x19b0   : > { %v9021_v46 = vpop.eup %9020  ;;  %v4319_v27 = vpack.c.bf16 %v4315_v40, %v4315_v40 }
0x19b1   : > { %v4314_v45 = vmul.f32 %v9021_v46, %v9013_v0 }
0x19b2   : > { %8433 = vmatmul.mubr.msk.bf16.vlgmr.msra.gmra.mxu0 %vm881_vm8, %v4319_v27 }
0x19b3   : > { %v4318_v21 = vpack.c.bf16 %v4314_v45, %v4314_v45  ;;  %8443 = vmatpush3.bf16.msra.mxu0 %v4472_v11  ;;  %8444 = vmatprep.mubr.msk.bf16.mxu0 %vm9336_vm7, %v9335_v13 }
0x19b4   : > { %8454 = vmatprep.subr.bf16.mxu0 %v9335_v13 }
0x19b5   : > { %8427 = vmatmul.mubr.msk.bf16.vlgmr.msra.gmra.mxu1 %vm881_vm8, %v4318_v21 }
0x19b6   : > { %8437 = vmatpush3.bf16.msra.mxu1 %v4424_v51  ;;  %8438 = vmatprep.mubr.msk.bf16.mxu1 %vm9336_vm7, %v9335_v13 }
0x19b7   : > { %8448 = vmatprep.subr.bf16.mxu1 %v9335_v13 }
0x19d4   : > { %v4309_v35 = vpop.xlane.xlu0 %4308 }
0x19d5   : > { %9022 = vrcp.f32 %v4309_v35 }
0x19d8   : > { %v4517_v0 = vpop.permute.xlu0 %4516 }
0x19d9   : > { %v4522_v14 = vsel %vm881_vm8, %v4517_v0, 0 }
0x19db   : > { %v4306_v56 = vpop.xlane.xlu1 %4305 }
0x19dc   : > { %9024 = vrcp.f32 %v4306_v56  ;;  %v4515_v52 = vpop.permute.xlu0 %4514 }
0x19df   : > { %v4567_v23 = vpop.permute.xlu1 %4566 }
0x19e0   : > { %v4572_v6 = vsel %vm881_vm8, %v4567_v23, 0  ;;  %v4617_v15 = vpop.permute.xlu0 %4616 }
0x19e2   : > { %v9023_v55 = vpop.eup %9022 }
0x19e3   : > { %v4317_v1 = vmul.f32 %v9023_v55, %v9015_v26  ;;  %v4565_v38 = vpop.permute.xlu1 %4564 }
0x19e4   : > { %v4615_v9 = vpop.permute.xlu0 %4614 }
0x19e5   : > { %v4321_v61 = vpack.c.bf16 %v4317_v1, %v4317_v1 }
0x19e7   : > { %8445 = vmatmul.mubr.msk.bf16.vlgmr.msra.gmra.mxu0 %vm881_vm8, %v4321_v61  ;;  %v4667_v10 = vpop.permute.xlu1 %4666 }
0x19e8   : > { %8455 = vmatpush3.bf16.xpose.msra.mxu0 %v4572_v6  ;;  %8456 = vmatprep.mubr.msk.bf16.mxu0 %vm9336_vm7, %v9335_v13  ;;  %v4672_v26 = vsel %vm881_vm8, %v4667_v10, 0 }
0x19e9   : > { %v9025_v37 = vpop.eup %9024  ;;  %8466 = vmatprep.subr.bf16.mxu0 %v9335_v13 }
0x19ea   : > { %v4316_v58 = vmul.f32 %v9025_v37, %v9017_v29  ;;  %v4622_v29 = vsel %vm881_vm8, %v4617_v15, 0 }
0x19eb   : > { %v4665_v43 = vpop.permute.xlu1 %4664 }
0x19ec   : > { %v4320_v8 = vpack.c.bf16 %v4316_v58, %v4316_v58 }
0x19ee   : > { %8439 = vmatmul.mubr.msk.bf16.vlgmr.msra.gmra.mxu1 %vm881_vm8, %v4320_v8 }
0x19ef   : > { %8449 = vmatpush3.bf16.xpose.msra.mxu1 %v4522_v14  ;;  %8457 = vmatmul.mubr.msk.bf16.vlgmr.msra.gmra.mxu0 %vm881_vm8, %v4565_v38 }
0x19f0   : > { %8467 = vmatpush3.bf16.xpose.msra.mxu0 %v4672_v26  ;;  %8450 = vmatprep.mubr.msk.bf16.mxu1 %vm9336_vm7, %v9335_v13 }
0x19f1   : > { %8460 = vmatprep.subr.bf16.mxu1 %v9335_v13  ;;  %8468 = vmatprep.mubr.msk.bf16.mxu0 %vm9336_vm7, %v9335_v13 }
0x19f2   : > { %8478 = vmatprep.subr.bf16.mxu0 %v9335_v13 }
0x19f6   : > { %8451 = vmatmul.mubr.msk.bf16.vlgmr.msra.gmra.mxu1 %vm881_vm8, %v4515_v52 }
0x19f7   : > { %8461 = vmatpush3.bf16.xpose.msra.mxu1 %v4622_v29  ;;  %8469 = vmatmul.mubr.msk.bf16.vlgmr.msra.gmra.mxu0 %vm881_vm8, %v4665_v43 }
0x19f8   : > { %8462 = vmatprep.mubr.msk.bf16.mxu1 %vm9336_vm7, %v9335_v13  ;;  %8472 = vmatprep.subr.bf16.mxu1 %v9335_v13 }
0x19f9   : > { %8480 = vmatprep.mubr.msk.bf16.mxu0 %vm9336_vm7, %v9335_v13 }
0x19fe   : > { %8463 = vmatmul.mubr.msk.bf16.vlgmr.msra.gmra.mxu1 %vm881_vm8, %v4615_v9 }
0x19ff   : > { %8474 = vmatprep.mubr.msk.bf16.mxu1 %vm9336_vm7, %v9335_v13 }
0x1a72   : > { %v10474_v54 = vpop.f32.mrf.mxu0 }
0x1a74   : > { %v8434_v57 = vpop.f32.mrf.mxu0 }
0x1a75   : > { %v10476_v28 = vpop.f32.mrf.mxu1 }
0x1a76   : > { %v8838_v60 = vpack.i.bf16 %v10474_v54, %v10476_v28  ;;  %v4415_v59 = vpop.f32.mrf.mxu0 }
0x1a77   : > { %v8428_v40 = vpop.f32.mrf.mxu1 }
0x1a78   : > { %v8435_v49 = vpop.f32.mrf.mxu0 }
0x1a79   : > { %v4367_v46 = vpop.f32.mrf.mxu1 }
0x1a7b   : > { %v8429_v27 = vpop.f32.mrf.mxu1 }
0x1aa7   : > { %v10480_v45 = vpop.f32.mrf.mxu0 }
0x1aa9   : > { %v8446_v11 = vpop.f32.mrf.mxu0 }
0x1aab   : > { %v4511_v21 = vpop.f32.mrf.mxu0 }
0x1aad   : > { %v8447_v51 = vpop.f32.mrf.mxu0 }
0x1aae   : > { %v10482_v35 = vpop.f32.mrf.mxu1 }
0x1aaf   : > { %v8843_v56 = vpack.i.bf16 %v10480_v45, %v10482_v35  ;;  %v4608_v23 = vpop.f32.mrf.mxu0 }
0x1ab0   : > { %v4609_v55 = vadd.f32 %v4608_v23, %v9738_v17  ;;  %v8440_v1 = vpop.f32.mrf.mxu1 }
0x1ab1   : > { %v8458_v61 = vpop.f32.mrf.mxu0 }
0x1ab2   : > { %v4717_v38 = vsel %vm881_vm8, %v4609_v55, -inf  ;;  %v4463_v0 = vpop.f32.mrf.mxu1 }
0x1ab3   : > { %4718 = vmax.xlane.f32.xlu1 %v4717_v38  ;;  %v4611_v6 = vpop.f32.mrf.mxu0 }
0x1ab4   : > { %v8441_v37 = vpop.f32.mrf.mxu1 }
0x1ab5   : > { %v8459_v58 = vpop.f32.mrf.mxu0 }
0x1ab6   : > { %v4558_v8 = vpop.f32.mrf.mxu1 }
0x1ab7   : > { %v4559_v10 = vadd.f32 %v4558_v8, %v9734_v12  ;;  %v4708_v52 = vpop.f32.mrf.mxu0 }
0x1ab8   : > { %v8452_v14 = vpop.f32.mrf.mxu1  ;;  %v4709_v49 = vadd.f32 %v4708_v52, %v9748_v36 }
0x1ab9   : > { %v8470_v26 = vpop.f32.mrf.mxu0  ;;  %v4714_v15 = vsel %vm881_vm8, %v4559_v10, -inf }
0x1aba   : > { %4715 = vmax.xlane.f32.xlu0 %v4714_v15  ;;  %v4561_v29 = vpop.f32.mrf.mxu1  ;;  %v4723_v11 = vsel %vm881_vm8, %v4709_v49, -inf }
0x1abb   : > { %v4711_v17 = vpop.f32.mrf.mxu0 }
0x1abc   : > { %v8453_v43 = vpop.f32.mrf.mxu1 }
0x1abd   : > { %v8471_v9 = vpop.f32.mrf.mxu0 }
0x1abe   : > { %v4658_v57 = vpop.f32.mrf.mxu1 }
0x1abf   : > { %v4659_v59 = vadd.f32 %v4658_v57, %v9743_v24 }
0x1ac0   : > { %v8464_v40 = vpop.f32.mrf.mxu1 }
0x1ac1   : > { %v4720_v46 = vsel %vm881_vm8, %v4659_v59, -inf }
0x1ac2   : > { %4721 = vmax.xlane.f32.xlu0 %v4720_v46  ;;  %v4661_v12 = vpop.f32.mrf.mxu1 }
0x1ac3   : > { %v8870_v12 = vld [vmem:[%s11078_s5 + $0x18] sm:$0xff]  }
0x1ac4   : > { %4762 = vrot.lane.b32.xlu1 %v10178_v7, %s11168_s26  ;;  %v8465_v27 = vpop.f32.mrf.mxu1 }
0x1ac6   : > { %4724 = vmax.xlane.f32.xlu0 %v4723_v11 }
0x1b3c   : > { %v4719_v21 = vpop.xlane.xlu1 %4718 }
0x1b3d   : > { %v4727_v51 = vsub.f32 %v4609_v55, %v4719_v21 }
0x1b3f   : > { %v4732_v23 = vmul.f32 1.442695, %v4727_v51 }
0x1b40   : > { %v4763_v1 = vpop.permute.xlu1 %4762 }
0x1b41   : > { %9026 = vpow2.f32 %v4732_v23  ;;  %v4768_v24 = vsel %vm1128_vm9, %v4763_v1, 0  ;;  %v8871_v23 = vld [vmem:[%s11078_s5 + $0x10] sm:$0xff]  }
0x1b42   : > { %8473 = vmatpush3.bf16.msra.mxu1 %v4768_v24 }
0x1b43   : > { %v4716_v36 = vpop.xlane.xlu0 %4715  ;;  %8484 = vmatprep.subr.bf16.mxu1 %v9335_v13 }
0x1b44   : > { %v4726_v61 = vsub.f32 %v4559_v10, %v4716_v36 }
0x1b46   : > { %v4730_v38 = vmul.f32 1.442695, %v4726_v61 }
0x1b48   : > { %9028 = vpow2.f32 %v4730_v38 }
0x1b4b   : > { %v4722_v0 = vpop.xlane.xlu0 %4721 }
0x1b4c   : > { %v4728_v7 = vsub.f32 %v4659_v59, %v4722_v0 }
0x1b4e   : > { %v9027_v6 = vpop.eup %9026  ;;  %v4734_v37 = vmul.f32 1.442695, %v4728_v7 }
0x1b4f   : > { %v4741_v58 = vsel %vm881_vm8, %v9027_v6, 0.0  ;;  %v4725_v8 = vpop.xlane.xlu0 %4724 }
0x1b50   : > { %9030 = vpow2.f32 %v4734_v37  ;;  %4742 = vadd.xlane.f32.xlu0 %v4741_v58  ;;  %v4729_v55 = vsub.f32 %v4709_v49, %v4725_v8 }
0x1b52   : > { %v4736_v52 = vmul.f32 1.442695, %v4729_v55 }
0x1b54   : > { %9032 = vpow2.f32 %v4736_v52 }
0x1b55   : > { %v9029_v14 = vpop.eup %9028 }
0x1b56   : > { %v4738_v26 = vsel %vm881_vm8, %v9029_v14, 0.0 }
0x1b57   : > { %4739 = vadd.xlane.f32.xlu1 %v4738_v26 }
0x1b5d   : > { %v9031_v15 = vpop.eup %9030 }
0x1b5e   : > { %v4744_v10 = vsel %vm881_vm8, %v9031_v15, 0.0 }
0x1b5f   : > { %4745 = vadd.xlane.f32.xlu1 %v4744_v10 }
0x1b61   : > { %v9033_v29 = vpop.eup %9032 }
0x1b62   : > { %v4747_v17 = vsel %vm881_vm8, %v9033_v29, 0.0 }
0x1b63   : > { %4748 = vadd.xlane.f32.xlu0 %v4747_v17 }
0x1b70   : > { %4858 = vrot.lane.b32.xlu1 %v10182_v18, %s11168_s26 }
0x1b74   : > { %4906 = vrot.lane.b32.xlu1 %v10190_v20, %s11168_s26 }
0x1b78   : > { %8834 = vrot.lane.b32.xlu1 %v8833_v34, %s11169_s12 }
0x1b79   : > { %4810 = vrot.lane.b32.xlu0 %v10184_v19, %s11168_s26 }
0x1b7c   : > { %8844 = vrot.lane.b32.xlu1 %v8843_v56, %s11170_s28 }
0x1b7d   : > { %8829 = vrot.lane.b32.xlu0 %v8828_v25, %s11169_s12 }
0x1b81   : > { %8839 = vrot.lane.b32.xlu0 %v8838_v60, %s11170_s28 }
0x1bd9   : > { %v4743_v18 = vpop.xlane.xlu0 %4742 }
0x1bda   : > { %9034 = vrcp.f32 %v4743_v18 }
0x1be0   : > { %v4740_v20 = vpop.xlane.xlu1 %4739 }
0x1be1   : > { %9036 = vrcp.f32 %v4740_v20 }
0x1be7   : > { %v9035_v42 = vpop.eup %9034 }
0x1be8   : > { %v4746_v19 = vpop.xlane.xlu1 %4745  ;;  %v4755_v35 = vmul.f32 %v9035_v42, %v9027_v6 }
0x1be9   : > { %9038 = vrcp.f32 %v4746_v19 }
0x1bea   : > { %v4759_v54 = vpack.c.bf16 %v4755_v35, %v4755_v35 }
0x1bec   : > { %v4859_v31 = vpop.permute.xlu1 %4858  ;;  %v4749_v34 = vpop.xlane.xlu0 %4748 }
0x1bed   : > { %9040 = vrcp.f32 %v4749_v34  ;;  %v4864_v28 = vsel %vm1128_vm9, %v4859_v31, 0 }
0x1bee   : > { %v9037_v45 = vpop.eup %9036 }
0x1bef   : > { %v4754_v56 = vmul.f32 %v9037_v45, %v9029_v14 }
0x1bf0   : > { %v4811_v41 = vpop.permute.xlu0 %4810  ;;  %v4907_v43 = vpop.permute.xlu1 %4906 }
0x1bf1   : > { %v4758_v44 = vpack.c.bf16 %v4754_v56, %v4754_v56  ;;  %v4816_v25 = vsel %vm1128_vm9, %v4811_v41, 0  ;;  %v4912_v60 = vsel %vm1128_vm9, %v4907_v43, 0 }
0x1bf2   : > { %8479 = vmatpush3.bf16.msra.mxu0 %v4816_v25 }
0x1bf3   : > { %8475 = vmatmul.mubr.msk.bf16.vlgmr.msra.gmra.mxu1 %vm881_vm8, %v4758_v44  ;;  %8490 = vmatprep.subr.bf16.mxu0 %v9335_v13 }
0x1bf4   : > { %8485 = vmatpush3.bf16.msra.mxu1 %v4864_v28  ;;  %8486 = vmatprep.mubr.msk.bf16.mxu1 %vm9336_vm7, %v9335_v13  ;;  %v8830_v26 = vpop.permute.xlu0 %8829  ;;  %v8835_v20 = vpop.permute.xlu1 %8834 }
0x1bf5   : > { %8481 = vmatmul.mubr.msk.bf16.vlgmr.msra.gmra.mxu0 %vm881_vm8, %v4759_v54  ;;  %8496 = vmatprep.subr.bf16.mxu1 %v8870_v12  ;;  %v8832_v10 = vunpack.i.h.bf16 %v8830_v26  ;;  %v8837_v54 = vunpack.i.h.bf16 %v8835_v20  ;;  %v8836_v28 = vunpack.i.l.bf16 %v8835_v20 }
0x1bf6   : > { %v9039_v9 = vpop.eup %9038  ;;  %8491 = vmatpush3.bf16.msra.mxu0 %v4912_v60  ;;  %8492 = vmatprep.mubr.msk.bf16.mxu0 %vm9336_vm7, %v9335_v13 }
0x1bf7   : > { %v4756_v57 = vmul.f32 %v9039_v9, %v9031_v15  ;;  %v5003_v42 = vsel %vm881_vm8, %v10304_v32, %v8832_v10 }
0x1bf8   : > { %v8840_v15 = vpop.permute.xlu0 %8839  ;;  %v8845_v43 = vpop.permute.xlu1 %8844 }
0x1bf9   : > { %v4760_v59 = vpack.c.bf16 %v4756_v57, %v4756_v57  ;;  %v8842_v17 = vunpack.i.h.bf16 %v8840_v15  ;;  %v8841_v18 = vunpack.i.l.bf16 %v8840_v15  ;;  %v8847_v32 = vunpack.i.h.bf16 %v8845_v43 }
0x1bfa   : > { %v9041_v40 = vpop.eup %9040  ;;  %v8846_v60 = vunpack.i.l.bf16 %v8845_v43  ;;  %v5004_v57 = vsel %vm881_vm8, %v10306_v39, %v8836_v28  ;;  %v8874_v43 = vld [vmem:[%s11080_s7 + $0x38] sm:$0xff]  }
0x1bfb   : > { %v4757_v49 = vmul.f32 %v9041_v40, %v9033_v29  ;;  %8487 = vmatmul.mubr.msk.bf16.vlgmr.msra.gmra.mxu1 %vm881_vm8, %v4760_v59  ;;  %v8831_v29 = vunpack.i.l.bf16 %v8830_v26  ;;  %v5007_v56 = vsel %vm2692_vm10, %v5003_v42, %v8842_v17 }
0x1bfc   : > { %8497 = vmatpush3.bf16.msra.mxu1 %v8870_v12 }
0x1bfd   : > { %v4761_v46 = vpack.c.bf16 %v4757_v49, %v4757_v49  ;;  %8498 = vmatprep.subr.bf16.mxu1 %v8871_v23  ;;  %v5002_v31 = vsel %vm881_vm8, %v10302_v16, %v8831_v29  ;;  %v5005_v16 = vsel %vm881_vm8, %v10308_v47, %v8837_v54  ;;  %v5008_v49 = vsel %vm2692_vm10, %v5004_v57, %v8846_v60 }
0x1bfe   : > { %v5006_v35 = vsel %vm2692_vm10, %v5002_v31, %v8841_v18 }
0x1bff   : > { %8493 = vmatmul.mubr.msk.bf16.vlgmr.msra.gmra.mxu0 %vm881_vm8, %v4761_v46  ;;  %v5009_v46 = vsel %vm2692_vm10, %v5005_v16, %v8847_v32 }
0x1c00   : > { %8499 = vmatpush3.bf16.msra.mxu1 %v8871_v23 }
0x1c01   : > { %8512 = vmatprep.subr.bf16.mxu1 %v8874_v43 }
0x1cb3   : > { %v4804_v27 = vpop.f32.mrf.mxu1 }
0x1cb5   : > { %v8476_v11 = vpop.f32.mrf.mxu1  ;;  %v4852_v21 = vpop.f32.mrf.mxu0 }
0x1cb6   : > { %v8848_v51 = vpack.i.bf16 %v4852_v21, %v4804_v27  ;;  %v10562_v21 = vld [vmem:[#allocation8 + $0x8] sm:$0xff] }
0x1cb7   : > { %v4807_v1 = vpop.f32.mrf.mxu1  ;;  %v8482_v24 = vpop.f32.mrf.mxu0  ;;  %v5019_v47 = vrot.slane %v10562_v21, %v9636_v4 }
0x1cb8   : > { %8849 = vrot.lane.b32.xlu0 %v8848_v51, %s11171_s14 }
0x1cb9   : > { %v8477_v36 = vpop.f32.mrf.mxu1  ;;  %v4855_v61 = vpop.f32.mrf.mxu0 }
0x1cbb   : > { %v8483_v38 = vpop.f32.mrf.mxu0  ;;  %v4900_v0 = vpop.f32.mrf.mxu1 }
0x1cbd   : > { %v8488_v7 = vpop.f32.mrf.mxu1 }
0x1cbf   : > { %v4903_v6 = vpop.f32.mrf.mxu1  ;;  %v4948_v37 = vpop.f32.mrf.mxu0 }
0x1cc0   : > { %v8853_v58 = vpack.i.bf16 %v4948_v37, %v4900_v0 }
0x1cc1   : > { %v8489_v8 = vpop.f32.mrf.mxu1  ;;  %v8494_v55 = vpop.f32.mrf.mxu0 }
0x1cc2   : > { %8854 = vrot.lane.b32.xlu1 %v8853_v58, %s11171_s14 }
0x1cc3   : > { %v4951_v52 = vpop.f32.mrf.mxu0 }
0x1cc5   : > { %v8495_v14 = vpop.f32.mrf.mxu0 }
0x1d2a   : > { %v8850_v19 = vpop.permute.xlu0 %8849 }
0x1d2b   : > { %v8852_v34 = vunpack.i.h.bf16 %v8850_v19  ;;  %v8851_v45 = vunpack.i.l.bf16 %v8850_v19 }
0x1d2d   : > { %v5011_v41 = vsel %vm2697_vm11, %v5007_v56, %v8852_v34  ;;  %v5010_v44 = vsel %vm2697_vm11, %v5006_v35, %v8851_v45 }
0x1d2e   : > { %v5014_v25 = vpack.c.bf16 %v5011_v41, %v5010_v44  ;;  %v8872_v44 = vld [vmem:[%s11079_s6 + $0x18] sm:$0xff]  }
0x1d2f   : > { %8504 = vmatprep.subr.bf16.mxu0 %v8872_v44 }
0x1d30   : > { %8500 = vmatprep.mubr.msk.bf16.mxu1 %vm790_vm6, %v5014_v25  ;;  %v8873_v25 = vld [vmem:[%s11079_s6 + $0x10] sm:$0xff]   ;;  %8505 = vmatpush3.bf16.msra.mxu0 %v8872_v44 }
0x1d31   : > { %8506 = vmatprep.subr.bf16.mxu0 %v8873_v25 }
0x1d34   : > { %v8855_v9 = vpop.permute.xlu1 %8854  ;;  %8507 = vmatpush3.bf16.msra.mxu0 %v8873_v25 }
0x1d35   : > { %v8857_v59 = vunpack.i.h.bf16 %v8855_v9  ;;  %v8856_v40 = vunpack.i.l.bf16 %v8855_v9  ;;  %8524 = vmatprep.subr.bf16.mxu0 %v9335_v13 }
0x1d37   : > { %v5013_v12 = vsel %vm2697_vm11, %v5009_v46, %v8857_v59  ;;  %v5012_v27 = vsel %vm2697_vm11, %v5008_v49, %v8856_v40 }
0x1d38   : > { %v5015_v11 = vpack.c.bf16 %v5013_v12, %v5012_v27 }
0x1d3a   : > { %8501 = vmatmul.mubr.msk.bf16.vlgmr.msra.gmra.mxu1 %vm790_vm6, %v5015_v11  ;;  %v5146_v11 = vrot.slane %v10562_v21, %v10107_v48 }
0x1d3b   : > { %8513 = vmatpush3.bf16.msra.mxu1 %v8874_v43 }
0x1dfa   : > { %v8502_v51 = vpop.f32.mrf.mxu1 }
0x1dfb   : > { %v5081_v23 = vadd.f32 %v8502_v51, %v5019_v47 }
0x1dfc   : > { %v5072_v39 = vpop.f32.mrf.mxu1 }
0x1dfd   : > { %v5073_v1 = vadd.f32 %v5072_v39, %v5019_v47  ;;  %v5089_v38 = vadd.f32 %v5081_v23, %v10168_v62 }
0x1dfe   : > { %v8503_v24 = vpop.f32.mrf.mxu1 }
0x1dff   : > { %v5087_v36 = vadd.f32 %v5073_v1, %v10161_v50  ;;  %v5084_v0 = vadd.f32 %v8503_v24, %v5019_v47  ;;  %v5097_v55 = vsel %vm790_vm6, %v5089_v38, 0.0 }
0x1e00   : > { %v5075_v61 = vpop.f32.mrf.mxu1 }
0x1e01   : > { %v5076_v7 = vadd.f32 %v5075_v61, %v5019_v47  ;;  %v5091_v6 = vsel %vm790_vm6, %v5087_v36, 0.0  ;;  %v5090_v58 = vadd.f32 %v5084_v0, %v10170_v63 }
0x1e02   : > { %5092 = vadd.xlane.f32.xlu0 %v5091_v6 }
0x1e03   : > { %v5088_v37 = vadd.f32 %v5076_v7, %v10163_v22  ;;  %v5100_v50 = vsel %vm790_vm6, %v5090_v58, 0.0 }
0x1e05   : > { %v5094_v8 = vsel %vm790_vm6, %v5088_v37, 0.0 }
0x1e06   : > { %5095 = vadd.xlane.f32.xlu1 %v5094_v8  ;;  %5098 = vadd.xlane.f32.xlu0 %v5097_v55 }
0x1e0a   : > { %5101 = vadd.xlane.f32.xlu0 %v5100_v50 }
0x1e8b   : > { %v5093_v52 = vpop.xlane.xlu0 %5092 }
0x1e8c   : > { %v5103_v62 = vmul.f32 0.03125, %v5093_v52 }
0x1e8e   : > { %v5107_v14 = vsub.f32 %v5087_v36, %v5103_v62  ;;  %v5154_v36 = vrot.slane %v10562_v21, %v10112_v53  ;;  %v8875_v62 = vld [vmem:[%s11080_s7 + $0x30] sm:$0xff]  }
0x1e8f   : > { %v5096_v26 = vpop.xlane.xlu1 %5095  ;;  %v5099_v15 = vpop.xlane.xlu0 %5098  ;;  %8514 = vmatprep.subr.bf16.mxu1 %v8875_v62 }
0x1e90   : > { %v5104_v10 = vmul.f32 0.03125, %v5096_v26  ;;  %v5105_v29 = vmul.f32 0.03125, %v5099_v15  ;;  %v5111_v17 = vmul.f32 %v5107_v14, %v5107_v14  ;;  %8515 = vmatpush3.bf16.msra.mxu1 %v8875_v62  ;;  %v8877_v26 = vld [vmem:[%s11080_s7 + $0x20] sm:$0xff]  }
0x1e92   : > { %v5108_v22 = vsub.f32 %v5088_v37, %v5104_v10  ;;  %v5109_v18 = vsub.f32 %v5089_v38, %v5105_v29  ;;  %v5115_v63 = vsel %vm790_vm6, %v5111_v17, 0.0  ;;  %v5164_v10 = vrot.slane %v10562_v21, %v9633_v3 }
0x1e93   : > { %5116 = vadd.xlane.f32.xlu1 %v5115_v63  ;;  %v5102_v20 = vpop.xlane.xlu0 %5101 }
0x1e94   : > { %v5106_v19 = vmul.f32 0.03125, %v5102_v20  ;;  %v5112_v42 = vmul.f32 %v5108_v22, %v5108_v22  ;;  %v5113_v31 = vmul.f32 %v5109_v18, %v5109_v18 }
0x1e96   : > { %v5110_v34 = vsub.f32 %v5090_v58, %v5106_v19  ;;  %v5118_v45 = vsel %vm790_vm6, %v5112_v42, 0.0  ;;  %v5121_v35 = vsel %vm790_vm6, %v5113_v31, 0.0 }
0x1e97   : > { %5119 = vadd.xlane.f32.xlu0 %v5118_v45  ;;  %5122 = vadd.xlane.f32.xlu1 %v5121_v35 }
0x1e98   : > { %v5114_v56 = vmul.f32 %v5110_v34, %v5110_v34 }
0x1e9a   : > { %v5124_v41 = vsel %vm790_vm6, %v5114_v56, 0.0 }
0x1e9b   : > { %5125 = vadd.xlane.f32.xlu0 %v5124_v41  ;;  %v5241_v41 = vrot.slane %v10562_v21, %v9639_v5 }
0x1f1c   : > { %v5117_v54 = vpop.xlane.xlu1 %5116 }
0x1f1d   : > { %v5127_v28 = vmul.f32 0.03125, %v5117_v54 }
0x1f1f   : > { %v5131_v32 = vadd.f32 1e-05, %v5127_v28 }
0x1f20   : > { %v5123_v60 = vpop.xlane.xlu1 %5122  ;;  %v5120_v9 = vpop.xlane.xlu0 %5119 }
0x1f21   : > { %9042 = vrsqrt.f32 %v5131_v32  ;;  %v5129_v16 = vmul.f32 0.03125, %v5123_v60  ;;  %v5128_v57 = vmul.f32 0.03125, %v5120_v9 }
0x1f23   : > { %v5133_v59 = vadd.f32 1e-05, %v5129_v16  ;;  %v5132_v40 = vadd.f32 1e-05, %v5128_v57 }
0x1f24   : > { %v5126_v49 = vpop.xlane.xlu0 %5125 }
0x1f25   : > { %9044 = vrsqrt.f32 %v5133_v59  ;;  %v5130_v46 = vmul.f32 0.03125, %v5126_v49 }
0x1f26   : > { %9046 = vrsqrt.f32 %v5132_v40 }
0x1f27   : > { %v5134_v12 = vadd.f32 1e-05, %v5130_v46 }
0x1f29   : > { %9048 = vrsqrt.f32 %v5134_v12 }
0x1f2e   : > { %v9043_v27 = vpop.eup %9042 }
0x1f2f   : > { %v5139_v47 = vmul.f32 %v9043_v27, %v5107_v14  ;;  %v8876_v14 = vld [vmem:[%s11080_s7 + $0x28] sm:$0xff]  }
0x1f30   : > { %8516 = vmatprep.subr.bf16.mxu1 %v8876_v14 }
0x1f31   : > { %v5147_v24 = vmul.f32 %v5146_v11, %v5139_v47  ;;  %8517 = vmatpush3.bf16.msra.mxu1 %v8876_v14 }
0x1f32   : > { %v9045_v51 = vpop.eup %9044  ;;  %8518 = vmatprep.subr.bf16.mxu1 %v8877_v26 }
0x1f33   : > { %v9047_v39 = vpop.eup %9046  ;;  %v5141_v23 = vmul.f32 %v9045_v51, %v5109_v18  ;;  %v5155_v6 = vadd.f32 %v5154_v36, %v5147_v24 }
0x1f34   : > { %v5140_v1 = vmul.f32 %v9047_v39, %v5108_v22 }
0x1f35   : > { %v5149_v0 = vmul.f32 %v5146_v11, %v5141_v23  ;;  %8519 = vmatpush3.bf16.msra.mxu1 %v8877_v26 }
0x1f36   : > { %v9049_v61 = vpop.eup %9048  ;;  %v5148_v38 = vmul.f32 %v5146_v11, %v5140_v1  ;;  %8538 = vmatprep.subr.bf16.mxu1 %v9335_v13 }
0x1f37   : > { %v5142_v7 = vmul.f32 %v9049_v61, %v5110_v34  ;;  %v5157_v55 = vadd.f32 %v5154_v36, %v5149_v0 }
0x1f38   : > { %v5156_v37 = vadd.f32 %v5154_v36, %v5148_v38 }
0x1f39   : > { %v5150_v58 = vmul.f32 %v5146_v11, %v5142_v7 }
0x1f3a   : > { %v5159_v8 = vpack.c.bf16 %v5156_v37, %v5155_v6 }
0x1f3b   : > { %v5158_v50 = vadd.f32 %v5154_v36, %v5150_v58 }
0x1f3c   : > { %8508 = vmatprep.mubr.msk.bf16.mxu0 %vm790_vm6, %v5159_v8 }
0x1f3d   : > { %v5160_v52 = vpack.c.bf16 %v5158_v50, %v5157_v55 }
0x1f3f   : > { %8509 = vmatmul.mubr.msk.bf16.vlgmr.msra.gmra.mxu0 %vm790_vm6, %v5160_v52  ;;  %v9110_v52 = vld [vmem:[%s9729_s18] sm:$0xf]  ;;  %s11175_s18 = smov 64  }
0x1f40   : > { %8528 = vmatprep.mubr.msk.bf16.mxu0 %vm9336_vm7, %v9335_v13  ;;  %v5394_v62 = vsel %vm5393_vm13, %v9110_v52, 0.0 }
0x1fff   : > { %v8510_v15 = vpop.f32.mrf.mxu0 }
0x2000   : > { %v5226_v63 = vadd.f32 %v8510_v15, %v5164_v10  ;;  %v5408_v15 = vrot.slane %v9110_v52, %v9636_v4 }
0x2001   : > { %v5217_v29 = vpop.f32.mrf.mxu0 }
0x2002   : > { %v5218_v22 = vadd.f32 %v5217_v29, %v5164_v10  ;;  %v5234_v45 = vmax.f32 %v5226_v63, 0.0  ;;  %v5415_v29 = vrot.slane %v9110_v52, %v9633_v3 }
0x2003   : > { %v8511_v17 = vpop.f32.mrf.mxu0 }
0x2004   : > { %v5229_v18 = vadd.f32 %v8511_v17, %v5164_v10  ;;  %v5232_v31 = vmax.f32 %v5218_v22, 0.0  ;;  %v5401_v17 = vrot.slane %v9110_v52, %v9630_v2  ;;  %v8878_v22 = vld [vmem:[%s11172_s22 + $0x8] sm:$0xff]  }
0x2005   : > { %v5220_v20 = vpop.f32.mrf.mxu0  ;;  %8525 = vmatpush3.bf16.msra.mxu0 %v8878_v22 }
0x2006   : > { %v5221_v19 = vadd.f32 %v5220_v20, %v5164_v10  ;;  %v5235_v42 = vmax.f32 %v5229_v18, 0.0  ;;  %v5422_v10 = vrot.slane %v9110_v52, %v9639_v5  ;;  %8526 = vmatprep.subr.bf16.mxu0 %v9335_v13  ;;  %v8879_v18 = vld [vmem:[%s11172_s22] sm:$0xff]  }
0x2008   : > { %v5233_v34 = vmax.f32 %v5221_v19, 0.0  ;;  %v5237_v56 = vpack.c.bf16 %v5235_v42, %v5234_v45 }
0x2009   : > { %8527 = vmatpush3.bf16.msra.mxu0 %v8879_v18 }
0x200a   : > { %v5236_v35 = vpack.c.bf16 %v5233_v34, %v5232_v31  ;;  %8532 = vmatprep.subr.bf16.mxu0 %v9335_v13 }
0x200c   : > { %8520 = vmatprep.mubr.msk.bf16.mxu1 %vm2955_vm12, %v5236_v35 }
0x200d   : > { %8521 = vmatmul.mubr.msk.bf16.vlgmr.msra.gmra.mxu1 %vm2955_vm12, %v5237_v56 }
0x200e   : > { %8540 = vmatprep.mubr.msk.bf16.mxu1 %vm9336_vm7, %v9335_v13 }
0x20cd   : > { %v8522_v44 = vpop.f32.mrf.mxu1 }
0x20ce   : > { %v5315_v25 = vadd.f32 %v8522_v44, %v5241_v41  ;;  %v5380_v44 = vrot.slane %v10562_v21, %v10152_v33 }
0x20cf   : > { %v5306_v43 = vpop.f32.mrf.mxu1 }
0x20d0   : > { %v5323_v54 = vadd.f32 %v5315_v25, %v5157_v55  ;;  %v5307_v16 = vadd.f32 %v5306_v43, %v5241_v41 }
0x20d1   : > { %v8523_v28 = vpop.f32.mrf.mxu1 }
0x20d2   : > { %v5318_v32 = vadd.f32 %v8523_v28, %v5241_v41  ;;  %v5331_v60 = vsel %vm790_vm6, %v5323_v54, 0.0  ;;  %v5321_v46 = vadd.f32 %v5307_v16, %v5155_v6  ;;  %v5388_v28 = vrot.slane %v10562_v21, %v10157_v30 }
0x20d3   : > { %5332 = vadd.xlane.f32.xlu0 %v5331_v60  ;;  %v5309_v9 = vpop.f32.mrf.mxu1 }
0x20d4   : > { %v5324_v57 = vadd.f32 %v5318_v32, %v5158_v50  ;;  %v5310_v59 = vadd.f32 %v5309_v9, %v5241_v41  ;;  %v5325_v27 = vsel %vm790_vm6, %v5321_v46, 0.0 }
0x20d6   : > { %v5322_v40 = vadd.f32 %v5310_v59, %v5156_v37  ;;  %v5334_v49 = vsel %vm790_vm6, %v5324_v57, 0.0 }
0x20d7   : > { %5335 = vadd.xlane.f32.xlu0 %v5334_v49 }
0x20d8   : > { %v5328_v12 = vsel %vm790_vm6, %v5322_v40, 0.0 }
0x20d9   : > { %5329 = vadd.xlane.f32.xlu1 %v5328_v12 }
0x20dd   : > { %5326 = vadd.xlane.f32.xlu1 %v5325_v27 }
0x215c   : > { %v5333_v11 = vpop.xlane.xlu0 %5332 }
0x215d   : > { %v5339_v47 = vmul.f32 0.03125, %v5333_v11 }
0x215f   : > { %v5343_v51 = vsub.f32 %v5323_v54, %v5339_v47 }
0x2160   : > { %v5336_v39 = vpop.xlane.xlu0 %5335 }
0x2161   : > { %v5340_v23 = vmul.f32 0.03125, %v5336_v39  ;;  %v5347_v1 = vmul.f32 %v5343_v51, %v5343_v51 }
0x2162   : > { %v5330_v24 = vpop.xlane.xlu1 %5329 }
0x2163   : > { %v5344_v36 = vsub.f32 %v5324_v57, %v5340_v23  ;;  %v5355_v61 = vsel %vm790_vm6, %v5347_v1, 0.0  ;;  %v5338_v37 = vmul.f32 0.03125, %v5330_v24 }
0x2164   : > { %5356 = vadd.xlane.f32.xlu0 %v5355_v61 }
0x2165   : > { %v5348_v38 = vmul.f32 %v5344_v36, %v5344_v36  ;;  %v10620_v55 = vsub.f32 %v5322_v40, %v5338_v37 }
0x2166   : > { %v5327_v0 = vpop.xlane.xlu1 %5326 }
0x2167   : > { %v5337_v7 = vmul.f32 0.03125, %v5327_v0  ;;  %v5358_v6 = vsel %vm790_vm6, %v5348_v38, 0.0  ;;  %v5346_v14 = vmul.f32 %v10620_v55, %v10620_v55 }
0x2168   : > { %5359 = vadd.xlane.f32.xlu0 %v5358_v6 }
0x2169   : > { %v5341_v58 = vsub.f32 %v5321_v46, %v5337_v7  ;;  %v5352_v26 = vsel %vm790_vm6, %v5346_v14, 0.0 }
0x216b   : > { %v5345_v8 = vmul.f32 %v5341_v58, %v5341_v58 }
0x216d   : > { %v5349_v50 = vsel %vm790_vm6, %v5345_v8, 0.0 }
0x216e   : > { %5350 = vadd.xlane.f32.xlu1 %v5349_v50 }
0x2172   : > { %5395 = vadd.xlane.f32.xlu1 %v5394_v62 }
0x2176   : > { %5353 = vadd.xlane.f32.xlu1 %v5352_v26 }
0x217e   : > { %5410 = vbcast.lane.b32.xlu0 %v5408_v15, 256 }
0x2182   : > { %5424 = vbcast.lane.b32.xlu0 %v5422_v10, 256 }
0x2187   : > { %5417 = vbcast.lane.b32.xlu1 %v5415_v29, 256 }
0x218b   : > { %5403 = vbcast.lane.b32.xlu1 %v5401_v17, 256 }
0x21ed   : > { %v5357_v63 = vpop.xlane.xlu0 %5356 }
0x21ee   : > { %v5363_v20 = vmul.f32 0.03125, %v5357_v63 }
0x21f0   : > { %v5367_v19 = vadd.f32 1e-05, %v5363_v20 }
0x21f1   : > { %v5360_v42 = vpop.xlane.xlu0 %5359 }
0x21f2   : > { %9050 = vrsqrt.f32 %v5367_v19  ;;  %v5364_v31 = vmul.f32 0.03125, %v5360_v42 }
0x21f4   : > { %v5368_v34 = vadd.f32 1e-05, %v5364_v31 }
0x21f5   : > { %v5411_v60 = vpop.permute.xlu0 %5410 }
0x21f6   : > { %9052 = vrsqrt.f32 %v5368_v34 }
0x21f7   : > { %v5351_v45 = vpop.xlane.xlu1 %5350 }
0x21f8   : > { %v5361_v35 = vmul.f32 0.03125, %v5351_v45 }
0x21f9   : > { %v5425_v27 = vpop.permute.xlu0 %5424 }
0x21fa   : > { %v5365_v56 = vadd.f32 1e-05, %v5361_v35 }
0x21fb   : > { %v5396_v41 = vpop.xlane.xlu1 %5395 }
0x21fc   : > { %9054 = vrsqrt.f32 %v5365_v56  ;;  %v5397_v21 = vmax.f32 %v5396_v41, 1.0 }
0x21fe   : > { %v5461_v52 = vrot.slane %v5397_v21, 3  ;;  %v5459_v29 = vrot.slane %v5397_v21, 1 }
0x21ff   : > { %v9051_v25 = vpop.eup %9050  ;;  %v5354_v43 = vpop.xlane.xlu1 %5353 }
0x2200   : > { %v5362_v54 = vmul.f32 0.03125, %v5354_v43  ;;  %v5375_v32 = vmul.f32 %v9051_v25, %v5343_v51 }
0x2202   : > { %v5366_v9 = vadd.f32 1e-05, %v5362_v54  ;;  %v5383_v16 = vmul.f32 %v5380_v44, %v5375_v32 }
0x2203   : > { %v9053_v57 = vpop.eup %9052  ;;  %v5418_v59 = vpop.permute.xlu1 %5417 }
0x2204   : > { %9056 = vrsqrt.f32 %v5366_v9  ;;  %v5391_v40 = vadd.f32 %v5388_v28, %v5383_v16  ;;  %v5376_v49 = vmul.f32 %v9053_v57, %v5344_v36  ;;  %v5460_v36 = vrot.slane %v5397_v21, 2 }
0x2206   : > { %v5428_v46 = vmul.f32 %v5418_v59, %v5391_v40  ;;  %v5384_v12 = vmul.f32 %v5380_v44, %v5376_v49  ;;  %9058 = vrcp.f32 %v5460_v36 }
0x2207   : > { %v5404_v0 = vpop.permute.xlu1 %5403  ;;  %9060 = vrcp.f32 %v5461_v52 }
0x2208   : > { %v5444_v11 = vsel %vm790_vm6, %v5428_v46, 0.0  ;;  %v5392_v47 = vadd.f32 %v5388_v28, %v5384_v12  ;;  %9062 = vrcp.f32 %v5397_v21 }
0x2209   : > { %v9055_v39 = vpop.eup %9054  ;;  %v5445_v23 = vrot.slane %v5444_v11, 4  ;;  %9064 = vrcp.f32 %v5459_v29 }
0x220a   : > { %v5429_v1 = vmul.f32 %v5425_v27, %v5392_v47  ;;  %v5373_v24 = vmul.f32 %v9055_v39, %v5341_v58 }
0x220b   : > { %v5446_v7 = vadd.f32 %v5445_v23, %v5444_v11 }
0x220c   : > { %v5451_v51 = vsel %vm790_vm6, %v5429_v1, 0.0  ;;  %v5381_v61 = vmul.f32 %v5380_v44, %v5373_v24 }
0x220d   : > { %v5452_v38 = vrot.slane %v5451_v51, 4  ;;  %v5447_v14 = vrot.slane %v5446_v7, 2 }
0x220e   : > { %v5389_v6 = vadd.f32 %v5388_v28, %v5381_v61 }
0x220f   : > { %v5453_v37 = vadd.f32 %v5452_v38, %v5451_v51  ;;  %v5448_v18 = vadd.f32 %v5447_v14, %v5446_v7 }
0x2210   : > { %v5426_v8 = vmul.f32 %v5404_v0, %v5389_v6 }
0x2211   : > { %v9057_v50 = vpop.eup %9056  ;;  %v5454_v15 = vrot.slane %v5453_v37, 2  ;;  %v5449_v31 = vrot.slane %v5448_v18, 1 }
0x2212   : > { %v5374_v62 = vmul.f32 %v9057_v50, %v10620_v55  ;;  %v5430_v26 = vsel %vm790_vm6, %v5426_v8, 0.0 }
0x2213   : > { %v5431_v58 = vrot.slane %v5430_v26, 4  ;;  %v5455_v63 = vadd.f32 %v5454_v15, %v5453_v37  ;;  %v5450_v41 = vadd.f32 %v5449_v31, %v5448_v18  ;;  %v9059_v43 = vpop.eup %9058  ;;  %v10670_v37 = vld [vmem:[#allocation9] sm:$0xff] }
0x2214   : > { %v5382_v10 = vmul.f32 %v5380_v44, %v5374_v62  ;;  %v9061_v32 = vpop.eup %9060  ;;  %v5504_v36 = vrot.slane %v10670_v37, %v9630_v2 }
0x2215   : > { %v5432_v17 = vadd.f32 %v5431_v58, %v5430_v26  ;;  %v5456_v45 = vrot.slane %v5455_v63, 1  ;;  %v10648_v9 = vmul.f32 %v9059_v43, %v5450_v41  ;;  %v9063_v57 = vpop.eup %9062 }
0x2216   : > { %v5390_v22 = vadd.f32 %v5388_v28, %v5382_v10  ;;  %v9065_v49 = vpop.eup %9064 }
0x2217   : > { %v5433_v20 = vrot.slane %v5432_v17, 2  ;;  %v5457_v25 = vadd.f32 %v5456_v45, %v5455_v63  ;;  %v5499_v46 = vpack.c.bf16 %v10648_v9, %v10648_v9 }
0x2218   : > { %v5427_v19 = vmul.f32 %v5411_v60, %v5390_v22 }
0x2219   : > { %v5434_v42 = vadd.f32 %v5433_v20, %v5432_v17  ;;  %v10650_v60 = vmul.f32 %v9061_v32, %v5457_v25  ;;  %v5511_v39 = vunpack.c.l.b16 %v5499_v46 }
0x221a   : > { %v5437_v55 = vsel %vm790_vm6, %v5427_v19, 0.0 }
0x221b   : > { %v5438_v34 = vrot.slane %v5437_v55, 4  ;;  %v5435_v56 = vrot.slane %v5434_v42, 1  ;;  %v5500_v27 = vpack.c.bf16 %v10650_v60, %v10650_v60  ;;  %v5516_v51 = vrot.slane %v5511_v39, 6 }
0x221d   : > { %v5439_v35 = vadd.f32 %v5438_v34, %v5437_v55  ;;  %v5436_v28 = vadd.f32 %v5435_v56, %v5434_v42  ;;  %v5512_v1 = vunpack.c.l.b16 %v5500_v27  ;;  %v577_v34 = vld [vmem:[%s11174_s9] sm:$0x1] }
0x221e   : > { %v5474_v45 = vsub.f32 1.0, %v577_v34 }
0x221f   : > { %v5440_v44 = vrot.slane %v5439_v35, 2  ;;  %v10652_v40 = vmul.f32 %v9063_v57, %v5436_v28  ;;  %v5519_v61 = vrot.slane %v5512_v1, 5 }
0x2221   : > { %v5441_v54 = vadd.f32 %v5440_v44, %v5439_v35  ;;  %v5497_v47 = vpack.c.bf16 %v10652_v40, %v10652_v40  ;;  %v5475_v35 = vmul.f32 -1e+09, %v5474_v45 }
0x2223   : > { %v5442_v16 = vrot.slane %v5441_v54, 1  ;;  %v5509_v21 = vunpack.c.l.b16 %v5497_v47  ;;  %v10710_v56 = vrot.slane %v5475_v35, %v9630_v2 }
0x2225   : > { %v5443_v59 = vadd.f32 %v5442_v16, %v5441_v54 }
0x2227   : > { %v10656_v12 = vmul.f32 %v9065_v49, %v5443_v59 }
0x2229   : > { %v5498_v11 = vpack.c.bf16 %v10656_v12, %v10656_v12 }
0x222b   : > { %v5510_v23 = vunpack.c.l.b16 %v5498_v11 }
0x222d   : > { %v5513_v24 = vrot.slane %v5510_v23, 7 }
0x222f   : > { %v5515_v38 = vsel %vm5514_vm14, %v5513_v24, %v5509_v21 }
0x2230   : > { %v5518_v0 = vsel %vm5517_vm15, %v5516_v51, %v5515_v38 }
0x2231   : > { %v5521_v7 = vsel %vm5520_vm0, %v5519_v61, %v5518_v0 }
0x2232   : > { %v5522_v6 = vpack.c.b16 %v5521_v7, %v5521_v7 }
0x2234   : > { %8529 = vmatmul.mubr.msk.bf16.vlgmr.msra.gmra.mxu0 %vm790_vm6, %v5522_v6 }
0x2235   : > { %8534 = vmatprep.mubr.msk.bf16.mxu0 %vm9336_vm7, %v9335_v13 }
0x22f4   : > { %v5572_v8 = vpop.f32.mrf.mxu0 }
0x22f5   : > { %v5573_v50 = vadd.f32 %v5572_v8, %v5504_v36 }
0x22f6   : > { %v8530_v52 = vpop.f32.mrf.mxu0 }
0x22f7   : > { %v5578_v62 = vmul.f32 0.35355338, %v5573_v50  ;;  %v10674_v14 = vpack.c.bf16 %v5573_v50, %v5573_v50 }
0x22f8   : > { %v5575_v26 = vpop.f32.mrf.mxu0 }
0x22f9   : > { %5702 = vrot.lane.b32.xlu0 %v10674_v14, %s11128_s25  ;;  %5588 = vrot.lane.b32.xlu1 %v10674_v14, %s11127_s23  ;;  %v5579_v58 = vpack.c.bf16 %v5578_v62, %v5578_v62  ;;  %s11183_s23 = smov 80   ;;  %s11184_s25 = smov 120  }
0x22fa   : > { %v8531_v15 = vpop.f32.mrf.mxu0 }
0x22fd   : > { %5812 = vrot.lane.b32.xlu0 %v10674_v14, %s11126_s24  ;;  %5700 = vrot.lane.b32.xlu1 %v5579_v58, %s11125_s8  ;;  %s11185_s24 = smov 72   ;;  %s11186_s8 = smov 112  }
0x2301   : > { %5922 = vrot.lane.b32.xlu0 %v10674_v14, %s11124_s21  ;;  %5810 = vrot.lane.b32.xlu1 %v5579_v58, %s11123_s10  ;;  %s11178_s10 = sld [smem:[#allocation28_spill]]  ;;  %s7477_s21 = scalar_lea.sflag [#allocation4], %s9603_s27 }
0x2305   : > { %5920 = vrot.lane.b32.xlu1 %v5579_v58, %s11173_s0 }
0x236b   : > { %v5589_v10 = vpop.permute.xlu1 %5588  ;;  %v5703_v17 = vpop.permute.xlu0 %5702 }
0x236c   : > { %v5594_v29 = vsel %vm881_vm8, %v5589_v10, 0  ;;  %v5708_v22 = vsel %vm881_vm8, %v5703_v17, 0 }
0x236d   : > { %8533 = vmatpush3.bf16.xpose.msra.mxu0 %v5594_v29 }
0x236e   : > { %8544 = vmatprep.subr.bf16.mxu0 %v9335_v13 }
0x236f   : > { %v5813_v18 = vpop.permute.xlu0 %5812  ;;  %v5701_v63 = vpop.permute.xlu1 %5700 }
0x2370   : > { %v5818_v20 = vsel %vm881_vm8, %v5813_v18, 0 }
0x2373   : > { %v5923_v19 = vpop.permute.xlu0 %5922  ;;  %v5811_v42 = vpop.permute.xlu1 %5810 }
0x2374   : > { %8535 = vmatmul.mubr.msk.bf16.vlgmr.msra.gmra.mxu0 %vm881_vm8, %v5579_v58  ;;  %v5928_v55 = vsel %vm881_vm8, %v5923_v19, 0 }
0x2375   : > { %8545 = vmatpush3.bf16.xpose.msra.mxu0 %v5708_v22  ;;  %8546 = vmatprep.mubr.msk.bf16.mxu0 %vm9336_vm7, %v9335_v13 }
0x2376   : > { %8556 = vmatprep.subr.bf16.mxu0 %v9335_v13 }
0x2377   : > { %v5921_v31 = vpop.permute.xlu1 %5920 }
0x237c   : > { %8547 = vmatmul.mubr.msk.bf16.vlgmr.msra.gmra.mxu0 %vm881_vm8, %v5701_v63 }
0x237d   : > { %8557 = vmatpush3.bf16.xpose.msra.mxu0 %v5818_v20  ;;  %8558 = vmatprep.mubr.msk.bf16.mxu0 %vm9336_vm7, %v9335_v13 }
0x237e   : > { %8568 = vmatprep.subr.bf16.mxu0 %v9335_v13 }
0x2384   : > { %8559 = vmatmul.mubr.msk.bf16.vlgmr.msra.gmra.mxu0 %vm881_vm8, %v5811_v42 }
0x2385   : > { %8569 = vmatpush3.bf16.xpose.msra.mxu0 %v5928_v55  ;;  %8570 = vmatprep.mubr.msk.bf16.mxu0 %vm9336_vm7, %v9335_v13 }
0x2386   : > { %8580 = vmatprep.subr.bf16.mxu0 %v9335_v13 }
0x238c   : > { %8571 = vmatmul.mubr.msk.bf16.vlgmr.msra.gmra.mxu0 %vm881_vm8, %v5921_v31 }
0x238d   : > { %8584 = vmatprep.mubr.msk.bf16.mxu0 %vm9336_vm7, %v9335_v13 }
0x2434   : > { %v5630_v41 = vpop.f32.mrf.mxu0 }
0x2435   : > { %v5631_v44 = vadd.f32 %v5630_v41, %v10710_v56 }
0x2436   : > { %v8536_v25 = vpop.f32.mrf.mxu0 }
0x2437   : > { %v5637_v43 = vsel %vm5636_vm1, %v5631_v44, -inf }
0x2438   : > { %5638 = vmax.xlane.f32.xlu0 %v5637_v43  ;;  %v5633_v54 = vpop.f32.mrf.mxu0 }
0x243a   : > { %v8537_v28 = vpop.f32.mrf.mxu0 }
0x243c   : > { %v5744_v32 = vpop.f32.mrf.mxu0 }
0x243d   : > { %v5745_v16 = vadd.f32 %v5744_v32, %v10710_v56 }
0x243e   : > { %v8548_v57 = vpop.f32.mrf.mxu0 }
0x243f   : > { %v5750_v59 = vsel %vm5636_vm1, %v5745_v16, -inf }
0x2440   : > { %5751 = vmax.xlane.f32.xlu1 %v5750_v59  ;;  %v5747_v49 = vpop.f32.mrf.mxu0 }
0x2442   : > { %v8549_v46 = vpop.f32.mrf.mxu0 }
0x2444   : > { %v5854_v27 = vpop.f32.mrf.mxu0 }
0x2445   : > { %v5855_v11 = vadd.f32 %v5854_v27, %v10710_v56 }
0x2446   : > { %v8560_v47 = vpop.f32.mrf.mxu0 }
0x2447   : > { %v5860_v39 = vsel %vm5636_vm1, %v5855_v11, -inf }
0x2448   : > { %5861 = vmax.xlane.f32.xlu0 %v5860_v39  ;;  %v5857_v23 = vpop.f32.mrf.mxu0 }
0x244a   : > { %v8561_v1 = vpop.f32.mrf.mxu0 }
0x244c   : > { %v5964_v24 = vpop.f32.mrf.mxu0 }
0x244d   : > { %v5965_v21 = vadd.f32 %v5964_v24, %v10710_v56 }
0x244e   : > { %v8572_v51 = vpop.f32.mrf.mxu0 }
0x244f   : > { %v5970_v61 = vsel %vm5636_vm1, %v5965_v21, -inf }
0x2450   : > { %5971 = vmax.xlane.f32.xlu0 %v5970_v61  ;;  %v5967_v38 = vpop.f32.mrf.mxu0 }
0x2452   : > { %v8573_v0 = vpop.f32.mrf.mxu0 }
0x24c1   : > { %v5639_v7 = vpop.xlane.xlu0 %5638 }
0x24c2   : > { %v5640_v6 = vsub.f32 %v5631_v44, %v5639_v7 }
0x24c4   : > { %v5641_v36 = vmul.f32 1.442695, %v5640_v6 }
0x24c6   : > { %9066 = vpow2.f32 %v5641_v36 }
0x24c9   : > { %v5752_v8 = vpop.xlane.xlu1 %5751 }
0x24ca   : > { %v5753_v50 = vsub.f32 %v5745_v16, %v5752_v8  ;;  %v8880_v8 = vld [vmem:[%s11178_s10 + $0x8] sm:$0xff]  }
0x24cb   : > { %8581 = vmatpush3.bf16.msra.mxu0 %v8880_v8 }
0x24cc   : > { %v5754_v52 = vmul.f32 1.442695, %v5753_v50  ;;  %8582 = vmatprep.subr.bf16.mxu0 %v9335_v13  ;;  %v8881_v50 = vld [vmem:[%s11178_s10] sm:$0xff]  }
0x24ce   : > { %9068 = vpow2.f32 %v5754_v52 }
0x24cf   : > { %8583 = vmatpush3.bf16.msra.mxu0 %v8881_v50 }
0x24d0   : > { %8596 = vmatprep.subr.bf16.mxu0 %v9335_v13 }
0x24d1   : > { %v5862_v15 = vpop.xlane.xlu0 %5861 }
0x24d2   : > { %v5863_v20 = vsub.f32 %v5855_v11, %v5862_v15 }
0x24d3   : > { %v9067_v62 = vpop.eup %9066 }
0x24d4   : > { %v5643_v26 = vsel %vm5636_vm1, %v9067_v62, 0.0  ;;  %v5864_v19 = vmul.f32 1.442695, %v5863_v20 }
0x24d5   : > { %5644 = vadd.xlane.f32.xlu1 %v5643_v26 }
0x24d9   : > { %v5972_v58 = vpop.xlane.xlu0 %5971 }
0x24da   : > { %v5973_v10 = vsub.f32 %v5965_v21, %v5972_v58 }
0x24db   : > { %v9069_v29 = vpop.eup %9068 }
0x24dc   : > { %v5974_v17 = vmul.f32 1.442695, %v5973_v10  ;;  %v5756_v22 = vsel %vm5636_vm1, %v9069_v29, 0.0 }
0x24dd   : > { %5757 = vadd.xlane.f32.xlu0 %v5756_v22 }
0x24de   : > { %9070 = vpow2.f32 %v5974_v17 }
0x24df   : > { %9072 = vpow2.f32 %v5864_v19 }
0x24e6   : > { %5649 = vrot.lane.b32.xlu1 %v10674_v14, %s11175_s18 }
0x24eb   : > { %v9071_v18 = vpop.eup %9070 }
0x24ec   : > { %v5976_v63 = vsel %vm5636_vm1, %v9071_v18, 0.0  ;;  %v9073_v42 = vpop.eup %9072 }
0x24ed   : > { %5977 = vadd.xlane.f32.xlu0 %v5976_v63  ;;  %v5866_v55 = vsel %vm5636_vm1, %v9073_v42, 0.0 }
0x2503   : > { %5762 = vrot.lane.b32.xlu0 %v10674_v14, %s11176_s1 }
0x250a   : > { %5867 = vadd.xlane.f32.xlu1 %v5866_v55 }
0x251b   : > { %5872 = vrot.lane.b32.xlu1 %v10674_v14, %s11177_s19 }
0x251f   : > { %5982 = vrot.lane.b32.xlu1 %v10674_v14, %s11168_s26 }
0x255e   : > { %v5645_v31 = vpop.xlane.xlu1 %5644 }
0x255f   : > { %9074 = vrcp.f32 %v5645_v31  ;;  %v6049_v31 = vrot.slane %v10670_v37, %v9636_v4 }
0x2562   : > { %v5650_v34 = vpop.permute.xlu1 %5649 }
0x2563   : > { %v5657_v45 = vsel %vm5655_vm2, %v5650_v34, 0 }
0x2564   : > { %8539 = vmatpush3.bf16.msra.mxu1 %v5657_v45 }
0x2565   : > { %8550 = vmatprep.subr.bf16.mxu1 %v9335_v13 }
0x2566   : > { %v5758_v35 = vpop.xlane.xlu0 %5757 }
0x2567   : > { %9076 = vrcp.f32 %v5758_v35 }
0x256c   : > { %v9075_v41 = vpop.eup %9074 }
0x256d   : > { %v5647_v44 = vmul.f32 %v9075_v41, %v9067_v62 }
0x256f   : > { %v5648_v25 = vpack.c.bf16 %v5647_v44, %v5647_v44 }
0x2571   : > { %8541 = vmatmul.mubr.msk.bf16.vlgmr.msra.gmra.mxu1 %vm5651_vm3, %v5648_v25 }
0x2572   : > { %8552 = vmatprep.mubr.msk.bf16.mxu1 %vm9336_vm7, %v9335_v13 }
0x2574   : > { %v9077_v14 = vpop.eup %9076 }
0x2575   : > { %v5760_v54 = vmul.f32 %v9077_v14, %v9069_v29 }
0x2576   : > { %v5978_v43 = vpop.xlane.xlu0 %5977 }
0x2577   : > { %v5761_v16 = vpack.c.bf16 %v5760_v54, %v5760_v54 }
0x257a   : > { %v5763_v28 = vpop.permute.xlu0 %5762 }
0x257b   : > { %v5768_v32 = vsel %vm5655_vm2, %v5763_v28, 0 }
0x257c   : > { %8551 = vmatpush3.bf16.msra.mxu1 %v5768_v32 }
0x257d   : > { %8562 = vmatprep.subr.bf16.mxu1 %v9335_v13 }
0x257f   : > { %8553 = vmatmul.mubr.msk.bf16.vlgmr.msra.gmra.mxu1 %vm5651_vm3, %v5761_v16 }
0x2580   : > { %8564 = vmatprep.mubr.msk.bf16.mxu1 %vm9336_vm7, %v9335_v13 }
0x2593   : > { %v5868_v57 = vpop.xlane.xlu1 %5867 }
0x2594   : > { %9078 = vrcp.f32 %v5868_v57 }
0x2595   : > { %9080 = vrcp.f32 %v5978_v43 }
0x2597   : > { %v5873_v59 = vpop.permute.xlu1 %5872 }
0x2598   : > { %v5878_v49 = vsel %vm5655_vm2, %v5873_v59, 0 }
0x2599   : > { %8563 = vmatpush3.bf16.msra.mxu1 %v5878_v49 }
0x259a   : > { %8574 = vmatprep.subr.bf16.mxu1 %v9335_v13 }
0x259b   : > { %v5983_v11 = vpop.permute.xlu1 %5982 }
0x259c   : > { %v5988_v23 = vsel %vm5655_vm2, %v5983_v11, 0 }
0x25a1   : > { %v9079_v46 = vpop.eup %9078 }
0x25a2   : > { %v5870_v27 = vmul.f32 %v9079_v46, %v9073_v42  ;;  %v9081_v39 = vpop.eup %9080 }
0x25a3   : > { %v5980_v1 = vmul.f32 %v9081_v39, %v9071_v18 }
0x25a4   : > { %v5871_v47 = vpack.c.bf16 %v5870_v27, %v5870_v27 }
0x25a5   : > { %v5981_v24 = vpack.c.bf16 %v5980_v1, %v5980_v1 }
0x25a6   : > { %8565 = vmatmul.mubr.msk.bf16.vlgmr.msra.gmra.mxu1 %vm5651_vm3, %v5871_v47 }
0x25a7   : > { %8575 = vmatpush3.bf16.msra.mxu1 %v5988_v23  ;;  %8576 = vmatprep.mubr.msk.bf16.mxu1 %vm9336_vm7, %v9335_v13 }
0x25a8   : > { %8588 = vmatprep.subr.bf16.mxu1 %v9335_v13 }
0x25ae   : > { %8577 = vmatmul.mubr.msk.bf16.vlgmr.msra.gmra.mxu1 %vm5651_vm3, %v5981_v24 }
0x25af   : > { %8592 = vmatprep.mubr.msk.bf16.mxu1 %vm9336_vm7, %v9335_v13 }
0x2631   : > { %v5693_v21 = vpop.f32.mrf.mxu1 }
0x2633   : > { %v8542_v51 = vpop.f32.mrf.mxu1 }
0x2635   : > { %v5696_v61 = vpop.f32.mrf.mxu1 }
0x2637   : > { %v8543_v38 = vpop.f32.mrf.mxu1 }
0x263f   : > { %v5804_v0 = vpop.f32.mrf.mxu1 }
0x2640   : > { %6031 = vrot.lane.b32.xlu0 %v5804_v0, %s11169_s12 }
0x2641   : > { %v8554_v7 = vpop.f32.mrf.mxu1 }
0x2643   : > { %v5807_v6 = vpop.f32.mrf.mxu1 }
0x2645   : > { %v8555_v36 = vpop.f32.mrf.mxu1 }
0x2666   : > { %v5914_v52 = vpop.f32.mrf.mxu1 }
0x2667   : > { %6035 = vrot.lane.b32.xlu1 %v5914_v52, %s11170_s28 }
0x2668   : > { %v8566_v62 = vpop.f32.mrf.mxu1 }
0x266a   : > { %v5917_v26 = vpop.f32.mrf.mxu1 }
0x266b   : > { %v8882_v26 = vld [vmem:[%s11179_s11 + $0x8] sm:$0xff]  }
0x266c   : > { %v8567_v15 = vpop.f32.mrf.mxu1  ;;  %8589 = vmatpush3.bf16.msra.mxu1 %v8882_v26 }
0x266d   : > { %v8883_v15 = vld [vmem:[%s11179_s11] sm:$0xff]   ;;  %8590 = vmatprep.subr.bf16.mxu1 %v9335_v13 }
0x266e   : > { %v6024_v58 = vpop.f32.mrf.mxu1 }
0x266f   : > { %6039 = vrot.lane.b32.xlu0 %v6024_v58, %s11171_s14  ;;  %v8884_v58 = vld [vmem:[%s11180_s2 + $0x18] sm:$0xff]  }
0x2670   : > { %v8578_v10 = vpop.f32.mrf.mxu1  ;;  %8591 = vmatpush3.bf16.msra.mxu1 %v8883_v15 }
0x2671   : > { %8608 = vmatprep.subr.bf16.mxu1 %v9335_v13  ;;  %v8885_v10 = vld [vmem:[%s11180_s2 + $0x10] sm:$0xff]  }
0x2672   : > { %v6027_v29 = vpop.f32.mrf.mxu1 }
0x2674   : > { %v8579_v17 = vpop.f32.mrf.mxu1 }
0x26b2   : > { %v6032_v22 = vpop.permute.xlu0 %6031 }
0x26b3   : > { %v6042_v63 = vsel %vm881_vm8, %v5693_v21, %v6032_v22 }
0x26d9   : > { %v6036_v18 = vpop.permute.xlu1 %6035 }
0x26da   : > { %v6043_v20 = vsel %vm2692_vm10, %v6042_v63, %v6036_v18  ;;  %v6181_v18 = vrot.slane %v10670_v37, %v10107_v48 }
0x26e1   : > { %v6040_v19 = vpop.permute.xlu0 %6039 }
0x26e2   : > { %v6044_v42 = vsel %vm2697_vm11, %v6043_v20, %v6040_v19  ;;  %v6189_v20 = vrot.slane %v10670_v37, %v10112_v53 }
0x26e3   : > { %v6045_v55 = vpack.c.bf16 %v6044_v42, %v6044_v42 }
0x26e5   : > { %8585 = vmatmul.mubr.msk.bf16.vlgmr.msra.gmra.mxu0 %vm790_vm6, %v6045_v55 }
0x26e6   : > { %8604 = vmatprep.mubr.msk.bf16.mxu0 %vm9336_vm7, %v9335_v13  ;;  %8597 = vmatpush3.bf16.msra.mxu0 %v8884_v58 }
0x26e7   : > { %8598 = vmatprep.subr.bf16.mxu0 %v9335_v13 }
0x26ea   : > { %8599 = vmatpush3.bf16.msra.mxu0 %v8885_v10 }
0x26eb   : > { %8600 = vmatprep.subr.bf16.mxu0 %v9335_v13 }
0x27a5   : > { %v6099_v34 = vpop.f32.mrf.mxu0 }
0x27a6   : > { %v6100_v45 = vadd.f32 %v6099_v34, %v6049_v31 }
0x27a7   : > { %v8586_v35 = vpop.f32.mrf.mxu0 }
0x27a8   : > { %v6106_v41 = vrot.slane %v6100_v45, 1  ;;  %v6107_v44 = vrot.slane %v6100_v45, 2  ;;  %v6108_v25 = vrot.slane %v6100_v45, 3  ;;  %v6113_v16 = vadd.f32 %v6100_v45, %v10652_v40 }
0x27a9   : > { %v6102_v14 = vpop.f32.mrf.mxu0 }
0x27aa   : > { %v6114_v43 = vadd.f32 %v6106_v41, %v10656_v12  ;;  %v6115_v54 = vadd.f32 %v6107_v44, %v10648_v9  ;;  %v6116_v28 = vadd.f32 %v6108_v25, %v10650_v60 }
0x27ab   : > { %v8587_v32 = vpop.f32.mrf.mxu0 }
0x27ac   : > { %v6121_v57 = vrot.slane %v6114_v43, 7  ;;  %v6123_v59 = vrot.slane %v6115_v54, 6  ;;  %v6125_v46 = vrot.slane %v6116_v28, 5 }
0x27ae   : > { %v6122_v49 = vsel %vm5514_vm14, %v6121_v57, %v6113_v16 }
0x27af   : > { %v6124_v27 = vsel %vm5517_vm15, %v6123_v59, %v6122_v49 }
0x27b0   : > { %v6126_v11 = vsel %vm5520_vm0, %v6125_v46, %v6124_v27 }
0x27b1   : > { %v6129_v47 = vsel %vm6128_vm4, %v6126_v11, 0.0 }
0x27b2   : > { %6130 = vadd.xlane.f32.xlu1 %v6129_v47 }
0x283b   : > { %v6131_v12 = vpop.xlane.xlu1 %6130 }
0x283c   : > { %v6132_v9 = vmul.f32 0.03125, %v6131_v12 }
0x283e   : > { %v6134_v39 = vrot.slane %v6132_v9, 1  ;;  %v6135_v60 = vrot.slane %v6132_v9, 2  ;;  %v6136_v23 = vrot.slane %v6132_v9, 3  ;;  %v6141_v1 = vsub.f32 %v6113_v16, %v6132_v9 }
0x2840   : > { %v6142_v40 = vsub.f32 %v6114_v43, %v6134_v39  ;;  %v6143_v24 = vsub.f32 %v6115_v54, %v6135_v60  ;;  %v6144_v21 = vsub.f32 %v6116_v28, %v6136_v23  ;;  %v6145_v0 = vmul.f32 %v6141_v1, %v6141_v1 }
0x2842   : > { %v6146_v51 = vmul.f32 %v6142_v40, %v6142_v40  ;;  %v6147_v61 = vmul.f32 %v6143_v24, %v6143_v24  ;;  %v6148_v38 = vmul.f32 %v6144_v21, %v6144_v21 }
0x2844   : > { %v6153_v7 = vrot.slane %v6146_v51, 7  ;;  %v6155_v6 = vrot.slane %v6147_v61, 6  ;;  %v6157_v8 = vrot.slane %v6148_v38, 5  ;;  %v6201_v51 = vrot.slane %v10670_v37, %v9633_v3 }
0x2846   : > { %v6154_v36 = vsel %vm5514_vm14, %v6153_v7, %v6145_v0 }
0x2847   : > { %v6156_v50 = vsel %vm5517_vm15, %v6155_v6, %v6154_v36 }
0x2848   : > { %v6158_v52 = vsel %vm5520_vm0, %v6157_v8, %v6156_v50  ;;  %v6277_v50 = vrot.slane %v10670_v37, %v9639_v5 }
0x2849   : > { %v6160_v62 = vsel %vm6128_vm4, %v6158_v52, 0.0 }
0x284a   : > { %6161 = vadd.xlane.f32.xlu0 %v6160_v62 }
0x28d3   : > { %v6162_v29 = vpop.xlane.xlu0 %6161 }
0x28d4   : > { %v6163_v17 = vmul.f32 0.03125, %v6162_v29 }
0x28d6   : > { %v6164_v22 = vadd.f32 1e-05, %v6163_v17 }
0x28d8   : > { %9082 = vrsqrt.f32 %v6164_v22 }
0x28e5   : > { %v9083_v63 = vpop.eup %9082 }
0x28e6   : > { %v6167_v19 = vrot.slane %v9083_v63, 1  ;;  %v6168_v42 = vrot.slane %v9083_v63, 2  ;;  %v6169_v55 = vrot.slane %v9083_v63, 3  ;;  %v6174_v31 = vmul.f32 %v9083_v63, %v6141_v1 }
0x28e8   : > { %v6175_v34 = vmul.f32 %v6167_v19, %v6142_v40  ;;  %v6176_v45 = vmul.f32 %v6168_v42, %v6143_v24  ;;  %v6177_v35 = vmul.f32 %v6169_v55, %v6144_v21  ;;  %v6182_v41 = vmul.f32 %v6181_v18, %v6174_v31  ;;  %v8886_v24 = vld [vmem:[%s11180_s2 + $0x8] sm:$0xff]   ;;  %v8887_v21 = vld [vmem:[%s11180_s2] sm:$0xff]  }
0x28e9   : > { %8601 = vmatpush3.bf16.msra.mxu0 %v8886_v24 }
0x28ea   : > { %v6183_v44 = vmul.f32 %v6181_v18, %v6175_v34  ;;  %v6184_v25 = vmul.f32 %v6181_v18, %v6176_v45  ;;  %v6185_v14 = vmul.f32 %v6181_v18, %v6177_v35  ;;  %v6190_v43 = vadd.f32 %v6189_v20, %v6182_v41  ;;  %8602 = vmatprep.subr.bf16.mxu0 %v9335_v13 }
0x28ec   : > { %v6191_v54 = vadd.f32 %v6189_v20, %v6183_v44  ;;  %v6192_v28 = vadd.f32 %v6189_v20, %v6184_v25  ;;  %v6193_v32 = vadd.f32 %v6189_v20, %v6185_v14  ;;  %v6194_v16 = vpack.c.bf16 %v6190_v43, %v6190_v43 }
0x28ed   : > { %8603 = vmatpush3.bf16.msra.mxu0 %v8887_v21 }
0x28ee   : > { %v6195_v57 = vpack.c.bf16 %v6191_v54, %v6191_v54  ;;  %v6196_v59 = vpack.c.bf16 %v6192_v28, %v6192_v28  ;;  %v6197_v49 = vpack.c.bf16 %v6193_v32, %v6193_v32  ;;  %v6206_v47 = vunpack.c.l.b16 %v6194_v16  ;;  %8622 = vmatprep.subr.bf16.mxu0 %v9335_v13 }
0x28f0   : > { %v6207_v46 = vunpack.c.l.b16 %v6195_v57  ;;  %v6208_v27 = vunpack.c.l.b16 %v6196_v59  ;;  %v6209_v11 = vunpack.c.l.b16 %v6197_v49 }
0x28f2   : > { %v6210_v12 = vrot.slane %v6207_v46, 7  ;;  %v6212_v9 = vrot.slane %v6208_v27, 6  ;;  %v6214_v60 = vrot.slane %v6209_v11, 5 }
0x28f4   : > { %v6211_v39 = vsel %vm5514_vm14, %v6210_v12, %v6206_v47 }
0x28f5   : > { %v6213_v23 = vsel %vm5517_vm15, %v6212_v9, %v6211_v39 }
0x28f6   : > { %v6215_v1 = vsel %vm5520_vm0, %v6214_v60, %v6213_v23  ;;  %v8888_v23 = vld [vmem:[%s11172_s22 + $0x18] sm:$0xff]  }
0x28f7   : > { %v6216_v40 = vpack.c.b16 %v6215_v1, %v6215_v1  ;;  %v8889_v1 = vld [vmem:[%s11172_s22 + $0x10] sm:$0xff]  }
0x28f9   : > { %8593 = vmatmul.mubr.msk.bf16.vlgmr.msra.gmra.mxu1 %vm790_vm6, %v6216_v40 }
0x28fa   : > { %8612 = vmatprep.mubr.msk.bf16.mxu1 %vm9336_vm7, %v9335_v13  ;;  %8609 = vmatpush3.bf16.msra.mxu1 %v8888_v23 }
0x28fb   : > { %8610 = vmatprep.subr.bf16.mxu1 %v9335_v13 }
0x28fe   : > { %8611 = vmatpush3.bf16.msra.mxu1 %v8889_v1 }
0x28ff   : > { %8616 = vmatprep.subr.bf16.mxu1 %v9335_v13 }
0x29b9   : > { %v6266_v61 = vpop.f32.mrf.mxu1 }
0x29ba   : > { %v6267_v38 = vadd.f32 %v6266_v61, %v6201_v51  ;;  %v6420_v51 = vrot.slane %v10670_v37, %v10152_v33 }
0x29bb   : > { %v8594_v0 = vpop.f32.mrf.mxu1 }
0x29bc   : > { %v6272_v7 = vmax.f32 %v6267_v38, 0.0  ;;  %v6428_v38 = vrot.slane %v10670_v37, %v10157_v30 }
0x29bd   : > { %v6269_v6 = vpop.f32.mrf.mxu1 }
0x29be   : > { %v6273_v36 = vpack.c.bf16 %v6272_v7, %v6272_v7 }
0x29bf   : > { %v8595_v8 = vpop.f32.mrf.mxu1 }
0x29c0   : > { %8605 = vmatmul.mubr.msk.bf16.vlgmr.msra.gmra.mxu0 %vm2955_vm12, %v6273_v36 }
0x29c1   : > { %8624 = vmatprep.mubr.msk.bf16.mxu0 %vm9336_vm7, %v9335_v13 }
0x2a80   : > { %v6339_v52 = vpop.f32.mrf.mxu0 }
0x2a81   : > { %v6340_v62 = vadd.f32 %v6339_v52, %v6277_v50 }
0x2a82   : > { %v8606_v26 = vpop.f32.mrf.mxu0 }
0x2a83   : > { %v6346_v15 = vrot.slane %v6340_v62, 1  ;;  %v6347_v58 = vrot.slane %v6340_v62, 2  ;;  %v6348_v10 = vrot.slane %v6340_v62, 3  ;;  %v6353_v20 = vadd.f32 %v6340_v62, %v6190_v43 }
0x2a84   : > { %v6342_v29 = vpop.f32.mrf.mxu0 }
0x2a85   : > { %v6354_v17 = vadd.f32 %v6346_v15, %v6191_v54  ;;  %v6355_v22 = vadd.f32 %v6347_v58, %v6192_v28  ;;  %v6356_v18 = vadd.f32 %v6348_v10, %v6193_v32 }
0x2a86   : > { %v8607_v63 = vpop.f32.mrf.mxu0 }
0x2a87   : > { %v6361_v19 = vrot.slane %v6354_v17, 7  ;;  %v6363_v42 = vrot.slane %v6355_v22, 6  ;;  %v6365_v31 = vrot.slane %v6356_v18, 5 }
0x2a89   : > { %v6362_v55 = vsel %vm5514_vm14, %v6361_v19, %v6353_v20 }
0x2a8a   : > { %v6364_v34 = vsel %vm5517_vm15, %v6363_v42, %v6362_v55 }
0x2a8b   : > { %v6366_v45 = vsel %vm5520_vm0, %v6365_v31, %v6364_v34 }
0x2a8c   : > { %v6368_v35 = vsel %vm6128_vm4, %v6366_v45, 0.0 }
0x2a8d   : > { %6369 = vadd.xlane.f32.xlu0 %v6368_v35 }
0x2b16   : > { %v6370_v41 = vpop.xlane.xlu0 %6369 }
0x2b17   : > { %v6371_v44 = vmul.f32 0.03125, %v6370_v41 }
0x2b19   : > { %v6373_v25 = vrot.slane %v6371_v44, 1  ;;  %v6374_v14 = vrot.slane %v6371_v44, 2  ;;  %v6375_v54 = vrot.slane %v6371_v44, 3  ;;  %v6380_v28 = vsub.f32 %v6353_v20, %v6371_v44 }
0x2b1b   : > { %v6381_v32 = vsub.f32 %v6354_v17, %v6373_v25  ;;  %v6382_v43 = vsub.f32 %v6355_v22, %v6374_v14  ;;  %v6383_v16 = vsub.f32 %v6356_v18, %v6375_v54  ;;  %v6384_v46 = vmul.f32 %v6380_v28, %v6380_v28  ;;  %v10866_v54 = vld [vmem:[#allocation9 + $0x8] sm:$0xff] }
0x2b1d   : > { %v6385_v57 = vmul.f32 %v6381_v32, %v6381_v32  ;;  %v6386_v59 = vmul.f32 %v6382_v43, %v6382_v43  ;;  %v6387_v49 = vmul.f32 %v6383_v16, %v6383_v16 }
0x2b1f   : > { %v6392_v27 = vrot.slane %v6385_v57, 7  ;;  %v6394_v11 = vrot.slane %v6386_v59, 6  ;;  %v6396_v12 = vrot.slane %v6387_v49, 5 }
0x2b21   : > { %v6393_v47 = vsel %vm5514_vm14, %v6392_v27, %v6384_v46 }
0x2b22   : > { %v6395_v9 = vsel %vm5517_vm15, %v6394_v11, %v6393_v47 }
0x2b23   : > { %v6397_v39 = vsel %vm5520_vm0, %v6396_v12, %v6395_v9 }
0x2b24   : > { %v6399_v60 = vsel %vm6128_vm4, %v6397_v39, 0.0 }
0x2b25   : > { %6400 = vadd.xlane.f32.xlu1 %v6399_v60 }
0x2bae   : > { %v6401_v40 = vpop.xlane.xlu1 %6400 }
0x2baf   : > { %v6402_v24 = vmul.f32 0.03125, %v6401_v40 }
0x2bb1   : > { %v6403_v21 = vadd.f32 1e-05, %v6402_v24 }
0x2bb3   : > { %9084 = vrsqrt.f32 %v6403_v21 }
0x2bc0   : > { %v9085_v61 = vpop.eup %9084 }
0x2bc1   : > { %v6406_v0 = vrot.slane %v9085_v61, 1  ;;  %v6407_v7 = vrot.slane %v9085_v61, 2  ;;  %v6408_v6 = vrot.slane %v9085_v61, 3  ;;  %v6413_v36 = vmul.f32 %v9085_v61, %v6380_v28 }
0x2bc2   : > { %v6466_v28 = vrot.slane %v10866_v54, %v9630_v2 }
0x2bc3   : > { %v6414_v8 = vmul.f32 %v6406_v0, %v6381_v32  ;;  %v6415_v50 = vmul.f32 %v6407_v7, %v6382_v43  ;;  %v6416_v52 = vmul.f32 %v6408_v6, %v6383_v16  ;;  %v6421_v62 = vmul.f32 %v6420_v51, %v6413_v36 }
0x2bc5   : > { %v6422_v26 = vmul.f32 %v6420_v51, %v6414_v8  ;;  %v6423_v15 = vmul.f32 %v6420_v51, %v6415_v50  ;;  %v6424_v58 = vmul.f32 %v6420_v51, %v6416_v52  ;;  %v10844_v10 = vadd.f32 %v6428_v38, %v6421_v62 }
0x2bc7   : > { %v10846_v29 = vadd.f32 %v6428_v38, %v6422_v26  ;;  %v10848_v17 = vadd.f32 %v6428_v38, %v6423_v15  ;;  %v10850_v22 = vadd.f32 %v6428_v38, %v6424_v58  ;;  %v6459_v37 = vpack.c.bf16 %v10844_v10, %v10844_v10 }
0x2bc9   : > { %v6460_v18 = vpack.c.bf16 %v10846_v29, %v10846_v29  ;;  %v6461_v63 = vpack.c.bf16 %v10848_v17, %v10848_v17  ;;  %v6462_v20 = vpack.c.bf16 %v10850_v22, %v10850_v22  ;;  %v6471_v31 = vunpack.c.l.b16 %v6459_v37 }
0x2bcb   : > { %v6472_v19 = vunpack.c.l.b16 %v6460_v18  ;;  %v6473_v42 = vunpack.c.l.b16 %v6461_v63  ;;  %v6474_v55 = vunpack.c.l.b16 %v6462_v20 }
0x2bcd   : > { %v6475_v34 = vrot.slane %v6472_v19, 7  ;;  %v6477_v45 = vrot.slane %v6473_v42, 6  ;;  %v6479_v41 = vrot.slane %v6474_v55, 5 }
0x2bcf   : > { %v6476_v35 = vsel %vm5514_vm14, %v6475_v34, %v6471_v31 }
0x2bd0   : > { %v6478_v44 = vsel %vm5517_vm15, %v6477_v45, %v6476_v35 }
0x2bd1   : > { %v6480_v25 = vsel %vm5520_vm0, %v6479_v41, %v6478_v44 }
0x2bd2   : > { %v6481_v14 = vpack.c.b16 %v6480_v25, %v6480_v25 }
0x2bd4   : > { %8613 = vmatmul.mubr.msk.bf16.vlgmr.msra.gmra.mxu1 %vm790_vm6, %v6481_v14 }
0x2bd5   : > { %8618 = vmatprep.mubr.msk.bf16.mxu1 %vm9336_vm7, %v9335_v13 }
0x2c94   : > { %v6531_v32 = vpop.f32.mrf.mxu1 }
0x2c95   : > { %v6532_v43 = vadd.f32 %v6531_v32, %v6466_v28 }
0x2c96   : > { %v8614_v16 = vpop.f32.mrf.mxu1 }
0x2c97   : > { %v6537_v57 = vmul.f32 0.35355338, %v6532_v43  ;;  %v10870_v59 = vpack.c.bf16 %v6532_v43, %v6532_v43 }
0x2c98   : > { %v6534_v49 = vpop.f32.mrf.mxu1 }
0x2c99   : > { %6652 = vrot.lane.b32.xlu1 %v10870_v59, %s11181_s3  ;;  %6541 = vrot.lane.b32.xlu0 %v10870_v59, %s11182_s4  ;;  %v6538_v27 = vpack.c.bf16 %v6537_v57, %v6537_v57 }
0x2c9a   : > { %v8615_v46 = vpop.f32.mrf.mxu1 }
0x2c9d   : > { %6762 = vrot.lane.b32.xlu0 %v10870_v59, %s11183_s23  ;;  %6650 = vrot.lane.b32.xlu1 %v6538_v27, %s11184_s25 }
0x2ca1   : > { %6872 = vrot.lane.b32.xlu0 %v10870_v59, %s11185_s24  ;;  %6760 = vrot.lane.b32.xlu1 %v6538_v27, %s11186_s8 }
0x2ca5   : > { %6870 = vrot.lane.b32.xlu1 %v6538_v27, %s11173_s0  ;;  %s7823_s0 = sshll.u32 %s9449_s17, 4  ;;  %s9352_s17 = smov [#allocation11]  }
0x2ca6   : > { %s9250_s3 = sshll.u32 %s9352_s17, 4  ;;  %s9251_s3 = int_to_ptr.vmem [resolvable:$false] %s9250_s3 }
0x2ca7   : > { %s9252_s4 = scalar_lea.vmem %s9251_s3, 32 }
0x2d0b   : > { %v6542_v2 = vpop.permute.xlu0 %6541  ;;  %v6653_v47 = vpop.permute.xlu1 %6652 }
0x2d0c   : > { %v6547_v11 = vsel %vm881_vm8, %v6542_v2, 0  ;;  %v6658_v12 = vsel %vm881_vm8, %v6653_v47, 0 }
0x2d0d   : > { %8617 = vmatpush3.bf16.xpose.msra.mxu1 %v6547_v11 }
0x2d0e   : > { %8628 = vmatprep.subr.bf16.mxu1 %v9335_v13 }
0x2d0f   : > { %v6763_v9 = vpop.permute.xlu0 %6762  ;;  %v6651_v39 = vpop.permute.xlu1 %6650 }
0x2d10   : > { %v6768_v60 = vsel %vm881_vm8, %v6763_v9, 0 }
0x2d13   : > { %v6873_v23 = vpop.permute.xlu0 %6872  ;;  %v6761_v1 = vpop.permute.xlu1 %6760 }
0x2d14   : > { %8619 = vmatmul.mubr.msk.bf16.vlgmr.msra.gmra.mxu1 %vm881_vm8, %v6538_v27  ;;  %v6878_v40 = vsel %vm881_vm8, %v6873_v23, 0 }
0x2d15   : > { %8629 = vmatpush3.bf16.xpose.msra.mxu1 %v6658_v12  ;;  %8630 = vmatprep.mubr.msk.bf16.mxu1 %vm9336_vm7, %v9335_v13 }
0x2d16   : > { %8640 = vmatprep.subr.bf16.mxu1 %v9335_v13 }
0x2d17   : > { %v6871_v24 = vpop.permute.xlu1 %6870 }
0x2d1c   : > { %8631 = vmatmul.mubr.msk.bf16.vlgmr.msra.gmra.mxu1 %vm881_vm8, %v6651_v39 }
0x2d1d   : > { %8641 = vmatpush3.bf16.xpose.msra.mxu1 %v6768_v60  ;;  %8642 = vmatprep.mubr.msk.bf16.mxu1 %vm9336_vm7, %v9335_v13 }
0x2d1e   : > { %8652 = vmatprep.subr.bf16.mxu1 %v9335_v13 }
0x2d24   : > { %8643 = vmatmul.mubr.msk.bf16.vlgmr.msra.gmra.mxu1 %vm881_vm8, %v6761_v1 }
0x2d25   : > { %8653 = vmatpush3.bf16.xpose.msra.mxu1 %v6878_v40  ;;  %8654 = vmatprep.mubr.msk.bf16.mxu1 %vm9336_vm7, %v9335_v13 }
0x2d26   : > { %8664 = vmatprep.subr.bf16.mxu1 %v9335_v13 }
0x2d2c   : > { %8655 = vmatmul.mubr.msk.bf16.vlgmr.msra.gmra.mxu1 %vm881_vm8, %v6871_v24 }
0x2d2d   : > { %8668 = vmatprep.mubr.msk.bf16.mxu1 %vm9336_vm7, %v9335_v13 }
0x2dd4   : > { %v6583_v21 = vpop.f32.mrf.mxu1 }
0x2dd5   : > { %v6584_v51 = vadd.f32 %v6583_v21, %v10710_v56 }
0x2dd6   : > { %v8620_v61 = vpop.f32.mrf.mxu1 }
0x2dd7   : > { %v6589_v38 = vsel %vm5636_vm1, %v6584_v51, -inf }
0x2dd8   : > { %6590 = vmax.xlane.f32.xlu0 %v6589_v38  ;;  %v6586_v0 = vpop.f32.mrf.mxu1 }
0x2dda   : > { %v8621_v7 = vpop.f32.mrf.mxu1 }
0x2ddc   : > { %v6694_v6 = vpop.f32.mrf.mxu1 }
0x2ddd   : > { %v6695_v36 = vadd.f32 %v6694_v6, %v10710_v56 }
0x2dde   : > { %v8632_v8 = vpop.f32.mrf.mxu1 }
0x2ddf   : > { %v6700_v50 = vsel %vm5636_vm1, %v6695_v36, -inf }
0x2de0   : > { %6701 = vmax.xlane.f32.xlu1 %v6700_v50  ;;  %v6697_v52 = vpop.f32.mrf.mxu1 }
0x2de2   : > { %v8633_v62 = vpop.f32.mrf.mxu1 }
0x2de4   : > { %v6804_v26 = vpop.f32.mrf.mxu1 }
0x2de5   : > { %v6805_v15 = vadd.f32 %v6804_v26, %v10710_v56 }
0x2de6   : > { %v8644_v58 = vpop.f32.mrf.mxu1 }
0x2de7   : > { %v6810_v37 = vsel %vm5636_vm1, %v6805_v15, -inf }
0x2de8   : > { %6811 = vmax.xlane.f32.xlu0 %v6810_v37  ;;  %v6807_v18 = vpop.f32.mrf.mxu1 }
0x2dea   : > { %v8645_v63 = vpop.f32.mrf.mxu1 }
0x2dec   : > { %v6914_v20 = vpop.f32.mrf.mxu1 }
0x2ded   : > { %v6915_v19 = vadd.f32 %v6914_v20, %v10710_v56 }
0x2dee   : > { %v8656_v42 = vpop.f32.mrf.mxu1 }
0x2def   : > { %v6920_v55 = vsel %vm5636_vm1, %v6915_v19, -inf }
0x2df0   : > { %6921 = vmax.xlane.f32.xlu0 %v6920_v55  ;;  %v6917_v31 = vpop.f32.mrf.mxu1 }
0x2df2   : > { %v8657_v34 = vpop.f32.mrf.mxu1 }
0x2e61   : > { %v6591_v45 = vpop.xlane.xlu0 %6590 }
0x2e62   : > { %v6592_v35 = vsub.f32 %v6584_v51, %v6591_v45 }
0x2e64   : > { %v6593_v41 = vmul.f32 1.442695, %v6592_v35  ;;  %v8890_v35 = vld [vmem:[%s11178_s10 + $0x18] sm:$0xff]  }
0x2e65   : > { %8665 = vmatpush3.bf16.msra.mxu1 %v8890_v35 }
0x2e66   : > { %9086 = vpow2.f32 %v6593_v41  ;;  %8666 = vmatprep.subr.bf16.mxu1 %v9335_v13  ;;  %v8891_v41 = vld [vmem:[%s11178_s10 + $0x10] sm:$0xff]  }
0x2e69   : > { %v6702_v44 = vpop.xlane.xlu1 %6701  ;;  %8667 = vmatpush3.bf16.msra.mxu1 %v8891_v41  ;;  %v8892_v41 = vld [vmem:[%s11179_s11 + $0x18] sm:$0xff]  }
0x2e6a   : > { %v6703_v25 = vsub.f32 %v6695_v36, %v6702_v44  ;;  %8680 = vmatprep.subr.bf16.mxu1 %v9335_v13 }
0x2e6c   : > { %v6704_v14 = vmul.f32 1.442695, %v6703_v25 }
0x2e6e   : > { %9088 = vpow2.f32 %v6704_v14 }
0x2e71   : > { %v6812_v43 = vpop.xlane.xlu0 %6811 }
0x2e72   : > { %v6813_v11 = vsub.f32 %v6805_v15, %v6812_v43 }
0x2e73   : > { %v9087_v28 = vpop.eup %9086 }
0x2e74   : > { %v6595_v32 = vsel %vm5636_vm1, %v9087_v28, 0.0  ;;  %v6814_v47 = vmul.f32 1.442695, %v6813_v11 }
0x2e75   : > { %6596 = vadd.xlane.f32.xlu1 %v6595_v32 }
0x2e79   : > { %v6922_v56 = vpop.xlane.xlu0 %6921 }
0x2e7a   : > { %v6923_v16 = vsub.f32 %v6915_v19, %v6922_v56 }
0x2e7b   : > { %v9089_v57 = vpop.eup %9088 }
0x2e7c   : > { %v6924_v49 = vmul.f32 1.442695, %v6923_v16  ;;  %v6706_v46 = vsel %vm5636_vm1, %v9089_v57, 0.0 }
0x2e7d   : > { %6707 = vadd.xlane.f32.xlu0 %v6706_v46 }
0x2e7e   : > { %9090 = vpow2.f32 %v6924_v49 }
0x2e7f   : > { %9092 = vpow2.f32 %v6814_v47 }
0x2e86   : > { %6601 = vrot.lane.b32.xlu1 %v10870_v59, %s11175_s18  ;;  %s569_s18 = scalar_lea.vmem [#allocation11], %s9603_s27 }
0x2e8b   : > { %v9091_v27 = vpop.eup %9090 }
0x2e8c   : > { %v6926_v2 = vsel %vm5636_vm1, %v9091_v27, 0.0  ;;  %v9093_v12 = vpop.eup %9092 }
0x2e8d   : > { %6927 = vadd.xlane.f32.xlu0 %v6926_v2  ;;  %v6816_v9 = vsel %vm5636_vm1, %v9093_v12, 0.0 }
0x2ea3   : > { %6712 = vrot.lane.b32.xlu0 %v10870_v59, %s11176_s1  ;;  %s7489_s1 = sshll.u32 %s569_s18, 4  ;;  %s7490_s1 = int_to_ptr.vmem [resolvable:$true] %s7489_s1 }
0x2ea4   : > { %s9246_s9 = scalar_lea.vmem %s7490_s1, 16  ;;  %p9253_p8 = scmp.lt.s32.totalorder %s7490_s1, %s9251_s3 }
0x2ea5   : > { %p9247_p12 = scmp.ne.s32.totalorder %s7490_s1, %s9246_s9  ;;  %p9254_p7 = scmp.lt.s32.totalorder %s9252_s4, %s9246_s9 }
0x2ea7   : > { %p9248_p5 = pnand %p9247_p12, %p11189_p0  ;;  %p9255_p10 = por %p9254_p7, %p9253_p8 }
0x2ea9   : > { %p9249_p4 = pneg %p9248_p5 }
0x2eaa   : > { %6817 = vadd.xlane.f32.xlu1 %v6816_v9 }
0x2eab   : > { %p9256_p2 = pnand %p9255_p10, %p9249_p4 }
0x2ebb   : > { %6822 = vrot.lane.b32.xlu1 %v10870_v59, %s11177_s19 }
0x2ebf   : > { %6932 = vrot.lane.b32.xlu1 %v10870_v59, %s11168_s26  ;;  %s11187_s26 = scalar_lea.vmem [#allocation7], %s9603_s27 }
0x2efe   : > { %v6597_v39 = vpop.xlane.xlu1 %6596 }
0x2eff   : > { %9094 = vrcp.f32 %v6597_v39 }
0x2f02   : > { %v6602_v60 = vpop.permute.xlu1 %6601 }
0x2f03   : > { %v6607_v23 = vsel %vm5655_vm2, %v6602_v60, 0 }
0x2f04   : > { %8623 = vmatpush3.bf16.msra.mxu0 %v6607_v23 }
0x2f05   : > { %8634 = vmatprep.subr.bf16.mxu0 %v9335_v13 }
0x2f06   : > { %v6708_v1 = vpop.xlane.xlu0 %6707 }
0x2f07   : > { %9096 = vrcp.f32 %v6708_v1 }
0x2f0c   : > { %v9095_v40 = vpop.eup %9094 }
0x2f0d   : > { %v6599_v24 = vmul.f32 %v9095_v40, %v9087_v28 }
0x2f0f   : > { %v6600_v21 = vpack.c.bf16 %v6599_v24, %v6599_v24 }
0x2f11   : > { %8625 = vmatmul.mubr.msk.bf16.vlgmr.msra.gmra.mxu0 %vm5651_vm3, %v6600_v21 }
0x2f12   : > { %8636 = vmatprep.mubr.msk.bf16.mxu0 %vm9336_vm7, %v9335_v13 }
0x2f14   : > { %v9097_v51 = vpop.eup %9096 }
0x2f15   : > { %v6710_v61 = vmul.f32 %v9097_v51, %v9089_v57 }
0x2f16   : > { %v6928_v59 = vpop.xlane.xlu0 %6927 }
0x2f17   : > { %v6711_v7 = vpack.c.bf16 %v6710_v61, %v6710_v61 }
0x2f1a   : > { %v6713_v38 = vpop.permute.xlu0 %6712 }
0x2f1b   : > { %v6718_v0 = vsel %vm5655_vm2, %v6713_v38, 0 }
0x2f1c   : > { %8635 = vmatpush3.bf16.msra.mxu0 %v6718_v0 }
0x2f1d   : > { %8646 = vmatprep.subr.bf16.mxu0 %v9335_v13 }
0x2f1f   : > { %8637 = vmatmul.mubr.msk.bf16.vlgmr.msra.gmra.mxu0 %vm5651_vm3, %v6711_v7 }
0x2f20   : > { %8648 = vmatprep.mubr.msk.bf16.mxu0 %vm9336_vm7, %v9335_v13 }
0x2f33   : > { %v6818_v6 = vpop.xlane.xlu1 %6817 }
0x2f34   : > { %9098 = vrcp.f32 %v6818_v6 }
0x2f35   : > { %9100 = vrcp.f32 %v6928_v59 }
0x2f37   : > { %v6823_v36 = vpop.permute.xlu1 %6822 }
0x2f38   : > { %v6828_v8 = vsel %vm5655_vm2, %v6823_v36, 0 }
0x2f39   : > { %8647 = vmatpush3.bf16.msra.mxu0 %v6828_v8 }
0x2f3a   : > { %8658 = vmatprep.subr.bf16.mxu0 %v9335_v13 }
0x2f3b   : > { %v6933_v62 = vpop.permute.xlu1 %6932 }
0x2f3c   : > { %v6938_v58 = vsel %vm5655_vm2, %v6933_v62, 0 }
0x2f41   : > { %v9099_v50 = vpop.eup %9098 }
0x2f42   : > { %v6820_v52 = vmul.f32 %v9099_v50, %v9093_v12  ;;  %v9101_v15 = vpop.eup %9100  ;;  %v6999_v12 = vrot.slane %v10866_v54, %v9636_v4 }
0x2f43   : > { %v6930_v37 = vmul.f32 %v9101_v15, %v9091_v27 }
0x2f44   : > { %v6821_v26 = vpack.c.bf16 %v6820_v52, %v6820_v52 }
0x2f45   : > { %v6931_v18 = vpack.c.bf16 %v6930_v37, %v6930_v37 }
0x2f46   : > { %8649 = vmatmul.mubr.msk.bf16.vlgmr.msra.gmra.mxu0 %vm5651_vm3, %v6821_v26 }
0x2f47   : > { %8659 = vmatpush3.bf16.msra.mxu0 %v6938_v58  ;;  %8660 = vmatprep.mubr.msk.bf16.mxu0 %vm9336_vm7, %v9335_v13 }
0x2f48   : > { %8672 = vmatprep.subr.bf16.mxu0 %v9335_v13 }
0x2f4e   : > { %8661 = vmatmul.mubr.msk.bf16.vlgmr.msra.gmra.mxu0 %vm5651_vm3, %v6931_v18 }
0x2f4f   : > { %8676 = vmatprep.mubr.msk.bf16.mxu0 %vm9336_vm7, %v9335_v13  ;;  %8673 = vmatpush3.bf16.msra.mxu0 %v8892_v41 }
0x2f50   : > { %8674 = vmatprep.subr.bf16.mxu0 %v9335_v13 }
0x2fd1   : > { %v6643_v63 = vpop.f32.mrf.mxu0 }
0x2fd3   : > { %v8626_v20 = vpop.f32.mrf.mxu0 }
0x2fd5   : > { %v6646_v19 = vpop.f32.mrf.mxu0 }
0x2fd7   : > { %v8627_v42 = vpop.f32.mrf.mxu0 }
0x2fdf   : > { %v6754_v55 = vpop.f32.mrf.mxu0 }
0x2fe0   : > { %6981 = vrot.lane.b32.xlu0 %v6754_v55, %s11169_s12 }
0x2fe1   : > { %v8638_v31 = vpop.f32.mrf.mxu0 }
0x2fe3   : > { %v6757_v34 = vpop.f32.mrf.mxu0 }
0x2fe5   : > { %v8639_v45 = vpop.f32.mrf.mxu0 }
0x3006   : > { %v6864_v44 = vpop.f32.mrf.mxu0 }
0x3007   : > { %6985 = vrot.lane.b32.xlu1 %v6864_v44, %s11170_s28  ;;  %v8893_v44 = vld [vmem:[%s11179_s11 + $0x10] sm:$0xff]   ;;  %s11188_s28 = sld [smem:[#allocation31_spill]] }
0x3008   : > { %v8650_v25 = vpop.f32.mrf.mxu0  ;;  %8675 = vmatpush3.bf16.msra.mxu0 %v8893_v44 }
0x3009   : > { %8692 = vmatprep.subr.mxu0 %v9335_v13  ;;  %v8894_v25 = vld [vmem:[%s11180_s2 + $0x38] sm:$0xff]  }
0x300a   : > { %v6867_v14 = vpop.f32.mrf.mxu0 }
0x300b   : > { %v8895_v14 = vld [vmem:[%s11180_s2 + $0x30] sm:$0xff]  }
0x300c   : > { %v8651_v28 = vpop.f32.mrf.mxu0 }
0x300d   : > { %s11036_s19 = scalar_lea.hbm %s11188_s28, %s7823_s0 }
0x300e   : > { %v6974_v32 = vpop.f32.mrf.mxu0 }
0x300f   : > { %6989 = vrot.lane.b32.xlu0 %v6974_v32, %s11171_s14 }
0x3010   : > { %v8662_v43 = vpop.f32.mrf.mxu0 }
0x3012   : > { %v6977_v56 = vpop.f32.mrf.mxu0 }
0x3013   : > { %v7130_v56 = vrot.slane %v10866_v54, %v10107_v48 }
0x3014   : > { %v8663_v16 = vpop.f32.mrf.mxu0 }
0x3052   : > { %v6982_v57 = vpop.permute.xlu0 %6981 }
0x3053   : > { %v6992_v46 = vsel %vm881_vm8, %v6643_v63, %v6982_v57  ;;  %v7138_v57 = vrot.slane %v10866_v54, %v10112_v53 }
0x3079   : > { %v6986_v49 = vpop.permute.xlu1 %6985 }
0x307a   : > { %v6993_v27 = vsel %vm2692_vm10, %v6992_v46, %v6986_v49 }
0x3081   : > { %v6990_v2 = vpop.permute.xlu0 %6989 }
0x3082   : > { %v6994_v11 = vsel %vm2697_vm11, %v6993_v27, %v6990_v2 }
0x3083   : > { %v6995_v47 = vpack.c.bf16 %v6994_v11, %v6994_v11 }
0x3085   : > { %8669 = vmatmul.mubr.msk.bf16.vlgmr.msra.gmra.mxu1 %vm790_vm6, %v6995_v47 }
0x3086   : > { %8688 = vmatprep.mubr.msk.bf16.mxu1 %vm9336_vm7, %v9335_v13  ;;  %8681 = vmatpush3.bf16.msra.mxu1 %v8894_v25 }
0x3087   : > { %8682 = vmatprep.subr.bf16.mxu1 %v9335_v13 }
0x308a   : > { %8683 = vmatpush3.bf16.msra.mxu1 %v8895_v14 }
0x308b   : > { %8684 = vmatprep.subr.bf16.mxu1 %v9335_v13 }
0x3145   : > { %v7049_v9 = vpop.f32.mrf.mxu1 }
0x3146   : > { %v7050_v39 = vadd.f32 %v7049_v9, %v6999_v12 }
0x3147   : > { %v8670_v60 = vpop.f32.mrf.mxu1 }
0x3148   : > { %v7056_v23 = vrot.slane %v7050_v39, 1  ;;  %v7057_v1 = vrot.slane %v7050_v39, 2  ;;  %v7058_v40 = vrot.slane %v7050_v39, 3  ;;  %v7063_v38 = vadd.f32 %v7050_v39, %v10844_v10 }
0x3149   : > { %v7052_v24 = vpop.f32.mrf.mxu1 }
0x314a   : > { %v7064_v21 = vadd.f32 %v7056_v23, %v10846_v29  ;;  %v7065_v51 = vadd.f32 %v7057_v1, %v10848_v17  ;;  %v7066_v59 = vadd.f32 %v7058_v40, %v10850_v22 }
0x314b   : > { %v8671_v61 = vpop.f32.mrf.mxu1 }
0x314c   : > { %v7071_v0 = vrot.slane %v7064_v21, 7  ;;  %v7073_v7 = vrot.slane %v7065_v51, 6  ;;  %v7075_v6 = vrot.slane %v7066_v59, 5 }
0x314e   : > { %v7072_v4 = vsel %vm5514_vm14, %v7071_v0, %v7063_v38 }
0x314f   : > { %v7074_v36 = vsel %vm5517_vm15, %v7073_v7, %v7072_v4 }
0x3150   : > { %v7076_v8 = vsel %vm5520_vm0, %v7075_v6, %v7074_v36 }
0x3151   : > { %v7078_v50 = vsel %vm6128_vm4, %v7076_v8, 0.0 }
0x3152   : > { %7079 = vadd.xlane.f32.xlu1 %v7078_v50 }
0x31db   : > { %v7080_v29 = vpop.xlane.xlu1 %7079 }
0x31dc   : > { %v7081_v52 = vmul.f32 0.03125, %v7080_v29 }
0x31de   : > { %v7083_v17 = vrot.slane %v7081_v52, 1  ;;  %v7084_v62 = vrot.slane %v7081_v52, 2  ;;  %v7085_v22 = vrot.slane %v7081_v52, 3  ;;  %v7090_v26 = vsub.f32 %v7063_v38, %v7081_v52 }
0x31e0   : > { %v7091_v15 = vsub.f32 %v7064_v21, %v7083_v17  ;;  %v7092_v10 = vsub.f32 %v7065_v51, %v7084_v62  ;;  %v7093_v58 = vsub.f32 %v7066_v59, %v7085_v22  ;;  %v7094_v20 = vmul.f32 %v7090_v26, %v7090_v26  ;;  %v8896_v17 = vld [vmem:[%s11180_s2 + $0x28] sm:$0xff]   ;;  %v8897_v62 = vld [vmem:[%s11180_s2 + $0x20] sm:$0xff]  }
0x31e1   : > { %8685 = vmatpush3.bf16.msra.mxu1 %v8896_v17  ;;  %v7150_v22 = vrot.slane %v10866_v54, %v9633_v3 }
0x31e2   : > { %v7095_v37 = vmul.f32 %v7091_v15, %v7091_v15  ;;  %v7096_v18 = vmul.f32 %v7092_v10, %v7092_v10  ;;  %v7097_v63 = vmul.f32 %v7093_v58, %v7093_v58  ;;  %8686 = vmatprep.subr.bf16.mxu1 %v9335_v13 }
0x31e4   : > { %v7102_v19 = vrot.slane %v7095_v37, 7  ;;  %v7104_v42 = vrot.slane %v7096_v18, 6  ;;  %v7106_v31 = vrot.slane %v7097_v63, 5 }
0x31e5   : > { %8687 = vmatpush3.bf16.msra.mxu1 %v8897_v62 }
0x31e6   : > { %v7103_v55 = vsel %vm5514_vm14, %v7102_v19, %v7094_v20 }
0x31e7   : > { %v7105_v34 = vsel %vm5517_vm15, %v7104_v42, %v7103_v55 }
0x31e8   : > { %v7107_v45 = vsel %vm5520_vm0, %v7106_v31, %v7105_v34 }
0x31e9   : > { %v7109_v35 = vsel %vm6128_vm4, %v7107_v45, 0.0 }
0x31ea   : > { %7110 = vadd.xlane.f32.xlu0 %v7109_v35 }
0x3273   : > { %v7111_v28 = vpop.xlane.xlu0 %7110 }
0x3274   : > { %v7112_v32 = vmul.f32 0.03125, %v7111_v28 }
0x3276   : > { %v7113_v43 = vadd.f32 1e-05, %v7112_v32 }
0x3278   : > { %9102 = vrsqrt.f32 %v7113_v43 }
0x3285   : > { %v9103_v16 = vpop.eup %9102 }
0x3286   : > { %v7116_v49 = vrot.slane %v9103_v16, 1  ;;  %v7117_v46 = vrot.slane %v9103_v16, 2  ;;  %v7118_v27 = vrot.slane %v9103_v16, 3  ;;  %v7123_v2 = vmul.f32 %v9103_v16, %v7090_v26 }
0x3288   : > { %v7124_v11 = vmul.f32 %v7116_v49, %v7091_v15  ;;  %v7125_v47 = vmul.f32 %v7117_v46, %v7092_v10  ;;  %v7126_v12 = vmul.f32 %v7118_v27, %v7093_v58  ;;  %v7131_v9 = vmul.f32 %v7130_v56, %v7123_v2 }
0x328a   : > { %v7132_v39 = vmul.f32 %v7130_v56, %v7124_v11  ;;  %v7133_v60 = vmul.f32 %v7130_v56, %v7125_v47  ;;  %v7134_v23 = vmul.f32 %v7130_v56, %v7126_v12  ;;  %v7139_v1 = vadd.f32 %v7138_v57, %v7131_v9 }
0x328c   : > { %v7140_v40 = vadd.f32 %v7138_v57, %v7132_v39  ;;  %v7141_v24 = vadd.f32 %v7138_v57, %v7133_v60  ;;  %v7142_v21 = vadd.f32 %v7138_v57, %v7134_v23  ;;  %v7143_v48 = vpack.c.bf16 %v7139_v1, %v7139_v1 }
0x328e   : > { %v7144_v51 = vpack.c.bf16 %v7140_v40, %v7140_v40  ;;  %v7145_v59 = vpack.c.bf16 %v7141_v24, %v7141_v24  ;;  %v7146_v61 = vpack.c.bf16 %v7142_v21, %v7142_v21  ;;  %v7155_v7 = vunpack.c.l.b16 %v7143_v48 }
0x3290   : > { %v7156_v53 = vunpack.c.l.b16 %v7144_v51  ;;  %v7157_v38 = vunpack.c.l.b16 %v7145_v59  ;;  %v7158_v0 = vunpack.c.l.b16 %v7146_v61 }
0x3292   : > { %v7159_v4 = vrot.slane %v7156_v53, 7  ;;  %v7161_v6 = vrot.slane %v7157_v38, 6  ;;  %v7163_v8 = vrot.slane %v7158_v0, 5  ;;  %v9111_v53 = vld [vmem:[%s11187_s26] sm:$0x1] }
0x3293   : > { %v7383_v38 = vsel %vm7382_vm5, %v9111_v53, 0.0 }
0x3294   : > { %v7160_v36 = vsel %vm5514_vm14, %v7159_v4, %v7155_v7 }
0x3295   : > { %v7162_v50 = vsel %vm5517_vm15, %v7161_v6, %v7160_v36  ;;  %v7369_v36 = vrot.slane %v10866_v54, %v10152_v33 }
0x3296   : > { %v7164_v29 = vsel %vm5520_vm0, %v7163_v8, %v7162_v50 }
0x3297   : > { %v7165_v52 = vpack.c.b16 %v7164_v29, %v7164_v29 }
0x3299   : > { %8677 = vmatmul.mubr.msk.bf16.vlgmr.msra.gmra.mxu0 %vm790_vm6, %v7165_v52  ;;  %vm7474_vm6 = vcmask 253952  }
0x329a   : > { %8694 = vmatprep.mubr.msk.f32.mxu0 %vm9336_vm7, %v9335_v13  ;;  %v7226_v13 = vrot.slane %v10866_v54, %v9639_v5 }
0x3359   : > { %v7215_v26 = vpop.f32.mrf.mxu0 }
0x335a   : > { %v7216_v15 = vadd.f32 %v7215_v26, %v7150_v22  ;;  %v7377_v26 = vrot.slane %v10866_v54, %v10157_v30 }
0x335b   : > { %v8678_v10 = vpop.f32.mrf.mxu0 }
0x335c   : > { %v7221_v58 = vmax.f32 %v7216_v15, 0.0 }
0x335d   : > { %v7218_v37 = vpop.f32.mrf.mxu0 }
0x335e   : > { %v7222_v18 = vpack.c.bf16 %v7221_v58, %v7221_v58 }
0x335f   : > { %v8679_v63 = vpop.f32.mrf.mxu0 }
0x3360   : > { %8689 = vmatmul.mubr.msk.bf16.vlgmr.msra.gmra.mxu1 %vm2955_vm12, %v7222_v18 }
0x3420   : > { %v7288_v20 = vpop.f32.mrf.mxu1 }
0x3421   : > { %v7289_v19 = vadd.f32 %v7288_v20, %v7226_v13 }
0x3422   : > { %v8690_v42 = vpop.f32.mrf.mxu1 }
0x3423   : > { %v7295_v55 = vrot.slane %v7289_v19, 1  ;;  %v7296_v31 = vrot.slane %v7289_v19, 2  ;;  %v7297_v34 = vrot.slane %v7289_v19, 3  ;;  %v7302_v25 = vadd.f32 %v7289_v19, %v7139_v1 }
0x3424   : > { %v7291_v45 = vpop.f32.mrf.mxu1 }
0x3425   : > { %v7303_v3 = vadd.f32 %v7295_v55, %v7140_v40  ;;  %v7304_v35 = vadd.f32 %v7296_v31, %v7141_v24  ;;  %v7305_v41 = vadd.f32 %v7297_v34, %v7142_v21 }
0x3426   : > { %v8691_v44 = vpop.f32.mrf.mxu1 }
0x3427   : > { %v7310_v14 = vrot.slane %v7303_v3, 7  ;;  %v7312_v28 = vrot.slane %v7304_v35, 6  ;;  %v7314_v43 = vrot.slane %v7305_v41, 5 }
0x3429   : > { %v7311_v32 = vsel %vm5514_vm14, %v7310_v14, %v7302_v25 }
0x342a   : > { %v7313_v56 = vsel %vm5517_vm15, %v7312_v28, %v7311_v32 }
0x342b   : > { %v7315_v5 = vsel %vm5520_vm0, %v7314_v43, %v7313_v56 }
0x342c   : > { %v7317_v16 = vsel %vm6128_vm4, %v7315_v5, 0.0 }
0x342d   : > { %7318 = vadd.xlane.f32.xlu0 %v7317_v16 }
0x3431   : > { %7384 = vadd.xlane.f32.xlu0 %v7383_v38 }
0x34b6   : > { %v7319_v57 = vpop.xlane.xlu0 %7318 }
0x34b7   : > { %v7320_v49 = vmul.f32 0.03125, %v7319_v57 }
0x34b9   : > { %v7322_v46 = vrot.slane %v7320_v49, 1  ;;  %v7323_v27 = vrot.slane %v7320_v49, 2  ;;  %v7324_v2 = vrot.slane %v7320_v49, 3  ;;  %v7329_v11 = vsub.f32 %v7302_v25, %v7320_v49 }
0x34ba   : > { %v7385_v30 = vpop.xlane.xlu0 %7384 }
0x34bb   : > { %v7330_v47 = vsub.f32 %v7303_v3, %v7322_v46  ;;  %v7331_v12 = vsub.f32 %v7304_v35, %v7323_v27  ;;  %v7332_v9 = vsub.f32 %v7305_v41, %v7324_v2  ;;  %v7333_v1 = vmul.f32 %v7329_v11, %v7329_v11 }
0x34bc   : > { %v7386_v54 = vmax.f32 %v7385_v30, 1.0 }
0x34bd   : > { %v7334_v39 = vmul.f32 %v7330_v47, %v7330_v47  ;;  %v7335_v60 = vmul.f32 %v7331_v12, %v7331_v12  ;;  %v7336_v23 = vmul.f32 %v7332_v9, %v7332_v9 }
0x34bf   : > { %v7341_v40 = vrot.slane %v7334_v39, 7  ;;  %v7343_v24 = vrot.slane %v7335_v60, 6  ;;  %v7345_v48 = vrot.slane %v7336_v23, 5 }
0x34c1   : > { %v7342_v21 = vsel %vm5514_vm14, %v7341_v40, %v7333_v1 }
0x34c2   : > { %v7344_v51 = vsel %vm5517_vm15, %v7343_v24, %v7342_v21 }
0x34c3   : > { %v7346_v59 = vsel %vm5520_vm0, %v7345_v48, %v7344_v51 }
0x34c4   : > { %v7348_v61 = vsel %vm6128_vm4, %v7346_v59, 0.0 }
0x34c5   : > { %7349 = vadd.xlane.f32.xlu1 %v7348_v61 }
0x354e   : > { %v7350_v0 = vpop.xlane.xlu1 %7349 }
0x354f   : > { %v7351_v7 = vmul.f32 0.03125, %v7350_v0 }
0x3551   : > { %v7352_v4 = vadd.f32 1e-05, %v7351_v7 }
0x3553   : > { %9104 = vrsqrt.f32 %v7352_v4 }
0x3554   : > { %9106 = vrcp.f32 %v7386_v54 }
0x3560   : > { %v9105_v6 = vpop.eup %9104 }
0x3561   : > { %v7355_v8 = vrot.slane %v9105_v6, 1  ;;  %v7356_v50 = vrot.slane %v9105_v6, 2  ;;  %v7357_v29 = vrot.slane %v9105_v6, 3  ;;  %v7362_v52 = vmul.f32 %v9105_v6, %v7329_v11  ;;  %v9107_v45 = vpop.eup %9106 }
0x3563   : > { %v7363_v17 = vmul.f32 %v7355_v8, %v7330_v47  ;;  %v7364_v62 = vmul.f32 %v7356_v50, %v7331_v12  ;;  %v7365_v22 = vmul.f32 %v7357_v29, %v7332_v9  ;;  %v7370_v15 = vmul.f32 %v7369_v36, %v7362_v52 }
0x3565   : > { %v7371_v10 = vmul.f32 %v7369_v36, %v7363_v17  ;;  %v7372_v58 = vmul.f32 %v7369_v36, %v7364_v62  ;;  %v7373_v37 = vmul.f32 %v7369_v36, %v7365_v22  ;;  %v7378_v33 = vadd.f32 %v7377_v26, %v7370_v15 }
0x3567   : > { %v7379_v18 = vadd.f32 %v7377_v26, %v7371_v10  ;;  %v7380_v63 = vadd.f32 %v7377_v26, %v7372_v58  ;;  %v7381_v13 = vadd.f32 %v7377_v26, %v7373_v37 }
0x3569   : > { %v7391_v20 = vrot.slane %v7379_v18, 7  ;;  %v7393_v19 = vrot.slane %v7380_v63, 6  ;;  %v7395_v55 = vrot.slane %v7381_v13, 5 }
0x356b   : > { %v7392_v42 = vsel %vm5514_vm14, %v7391_v20, %v7378_v33 }
0x356c   : > { %v7394_v31 = vsel %vm5517_vm15, %v7393_v19, %v7392_v42 }
0x356d   : > { %v7396_v34 = vsel %vm5520_vm0, %v7395_v55, %v7394_v31 }
0x356e   : > { %8693 = vmatpush3.msk.msra.mxu0 %vm1128_vm9, %v7396_v34 }
0x356f   : > { %8695 = vmatmul.mubr.msk.f32.vlgmr.msra.gmra.mxu0 %vm5651_vm3, %v9111_v53 }
0x362f   : > { %v7468_v3 = vpop.f32.mrf.mxu0 }
0x3630   : > { %v7473_v35 = vmul.f32 %v9107_v45, %v7468_v3 }
0x3631   : > { %v8696_v41 = vpop.f32.mrf.mxu0 }
0x3632   : > { %7475 = vst.msk [vmem:[%s569_s18] sm:$0x1] %vm7474_vm6, %v7473_v35 }
0x3633   : > { %9259 = shalt.err (!%p9256_p2)
}
0x3634   : > { %s9260_s23 = scalar_lea.hbm %s11036_s19, 16  ;;  %s9264_s24 = scalar_lea.hbm %s11188_s28, 32 }
0x3635   : > { %p9261_p11 = scmp.ne.s32.totalorder %s11036_s19, %s9260_s23  ;;  %p9265_p3 = scmp.lt.s32.totalorder %s11036_s19, %s11188_s28 }
0x3636   : > { %p9266_p1 = scmp.lt.s32.totalorder %s9264_s24, %s9260_s23 }
0x3637   : > { %p9262_p9 = pnand %p9261_p11, %p11189_p0 }
0x3638   : > { %p9267_p6 = por %p9266_p1, %p9265_p3 }
0x3639   : > { %p9263_p13 = pneg %p9262_p9 }
0x363b   : > { %p9268_p12 = pnand %p9267_p6, %p9263_p13 }
0x363d   : > { %9271 = shalt.err (!%p9268_p12)
}
0x363e   : > { %8713 = dma.vmem_to_hbm [thread:$0]  (%p11189_p0), %s7490_s1, 16, %s11036_s19, %s7477_s21  }
0x363f PF: > { %s11190_s0 = sld [smem:[#allocation18_spill]]  ;;  %p11193_p4 = scmp.ge.s32.totalorder %s9326_s16, 2 }
0x3640   : > { %s11191_s18 = sld [smem:[#allocation19_spill]] }
0x3645   : > { %s7501_s14 = sand.u32 1, %s11190_s0  }
0x3646   : > { %p11192_p5 = scmp.ne.s32.totalorder %s11191_s18, 0  ;;  %s7502_s12 = scalar_lea.sflag [#allocation4], %s7501_s14 }
0x3648   : > { %p8733_p8 = pnand %p11193_p4, %p11192_p5 }
0x364a   : > { %p8734_p7 = pneg %p8733_p8 }
0x364c   : > { %9309 = dma.done.wait (%p8734_p7), %s7502_s12, 16  }
0x364d   : > { %9311 = vsyncadd (%p8734_p7), %s7502_s12, 4294967280  ;;  %s11194_s16 = sld [smem:[#allocation20_spill]]  ;;  %s11195_s29 = smov %s9318_s30 }
0x364e   : > { %s11196_s30 = smov %s9322_s15  ;;  %s11197_s15 = smov %s9505_s20 }
0x3653   : > { %p29_p10 = scmp.ge.s32.totalorder %s11194_s16, 4  }
0x3655   :  { %31 = sbr.rel (!%p29_p10) target bundleno = 19 (0x13), region = 157 }
0x365a   :  { %7506 = vsyncpa [#allocation3], 1 }
0x365b   :  { %7508 = vsyncpa [#allocation3 + $0x1], 1 }
0x365c   :  { %7509 = vsyncpa [#allocation6], 1 }
0x365d   :  { %7510 = vsyncpa [#allocation10], 1 }
0x365e   :  { %7511 = vsyncpa [#allocation4], 1 }
0x365f   :  { %7513 = vsyncpa [#allocation4 + $0x1], 1 }

</bundles_post_ra>
